<compile_context>
chip_gen: v6e
topology: v6e:2x2x1
jax: 0.10.0
libtpu: 0.0.40
codegen_flags: <defaults>
</compile_context>

<pallas_src>
import functools

import jax
import jax.numpy as jnp
from jax.experimental import pallas as pl
from jax.experimental.pallas import tpu as pltpu


LATENT = 128
FEAT = 22 * 22 * 20          # 9680
FEAT_PAD = 76 * 128          # 9728 (FEAT rounded up to a lane multiple)


# ----------------------------------------------------------------------------
# Pallas kernels
# ----------------------------------------------------------------------------
def _mm_bias_act_kernel(x_ref, w_ref, b_ref, o_ref, *, act):
    """One tile of act(x @ w + b).  x:(tm,K) bf16, w:(K,tn) bf16, b:(1,tn) f32."""
    acc = jnp.dot(x_ref[...], w_ref[...], preferred_element_type=jnp.float32)
    acc = acc + b_ref[...]
    if act == "relu":
        acc = jnp.maximum(acc, 0.0)
    elif act == "sigmoid":
        # sigmoid(x) = 0.5*(tanh(x/2)+1): tanh runs on the EUP slot and never
        # produces an inf intermediate (unlike 1/(1+exp(-x))).
        acc = 0.5 * (jnp.tanh(0.5 * acc) + 1.0)
    o_ref[...] = acc


def _dense_meanlogvar_reparam_kernel(x_ref, w_ref, b_ref, eps_ref,
                                     mean_ref, logvar_ref, z_ref):
    """Fused: [mean | logvar] = x @ w + b ;  z = mean + exp(logvar/2) * eps."""
    acc = jnp.dot(x_ref[...], w_ref[...], preferred_element_type=jnp.float32)
    acc = acc + b_ref[...]
    L = mean_ref.shape[1]
    mean = acc[:, :L]
    logvar = acc[:, L:]
    mean_ref[...] = mean
    logvar_ref[...] = logvar
    z_ref[...] = mean + jnp.exp(logvar * 0.5) * eps_ref[...]


# ----------------------------------------------------------------------------
# Wrappers around pallas_call
# ----------------------------------------------------------------------------
def _round_up(x, m):
    return (x + m - 1) // m * m


def matmul_bias_act(x, w, b, act):
    """act(x @ w + b), M-tiled (parallel grid).

    x: (M, K) float activation (padded here to the weight's Kp; fuses under jit)
    w: (Kp, N) bf16, pre-padded/pre-transposed once in prepare_params
    b: (1, N) f32
    Returns (M, N) f32.
    """
    M, K = x.shape
    Kp, N = w.shape
    tm = 128 if M >= 128 else 8
    Mp = _round_up(M, tm)
    xp = jnp.pad(x.astype(jnp.bfloat16), ((0, Mp - M), (0, Kp - K)))

    out = pl.pallas_call(
        functools.partial(_mm_bias_act_kernel, act=act),
        out_shape=jax.ShapeDtypeStruct((Mp, N), jnp.float32),
        grid=(Mp // tm,),
        in_specs=[
            pl.BlockSpec((tm, Kp), lambda i: (i, 0)),
            pl.BlockSpec((Kp, N), lambda i: (0, 0)),
            pl.BlockSpec((1, N), lambda i: (0, 0)),
        ],
        out_specs=pl.BlockSpec((tm, N), lambda i: (i, 0)),
        compiler_params=pltpu.CompilerParams(dimension_semantics=("parallel",)),
    )(xp, w, b)
    return out[:M]


def dense_out_relu(z, w, b, n_tiles=2):
    """relu(z @ w + b) with the wide N axis split over a parallel grid axis
    (keeps both TensorCores busy on v7x)."""
    M, K = z.shape
    Kw, Np = w.shape
    tn = Np // n_tiles
    return pl.pallas_call(
        functools.partial(_mm_bias_act_kernel, act="relu"),
        out_shape=jax.ShapeDtypeStruct((M, Np), jnp.float32),
        grid=(n_tiles,),
        in_specs=[
            pl.BlockSpec((M, K), lambda j: (0, 0)),
            pl.BlockSpec((Kw, tn), lambda j: (0, j)),
            pl.BlockSpec((1, tn), lambda j: (0, j)),
        ],
        out_specs=pl.BlockSpec((M, tn), lambda j: (0, j)),
        compiler_params=pltpu.CompilerParams(dimension_semantics=("parallel",)),
    )(z.astype(jnp.bfloat16), w, b)


def dense_meanlogvar_reparam(flat, w, b, eps):
    """Single fused kernel: mean, logvar and z from one 9680x256 matmul.
    Small enough (<6 MiB of operands) to run as one un-gridded block in VMEM."""
    M, K = flat.shape
    Kp = w.shape[0]
    xp = jnp.pad(flat.astype(jnp.bfloat16), ((0, 0), (0, Kp - K)))
    L = eps.shape[1]
    shp = jax.ShapeDtypeStruct((M, L), jnp.float32)
    return pl.pallas_call(
        _dense_meanlogvar_reparam_kernel,
        out_shape=(shp, shp, shp),
    )(xp, w, b, eps.astype(jnp.float32))


# ----------------------------------------------------------------------------
# Glue: im2col, parameter init, one-time weight prep, forward
# ----------------------------------------------------------------------------
def im2col(x, k):
    """x: (B, H, W, C) -> (B, H-k+1, W-k+1, k*k*C), last dim ordered (di, dj, c).
    Stays in XLA; fuses under jit at these sizes (total activations < 2 MB)."""
    B, H, W, C = x.shape
    Ho, Wo = H - k + 1, W - k + 1
    patches = []
    for di in range(k):
        for dj in range(k):
            patches.append(x[:, di:di + Ho, dj:dj + Wo, :])
    return jnp.concatenate(patches, axis=-1)


def _uniform(key, shape, fan_in):
    bound = 1.0 / jnp.sqrt(float(fan_in))
    return jax.random.uniform(key, shape, jnp.float32, -bound, bound)


def init_params(key):
    ks = jax.random.split(key, 14)
    p = {}
    # encoder_cv_i: Conv2d(1, 10, 5)          fan_in = 1*5*5 = 25
    p["enc_w1"] = _uniform(ks[0], (10, 1, 5, 5), 25)
    p["enc_b1"] = _uniform(ks[1], (10,), 25)
    # encoder_cv_h: Conv2d(10, 20, 3)         fan_in = 10*3*3 = 90
    p["enc_w2"] = _uniform(ks[2], (20, 10, 3, 3), 90)
    p["enc_b2"] = _uniform(ks[3], (20,), 90)
    # dense_mean / dense_logvar: Linear(9680, 128)   (PyTorch stores (out, in))
    p["wm"] = _uniform(ks[4], (128, FEAT), FEAT)
    p["bm"] = _uniform(ks[5], (128,), FEAT)
    p["wl"] = _uniform(ks[6], (128, FEAT), FEAT)
    p["bl"] = _uniform(ks[7], (128,), FEAT)
    # dense_out: Linear(128, 9680)
    p["wo"] = _uniform(ks[8], (FEAT, 128), 128)
    p["bo"] = _uniform(ks[9], (FEAT,), 128)
    # decoder_cv_h: ConvTranspose2d(20, 10, 3)  weight (in,out,kh,kw), fan_in=10*9=90
    p["dec_w1"] = _uniform(ks[10], (20, 10, 3, 3), 90)
    p["dec_b1"] = _uniform(ks[11], (10,), 90)
    # decoder_cv_o: ConvTranspose2d(10, 1, 5)   fan_in = out*k*k = 1*25 = 25
    p["dec_w2"] = _uniform(ks[12], (10, 1, 5, 5), 25)
    p["dec_b2"] = _uniform(ks[13], (1,), 25)
    return p


def _pad2d(a, rows, cols):
    return jnp.pad(a, ((0, rows - a.shape[0]), (0, cols - a.shape[1])))


def prepare_params(p):
    """One-time weight preprocessing: transpose/flip into matmul layout, pad
    K/N to MXU-friendly sizes, cast weights to bf16 (biases stay f32)."""
    q = {}

    def conv_w(w_oikk, kp):          # Conv2d weight (out,in,kh,kw) -> (kp, 128) bf16
        k = w_oikk.shape[-1]
        cin, cout = w_oikk.shape[1], w_oikk.shape[0]
        w = jnp.transpose(w_oikk, (2, 3, 1, 0)).reshape(k * k * cin, cout)
        return _pad2d(w, kp, 128).astype(jnp.bfloat16)

    def deconv_w(w_iokk, kp):        # ConvTranspose2d weight (in,out,kh,kw), flipped
        k = w_iokk.shape[-1]
        cin, cout = w_iokk.shape[0], w_iokk.shape[1]
        w = jnp.transpose(jnp.flip(w_iokk, (2, 3)), (2, 3, 0, 1)).reshape(k * k * cin, cout)
        return _pad2d(w, kp, 128).astype(jnp.bfloat16)

    def bias(b, n):
        return _pad2d(b.reshape(1, -1).astype(jnp.float32), 1, n)

    q["enc_w1"] = conv_w(p["enc_w1"], 128)      # K=25  -> 128
    q["enc_b1"] = bias(p["enc_b1"], 128)
    q["enc_w2"] = conv_w(p["enc_w2"], 128)      # K=90  -> 128
    q["enc_b2"] = bias(p["enc_b2"], 128)

    # fused [mean | logvar] dense: (9680, 256) -> (9728, 256)
    w_ml = jnp.concatenate([p["wm"].T, p["wl"].T], axis=1)
    q["w_ml"] = _pad2d(w_ml, FEAT_PAD, 2 * LATENT).astype(jnp.bfloat16)
    q["b_ml"] = jnp.concatenate([p["bm"], p["bl"]]).reshape(1, 2 * LATENT).astype(jnp.float32)

    # decoder dense: (128, 9680) -> (128, 9728)
    q["w_out"] = _pad2d(p["wo"].T, LATENT, FEAT_PAD).astype(jnp.bfloat16)
    q["b_out"] = bias(p["bo"], FEAT_PAD)

    q["dec_w1"] = deconv_w(p["dec_w1"], 256)    # K=180 -> 256
    q["dec_b1"] = bias(p["dec_b1"], 128)
    q["dec_w2"] = deconv_w(p["dec_w2"], 256)    # K=250 -> 256
    q["dec_b2"] = bias(p["dec_b2"], 128)
    return q


@jax.jit
def conv_vae_forward(q, x_nchw, eps_key):
    B = x_nchw.shape[0]
    x = jnp.transpose(x_nchw, (0, 2, 3, 1))  # NHWC (B, 28, 28, 1)

    # ---------------- encode ----------------
    # encoder_cv_i: 5x5 conv, 1 -> 10, relu    -> (B, 24, 24, 10)
    p1 = im2col(x, 5).reshape(B * 24 * 24, 25)
    h1 = matmul_bias_act(p1, q["enc_w1"], q["enc_b1"], "relu")[:, :10]
    h1 = h1.reshape(B, 24, 24, 10)

    # encoder_cv_h: 3x3 conv, 10 -> 20, relu   -> (B, 22, 22, 20)
    p2 = im2col(h1, 3).reshape(B * 22 * 22, 90)
    h2 = matmul_bias_act(p2, q["enc_w2"], q["enc_b2"], "relu")[:, :20]
    h2 = h2.reshape(B, 22, 22, 20)

    # flatten with PyTorch NCHW .view(-1, 22*22*20) ordering
    flat = jnp.transpose(h2, (0, 3, 1, 2)).reshape(B, FEAT)

    # ---------------- mean / logvar / reparameterize (one fused kernel) -----
    # TODO(synk): torch.randn_like uses PyTorch's stateful global RNG; noise is
    # drawn from an explicit JAX key and consumed inside the fused Pallas kernel.
    eps = jax.random.normal(eps_key, (B, LATENT), jnp.float32)
    mean, log_var, z = dense_meanlogvar_reparam(flat, q["w_ml"], q["b_ml"], eps)

    # ---------------- decode ----------------
    h = dense_out_relu(z, q["w_out"], q["b_out"])[:, :FEAT]          # (B, 9680)
    h = jnp.transpose(h.reshape(B, 20, 22, 22), (0, 2, 3, 1))        # NHWC

    # decoder_cv_h: ConvTranspose2d(20,10,3) == conv with full pad + flipped kernel
    hp = jnp.pad(h, ((0, 0), (2, 2), (2, 2), (0, 0)))
    p3 = im2col(hp, 3).reshape(B * 24 * 24, 180)
    d1 = matmul_bias_act(p3, q["dec_w1"], q["dec_b1"], "relu")[:, :10]
    d1 = d1.reshape(B, 24, 24, 10)

    # decoder_cv_o: ConvTranspose2d(10,1,5), sigmoid
    dp = jnp.pad(d1, ((0, 0), (4, 4), (4, 4), (0, 0)))
    p4 = im2col(dp, 5).reshape(B * 28 * 28, 250)
    out = matmul_bias_act(p4, q["dec_w2"], q["dec_b2"], "sigmoid")[:, :1]
    out = out.reshape(B, 28, 28, 1)

    x_out = jnp.transpose(out, (0, 3, 1, 2))  # back to NCHW (B, 1, 28, 28)
    return x_out, mean, log_var


if __name__ == "__main__":
    # Input spatial size is fixed by the module: 28x28 -> 24x24 -> 22x22.
    key = jax.random.PRNGKey(0)
    x = jax.random.normal(key, (2, 1, 28, 28), jnp.float32)

    params = init_params(jax.random.PRNGKey(1))
    prepared = prepare_params(params)            # one-time weight prep (hoisted)
    prepared = jax.tree_util.tree_map(jax.block_until_ready, prepared)
    eps_key = jax.random.PRNGKey(2)

    x_out, mean, log_var = conv_vae_forward(prepared, x, eps_key)
    jax.block_until_ready((x_out, mean, log_var))

    assert x_out.shape == (2, 1, 28, 28)
    assert mean.shape == (2, 128)
    assert log_var.shape == (2, 128)
    assert bool(jnp.all(jnp.isfinite(x_out)))
    assert bool(jnp.all((x_out >= 0.0) & (x_out <= 1.0)))  # sigmoid output range

    print("KERNEL_OK")
</pallas_src>

<mosaic_0001>
module attributes {stable_mosaic.version = 11 : i64} {
  func.func @_mm_bias_act_kernel(%arg0: i32, %arg1: memref<128x128xbf16, #tpu.memory_space<vmem>>, %arg2: memref<128x128xbf16, #tpu.memory_space<vmem>>, %arg3: memref<1x128xf32, #tpu.memory_space<vmem>>, %arg4: memref<128x128xf32, #tpu.memory_space<vmem>>) attributes {dimension_semantics = [#tpu.dimension_semantics<parallel>], iteration_bounds = array<i64: 9>, scalar_prefetch = 0 : i64, scratch_operands = 0 : i64, tpu.core_type = #tpu.core_type<tc>, window_params = [{transform_indices = @transform_0, window_bounds = array<i64: 128, 128>}, {pipeline_mode = #tpu.pipeline_mode<synchronous>, transform_indices = @transform_1, window_bounds = array<i64: 128, 128>}, {pipeline_mode = #tpu.pipeline_mode<synchronous>, transform_indices = @transform_2, window_bounds = array<i64: 1, 128>}, {transform_indices = @transform_3, window_bounds = array<i64: 128, 128>}]} {
    %c0 = arith.constant 0 : index
    %c0_0 = arith.constant 0 : index
    %0 = vector.load %arg1[%c0, %c0_0] : memref<128x128xbf16, #tpu.memory_space<vmem>>, vector<128x128xbf16>
    %c0_1 = arith.constant 0 : index
    %c0_2 = arith.constant 0 : index
    %1 = vector.load %arg2[%c0_1, %c0_2] : memref<128x128xbf16, #tpu.memory_space<vmem>>, vector<128x128xbf16>
    %cst = arith.constant dense<0.000000e+00> : vector<128x128xf32>
    %2 = tpu.matmul %0, %1, %cst {dimension_numbers = #tpu.dot_dimension_numbers<[1], [0], [0], [1], [0, 0, 1, 1], [], []>} : vector<128x128xbf16>, vector<128x128xbf16>, vector<128x128xf32> -> vector<128x128xf32>
    %c0_3 = arith.constant 0 : index
    %c0_4 = arith.constant 0 : index
    %3 = vector.load %arg3[%c0_3, %c0_4] : memref<1x128xf32, #tpu.memory_space<vmem>>, vector<1x128xf32>
    %4 = vector.broadcast %3 : vector<1x128xf32> to vector<128x128xf32>
    %5 = arith.addf %2, %4 : vector<128x128xf32>
    %cst_5 = arith.constant 0.000000e+00 : f32
    %6 = vector.broadcast %cst_5 : f32 to vector<128x128xf32>
    %7 = arith.maximumf %5, %6 : vector<128x128xf32>
    %c0_6 = arith.constant 0 : index
    %c0_7 = arith.constant 0 : index
    %8 = vector.load %arg4[%c0_6, %c0_7] : memref<128x128xf32, #tpu.memory_space<vmem>>, vector<128x128xf32>
    tpu.vector_store %arg4[%c0_6, %c0_7], %7 {strides = array<i32>} : memref<128x128xf32, #tpu.memory_space<vmem>>, vector<128x128xf32>,
    return
  }
  func.func @transform_0(%arg0: i32) -> (i32, i32) {
    %c0_i32 = arith.constant 0 : i32
    %c0_i32_0 = arith.constant 0 : i32
    return %arg0, %c0_i32 : i32, i32
  }
  func.func @transform_1(%arg0: i32) -> (i32, i32) {
    %c0_i32 = arith.constant 0 : i32
    %c0_i32_0 = arith.constant 0 : i32
    %c0_i32_1 = arith.constant 0 : i32
    return %c0_i32, %c0_i32_0 : i32, i32
  }
  func.func @transform_2(%arg0: i32) -> (i32, i32) {
    %c0_i32 = arith.constant 0 : i32
    %c0_i32_0 = arith.constant 0 : i32
    %c0_i32_1 = arith.constant 0 : i32
    return %c0_i32, %c0_i32_0 : i32, i32
  }
  func.func @transform_3(%arg0: i32) -> (i32, i32) {
    %c0_i32 = arith.constant 0 : i32
    %c0_i32_0 = arith.constant 0 : i32
    return %arg0, %c0_i32 : i32, i32
  }
}

module attributes {stable_mosaic.version = 11 : i64} {
  func.func @_mm_bias_act_kernel(%arg0: i32, %arg1: memref<128x128xbf16, #tpu.memory_space<vmem>>, %arg2: memref<128x128xbf16, #tpu.memory_space<vmem>>, %arg3: memref<1x128xf32, #tpu.memory_space<vmem>>, %arg4: memref<128x128xf32, #tpu.memory_space<vmem>>) attributes {dimension_semantics = [#tpu.dimension_semantics<parallel>], iteration_bounds = array<i64: 8>, scalar_prefetch = 0 : i64, scratch_operands = 0 : i64, tpu.core_type = #tpu.core_type<tc>, window_params = [{transform_indices = @transform_0, window_bounds = array<i64: 128, 128>}, {pipeline_mode = #tpu.pipeline_mode<synchronous>, transform_indices = @transform_1, window_bounds = array<i64: 128, 128>}, {pipeline_mode = #tpu.pipeline_mode<synchronous>, transform_indices = @transform_2, window_bounds = array<i64: 1, 128>}, {transform_indices = @transform_3, window_bounds = array<i64: 128, 128>}]} {
    %c0 = arith.constant 0 : index
    %c0_0 = arith.constant 0 : index
    %0 = vector.load %arg1[%c0, %c0_0] : memref<128x128xbf16, #tpu.memory_space<vmem>>, vector<128x128xbf16>
    %c0_1 = arith.constant 0 : index
    %c0_2 = arith.constant 0 : index
    %1 = vector.load %arg2[%c0_1, %c0_2] : memref<128x128xbf16, #tpu.memory_space<vmem>>, vector<128x128xbf16>
    %cst = arith.constant dense<0.000000e+00> : vector<128x128xf32>
    %2 = tpu.matmul %0, %1, %cst {dimension_numbers = #tpu.dot_dimension_numbers<[1], [0], [0], [1], [0, 0, 1, 1], [], []>} : vector<128x128xbf16>, vector<128x128xbf16>, vector<128x128xf32> -> vector<128x128xf32>
    %c0_3 = arith.constant 0 : index
    %c0_4 = arith.constant 0 : index
    %3 = vector.load %arg3[%c0_3, %c0_4] : memref<1x128xf32, #tpu.memory_space<vmem>>, vector<1x128xf32>
    %4 = vector.broadcast %3 : vector<1x128xf32> to vector<128x128xf32>
    %5 = arith.addf %2, %4 : vector<128x128xf32>
    %cst_5 = arith.constant 0.000000e+00 : f32
    %6 = vector.broadcast %cst_5 : f32 to vector<128x128xf32>
    %7 = arith.maximumf %5, %6 : vector<128x128xf32>
    %c0_6 = arith.constant 0 : index
    %c0_7 = arith.constant 0 : index
    %8 = vector.load %arg4[%c0_6, %c0_7] : memref<128x128xf32, #tpu.memory_space<vmem>>, vector<128x128xf32>
    tpu.vector_store %arg4[%c0_6, %c0_7], %7 {strides = array<i32>} : memref<128x128xf32, #tpu.memory_space<vmem>>, vector<128x128xf32>,
    return
  }
  func.func @transform_0(%arg0: i32) -> (i32, i32) {
    %c0_i32 = arith.constant 0 : i32
    %c0_i32_0 = arith.constant 0 : i32
    return %arg0, %c0_i32 : i32, i32
  }
  func.func @transform_1(%arg0: i32) -> (i32, i32) {
    %c0_i32 = arith.constant 0 : i32
    %c0_i32_0 = arith.constant 0 : i32
    %c0_i32_1 = arith.constant 0 : i32
    return %c0_i32, %c0_i32_0 : i32, i32
  }
  func.func @transform_2(%arg0: i32) -> (i32, i32) {
    %c0_i32 = arith.constant 0 : i32
    %c0_i32_0 = arith.constant 0 : i32
    %c0_i32_1 = arith.constant 0 : i32
    return %c0_i32, %c0_i32_0 : i32, i32
  }
  func.func @transform_3(%arg0: i32) -> (i32, i32) {
    %c0_i32 = arith.constant 0 : i32
    %c0_i32_0 = arith.constant 0 : i32
    return %arg0, %c0_i32 : i32, i32
  }
}

module attributes {stable_mosaic.version = 11 : i64} {
  func.func @_dense_meanlogvar_reparam_kernel(%arg0: memref<2x9728xbf16, #tpu.memory_space<vmem>>, %arg1: memref<9728x256xbf16, #tpu.memory_space<vmem>>, %arg2: memref<1x256xf32, #tpu.memory_space<vmem>>, %arg3: memref<2x128xf32, #tpu.memory_space<vmem>>, %arg4: memref<2x128xf32, #tpu.memory_space<vmem>>, %arg5: memref<2x128xf32, #tpu.memory_space<vmem>>, %arg6: memref<2x128xf32, #tpu.memory_space<vmem>>) attributes {dimension_semantics = [], scalar_prefetch = 0 : i64, scratch_operands = 0 : i64, tpu.core_type = #tpu.core_type<tc>} {
    %c0 = arith.constant 0 : index
    %c0_0 = arith.constant 0 : index
    %0 = vector.load %arg0[%c0, %c0_0] : memref<2x9728xbf16, #tpu.memory_space<vmem>>, vector<2x9728xbf16>
    %c0_1 = arith.constant 0 : index
    %c0_2 = arith.constant 0 : index
    %1 = vector.load %arg1[%c0_1, %c0_2] : memref<9728x256xbf16, #tpu.memory_space<vmem>>, vector<9728x256xbf16>
    %cst = arith.constant dense<0.000000e+00> : vector<2x256xf32>
    %2 = tpu.matmul %0, %1, %cst {dimension_numbers = #tpu.dot_dimension_numbers<[1], [0], [0], [1], [0, 0, 1, 1], [], []>} : vector<2x9728xbf16>, vector<9728x256xbf16>, vector<2x256xf32> -> vector<2x256xf32>
    %c0_3 = arith.constant 0 : index
    %c0_4 = arith.constant 0 : index
    %3 = vector.load %arg2[%c0_3, %c0_4] : memref<1x256xf32, #tpu.memory_space<vmem>>, vector<1x256xf32>
    %4 = vector.broadcast %3 : vector<1x256xf32> to vector<2x256xf32>
    %5 = arith.addf %2, %4 : vector<2x256xf32>
    %6 = vector.extract_strided_slice %5 {offsets = [0, 0], sizes = [2, 128], strides = [1, 1]} : vector<2x256xf32> to vector<2x128xf32>
    %7 = vector.extract_strided_slice %5 {offsets = [0, 128], sizes = [2, 128], strides = [1, 1]} : vector<2x256xf32> to vector<2x128xf32>
    %c0_5 = arith.constant 0 : index
    %c0_6 = arith.constant 0 : index
    %8 = vector.load %arg4[%c0_5, %c0_6] : memref<2x128xf32, #tpu.memory_space<vmem>>, vector<2x128xf32>
    tpu.vector_store %arg4[%c0_5, %c0_6], %6 {strides = array<i32>} : memref<2x128xf32, #tpu.memory_space<vmem>>, vector<2x128xf32>,
    %c0_7 = arith.constant 0 : index
    %c0_8 = arith.constant 0 : index
    %9 = vector.load %arg5[%c0_7, %c0_8] : memref<2x128xf32, #tpu.memory_space<vmem>>, vector<2x128xf32>
    tpu.vector_store %arg5[%c0_7, %c0_8], %7 {strides = array<i32>} : memref<2x128xf32, #tpu.memory_space<vmem>>, vector<2x128xf32>,
    %cst_9 = arith.constant 5.000000e-01 : f32
    %10 = vector.broadcast %cst_9 : f32 to vector<2x128xf32>
    %11 = arith.mulf %7, %10 : vector<2x128xf32>
    %12 = math.exp %11 : vector<2x128xf32>
    %c0_10 = arith.constant 0 : index
    %c0_11 = arith.constant 0 : index
    %13 = vector.load %arg3[%c0_10, %c0_11] : memref<2x128xf32, #tpu.memory_space<vmem>>, vector<2x128xf32>
    %14 = arith.mulf %12, %13 : vector<2x128xf32>
    %15 = arith.addf %6, %14 : vector<2x128xf32>
    %c0_12 = arith.constant 0 : index
    %c0_13 = arith.constant 0 : index
    %16 = vector.load %arg6[%c0_12, %c0_13] : memref<2x128xf32, #tpu.memory_space<vmem>>, vector<2x128xf32>
    tpu.vector_store %arg6[%c0_12, %c0_13], %15 {strides = array<i32>} : memref<2x128xf32, #tpu.memory_space<vmem>>, vector<2x128xf32>,
    return
  }
}

module attributes {stable_mosaic.version = 11 : i64} {
  func.func @_mm_bias_act_kernel(%arg0: i32, %arg1: memref<2x128xbf16, #tpu.memory_space<vmem>>, %arg2: memref<128x4864xbf16, #tpu.memory_space<vmem>>, %arg3: memref<1x4864xf32, #tpu.memory_space<vmem>>, %arg4: memref<2x4864xf32, #tpu.memory_space<vmem>>) attributes {dimension_semantics = [#tpu.dimension_semantics<parallel>], iteration_bounds = array<i64: 2>, scalar_prefetch = 0 : i64, scratch_operands = 0 : i64, tpu.core_type = #tpu.core_type<tc>, window_params = [{pipeline_mode = #tpu.pipeline_mode<synchronous>, transform_indices = @transform_0, window_bounds = array<i64: 2, 128>}, {transform_indices = @transform_1, window_bounds = array<i64: 128, 4864>}, {transform_indices = @transform_2, window_bounds = array<i64: 1, 4864>}, {transform_indices = @transform_3, window_bounds = array<i64: 2, 4864>}]} {
    %c0 = arith.constant 0 : index
    %c0_0 = arith.constant 0 : index
    %0 = vector.load %arg1[%c0, %c0_0] : memref<2x128xbf16, #tpu.memory_space<vmem>>, vector<2x128xbf16>
    %c0_1 = arith.constant 0 : index
    %c0_2 = arith.constant 0 : index
    %1 = vector.load %arg2[%c0_1, %c0_2] : memref<128x4864xbf16, #tpu.memory_space<vmem>>, vector<128x4864xbf16>
    %cst = arith.constant dense<0.000000e+00> : vector<2x4864xf32>
    %2 = tpu.matmul %0, %1, %cst {dimension_numbers = #tpu.dot_dimension_numbers<[1], [0], [0], [1], [0, 0, 1, 1], [], []>} : vector<2x128xbf16>, vector<128x4864xbf16>, vector<2x4864xf32> -> vector<2x4864xf32>
    %c0_3 = arith.constant 0 : index
    %c0_4 = arith.constant 0 : index
    %3 = vector.load %arg3[%c0_3, %c0_4] : memref<1x4864xf32, #tpu.memory_space<vmem>>, vector<1x4864xf32>
    %4 = vector.broadcast %3 : vector<1x4864xf32> to vector<2x4864xf32>
    %5 = arith.addf %2, %4 : vector<2x4864xf32>
    %cst_5 = arith.constant 0.000000e+00 : f32
    %6 = vector.broadcast %cst_5 : f32 to vector<2x4864xf32>
    %7 = arith.maximumf %5, %6 : vector<2x4864xf32>
    %c0_6 = arith.constant 0 : index
    %c0_7 = arith.constant 0 : index
    %8 = vector.load %arg4[%c0_6, %c0_7] : memref<2x4864xf32, #tpu.memory_space<vmem>>, vector<2x4864xf32>
    tpu.vector_store %arg4[%c0_6, %c0_7], %7 {strides = array<i32>} : memref<2x4864xf32, #tpu.memory_space<vmem>>, vector<2x4864xf32>,
    return
  }
  func.func @transform_0(%arg0: i32) -> (i32, i32) {
    %c0_i32 = arith.constant 0 : i32
    %c0_i32_0 = arith.constant 0 : i32
    %c0_i32_1 = arith.constant 0 : i32
    return %c0_i32, %c0_i32_0 : i32, i32
  }
  func.func @transform_1(%arg0: i32) -> (i32, i32) {
    %c0_i32 = arith.constant 0 : i32
    %c0_i32_0 = arith.constant 0 : i32
    return %c0_i32, %arg0 : i32, i32
  }
  func.func @transform_2(%arg0: i32) -> (i32, i32) {
    %c0_i32 = arith.constant 0 : i32
    %c0_i32_0 = arith.constant 0 : i32
    return %c0_i32, %arg0 : i32, i32
  }
  func.func @transform_3(%arg0: i32) -> (i32, i32) {
    %c0_i32 = arith.constant 0 : i32
    %c0_i32_0 = arith.constant 0 : i32
    return %c0_i32, %arg0 : i32, i32
  }
}

module attributes {stable_mosaic.version = 11 : i64} {
  func.func @_mm_bias_act_kernel(%arg0: i32, %arg1: memref<128x256xbf16, #tpu.memory_space<vmem>>, %arg2: memref<256x128xbf16, #tpu.memory_space<vmem>>, %arg3: memref<1x128xf32, #tpu.memory_space<vmem>>, %arg4: memref<128x128xf32, #tpu.memory_space<vmem>>) attributes {dimension_semantics = [#tpu.dimension_semantics<parallel>], iteration_bounds = array<i64: 9>, scalar_prefetch = 0 : i64, scratch_operands = 0 : i64, tpu.core_type = #tpu.core_type<tc>, window_params = [{transform_indices = @transform_0, window_bounds = array<i64: 128, 256>}, {pipeline_mode = #tpu.pipeline_mode<synchronous>, transform_indices = @transform_1, window_bounds = array<i64: 256, 128>}, {pipeline_mode = #tpu.pipeline_mode<synchronous>, transform_indices = @transform_2, window_bounds = array<i64: 1, 128>}, {transform_indices = @transform_3, window_bounds = array<i64: 128, 128>}]} {
    %c0 = arith.constant 0 : index
    %c0_0 = arith.constant 0 : index
    %0 = vector.load %arg1[%c0, %c0_0] : memref<128x256xbf16, #tpu.memory_space<vmem>>, vector<128x256xbf16>
    %c0_1 = arith.constant 0 : index
    %c0_2 = arith.constant 0 : index
    %1 = vector.load %arg2[%c0_1, %c0_2] : memref<256x128xbf16, #tpu.memory_space<vmem>>, vector<256x128xbf16>
    %cst = arith.constant dense<0.000000e+00> : vector<128x128xf32>
    %2 = tpu.matmul %0, %1, %cst {dimension_numbers = #tpu.dot_dimension_numbers<[1], [0], [0], [1], [0, 0, 1, 1], [], []>} : vector<128x256xbf16>, vector<256x128xbf16>, vector<128x128xf32> -> vector<128x128xf32>
    %c0_3 = arith.constant 0 : index
    %c0_4 = arith.constant 0 : index
    %3 = vector.load %arg3[%c0_3, %c0_4] : memref<1x128xf32, #tpu.memory_space<vmem>>, vector<1x128xf32>
    %4 = vector.broadcast %3 : vector<1x128xf32> to vector<128x128xf32>
    %5 = arith.addf %2, %4 : vector<128x128xf32>
    %cst_5 = arith.constant 0.000000e+00 : f32
    %6 = vector.broadcast %cst_5 : f32 to vector<128x128xf32>
    %7 = arith.maximumf %5, %6 : vector<128x128xf32>
    %c0_6 = arith.constant 0 : index
    %c0_7 = arith.constant 0 : index
    %8 = vector.load %arg4[%c0_6, %c0_7] : memref<128x128xf32, #tpu.memory_space<vmem>>, vector<128x128xf32>
    tpu.vector_store %arg4[%c0_6, %c0_7], %7 {strides = array<i32>} : memref<128x128xf32, #tpu.memory_space<vmem>>, vector<128x128xf32>,
    return
  }
  func.func @transform_0(%arg0: i32) -> (i32, i32) {
    %c0_i32 = arith.constant 0 : i32
    %c0_i32_0 = arith.constant 0 : i32
    return %arg0, %c0_i32 : i32, i32
  }
  func.func @transform_1(%arg0: i32) -> (i32, i32) {
    %c0_i32 = arith.constant 0 : i32
    %c0_i32_0 = arith.constant 0 : i32
    %c0_i32_1 = arith.constant 0 : i32
    return %c0_i32, %c0_i32_0 : i32, i32
  }
  func.func @transform_2(%arg0: i32) -> (i32, i32) {
    %c0_i32 = arith.constant 0 : i32
    %c0_i32_0 = arith.constant 0 : i32
    %c0_i32_1 = arith.constant 0 : i32
    return %c0_i32, %c0_i32_0 : i32, i32
  }
  func.func @transform_3(%arg0: i32) -> (i32, i32) {
    %c0_i32 = arith.constant 0 : i32
    %c0_i32_0 = arith.constant 0 : i32
    return %arg0, %c0_i32 : i32, i32
  }
}

module attributes {stable_mosaic.version = 11 : i64} {
  func.func @_mm_bias_act_kernel(%arg0: i32, %arg1: memref<128x256xbf16, #tpu.memory_space<vmem>>, %arg2: memref<256x128xbf16, #tpu.memory_space<vmem>>, %arg3: memref<1x128xf32, #tpu.memory_space<vmem>>, %arg4: memref<128x128xf32, #tpu.memory_space<vmem>>) attributes {dimension_semantics = [#tpu.dimension_semantics<parallel>], iteration_bounds = array<i64: 13>, scalar_prefetch = 0 : i64, scratch_operands = 0 : i64, tpu.core_type = #tpu.core_type<tc>, window_params = [{transform_indices = @transform_0, window_bounds = array<i64: 128, 256>}, {pipeline_mode = #tpu.pipeline_mode<synchronous>, transform_indices = @transform_1, window_bounds = array<i64: 256, 128>}, {pipeline_mode = #tpu.pipeline_mode<synchronous>, transform_indices = @transform_2, window_bounds = array<i64: 1, 128>}, {transform_indices = @transform_3, window_bounds = array<i64: 128, 128>}]} {
    %c0 = arith.constant 0 : index
    %c0_0 = arith.constant 0 : index
    %0 = vector.load %arg1[%c0, %c0_0] : memref<128x256xbf16, #tpu.memory_space<vmem>>, vector<128x256xbf16>
    %c0_1 = arith.constant 0 : index
    %c0_2 = arith.constant 0 : index
    %1 = vector.load %arg2[%c0_1, %c0_2] : memref<256x128xbf16, #tpu.memory_space<vmem>>, vector<256x128xbf16>
    %cst = arith.constant dense<0.000000e+00> : vector<128x128xf32>
    %2 = tpu.matmul %0, %1, %cst {dimension_numbers = #tpu.dot_dimension_numbers<[1], [0], [0], [1], [0, 0, 1, 1], [], []>} : vector<128x256xbf16>, vector<256x128xbf16>, vector<128x128xf32> -> vector<128x128xf32>
    %c0_3 = arith.constant 0 : index
    %c0_4 = arith.constant 0 : index
    %3 = vector.load %arg3[%c0_3, %c0_4] : memref<1x128xf32, #tpu.memory_space<vmem>>, vector<1x128xf32>
    %4 = vector.broadcast %3 : vector<1x128xf32> to vector<128x128xf32>
    %5 = arith.addf %2, %4 : vector<128x128xf32>
    %cst_5 = arith.constant 5.000000e-01 : f32
    %6 = vector.broadcast %cst_5 : f32 to vector<128x128xf32>
    %7 = arith.mulf %6, %5 : vector<128x128xf32>
    %8 = math.tanh %7 : vector<128x128xf32>
    %cst_6 = arith.constant 1.000000e+00 : f32
    %9 = vector.broadcast %cst_6 : f32 to vector<128x128xf32>
    %10 = arith.addf %8, %9 : vector<128x128xf32>
    %cst_7 = arith.constant 5.000000e-01 : f32
    %11 = vector.broadcast %cst_7 : f32 to vector<128x128xf32>
    %12 = arith.mulf %11, %10 : vector<128x128xf32>
    %c0_8 = arith.constant 0 : index
    %c0_9 = arith.constant 0 : index
    %13 = vector.load %arg4[%c0_8, %c0_9] : memref<128x128xf32, #tpu.memory_space<vmem>>, vector<128x128xf32>
    tpu.vector_store %arg4[%c0_8, %c0_9], %12 {strides = array<i32>} : memref<128x128xf32, #tpu.memory_space<vmem>>, vector<128x128xf32>,
    return
  }
  func.func @transform_0(%arg0: i32) -> (i32, i32) {
    %c0_i32 = arith.constant 0 : i32
    %c0_i32_0 = arith.constant 0 : i32
    return %arg0, %c0_i32 : i32, i32
  }
  func.func @transform_1(%arg0: i32) -> (i32, i32) {
    %c0_i32 = arith.constant 0 : i32
    %c0_i32_0 = arith.constant 0 : i32
    %c0_i32_1 = arith.constant 0 : i32
    return %c0_i32, %c0_i32_0 : i32, i32
  }
  func.func @transform_2(%arg0: i32) -> (i32, i32) {
    %c0_i32 = arith.constant 0 : i32
    %c0_i32_0 = arith.constant 0 : i32
    %c0_i32_1 = arith.constant 0 : i32
    return %c0_i32, %c0_i32_0 : i32, i32
  }
  func.func @transform_3(%arg0: i32) -> (i32, i32) {
    %c0_i32 = arith.constant 0 : i32
    %c0_i32_0 = arith.constant 0 : i32
    return %arg0, %c0_i32 : i32, i32
  }
}

</mosaic_0001>

<bundles_post_ra>
// kernel: conv_vae_forward.6
= control target key start
LH: loop header
LB: loop body
LE: loop exit
PB: predicated region body
PF: predicated region fallthrough
CT: control target
= control target key end

     0   :  { %8 = vsyncpa [#allocation3], 0  ;;  %s877_s0 = inlined_call_operand.vmem [shape: bf16[1152,128], index: 0, kind: input, shape index: {}]   ;;  %s878_s1 = inlined_call_operand.hbm [shape: bf16[128,128], index: 1, kind: input, shape index: {}]   ;;  %s879_s2 = inlined_call_operand.hbm [shape: f32[1,128], index: 2, kind: input, shape index: {}]   ;;  %s880_s3 = inlined_call_operand.vmem [shape: f32[1152,128], index: 3, kind: output, shape index: {}]  }
   0x1   :  { %9 = vsyncpa [#allocation5], 0  ;;  %s780_s12 = smov 0  }
   0x2 LB: > { %s545_s13 = sadd.s32 4294967295, %s754_s12   ;;  %p547_p0 = scmp.ge.s32.totalorder %s754_s12, 1  ;;  %s754_s12 = sphi %s780_s12, %s15_s12  }
   0x3   : > { %p114_p1 = scmp.lt.s32.totalorder %s754_s12, 10  ;;  %s756_s14 = smov [#allocation2]  }
   0x4   : > { %s126_s15 = sshll.u32 %s756_s14, 4  ;;  %p794_p3 = scmp.eq.s32.totalorder %s545_s13, 0  ;;  %s127_s15 = int_to_ptr.vmem [resolvable:$true] %s126_s15 }
   0x5   : > { %p788_p2 = pnand %p547_p0, %p114_p1  ;;  %s757_s18 = smov [#allocation4]  }
   0x6   : > { %s140_s19 = sshll.u32 %s757_s18, 4  ;;  %s699_s21 = scalar_lea.vmem %s127_s15, 1024  ;;  %s141_s19 = int_to_ptr.vmem [resolvable:$true] %s140_s19 }
   0x7   : > { %p649_p4 = pneg %p788_p2  ;;  %p700_p7 = scmp.ne.s32.totalorder %s127_s15, %s699_s21 }
   0x8   : > { %p707_p10 = scmp.lt.s32.totalorder %s127_s15, %s127_s15  ;;  %p708_p11 = scmp.lt.s32.totalorder %s699_s21, %s699_s21 }
   0x9   : > { %p802_p5 = pnand %p794_p3, %p649_p4 }
   0xa   : > { %p709_p12 = por %p708_p11, %p707_p10 }
   0xb   : > { %p690_p6 = pneg %p802_p5 }
   0xd   : > { %p702_p8 = pnand %p700_p7, %p690_p6 }
   0xf   : > { %p703_p9 = pneg %p702_p8 }
  0x11   : > { %p710_p13 = pnand %p709_p12, %p703_p9 }
  0x13   : > { %713 = shalt.err (!%p710_p13)
}
  0x14   : > { %s758_s22 = smov 64   ;;  %s759_s23 = smov 4  }
  0x15   : > { %652 = dma.hbm_to_vmem [thread:$0]  (!%p802_p5), %s878_s1, 1024, %s127_s15, [#allocation3], %s758_s22, %s758_s22, %s759_s23  }
  0x16   : > { %s725_s26 = scalar_lea.vmem %s141_s19, 16  ;;  %s732_s27 = scalar_lea.vmem %s141_s19, 32 }
  0x17   : > { %p726_p0 = scmp.ne.s32.totalorder %s141_s19, %s725_s26  ;;  %p733_p7 = scmp.lt.s32.totalorder %s141_s19, %s141_s19 }
  0x18   : > { %p734_p8 = scmp.lt.s32.totalorder %s732_s27, %s725_s26 }
  0x19   : > { %p728_p1 = pnand %p726_p0, %p690_p6 }
  0x1a   : > { %p735_p9 = por %p734_p8, %p733_p7 }
  0x1b   : > { %p729_p4 = pneg %p728_p1 }
  0x1d   : > { %p736_p10 = pnand %p735_p9, %p729_p4 }
  0x1f   : > { %739 = shalt.err (!%p736_p10)
}
  0x20   : > { %655 = dma.hbm_to_vmem [thread:$0]  (!%p802_p5), %s879_s2, 16, %s141_s19, [#allocation5]  }
  0x21   : > { %162 = sbr.rel (%p788_p2) target bundleno = 286 (0x11e), region = 32 }
  0x26   : > { %745 = dma.done.wait (%p794_p3), [#allocation3], 1024  }
  0x27   : > { %747 = vsyncadd (%p794_p3), [#allocation3], 4294966272 }
  0x28   : > { %749 = dma.done.wait (%p794_p3), [#allocation5], 16  }
  0x29   : > { %751 = vsyncadd (%p794_p3), [#allocation5], 4294967280  ;;  %s554_s30 = sshll.u32 %s545_s13, 4  ;;  %v672_v0 = vld [vmem:[#allocation2 + $0x38] sm:$0xff]   ;;  %v673_v1 = vld [vmem:[#allocation2 + $0x30] sm:$0xff]  }
  0x2a   : > { %p191_p6 = scmp.lt.s32.totalorder %s554_s30, 143  ;;  %593 = vmatprep.subr.bf16.mxu0 %v672_v0  ;;  %625 = vmatprep.subr.bf16.mxu1 %v672_v0  ;;  %v674_v2 = vld [vmem:[#allocation2 + $0x28] sm:$0xff]   ;;  %v675_v3 = vld [vmem:[#allocation2 + $0x20] sm:$0xff]   ;;  %v676_v6 = vld [vmem:[#allocation2 + $0x18] sm:$0xff]  }
  0x2b   : > { %594 = vmatpush3.bf16.msra.mxu0 %v672_v0  ;;  %633 = vmatpush3.bf16.msra.mxu1 %v672_v0  ;;  %v677_v7 = vld [vmem:[#allocation2 + $0x10] sm:$0xff]   ;;  %v678_v8 = vld [vmem:[#allocation2 + $0x8] sm:$0xff]   ;;  %v679_v9 = vld [vmem:[#allocation2] sm:$0xff]  }
  0x2c   : > { %s885_s30 = smov (!%p191_p6, %s554_s30), 143  ;;  %595 = vmatprep.subr.bf16.mxu0 %v673_v1  ;;  %626 = vmatprep.subr.bf16.mxu1 %v673_v1  ;;  %v558_v16 = vld [vmem:[#allocation4] ss:$0 sm:$0xff] }
  0x2d   : > { %s555_s4 = sshll.u32 %s885_s30, 2  ;;  %s557_s8 = sshll.u32 %s885_s30, 3 }
  0x2e   : > { %s842_s7 = scalar_lea.vmem %s877_s0, %s555_s4  ;;  %s856_s11 = scalar_lea.vmem %s880_s3, %s557_s8 }
  0x2f   : > { %596 = vmatpush3.bf16.msra.mxu0 %v673_v1  ;;  %634 = vmatpush3.bf16.msra.mxu1 %v673_v1  ;;  %v680_v4 = vld [vmem:[%s842_s7] sm:$0xff]   ;;  %v682_v10 = vld [vmem:[%s842_s7 + $0x8] sm:$0xff]   ;;  %v684_v12 = vld [vmem:[%s842_s7 + $0x10] sm:$0xff]  }
  0x30   : > { %597 = vmatprep.subr.bf16.mxu0 %v674_v2  ;;  %627 = vmatprep.subr.bf16.mxu1 %v674_v2  ;;  %v681_v5 = vld [vmem:[%s842_s7 + $0x20] sm:$0xff]   ;;  %v683_v11 = vld [vmem:[%s842_s7 + $0x28] sm:$0xff]   ;;  %v685_v13 = vld [vmem:[%s842_s7 + $0x30] sm:$0xff]  }
  0x31   : > { %609 = vmatprep.mubr.bf16.mxu0 %v680_v4  ;;  %617 = vmatprep.mubr.bf16.mxu1 %v681_v5  ;;  %v686_v14 = vld [vmem:[%s842_s7 + $0x18] sm:$0xff]  }
  0x32   : > { %v687_v15 = vld [vmem:[%s842_s7 + $0x38] sm:$0xff]  }
  0x33   : > { %598 = vmatpush3.bf16.msra.mxu0 %v674_v2  ;;  %635 = vmatpush3.bf16.msra.mxu1 %v674_v2 }
  0x34   : > { %599 = vmatprep.subr.bf16.mxu0 %v675_v3  ;;  %628 = vmatprep.subr.bf16.mxu1 %v675_v3 }
  0x37   : > { %600 = vmatpush3.bf16.msra.mxu0 %v675_v3  ;;  %636 = vmatpush3.bf16.msra.mxu1 %v675_v3 }
  0x38   : > { %601 = vmatprep.subr.bf16.mxu0 %v676_v6  ;;  %629 = vmatprep.subr.bf16.mxu1 %v676_v6 }
  0x3b   : > { %602 = vmatpush3.bf16.msra.mxu0 %v676_v6  ;;  %637 = vmatpush3.bf16.msra.mxu1 %v676_v6 }
  0x3c   : > { %603 = vmatprep.subr.bf16.mxu0 %v677_v7  ;;  %630 = vmatprep.subr.bf16.mxu1 %v677_v7 }
  0x3f   : > { %604 = vmatpush3.bf16.msra.mxu0 %v677_v7  ;;  %638 = vmatpush3.bf16.msra.mxu1 %v677_v7 }
  0x40   : > { %605 = vmatprep.subr.bf16.mxu0 %v678_v8  ;;  %631 = vmatprep.subr.bf16.mxu1 %v678_v8 }
  0x43   : > { %606 = vmatpush3.bf16.msra.mxu0 %v678_v8  ;;  %639 = vmatpush3.bf16.msra.mxu1 %v678_v8 }
  0x44   : > { %607 = vmatprep.subr.bf16.mxu0 %v679_v9  ;;  %632 = vmatprep.subr.bf16.mxu1 %v679_v9 }
  0x47   : > { %608 = vmatpush3.bf16.msra.mxu0 %v679_v9  ;;  %640 = vmatpush3.bf16.msra.mxu1 %v679_v9 }
  0x4a   : > { %610 = vmatmul.mubr.bf16.vlgmr.msra.gmra.mxu0 %v682_v10  ;;  %618 = vmatmul.mubr.bf16.vlgmr.msra.gmra.mxu1 %v683_v11 }
  0x4b   : > { %613 = vmatprep.mubr.bf16.mxu0 %v684_v12  ;;  %621 = vmatprep.mubr.bf16.mxu1 %v685_v13 }
  0x52   : > { %614 = vmatmul.mubr.bf16.gmra.mxu0 %v686_v14  ;;  %622 = vmatmul.mubr.bf16.gmra.mxu1 %v687_v15 }
 0x10a   : > { %v611_v17 = vpop.f32.mrf.mxu0  ;;  %v619_v18 = vpop.f32.mrf.mxu1 }
 0x10b   : > { %v381_v19 = vadd.f32 %v611_v17, %v558_v16  ;;  %v413_v20 = vadd.f32 %v619_v18, %v558_v16 }
 0x10c   : > { %v372_v21 = vpop.f32.mrf.mxu0  ;;  %v404_v22 = vpop.f32.mrf.mxu1 }
 0x10d   : > { %v437_v23 = vmax.f32 %v381_v19, 0.0  ;;  %v445_v24 = vmax.f32 %v413_v20, 0.0  ;;  %v373_v25 = vadd.f32 %v558_v16, %v372_v21  ;;  %v405_v26 = vadd.f32 %v558_v16, %v404_v22 }
 0x10e   : > { %v612_v27 = vpop.f32.mrf.mxu0  ;;  %v620_v28 = vpop.f32.mrf.mxu1 }
 0x10f   : > { %453 = vst [vmem:[%s856_s11 + $0x10] sm:$0xff] %v437_v23  ;;  %461 = vst [vmem:[%s856_s11 + $0x50] sm:$0xff] %v445_v24  ;;  %v435_v29 = vmax.f32 %v373_v25, 0.0  ;;  %v443_v30 = vmax.f32 %v405_v26, 0.0  ;;  %v384_v31 = vadd.f32 %v612_v27, %v558_v16  ;;  %v416_v32 = vadd.f32 %v620_v28, %v558_v16 }
 0x110   : > { %v375_v33 = vpop.f32.mrf.mxu0  ;;  %v407_v34 = vpop.f32.mrf.mxu1 }
 0x111   : > { %451 = vst [vmem:[%s856_s11] sm:$0xff] %v435_v29  ;;  %459 = vst [vmem:[%s856_s11 + $0x40] sm:$0xff] %v443_v30  ;;  %v438_v35 = vmax.f32 %v384_v31, 0.0  ;;  %v446_v36 = vmax.f32 %v416_v32, 0.0  ;;  %v376_v37 = vadd.f32 %v558_v16, %v375_v33  ;;  %v408_v38 = vadd.f32 %v558_v16, %v407_v34 }
 0x112   : > { %v615_v39 = vpop.f32.mrf.mxu0  ;;  %v623_v40 = vpop.f32.mrf.mxu1 }
 0x113   : > { %454 = vst [vmem:[%s856_s11 + $0x18] sm:$0xff] %v438_v35  ;;  %462 = vst [vmem:[%s856_s11 + $0x58] sm:$0xff] %v446_v36  ;;  %v436_v41 = vmax.f32 %v376_v37, 0.0  ;;  %v444_v42 = vmax.f32 %v408_v38, 0.0  ;;  %v397_v43 = vadd.f32 %v615_v39, %v558_v16  ;;  %v429_v44 = vadd.f32 %v623_v40, %v558_v16 }
 0x114   : > { %v388_v45 = vpop.f32.mrf.mxu0  ;;  %v420_v46 = vpop.f32.mrf.mxu1 }
 0x115   : > { %452 = vst [vmem:[%s856_s11 + $0x8] sm:$0xff] %v436_v41  ;;  %460 = vst [vmem:[%s856_s11 + $0x48] sm:$0xff] %v444_v42  ;;  %v441_v47 = vmax.f32 %v397_v43, 0.0  ;;  %v449_v48 = vmax.f32 %v429_v44, 0.0  ;;  %v389_v49 = vadd.f32 %v558_v16, %v388_v45  ;;  %v421_v50 = vadd.f32 %v558_v16, %v420_v46 }
 0x116   : > { %v616_v51 = vpop.f32.mrf.mxu0  ;;  %v624_v52 = vpop.f32.mrf.mxu1 }
 0x117   : > { %457 = vst [vmem:[%s856_s11 + $0x30] sm:$0xff] %v441_v47  ;;  %465 = vst [vmem:[%s856_s11 + $0x70] sm:$0xff] %v449_v48  ;;  %v439_v53 = vmax.f32 %v389_v49, 0.0  ;;  %v447_v54 = vmax.f32 %v421_v50, 0.0  ;;  %v400_v55 = vadd.f32 %v616_v51, %v558_v16  ;;  %v432_v56 = vadd.f32 %v624_v52, %v558_v16 }
 0x118   : > { %v391_v57 = vpop.f32.mrf.mxu0  ;;  %v423_v58 = vpop.f32.mrf.mxu1 }
 0x119   : > { %455 = vst [vmem:[%s856_s11 + $0x20] sm:$0xff] %v439_v53  ;;  %463 = vst [vmem:[%s856_s11 + $0x60] sm:$0xff] %v447_v54  ;;  %v442_v59 = vmax.f32 %v400_v55, 0.0  ;;  %v450_v60 = vmax.f32 %v432_v56, 0.0  ;;  %v392_v61 = vadd.f32 %v558_v16, %v391_v57  ;;  %v424_v62 = vadd.f32 %v558_v16, %v423_v58 }
 0x11b   : > { %458 = vst [vmem:[%s856_s11 + $0x38] sm:$0xff] %v442_v59  ;;  %466 = vst [vmem:[%s856_s11 + $0x78] sm:$0xff] %v450_v60  ;;  %v440_v63 = vmax.f32 %v392_v61, 0.0  ;;  %v448_v0 = vmax.f32 %v424_v62, 0.0 }
 0x11d   : > { %456 = vst [vmem:[%s856_s11 + $0x28] sm:$0xff] %v440_v63  ;;  %464 = vst [vmem:[%s856_s11 + $0x68] sm:$0xff] %v448_v0 }
 0x11e PF: > { %s15_s12 = sadd.s32 1, %s754_s12  }
 0x11f   : > { %p12_p2 = scmp.ge.s32.totalorder %s15_s12, 11  }
 0x121   :  { %14 = sbr.rel (!%p12_p2) target bundleno = 2 (0x2), region = 71 }
 0x126   :  { %489 = vsyncpa [#allocation3], 1 }
 0x127   :  { %491 = vsyncpa [#allocation3 + $0x1], 1 }
 0x128   :  { %492 = vsyncpa [#allocation5], 1 }

// kernel: conv_vae_forward.7
= control target key start
LH: loop header
LB: loop body
LE: loop exit
PB: predicated region body
PF: predicated region fallthrough
CT: control target
= control target key end

     0   :  { %s639_s12 = smov 0   ;;  %s715_s0 = inlined_call_operand.vmem [shape: bf16[1024,128], index: 0, kind: input, shape index: {}]   ;;  %s716_s1 = inlined_call_operand.vmem [shape: bf16[128,128], index: 1, kind: input, shape index: {}]   ;;  %s717_s2 = inlined_call_operand.vmem [shape: f32[1,128], index: 2, kind: input, shape index: {}]   ;;  %s718_s3 = inlined_call_operand.vmem [shape: f32[1024,128], index: 3, kind: output, shape index: {}]  }
   0x1 LB: > { %s495_s13 = sadd.s32 4294967295, %s617_s12   ;;  %p499_p0 = scmp.ge.s32.totalorder %s617_s12, 1  ;;  %s617_s12 = sphi %s639_s12, %s13_s12  }
   0x2   : > { %p138_p1 = scmp.lt.s32.totalorder %s617_s12, 9 }
   0x4   : > { %p139_p2 = pnand %p499_p0, %p138_p1 }
   0x5   : > { %s500_s16 = sshll.u32 (!%p139_p2), %s495_s13, 4 }
   0x6   : > { %142 = sbr.rel (%p139_p2) target bundleno = 256 (0x100), region = 32  ;;  %p163_p3 = scmp.lt.s32.totalorder (!%p139_p2), %s500_s16, 127 }
   0xb   : > { %v595_v0 = vld [vmem:[%s716_s1 + $0x38] sm:$0xff]   ;;  %v596_v1 = vld [vmem:[%s716_s1 + $0x30] sm:$0xff]   ;;  %s720_s16 = smov (!%p163_p3, %s500_s16), 127  ;;  %v597_v2 = vld [vmem:[%s716_s1 + $0x28] sm:$0xff]  }
   0xc   : > { %539 = vmatprep.subr.bf16.mxu0 %v595_v0  ;;  %571 = vmatprep.subr.bf16.mxu1 %v595_v0  ;;  %s501_s21 = sshll.u32 %s720_s16, 2  ;;  %v598_v3 = vld [vmem:[%s716_s1 + $0x20] sm:$0xff]   ;;  %v599_v6 = vld [vmem:[%s716_s1 + $0x18] sm:$0xff]   ;;  %v600_v7 = vld [vmem:[%s716_s1 + $0x10] sm:$0xff]   ;;  %s503_s10 = sshll.u32 %s720_s16, 3 }
   0xd   : > { %540 = vmatpush3.bf16.msra.mxu0 %v595_v0  ;;  %579 = vmatpush3.bf16.msra.mxu1 %v595_v0  ;;  %s662_s24 = scalar_lea.vmem %s715_s0, %s501_s21  ;;  %v601_v8 = vld [vmem:[%s716_s1 + $0x8] sm:$0xff]   ;;  %v602_v9 = vld [vmem:[%s716_s1] sm:$0xff]   ;;  %s694_s14 = scalar_lea.vmem %s718_s3, %s503_s10 }
   0xe   : > { %541 = vmatprep.subr.bf16.mxu0 %v596_v1  ;;  %572 = vmatprep.subr.bf16.mxu1 %v596_v1  ;;  %v603_v4 = vld [vmem:[%s662_s24] sm:$0xff]   ;;  %v605_v10 = vld [vmem:[%s662_s24 + $0x8] sm:$0xff]   ;;  %v607_v12 = vld [vmem:[%s662_s24 + $0x10] sm:$0xff]  }
   0xf   : > { %v604_v5 = vld [vmem:[%s662_s24 + $0x20] sm:$0xff]   ;;  %555 = vmatprep.mubr.bf16.mxu0 %v603_v4  ;;  %v606_v11 = vld [vmem:[%s662_s24 + $0x28] sm:$0xff]   ;;  %v608_v13 = vld [vmem:[%s662_s24 + $0x30] sm:$0xff]  }
  0x10   : > { %563 = vmatprep.mubr.bf16.mxu1 %v604_v5  ;;  %v609_v14 = vld [vmem:[%s662_s24 + $0x18] sm:$0xff]   ;;  %v504_v16 = vld [vmem:[%s717_s2] ss:$0 sm:$0xff] }
  0x11   : > { %542 = vmatpush3.bf16.msra.mxu0 %v596_v1  ;;  %580 = vmatpush3.bf16.msra.mxu1 %v596_v1  ;;  %v610_v15 = vld [vmem:[%s662_s24 + $0x38] sm:$0xff]  }
  0x12   : > { %543 = vmatprep.subr.bf16.mxu0 %v597_v2  ;;  %573 = vmatprep.subr.bf16.mxu1 %v597_v2 }
  0x15   : > { %544 = vmatpush3.bf16.msra.mxu0 %v597_v2  ;;  %581 = vmatpush3.bf16.msra.mxu1 %v597_v2 }
  0x16   : > { %545 = vmatprep.subr.bf16.mxu0 %v598_v3  ;;  %574 = vmatprep.subr.bf16.mxu1 %v598_v3 }
  0x19   : > { %546 = vmatpush3.bf16.msra.mxu0 %v598_v3  ;;  %582 = vmatpush3.bf16.msra.mxu1 %v598_v3 }
  0x1a   : > { %547 = vmatprep.subr.bf16.mxu0 %v599_v6  ;;  %575 = vmatprep.subr.bf16.mxu1 %v599_v6 }
  0x1d   : > { %548 = vmatpush3.bf16.msra.mxu0 %v599_v6  ;;  %583 = vmatpush3.bf16.msra.mxu1 %v599_v6 }
  0x1e   : > { %549 = vmatprep.subr.bf16.mxu0 %v600_v7  ;;  %576 = vmatprep.subr.bf16.mxu1 %v600_v7 }
  0x21   : > { %550 = vmatpush3.bf16.msra.mxu0 %v600_v7  ;;  %584 = vmatpush3.bf16.msra.mxu1 %v600_v7 }
  0x22   : > { %551 = vmatprep.subr.bf16.mxu0 %v601_v8  ;;  %577 = vmatprep.subr.bf16.mxu1 %v601_v8 }
  0x25   : > { %552 = vmatpush3.bf16.msra.mxu0 %v601_v8  ;;  %585 = vmatpush3.bf16.msra.mxu1 %v601_v8 }
  0x26   : > { %553 = vmatprep.subr.bf16.mxu0 %v602_v9  ;;  %578 = vmatprep.subr.bf16.mxu1 %v602_v9 }
  0x29   : > { %554 = vmatpush3.bf16.msra.mxu0 %v602_v9  ;;  %586 = vmatpush3.bf16.msra.mxu1 %v602_v9 }
  0x2c   : > { %556 = vmatmul.mubr.bf16.vlgmr.msra.gmra.mxu0 %v605_v10  ;;  %564 = vmatmul.mubr.bf16.vlgmr.msra.gmra.mxu1 %v606_v11 }
  0x2d   : > { %559 = vmatprep.mubr.bf16.mxu0 %v607_v12  ;;  %567 = vmatprep.mubr.bf16.mxu1 %v608_v13 }
  0x34   : > { %560 = vmatmul.mubr.bf16.gmra.mxu0 %v609_v14  ;;  %568 = vmatmul.mubr.bf16.gmra.mxu1 %v610_v15 }
  0xec   : > { %v557_v17 = vpop.f32.mrf.mxu0  ;;  %v565_v18 = vpop.f32.mrf.mxu1 }
  0xed   : > { %v353_v19 = vadd.f32 %v557_v17, %v504_v16  ;;  %v385_v20 = vadd.f32 %v565_v18, %v504_v16 }
  0xee   : > { %v344_v21 = vpop.f32.mrf.mxu0  ;;  %v376_v22 = vpop.f32.mrf.mxu1 }
  0xef   : > { %v409_v23 = vmax.f32 %v353_v19, 0.0  ;;  %v417_v24 = vmax.f32 %v385_v20, 0.0  ;;  %v345_v25 = vadd.f32 %v504_v16, %v344_v21  ;;  %v377_v26 = vadd.f32 %v504_v16, %v376_v22 }
  0xf0   : > { %v558_v27 = vpop.f32.mrf.mxu0  ;;  %v566_v28 = vpop.f32.mrf.mxu1 }
  0xf1   : > { %425 = vst [vmem:[%s694_s14 + $0x10] sm:$0xff] %v409_v23  ;;  %433 = vst [vmem:[%s694_s14 + $0x50] sm:$0xff] %v417_v24  ;;  %v407_v29 = vmax.f32 %v345_v25, 0.0  ;;  %v415_v30 = vmax.f32 %v377_v26, 0.0  ;;  %v356_v31 = vadd.f32 %v558_v27, %v504_v16  ;;  %v388_v32 = vadd.f32 %v566_v28, %v504_v16 }
  0xf2   : > { %v347_v33 = vpop.f32.mrf.mxu0  ;;  %v379_v34 = vpop.f32.mrf.mxu1 }
  0xf3   : > { %423 = vst [vmem:[%s694_s14] sm:$0xff] %v407_v29  ;;  %431 = vst [vmem:[%s694_s14 + $0x40] sm:$0xff] %v415_v30  ;;  %v410_v35 = vmax.f32 %v356_v31, 0.0  ;;  %v418_v36 = vmax.f32 %v388_v32, 0.0  ;;  %v348_v37 = vadd.f32 %v504_v16, %v347_v33  ;;  %v380_v38 = vadd.f32 %v504_v16, %v379_v34 }
  0xf4   : > { %v561_v39 = vpop.f32.mrf.mxu0  ;;  %v569_v40 = vpop.f32.mrf.mxu1 }
  0xf5   : > { %426 = vst [vmem:[%s694_s14 + $0x18] sm:$0xff] %v410_v35  ;;  %434 = vst [vmem:[%s694_s14 + $0x58] sm:$0xff] %v418_v36  ;;  %v408_v41 = vmax.f32 %v348_v37, 0.0  ;;  %v416_v42 = vmax.f32 %v380_v38, 0.0  ;;  %v369_v43 = vadd.f32 %v561_v39, %v504_v16  ;;  %v401_v44 = vadd.f32 %v569_v40, %v504_v16 }
  0xf6   : > { %v360_v45 = vpop.f32.mrf.mxu0  ;;  %v392_v46 = vpop.f32.mrf.mxu1 }
  0xf7   : > { %424 = vst [vmem:[%s694_s14 + $0x8] sm:$0xff] %v408_v41  ;;  %432 = vst [vmem:[%s694_s14 + $0x48] sm:$0xff] %v416_v42  ;;  %v413_v47 = vmax.f32 %v369_v43, 0.0  ;;  %v421_v48 = vmax.f32 %v401_v44, 0.0  ;;  %v361_v49 = vadd.f32 %v504_v16, %v360_v45  ;;  %v393_v50 = vadd.f32 %v504_v16, %v392_v46 }
  0xf8   : > { %v562_v51 = vpop.f32.mrf.mxu0  ;;  %v570_v52 = vpop.f32.mrf.mxu1 }
  0xf9   : > { %429 = vst [vmem:[%s694_s14 + $0x30] sm:$0xff] %v413_v47  ;;  %437 = vst [vmem:[%s694_s14 + $0x70] sm:$0xff] %v421_v48  ;;  %v411_v53 = vmax.f32 %v361_v49, 0.0  ;;  %v419_v54 = vmax.f32 %v393_v50, 0.0  ;;  %v372_v55 = vadd.f32 %v562_v51, %v504_v16  ;;  %v404_v56 = vadd.f32 %v570_v52, %v504_v16 }
  0xfa   : > { %v363_v57 = vpop.f32.mrf.mxu0  ;;  %v395_v58 = vpop.f32.mrf.mxu1 }
  0xfb   : > { %427 = vst [vmem:[%s694_s14 + $0x20] sm:$0xff] %v411_v53  ;;  %435 = vst [vmem:[%s694_s14 + $0x60] sm:$0xff] %v419_v54  ;;  %v414_v59 = vmax.f32 %v372_v55, 0.0  ;;  %v422_v60 = vmax.f32 %v404_v56, 0.0  ;;  %v364_v61 = vadd.f32 %v504_v16, %v363_v57  ;;  %v396_v62 = vadd.f32 %v504_v16, %v395_v58 }
  0xfd   : > { %430 = vst [vmem:[%s694_s14 + $0x38] sm:$0xff] %v414_v59  ;;  %438 = vst [vmem:[%s694_s14 + $0x78] sm:$0xff] %v422_v60  ;;  %v412_v63 = vmax.f32 %v364_v61, 0.0  ;;  %v420_v0 = vmax.f32 %v396_v62, 0.0 }
  0xff   : > { %428 = vst [vmem:[%s694_s14 + $0x28] sm:$0xff] %v412_v63  ;;  %436 = vst [vmem:[%s694_s14 + $0x68] sm:$0xff] %v420_v0 }
 0x100 PF: > { %s13_s12 = sadd.s32 1, %s617_s12  }
 0x101   : > { %p10_p4 = scmp.ge.s32.totalorder %s13_s12, 10  }
 0x103   :  { %12 = sbr.rel (!%p10_p4) target bundleno = 1 (0x1), region = 62 }

// kernel: conv_vae_forward.9
= control target key start
LH: loop header
LB: loop body
LE: loop exit
PB: predicated region body
PF: predicated region fallthrough
CT: control target
= control target key end

     0   :  { %s4797_s12 = smov 0   ;;  %s4799_s13 = smov 0   ;;  %s5946_s0 = inlined_call_operand.vmem [shape: bf16[2,128], index: 0, kind: input, shape index: {}]   ;;  %s5947_s1 = inlined_call_operand.vmem [shape: bf16[128,9728], index: 1, kind: input, shape index: {}]   ;;  %s5948_s2 = inlined_call_operand.vmem [shape: f32[1,9728], index: 2, kind: input, shape index: {}]   ;;  %s5949_s3 = inlined_call_operand.vmem [shape: f32[2,9728], index: 3, kind: output, shape index: {}]  }
   0x1   :  { %s4801_s14 = smov 0  }
   0x2 LB: > { %s3951_s15 = sadd.s32 4294967295, %s4773_s14   ;;  %s4814_s16 = sadd.s32 1, %s4773_s14   ;;  %s4773_s14 = sphi %s4801_s14, %s5952_s14   ;;  %s4769_s13 = sphi %s4799_s13, %s5951_s13   ;;  %s4765_s12 = sphi %s4797_s12, %s5950_s12  }
   0x3   : > { %s38_s17 = ssub.s32 %s4773_s14, %s4814_s16  ;;  %s41_s18 = sadd.s32 1, %s4769_s13 }
   0x4   : > { %p39_p0 = scmp.eq.s32.totalorder %s38_s17, 0  ;;  %p48_p1 = scmp.ne.s32.totalorder %s4769_s13, %s4765_s12 }
   0x5   : > { %p49_p2 = scmp.eq.s32.totalorder %s4773_s14, 0  ;;  %p3954_p4 = scmp.ge.s32.totalorder %s4773_s14, 2 }
   0x6   : > { %s4823_s19 = scalar_select %p39_p0, %s4769_s13, %s41_s18  }
   0x7   : > { %p50_p3 = por %p49_p2, %p48_p1  ;;  %129 = sbr.rel (%p3954_p4) target bundleno = 169 (0xa9), region = 20 }
   0xc   : > { %132 = sbr.rel (!%p50_p3) target bundleno = 169 (0xa9), region = 24  ;;  %s134_s20 = sand.u32 (%p50_p3), 1, %s4769_s13  }
   0xd   : > { %s4265_s21 = smul.u32 (%p50_p3), 152, %s4773_s14 }
   0xe   : > { %s4266_s22 = smul.u32 (%p50_p3), 2432, %s134_s20 }
   0xf   : > { %s4831_s25 = scalar_lea.vmem (%p50_p3), %s5947_s1, %s4265_s21 }
  0x10   : > { %v152_v0 = vld [vmem:[%s4831_s25] sm:$0xff] (%p50_p3)  ;;  %v154_v1 = vld [vmem:[%s4831_s25 + $0x8] sm:$0xff] (%p50_p3)  ;;  %v156_v2 = vld [vmem:[%s4831_s25 + $0x10] sm:$0xff] (%p50_p3)  ;;  %s4836_s26 = scalar_lea.vmem (%p50_p3), [#allocation2], %s4266_s22 }
  0x11   : > { %153 = vst [vmem:[%s4836_s26] sm:$0xff] %v152_v0  ;;  %155 = vst [vmem:[%s4836_s26 + $0x8] sm:$0xff] %v154_v1  ;;  %v158_v3 = vld [vmem:[%s4831_s25 + $0x18] sm:$0xff]  ;;  %v160_v4 = vld [vmem:[%s4831_s25 + $0x20] sm:$0xff] }
  0x12   : > { %157 = vst [vmem:[%s4836_s26 + $0x10] sm:$0xff] %v156_v2  ;;  %v162_v5 = vld [vmem:[%s4831_s25 + $0x28] sm:$0xff]  ;;  %159 = vst [vmem:[%s4836_s26 + $0x18] sm:$0xff] %v158_v3  ;;  %v164_v6 = vld [vmem:[%s4831_s25 + $0x30] sm:$0xff] }
  0x13   : > { %161 = vst [vmem:[%s4836_s26 + $0x20] sm:$0xff] %v160_v4  ;;  %163 = vst [vmem:[%s4836_s26 + $0x28] sm:$0xff] %v162_v5  ;;  %v166_v7 = vld [vmem:[%s4831_s25 + $0x38] sm:$0xff]  ;;  %v168_v8 = vld [vmem:[%s4831_s25 + $0x40] sm:$0xff] }
  0x14   : > { %165 = vst [vmem:[%s4836_s26 + $0x30] sm:$0xff] %v164_v6  ;;  %167 = vst [vmem:[%s4836_s26 + $0x38] sm:$0xff] %v166_v7  ;;  %v170_v9 = vld [vmem:[%s4831_s25 + $0x48] sm:$0xff]  ;;  %v172_v10 = vld [vmem:[%s4831_s25 + $0x50] sm:$0xff] }
  0x15   : > { %169 = vst [vmem:[%s4836_s26 + $0x40] sm:$0xff] %v168_v8  ;;  %v174_v11 = vld [vmem:[%s4831_s25 + $0x58] sm:$0xff]  ;;  %171 = vst [vmem:[%s4836_s26 + $0x48] sm:$0xff] %v170_v9  ;;  %v176_v12 = vld [vmem:[%s4831_s25 + $0x60] sm:$0xff] }
  0x16   : > { %173 = vst [vmem:[%s4836_s26 + $0x50] sm:$0xff] %v172_v10  ;;  %175 = vst [vmem:[%s4836_s26 + $0x58] sm:$0xff] %v174_v11  ;;  %v178_v13 = vld [vmem:[%s4831_s25 + $0x68] sm:$0xff]  ;;  %v180_v14 = vld [vmem:[%s4831_s25 + $0x70] sm:$0xff] }
  0x17   : > { %177 = vst [vmem:[%s4836_s26 + $0x60] sm:$0xff] %v176_v12  ;;  %179 = vst [vmem:[%s4836_s26 + $0x68] sm:$0xff] %v178_v13  ;;  %v182_v15 = vld [vmem:[%s4831_s25 + $0x78] sm:$0xff]  ;;  %v184_v16 = vld [vmem:[%s4831_s25 + $0x80] sm:$0xff] }
  0x18   : > { %181 = vst [vmem:[%s4836_s26 + $0x70] sm:$0xff] %v180_v14  ;;  %v186_v17 = vld [vmem:[%s4831_s25 + $0x88] sm:$0xff]  ;;  %183 = vst [vmem:[%s4836_s26 + $0x78] sm:$0xff] %v182_v15  ;;  %v188_v18 = vld [vmem:[%s4831_s25 + $0x90] sm:$0xff] }
  0x19   : > { %185 = vst [vmem:[%s4836_s26 + $0x80] sm:$0xff] %v184_v16  ;;  %187 = vst [vmem:[%s4836_s26 + $0x88] sm:$0xff] %v186_v17  ;;  %v190_v19 = vld [vmem:[%s4831_s25 + $0x130] sm:$0xff]  ;;  %v192_v20 = vld [vmem:[%s4831_s25 + $0x138] sm:$0xff] }
  0x1a   : > { %189 = vst [vmem:[%s4836_s26 + $0x90] sm:$0xff] %v188_v18  ;;  %191 = vst [vmem:[%s4836_s26 + $0x98] sm:$0xff] %v190_v19  ;;  %v194_v21 = vld [vmem:[%s4831_s25 + $0x140] sm:$0xff]  ;;  %v196_v22 = vld [vmem:[%s4831_s25 + $0x148] sm:$0xff] }
  0x1b   : > { %193 = vst [vmem:[%s4836_s26 + $0xa0] sm:$0xff] %v192_v20  ;;  %v198_v23 = vld [vmem:[%s4831_s25 + $0x150] sm:$0xff]  ;;  %195 = vst [vmem:[%s4836_s26 + $0xa8] sm:$0xff] %v194_v21  ;;  %v200_v24 = vld [vmem:[%s4831_s25 + $0x158] sm:$0xff] }
  0x1c   : > { %197 = vst [vmem:[%s4836_s26 + $0xb0] sm:$0xff] %v196_v22  ;;  %199 = vst [vmem:[%s4836_s26 + $0xb8] sm:$0xff] %v198_v23  ;;  %v202_v25 = vld [vmem:[%s4831_s25 + $0x160] sm:$0xff]  ;;  %v204_v26 = vld [vmem:[%s4831_s25 + $0x168] sm:$0xff] }
  0x1d   : > { %201 = vst [vmem:[%s4836_s26 + $0xc0] sm:$0xff] %v200_v24  ;;  %203 = vst [vmem:[%s4836_s26 + $0xc8] sm:$0xff] %v202_v25  ;;  %v206_v27 = vld [vmem:[%s4831_s25 + $0x170] sm:$0xff]  ;;  %v208_v28 = vld [vmem:[%s4831_s25 + $0x178] sm:$0xff] }
  0x1e   : > { %205 = vst [vmem:[%s4836_s26 + $0xd0] sm:$0xff] %v204_v26  ;;  %v210_v29 = vld [vmem:[%s4831_s25 + $0x180] sm:$0xff]  ;;  %207 = vst [vmem:[%s4836_s26 + $0xd8] sm:$0xff] %v206_v27  ;;  %v212_v30 = vld [vmem:[%s4831_s25 + $0x188] sm:$0xff] }
  0x1f   : > { %209 = vst [vmem:[%s4836_s26 + $0xe0] sm:$0xff] %v208_v28  ;;  %211 = vst [vmem:[%s4836_s26 + $0xe8] sm:$0xff] %v210_v29  ;;  %v214_v31 = vld [vmem:[%s4831_s25 + $0x190] sm:$0xff]  ;;  %v216_v32 = vld [vmem:[%s4831_s25 + $0x198] sm:$0xff] }
  0x20   : > { %213 = vst [vmem:[%s4836_s26 + $0xf0] sm:$0xff] %v212_v30  ;;  %215 = vst [vmem:[%s4836_s26 + $0xf8] sm:$0xff] %v214_v31  ;;  %v218_v33 = vld [vmem:[%s4831_s25 + $0x1a0] sm:$0xff]  ;;  %v220_v34 = vld [vmem:[%s4831_s25 + $0x1a8] sm:$0xff] }
  0x21   : > { %217 = vst [vmem:[%s4836_s26 + $0x100] sm:$0xff] %v216_v32  ;;  %v222_v35 = vld [vmem:[%s4831_s25 + $0x1b0] sm:$0xff]  ;;  %219 = vst [vmem:[%s4836_s26 + $0x108] sm:$0xff] %v218_v33  ;;  %v224_v36 = vld [vmem:[%s4831_s25 + $0x1b8] sm:$0xff] }
  0x22   : > { %221 = vst [vmem:[%s4836_s26 + $0x110] sm:$0xff] %v220_v34  ;;  %223 = vst [vmem:[%s4836_s26 + $0x118] sm:$0xff] %v222_v35  ;;  %v226_v37 = vld [vmem:[%s4831_s25 + $0x1c0] sm:$0xff]  ;;  %v230_v39 = vld [vmem:[%s4831_s25 + $0x268] sm:$0xff] }
  0x23   : > { %v228_v38 = vld [vmem:[%s4831_s25 + $0x260] sm:$0xff]  ;;  %225 = vst [vmem:[%s4836_s26 + $0x120] sm:$0xff] %v224_v36  ;;  %227 = vst [vmem:[%s4836_s26 + $0x128] sm:$0xff] %v226_v37  ;;  %v232_v40 = vld [vmem:[%s4831_s25 + $0x270] sm:$0xff] }
  0x24   : > { %229 = vst [vmem:[%s4836_s26 + $0x130] sm:$0xff] %v228_v38  ;;  %v234_v41 = vld [vmem:[%s4831_s25 + $0x278] sm:$0xff]  ;;  %231 = vst [vmem:[%s4836_s26 + $0x138] sm:$0xff] %v230_v39  ;;  %v236_v42 = vld [vmem:[%s4831_s25 + $0x280] sm:$0xff] }
  0x25   : > { %233 = vst [vmem:[%s4836_s26 + $0x140] sm:$0xff] %v232_v40  ;;  %235 = vst [vmem:[%s4836_s26 + $0x148] sm:$0xff] %v234_v41  ;;  %v238_v43 = vld [vmem:[%s4831_s25 + $0x288] sm:$0xff]  ;;  %v240_v44 = vld [vmem:[%s4831_s25 + $0x290] sm:$0xff] }
  0x26   : > { %237 = vst [vmem:[%s4836_s26 + $0x150] sm:$0xff] %v236_v42  ;;  %239 = vst [vmem:[%s4836_s26 + $0x158] sm:$0xff] %v238_v43  ;;  %v242_v45 = vld [vmem:[%s4831_s25 + $0x298] sm:$0xff]  ;;  %v244_v46 = vld [vmem:[%s4831_s25 + $0x2a0] sm:$0xff] }
  0x27   : > { %241 = vst [vmem:[%s4836_s26 + $0x160] sm:$0xff] %v240_v44  ;;  %v246_v47 = vld [vmem:[%s4831_s25 + $0x2a8] sm:$0xff]  ;;  %243 = vst [vmem:[%s4836_s26 + $0x168] sm:$0xff] %v242_v45  ;;  %v248_v48 = vld [vmem:[%s4831_s25 + $0x2b0] sm:$0xff] }
  0x28   : > { %245 = vst [vmem:[%s4836_s26 + $0x170] sm:$0xff] %v244_v46  ;;  %247 = vst [vmem:[%s4836_s26 + $0x178] sm:$0xff] %v246_v47  ;;  %v250_v49 = vld [vmem:[%s4831_s25 + $0x2b8] sm:$0xff]  ;;  %v252_v50 = vld [vmem:[%s4831_s25 + $0x2c0] sm:$0xff] }
  0x29   : > { %249 = vst [vmem:[%s4836_s26 + $0x180] sm:$0xff] %v248_v48  ;;  %251 = vst [vmem:[%s4836_s26 + $0x188] sm:$0xff] %v250_v49  ;;  %v254_v51 = vld [vmem:[%s4831_s25 + $0x2c8] sm:$0xff]  ;;  %v256_v52 = vld [vmem:[%s4831_s25 + $0x2d0] sm:$0xff] }
  0x2a   : > { %253 = vst [vmem:[%s4836_s26 + $0x190] sm:$0xff] %v252_v50  ;;  %v258_v53 = vld [vmem:[%s4831_s25 + $0x2d8] sm:$0xff]  ;;  %255 = vst [vmem:[%s4836_s26 + $0x198] sm:$0xff] %v254_v51  ;;  %v260_v54 = vld [vmem:[%s4831_s25 + $0x2e0] sm:$0xff] }
  0x2b   : > { %257 = vst [vmem:[%s4836_s26 + $0x1a0] sm:$0xff] %v256_v52  ;;  %259 = vst [vmem:[%s4836_s26 + $0x1a8] sm:$0xff] %v258_v53  ;;  %v262_v55 = vld [vmem:[%s4831_s25 + $0x2e8] sm:$0xff]  ;;  %v264_v56 = vld [vmem:[%s4831_s25 + $0x2f0] sm:$0xff] }
  0x2c   : > { %261 = vst [vmem:[%s4836_s26 + $0x1b0] sm:$0xff] %v260_v54  ;;  %263 = vst [vmem:[%s4836_s26 + $0x1b8] sm:$0xff] %v262_v55  ;;  %v266_v57 = vld [vmem:[%s4831_s25 + $0x390] sm:$0xff]  ;;  %v268_v58 = vld [vmem:[%s4831_s25 + $0x398] sm:$0xff] }
  0x2d   : > { %265 = vst [vmem:[%s4836_s26 + $0x1c0] sm:$0xff] %v264_v56  ;;  %v270_v59 = vld [vmem:[%s4831_s25 + $0x3a0] sm:$0xff]  ;;  %267 = vst [vmem:[%s4836_s26 + $0x1c8] sm:$0xff] %v266_v57  ;;  %v272_v60 = vld [vmem:[%s4831_s25 + $0x3a8] sm:$0xff] }
  0x2e   : > { %269 = vst [vmem:[%s4836_s26 + $0x1d0] sm:$0xff] %v268_v58  ;;  %271 = vst [vmem:[%s4836_s26 + $0x1d8] sm:$0xff] %v270_v59  ;;  %v274_v61 = vld [vmem:[%s4831_s25 + $0x3b0] sm:$0xff]  ;;  %v276_v62 = vld [vmem:[%s4831_s25 + $0x3b8] sm:$0xff] }
  0x2f   : > { %273 = vst [vmem:[%s4836_s26 + $0x1e0] sm:$0xff] %v272_v60  ;;  %275 = vst [vmem:[%s4836_s26 + $0x1e8] sm:$0xff] %v274_v61  ;;  %v278_v63 = vld [vmem:[%s4831_s25 + $0x3c0] sm:$0xff]  ;;  %v280_v0 = vld [vmem:[%s4831_s25 + $0x3c8] sm:$0xff] }
  0x30   : > { %277 = vst [vmem:[%s4836_s26 + $0x1f0] sm:$0xff] %v276_v62  ;;  %v282_v1 = vld [vmem:[%s4831_s25 + $0x3d0] sm:$0xff]  ;;  %279 = vst [vmem:[%s4836_s26 + $0x1f8] sm:$0xff] %v278_v63  ;;  %v284_v2 = vld [vmem:[%s4831_s25 + $0x3d8] sm:$0xff] }
  0x31   : > { %281 = vst [vmem:[%s4836_s26 + $0x200] sm:$0xff] %v280_v0  ;;  %283 = vst [vmem:[%s4836_s26 + $0x208] sm:$0xff] %v282_v1  ;;  %v286_v3 = vld [vmem:[%s4831_s25 + $0x3e0] sm:$0xff]  ;;  %v288_v4 = vld [vmem:[%s4831_s25 + $0x3e8] sm:$0xff] }
  0x32   : > { %285 = vst [vmem:[%s4836_s26 + $0x210] sm:$0xff] %v284_v2  ;;  %287 = vst [vmem:[%s4836_s26 + $0x218] sm:$0xff] %v286_v3  ;;  %v290_v5 = vld [vmem:[%s4831_s25 + $0x3f0] sm:$0xff]  ;;  %v292_v6 = vld [vmem:[%s4831_s25 + $0x3f8] sm:$0xff] }
  0x33   : > { %289 = vst [vmem:[%s4836_s26 + $0x220] sm:$0xff] %v288_v4  ;;  %v294_v7 = vld [vmem:[%s4831_s25 + $0x400] sm:$0xff]  ;;  %291 = vst [vmem:[%s4836_s26 + $0x228] sm:$0xff] %v290_v5  ;;  %v296_v8 = vld [vmem:[%s4831_s25 + $0x408] sm:$0xff] }
  0x34   : > { %293 = vst [vmem:[%s4836_s26 + $0x230] sm:$0xff] %v292_v6  ;;  %295 = vst [vmem:[%s4836_s26 + $0x238] sm:$0xff] %v294_v7  ;;  %v298_v9 = vld [vmem:[%s4831_s25 + $0x410] sm:$0xff]  ;;  %v300_v10 = vld [vmem:[%s4831_s25 + $0x418] sm:$0xff] }
  0x35   : > { %297 = vst [vmem:[%s4836_s26 + $0x240] sm:$0xff] %v296_v8  ;;  %299 = vst [vmem:[%s4836_s26 + $0x248] sm:$0xff] %v298_v9  ;;  %v302_v11 = vld [vmem:[%s4831_s25 + $0x420] sm:$0xff]  ;;  %v306_v13 = vld [vmem:[%s4831_s25 + $0x4c8] sm:$0xff] }
  0x36   : > { %301 = vst [vmem:[%s4836_s26 + $0x250] sm:$0xff] %v300_v10  ;;  %v304_v12 = vld [vmem:[%s4831_s25 + $0x4c0] sm:$0xff]  ;;  %303 = vst [vmem:[%s4836_s26 + $0x258] sm:$0xff] %v302_v11  ;;  %v308_v14 = vld [vmem:[%s4831_s25 + $0x4d0] sm:$0xff] }
  0x37   : > { %305 = vst [vmem:[%s4836_s26 + $0x260] sm:$0xff] %v304_v12  ;;  %307 = vst [vmem:[%s4836_s26 + $0x268] sm:$0xff] %v306_v13  ;;  %v310_v15 = vld [vmem:[%s4831_s25 + $0x4d8] sm:$0xff]  ;;  %v312_v16 = vld [vmem:[%s4831_s25 + $0x4e0] sm:$0xff] }
  0x38   : > { %309 = vst [vmem:[%s4836_s26 + $0x270] sm:$0xff] %v308_v14  ;;  %311 = vst [vmem:[%s4836_s26 + $0x278] sm:$0xff] %v310_v15  ;;  %v314_v17 = vld [vmem:[%s4831_s25 + $0x4e8] sm:$0xff]  ;;  %v316_v18 = vld [vmem:[%s4831_s25 + $0x4f0] sm:$0xff] }
  0x39   : > { %313 = vst [vmem:[%s4836_s26 + $0x280] sm:$0xff] %v312_v16  ;;  %v318_v19 = vld [vmem:[%s4831_s25 + $0x4f8] sm:$0xff]  ;;  %315 = vst [vmem:[%s4836_s26 + $0x288] sm:$0xff] %v314_v17  ;;  %v320_v20 = vld [vmem:[%s4831_s25 + $0x500] sm:$0xff] }
  0x3a   : > { %317 = vst [vmem:[%s4836_s26 + $0x290] sm:$0xff] %v316_v18  ;;  %319 = vst [vmem:[%s4836_s26 + $0x298] sm:$0xff] %v318_v19  ;;  %v322_v21 = vld [vmem:[%s4831_s25 + $0x508] sm:$0xff]  ;;  %v324_v22 = vld [vmem:[%s4831_s25 + $0x510] sm:$0xff] }
  0x3b   : > { %321 = vst [vmem:[%s4836_s26 + $0x2a0] sm:$0xff] %v320_v20  ;;  %323 = vst [vmem:[%s4836_s26 + $0x2a8] sm:$0xff] %v322_v21  ;;  %v326_v23 = vld [vmem:[%s4831_s25 + $0x518] sm:$0xff]  ;;  %v328_v24 = vld [vmem:[%s4831_s25 + $0x520] sm:$0xff] }
  0x3c   : > { %325 = vst [vmem:[%s4836_s26 + $0x2b0] sm:$0xff] %v324_v22  ;;  %v330_v25 = vld [vmem:[%s4831_s25 + $0x528] sm:$0xff]  ;;  %327 = vst [vmem:[%s4836_s26 + $0x2b8] sm:$0xff] %v326_v23  ;;  %v332_v26 = vld [vmem:[%s4831_s25 + $0x530] sm:$0xff] }
  0x3d   : > { %329 = vst [vmem:[%s4836_s26 + $0x2c0] sm:$0xff] %v328_v24  ;;  %331 = vst [vmem:[%s4836_s26 + $0x2c8] sm:$0xff] %v330_v25  ;;  %v334_v27 = vld [vmem:[%s4831_s25 + $0x538] sm:$0xff]  ;;  %v336_v28 = vld [vmem:[%s4831_s25 + $0x540] sm:$0xff] }
  0x3e   : > { %333 = vst [vmem:[%s4836_s26 + $0x2d0] sm:$0xff] %v332_v26  ;;  %335 = vst [vmem:[%s4836_s26 + $0x2d8] sm:$0xff] %v334_v27  ;;  %v338_v29 = vld [vmem:[%s4831_s25 + $0x548] sm:$0xff]  ;;  %v340_v30 = vld [vmem:[%s4831_s25 + $0x550] sm:$0xff] }
  0x3f   : > { %337 = vst [vmem:[%s4836_s26 + $0x2e0] sm:$0xff] %v336_v28  ;;  %v342_v31 = vld [vmem:[%s4831_s25 + $0x5f0] sm:$0xff]  ;;  %339 = vst [vmem:[%s4836_s26 + $0x2e8] sm:$0xff] %v338_v29  ;;  %v344_v32 = vld [vmem:[%s4831_s25 + $0x5f8] sm:$0xff] }
  0x40   : > { %341 = vst [vmem:[%s4836_s26 + $0x2f0] sm:$0xff] %v340_v30  ;;  %343 = vst [vmem:[%s4836_s26 + $0x2f8] sm:$0xff] %v342_v31  ;;  %v346_v33 = vld [vmem:[%s4831_s25 + $0x600] sm:$0xff]  ;;  %v348_v34 = vld [vmem:[%s4831_s25 + $0x608] sm:$0xff] }
  0x41   : > { %345 = vst [vmem:[%s4836_s26 + $0x300] sm:$0xff] %v344_v32  ;;  %347 = vst [vmem:[%s4836_s26 + $0x308] sm:$0xff] %v346_v33  ;;  %v350_v35 = vld [vmem:[%s4831_s25 + $0x610] sm:$0xff]  ;;  %v352_v36 = vld [vmem:[%s4831_s25 + $0x618] sm:$0xff] }
  0x42   : > { %349 = vst [vmem:[%s4836_s26 + $0x310] sm:$0xff] %v348_v34  ;;  %v354_v37 = vld [vmem:[%s4831_s25 + $0x620] sm:$0xff]  ;;  %351 = vst [vmem:[%s4836_s26 + $0x318] sm:$0xff] %v350_v35  ;;  %v356_v38 = vld [vmem:[%s4831_s25 + $0x628] sm:$0xff] }
  0x43   : > { %353 = vst [vmem:[%s4836_s26 + $0x320] sm:$0xff] %v352_v36  ;;  %355 = vst [vmem:[%s4836_s26 + $0x328] sm:$0xff] %v354_v37  ;;  %v358_v39 = vld [vmem:[%s4831_s25 + $0x630] sm:$0xff]  ;;  %v360_v40 = vld [vmem:[%s4831_s25 + $0x638] sm:$0xff] }
  0x44   : > { %357 = vst [vmem:[%s4836_s26 + $0x330] sm:$0xff] %v356_v38  ;;  %359 = vst [vmem:[%s4836_s26 + $0x338] sm:$0xff] %v358_v39  ;;  %v362_v41 = vld [vmem:[%s4831_s25 + $0x640] sm:$0xff]  ;;  %v364_v42 = vld [vmem:[%s4831_s25 + $0x648] sm:$0xff] }
  0x45   : > { %361 = vst [vmem:[%s4836_s26 + $0x340] sm:$0xff] %v360_v40  ;;  %v366_v43 = vld [vmem:[%s4831_s25 + $0x650] sm:$0xff]  ;;  %363 = vst [vmem:[%s4836_s26 + $0x348] sm:$0xff] %v362_v41  ;;  %v368_v44 = vld [vmem:[%s4831_s25 + $0x658] sm:$0xff] }
  0x46   : > { %365 = vst [vmem:[%s4836_s26 + $0x350] sm:$0xff] %v364_v42  ;;  %367 = vst [vmem:[%s4836_s26 + $0x358] sm:$0xff] %v366_v43  ;;  %v370_v45 = vld [vmem:[%s4831_s25 + $0x660] sm:$0xff]  ;;  %v372_v46 = vld [vmem:[%s4831_s25 + $0x668] sm:$0xff] }
  0x47   : > { %369 = vst [vmem:[%s4836_s26 + $0x360] sm:$0xff] %v368_v44  ;;  %371 = vst [vmem:[%s4836_s26 + $0x368] sm:$0xff] %v370_v45  ;;  %v374_v47 = vld [vmem:[%s4831_s25 + $0x670] sm:$0xff]  ;;  %v376_v48 = vld [vmem:[%s4831_s25 + $0x678] sm:$0xff] }
  0x48   : > { %373 = vst [vmem:[%s4836_s26 + $0x370] sm:$0xff] %v372_v46  ;;  %v378_v49 = vld [vmem:[%s4831_s25 + $0x680] sm:$0xff]  ;;  %375 = vst [vmem:[%s4836_s26 + $0x378] sm:$0xff] %v374_v47  ;;  %v382_v51 = vld [vmem:[%s4831_s25 + $0x728] sm:$0xff] }
  0x49   : > { %377 = vst [vmem:[%s4836_s26 + $0x380] sm:$0xff] %v376_v48  ;;  %379 = vst [vmem:[%s4836_s26 + $0x388] sm:$0xff] %v378_v49  ;;  %v380_v50 = vld [vmem:[%s4831_s25 + $0x720] sm:$0xff]  ;;  %v384_v52 = vld [vmem:[%s4831_s25 + $0x730] sm:$0xff] }
  0x4a   : > { %381 = vst [vmem:[%s4836_s26 + $0x390] sm:$0xff] %v380_v50  ;;  %383 = vst [vmem:[%s4836_s26 + $0x398] sm:$0xff] %v382_v51  ;;  %v386_v53 = vld [vmem:[%s4831_s25 + $0x738] sm:$0xff]  ;;  %v388_v54 = vld [vmem:[%s4831_s25 + $0x740] sm:$0xff] }
  0x4b   : > { %385 = vst [vmem:[%s4836_s26 + $0x3a0] sm:$0xff] %v384_v52  ;;  %v390_v55 = vld [vmem:[%s4831_s25 + $0x748] sm:$0xff]  ;;  %387 = vst [vmem:[%s4836_s26 + $0x3a8] sm:$0xff] %v386_v53  ;;  %v392_v56 = vld [vmem:[%s4831_s25 + $0x750] sm:$0xff] }
  0x4c   : > { %389 = vst [vmem:[%s4836_s26 + $0x3b0] sm:$0xff] %v388_v54  ;;  %391 = vst [vmem:[%s4836_s26 + $0x3b8] sm:$0xff] %v390_v55  ;;  %v394_v57 = vld [vmem:[%s4831_s25 + $0x758] sm:$0xff]  ;;  %v396_v58 = vld [vmem:[%s4831_s25 + $0x760] sm:$0xff] }
  0x4d   : > { %393 = vst [vmem:[%s4836_s26 + $0x3c0] sm:$0xff] %v392_v56  ;;  %395 = vst [vmem:[%s4836_s26 + $0x3c8] sm:$0xff] %v394_v57  ;;  %v398_v59 = vld [vmem:[%s4831_s25 + $0x768] sm:$0xff]  ;;  %v400_v60 = vld [vmem:[%s4831_s25 + $0x770] sm:$0xff] }
  0x4e   : > { %397 = vst [vmem:[%s4836_s26 + $0x3d0] sm:$0xff] %v396_v58  ;;  %v402_v61 = vld [vmem:[%s4831_s25 + $0x778] sm:$0xff]  ;;  %399 = vst [vmem:[%s4836_s26 + $0x3d8] sm:$0xff] %v398_v59  ;;  %v404_v62 = vld [vmem:[%s4831_s25 + $0x780] sm:$0xff] }
  0x4f   : > { %401 = vst [vmem:[%s4836_s26 + $0x3e0] sm:$0xff] %v400_v60  ;;  %403 = vst [vmem:[%s4836_s26 + $0x3e8] sm:$0xff] %v402_v61  ;;  %v406_v63 = vld [vmem:[%s4831_s25 + $0x788] sm:$0xff]  ;;  %v408_v0 = vld [vmem:[%s4831_s25 + $0x790] sm:$0xff] }
  0x50   : > { %405 = vst [vmem:[%s4836_s26 + $0x3f0] sm:$0xff] %v404_v62  ;;  %407 = vst [vmem:[%s4836_s26 + $0x3f8] sm:$0xff] %v406_v63  ;;  %v410_v1 = vld [vmem:[%s4831_s25 + $0x798] sm:$0xff]  ;;  %v412_v2 = vld [vmem:[%s4831_s25 + $0x7a0] sm:$0xff] }
  0x51   : > { %409 = vst [vmem:[%s4836_s26 + $0x400] sm:$0xff] %v408_v0  ;;  %v414_v3 = vld [vmem:[%s4831_s25 + $0x7a8] sm:$0xff]  ;;  %411 = vst [vmem:[%s4836_s26 + $0x408] sm:$0xff] %v410_v1  ;;  %v416_v4 = vld [vmem:[%s4831_s25 + $0x7b0] sm:$0xff] }
  0x52   : > { %413 = vst [vmem:[%s4836_s26 + $0x410] sm:$0xff] %v412_v2  ;;  %415 = vst [vmem:[%s4836_s26 + $0x418] sm:$0xff] %v414_v3  ;;  %v418_v5 = vld [vmem:[%s4831_s25 + $0x850] sm:$0xff]  ;;  %v420_v6 = vld [vmem:[%s4831_s25 + $0x858] sm:$0xff] }
  0x53   : > { %417 = vst [vmem:[%s4836_s26 + $0x420] sm:$0xff] %v416_v4  ;;  %419 = vst [vmem:[%s4836_s26 + $0x428] sm:$0xff] %v418_v5  ;;  %v422_v7 = vld [vmem:[%s4831_s25 + $0x860] sm:$0xff]  ;;  %v424_v8 = vld [vmem:[%s4831_s25 + $0x868] sm:$0xff] }
  0x54   : > { %421 = vst [vmem:[%s4836_s26 + $0x430] sm:$0xff] %v420_v6  ;;  %v426_v9 = vld [vmem:[%s4831_s25 + $0x870] sm:$0xff]  ;;  %423 = vst [vmem:[%s4836_s26 + $0x438] sm:$0xff] %v422_v7  ;;  %v428_v10 = vld [vmem:[%s4831_s25 + $0x878] sm:$0xff] }
  0x55   : > { %425 = vst [vmem:[%s4836_s26 + $0x440] sm:$0xff] %v424_v8  ;;  %427 = vst [vmem:[%s4836_s26 + $0x448] sm:$0xff] %v426_v9  ;;  %v430_v11 = vld [vmem:[%s4831_s25 + $0x880] sm:$0xff]  ;;  %v432_v12 = vld [vmem:[%s4831_s25 + $0x888] sm:$0xff] }
  0x56   : > { %429 = vst [vmem:[%s4836_s26 + $0x450] sm:$0xff] %v428_v10  ;;  %431 = vst [vmem:[%s4836_s26 + $0x458] sm:$0xff] %v430_v11  ;;  %v434_v13 = vld [vmem:[%s4831_s25 + $0x890] sm:$0xff]  ;;  %v436_v14 = vld [vmem:[%s4831_s25 + $0x898] sm:$0xff] }
  0x57   : > { %433 = vst [vmem:[%s4836_s26 + $0x460] sm:$0xff] %v432_v12  ;;  %v438_v15 = vld [vmem:[%s4831_s25 + $0x8a0] sm:$0xff]  ;;  %435 = vst [vmem:[%s4836_s26 + $0x468] sm:$0xff] %v434_v13  ;;  %v440_v16 = vld [vmem:[%s4831_s25 + $0x8a8] sm:$0xff] }
  0x58   : > { %437 = vst [vmem:[%s4836_s26 + $0x470] sm:$0xff] %v436_v14  ;;  %439 = vst [vmem:[%s4836_s26 + $0x478] sm:$0xff] %v438_v15  ;;  %v442_v17 = vld [vmem:[%s4831_s25 + $0x8b0] sm:$0xff]  ;;  %v444_v18 = vld [vmem:[%s4831_s25 + $0x8b8] sm:$0xff] }
  0x59   : > { %441 = vst [vmem:[%s4836_s26 + $0x480] sm:$0xff] %v440_v16  ;;  %443 = vst [vmem:[%s4836_s26 + $0x488] sm:$0xff] %v442_v17  ;;  %v446_v19 = vld [vmem:[%s4831_s25 + $0x8c0] sm:$0xff]  ;;  %v448_v20 = vld [vmem:[%s4831_s25 + $0x8c8] sm:$0xff] }
  0x5a   : > { %445 = vst [vmem:[%s4836_s26 + $0x490] sm:$0xff] %v444_v18  ;;  %v450_v21 = vld [vmem:[%s4831_s25 + $0x8d0] sm:$0xff]  ;;  %447 = vst [vmem:[%s4836_s26 + $0x498] sm:$0xff] %v446_v19  ;;  %v452_v22 = vld [vmem:[%s4831_s25 + $0x8d8] sm:$0xff] }
  0x5b   : > { %449 = vst [vmem:[%s4836_s26 + $0x4a0] sm:$0xff] %v448_v20  ;;  %451 = vst [vmem:[%s4836_s26 + $0x4a8] sm:$0xff] %v450_v21  ;;  %v454_v23 = vld [vmem:[%s4831_s25 + $0x8e0] sm:$0xff]  ;;  %v458_v25 = vld [vmem:[%s4831_s25 + $0x988] sm:$0xff] }
  0x5c   : > { %v456_v24 = vld [vmem:[%s4831_s25 + $0x980] sm:$0xff]  ;;  %453 = vst [vmem:[%s4836_s26 + $0x4b0] sm:$0xff] %v452_v22  ;;  %455 = vst [vmem:[%s4836_s26 + $0x4b8] sm:$0xff] %v454_v23  ;;  %v460_v26 = vld [vmem:[%s4831_s25 + $0x990] sm:$0xff] }
  0x5d   : > { %457 = vst [vmem:[%s4836_s26 + $0x4c0] sm:$0xff] %v456_v24  ;;  %v462_v27 = vld [vmem:[%s4831_s25 + $0x998] sm:$0xff]  ;;  %459 = vst [vmem:[%s4836_s26 + $0x4c8] sm:$0xff] %v458_v25  ;;  %v464_v28 = vld [vmem:[%s4831_s25 + $0x9a0] sm:$0xff] }
  0x5e   : > { %461 = vst [vmem:[%s4836_s26 + $0x4d0] sm:$0xff] %v460_v26  ;;  %463 = vst [vmem:[%s4836_s26 + $0x4d8] sm:$0xff] %v462_v27  ;;  %v466_v29 = vld [vmem:[%s4831_s25 + $0x9a8] sm:$0xff]  ;;  %v468_v30 = vld [vmem:[%s4831_s25 + $0x9b0] sm:$0xff] }
  0x5f   : > { %465 = vst [vmem:[%s4836_s26 + $0x4e0] sm:$0xff] %v464_v28  ;;  %467 = vst [vmem:[%s4836_s26 + $0x4e8] sm:$0xff] %v466_v29  ;;  %v470_v31 = vld [vmem:[%s4831_s25 + $0x9b8] sm:$0xff]  ;;  %v472_v32 = vld [vmem:[%s4831_s25 + $0x9c0] sm:$0xff] }
  0x60   : > { %469 = vst [vmem:[%s4836_s26 + $0x4f0] sm:$0xff] %v468_v30  ;;  %v474_v33 = vld [vmem:[%s4831_s25 + $0x9c8] sm:$0xff]  ;;  %471 = vst [vmem:[%s4836_s26 + $0x4f8] sm:$0xff] %v470_v31  ;;  %v476_v34 = vld [vmem:[%s4831_s25 + $0x9d0] sm:$0xff] }
  0x61   : > { %473 = vst [vmem:[%s4836_s26 + $0x500] sm:$0xff] %v472_v32  ;;  %475 = vst [vmem:[%s4836_s26 + $0x508] sm:$0xff] %v474_v33  ;;  %v478_v35 = vld [vmem:[%s4831_s25 + $0x9d8] sm:$0xff]  ;;  %v480_v36 = vld [vmem:[%s4831_s25 + $0x9e0] sm:$0xff] }
  0x62   : > { %477 = vst [vmem:[%s4836_s26 + $0x510] sm:$0xff] %v476_v34  ;;  %479 = vst [vmem:[%s4836_s26 + $0x518] sm:$0xff] %v478_v35  ;;  %v482_v37 = vld [vmem:[%s4831_s25 + $0x9e8] sm:$0xff]  ;;  %v484_v38 = vld [vmem:[%s4831_s25 + $0x9f0] sm:$0xff] }
  0x63   : > { %481 = vst [vmem:[%s4836_s26 + $0x520] sm:$0xff] %v480_v36  ;;  %v486_v39 = vld [vmem:[%s4831_s25 + $0x9f8] sm:$0xff]  ;;  %483 = vst [vmem:[%s4836_s26 + $0x528] sm:$0xff] %v482_v37  ;;  %v488_v40 = vld [vmem:[%s4831_s25 + $0xa00] sm:$0xff] }
  0x64   : > { %485 = vst [vmem:[%s4836_s26 + $0x530] sm:$0xff] %v484_v38  ;;  %487 = vst [vmem:[%s4836_s26 + $0x538] sm:$0xff] %v486_v39  ;;  %v490_v41 = vld [vmem:[%s4831_s25 + $0xa08] sm:$0xff]  ;;  %v492_v42 = vld [vmem:[%s4831_s25 + $0xa10] sm:$0xff] }
  0x65   : > { %489 = vst [vmem:[%s4836_s26 + $0x540] sm:$0xff] %v488_v40  ;;  %491 = vst [vmem:[%s4836_s26 + $0x548] sm:$0xff] %v490_v41  ;;  %v494_v43 = vld [vmem:[%s4831_s25 + $0xab0] sm:$0xff]  ;;  %v496_v44 = vld [vmem:[%s4831_s25 + $0xab8] sm:$0xff] }
  0x66   : > { %493 = vst [vmem:[%s4836_s26 + $0x550] sm:$0xff] %v492_v42  ;;  %v498_v45 = vld [vmem:[%s4831_s25 + $0xac0] sm:$0xff]  ;;  %495 = vst [vmem:[%s4836_s26 + $0x558] sm:$0xff] %v494_v43  ;;  %v500_v46 = vld [vmem:[%s4831_s25 + $0xac8] sm:$0xff] }
  0x67   : > { %497 = vst [vmem:[%s4836_s26 + $0x560] sm:$0xff] %v496_v44  ;;  %499 = vst [vmem:[%s4836_s26 + $0x568] sm:$0xff] %v498_v45  ;;  %v502_v47 = vld [vmem:[%s4831_s25 + $0xad0] sm:$0xff]  ;;  %v504_v48 = vld [vmem:[%s4831_s25 + $0xad8] sm:$0xff] }
  0x68   : > { %501 = vst [vmem:[%s4836_s26 + $0x570] sm:$0xff] %v500_v46  ;;  %503 = vst [vmem:[%s4836_s26 + $0x578] sm:$0xff] %v502_v47  ;;  %v506_v49 = vld [vmem:[%s4831_s25 + $0xae0] sm:$0xff]  ;;  %v508_v50 = vld [vmem:[%s4831_s25 + $0xae8] sm:$0xff] }
  0x69   : > { %505 = vst [vmem:[%s4836_s26 + $0x580] sm:$0xff] %v504_v48  ;;  %v510_v51 = vld [vmem:[%s4831_s25 + $0xaf0] sm:$0xff]  ;;  %507 = vst [vmem:[%s4836_s26 + $0x588] sm:$0xff] %v506_v49  ;;  %v512_v52 = vld [vmem:[%s4831_s25 + $0xaf8] sm:$0xff] }
  0x6a   : > { %509 = vst [vmem:[%s4836_s26 + $0x590] sm:$0xff] %v508_v50  ;;  %511 = vst [vmem:[%s4836_s26 + $0x598] sm:$0xff] %v510_v51  ;;  %v514_v53 = vld [vmem:[%s4831_s25 + $0xb00] sm:$0xff]  ;;  %v516_v54 = vld [vmem:[%s4831_s25 + $0xb08] sm:$0xff] }
  0x6b   : > { %513 = vst [vmem:[%s4836_s26 + $0x5a0] sm:$0xff] %v512_v52  ;;  %515 = vst [vmem:[%s4836_s26 + $0x5a8] sm:$0xff] %v514_v53  ;;  %v518_v55 = vld [vmem:[%s4831_s25 + $0xb10] sm:$0xff]  ;;  %v520_v56 = vld [vmem:[%s4831_s25 + $0xb18] sm:$0xff] }
  0x6c   : > { %517 = vst [vmem:[%s4836_s26 + $0x5b0] sm:$0xff] %v516_v54  ;;  %v522_v57 = vld [vmem:[%s4831_s25 + $0xb20] sm:$0xff]  ;;  %519 = vst [vmem:[%s4836_s26 + $0x5b8] sm:$0xff] %v518_v55  ;;  %v524_v58 = vld [vmem:[%s4831_s25 + $0xb28] sm:$0xff] }
  0x6d   : > { %521 = vst [vmem:[%s4836_s26 + $0x5c0] sm:$0xff] %v520_v56  ;;  %523 = vst [vmem:[%s4836_s26 + $0x5c8] sm:$0xff] %v522_v57  ;;  %v526_v59 = vld [vmem:[%s4831_s25 + $0xb30] sm:$0xff]  ;;  %v528_v60 = vld [vmem:[%s4831_s25 + $0xb38] sm:$0xff] }
  0x6e   : > { %525 = vst [vmem:[%s4836_s26 + $0x5d0] sm:$0xff] %v524_v58  ;;  %527 = vst [vmem:[%s4836_s26 + $0x5d8] sm:$0xff] %v526_v59  ;;  %v530_v61 = vld [vmem:[%s4831_s25 + $0xb40] sm:$0xff]  ;;  %v534_v63 = vld [vmem:[%s4831_s25 + $0xbe8] sm:$0xff] }
  0x6f   : > { %529 = vst [vmem:[%s4836_s26 + $0x5e0] sm:$0xff] %v528_v60  ;;  %v532_v62 = vld [vmem:[%s4831_s25 + $0xbe0] sm:$0xff]  ;;  %531 = vst [vmem:[%s4836_s26 + $0x5e8] sm:$0xff] %v530_v61  ;;  %v536_v0 = vld [vmem:[%s4831_s25 + $0xbf0] sm:$0xff] }
  0x70   : > { %533 = vst [vmem:[%s4836_s26 + $0x5f0] sm:$0xff] %v532_v62  ;;  %535 = vst [vmem:[%s4836_s26 + $0x5f8] sm:$0xff] %v534_v63  ;;  %v538_v1 = vld [vmem:[%s4831_s25 + $0xbf8] sm:$0xff]  ;;  %v540_v2 = vld [vmem:[%s4831_s25 + $0xc00] sm:$0xff] }
  0x71   : > { %537 = vst [vmem:[%s4836_s26 + $0x600] sm:$0xff] %v536_v0  ;;  %539 = vst [vmem:[%s4836_s26 + $0x608] sm:$0xff] %v538_v1  ;;  %v542_v3 = vld [vmem:[%s4831_s25 + $0xc08] sm:$0xff]  ;;  %v544_v4 = vld [vmem:[%s4831_s25 + $0xc10] sm:$0xff] }
  0x72   : > { %541 = vst [vmem:[%s4836_s26 + $0x610] sm:$0xff] %v540_v2  ;;  %v546_v5 = vld [vmem:[%s4831_s25 + $0xc18] sm:$0xff]  ;;  %543 = vst [vmem:[%s4836_s26 + $0x618] sm:$0xff] %v542_v3  ;;  %v548_v6 = vld [vmem:[%s4831_s25 + $0xc20] sm:$0xff] }
  0x73   : > { %545 = vst [vmem:[%s4836_s26 + $0x620] sm:$0xff] %v544_v4  ;;  %547 = vst [vmem:[%s4836_s26 + $0x628] sm:$0xff] %v546_v5  ;;  %v550_v7 = vld [vmem:[%s4831_s25 + $0xc28] sm:$0xff]  ;;  %v552_v8 = vld [vmem:[%s4831_s25 + $0xc30] sm:$0xff] }
  0x74   : > { %549 = vst [vmem:[%s4836_s26 + $0x630] sm:$0xff] %v548_v6  ;;  %551 = vst [vmem:[%s4836_s26 + $0x638] sm:$0xff] %v550_v7  ;;  %v554_v9 = vld [vmem:[%s4831_s25 + $0xc38] sm:$0xff]  ;;  %v556_v10 = vld [vmem:[%s4831_s25 + $0xc40] sm:$0xff] }
  0x75   : > { %553 = vst [vmem:[%s4836_s26 + $0x640] sm:$0xff] %v552_v8  ;;  %v558_v11 = vld [vmem:[%s4831_s25 + $0xc48] sm:$0xff]  ;;  %555 = vst [vmem:[%s4836_s26 + $0x648] sm:$0xff] %v554_v9  ;;  %v560_v12 = vld [vmem:[%s4831_s25 + $0xc50] sm:$0xff] }
  0x76   : > { %557 = vst [vmem:[%s4836_s26 + $0x650] sm:$0xff] %v556_v10  ;;  %559 = vst [vmem:[%s4836_s26 + $0x658] sm:$0xff] %v558_v11  ;;  %v562_v13 = vld [vmem:[%s4831_s25 + $0xc58] sm:$0xff]  ;;  %v564_v14 = vld [vmem:[%s4831_s25 + $0xc60] sm:$0xff] }
  0x77   : > { %561 = vst [vmem:[%s4836_s26 + $0x660] sm:$0xff] %v560_v12  ;;  %563 = vst [vmem:[%s4836_s26 + $0x668] sm:$0xff] %v562_v13  ;;  %v566_v15 = vld [vmem:[%s4831_s25 + $0xc68] sm:$0xff]  ;;  %v568_v16 = vld [vmem:[%s4831_s25 + $0xc70] sm:$0xff] }
  0x78   : > { %565 = vst [vmem:[%s4836_s26 + $0x670] sm:$0xff] %v564_v14  ;;  %v570_v17 = vld [vmem:[%s4831_s25 + $0xd10] sm:$0xff]  ;;  %567 = vst [vmem:[%s4836_s26 + $0x678] sm:$0xff] %v566_v15  ;;  %v572_v18 = vld [vmem:[%s4831_s25 + $0xd18] sm:$0xff] }
  0x79   : > { %569 = vst [vmem:[%s4836_s26 + $0x680] sm:$0xff] %v568_v16  ;;  %571 = vst [vmem:[%s4836_s26 + $0x688] sm:$0xff] %v570_v17  ;;  %v574_v19 = vld [vmem:[%s4831_s25 + $0xd20] sm:$0xff]  ;;  %v576_v20 = vld [vmem:[%s4831_s25 + $0xd28] sm:$0xff] }
  0x7a   : > { %573 = vst [vmem:[%s4836_s26 + $0x690] sm:$0xff] %v572_v18  ;;  %575 = vst [vmem:[%s4836_s26 + $0x698] sm:$0xff] %v574_v19  ;;  %v578_v21 = vld [vmem:[%s4831_s25 + $0xd30] sm:$0xff]  ;;  %v580_v22 = vld [vmem:[%s4831_s25 + $0xd38] sm:$0xff] }
  0x7b   : > { %577 = vst [vmem:[%s4836_s26 + $0x6a0] sm:$0xff] %v576_v20  ;;  %v582_v23 = vld [vmem:[%s4831_s25 + $0xd40] sm:$0xff]  ;;  %579 = vst [vmem:[%s4836_s26 + $0x6a8] sm:$0xff] %v578_v21  ;;  %v584_v24 = vld [vmem:[%s4831_s25 + $0xd48] sm:$0xff] }
  0x7c   : > { %581 = vst [vmem:[%s4836_s26 + $0x6b0] sm:$0xff] %v580_v22  ;;  %583 = vst [vmem:[%s4836_s26 + $0x6b8] sm:$0xff] %v582_v23  ;;  %v586_v25 = vld [vmem:[%s4831_s25 + $0xd50] sm:$0xff]  ;;  %v588_v26 = vld [vmem:[%s4831_s25 + $0xd58] sm:$0xff] }
  0x7d   : > { %585 = vst [vmem:[%s4836_s26 + $0x6c0] sm:$0xff] %v584_v24  ;;  %587 = vst [vmem:[%s4836_s26 + $0x6c8] sm:$0xff] %v586_v25  ;;  %v590_v27 = vld [vmem:[%s4831_s25 + $0xd60] sm:$0xff]  ;;  %v592_v28 = vld [vmem:[%s4831_s25 + $0xd68] sm:$0xff] }
  0x7e   : > { %589 = vst [vmem:[%s4836_s26 + $0x6d0] sm:$0xff] %v588_v26  ;;  %v594_v29 = vld [vmem:[%s4831_s25 + $0xd70] sm:$0xff]  ;;  %591 = vst [vmem:[%s4836_s26 + $0x6d8] sm:$0xff] %v590_v27  ;;  %v596_v30 = vld [vmem:[%s4831_s25 + $0xd78] sm:$0xff] }
  0x7f   : > { %593 = vst [vmem:[%s4836_s26 + $0x6e0] sm:$0xff] %v592_v28  ;;  %595 = vst [vmem:[%s4836_s26 + $0x6e8] sm:$0xff] %v594_v29  ;;  %v598_v31 = vld [vmem:[%s4831_s25 + $0xd80] sm:$0xff]  ;;  %v600_v32 = vld [vmem:[%s4831_s25 + $0xd88] sm:$0xff] }
  0x80   : > { %597 = vst [vmem:[%s4836_s26 + $0x6f0] sm:$0xff] %v596_v30  ;;  %599 = vst [vmem:[%s4836_s26 + $0x6f8] sm:$0xff] %v598_v31  ;;  %v602_v33 = vld [vmem:[%s4831_s25 + $0xd90] sm:$0xff]  ;;  %v604_v34 = vld [vmem:[%s4831_s25 + $0xd98] sm:$0xff] }
  0x81   : > { %601 = vst [vmem:[%s4836_s26 + $0x700] sm:$0xff] %v600_v32  ;;  %v606_v35 = vld [vmem:[%s4831_s25 + $0xda0] sm:$0xff]  ;;  %603 = vst [vmem:[%s4836_s26 + $0x708] sm:$0xff] %v602_v33  ;;  %v610_v37 = vld [vmem:[%s4831_s25 + $0xe48] sm:$0xff] }
  0x82   : > { %605 = vst [vmem:[%s4836_s26 + $0x710] sm:$0xff] %v604_v34  ;;  %607 = vst [vmem:[%s4836_s26 + $0x718] sm:$0xff] %v606_v35  ;;  %v608_v36 = vld [vmem:[%s4831_s25 + $0xe40] sm:$0xff]  ;;  %v612_v38 = vld [vmem:[%s4831_s25 + $0xe50] sm:$0xff] }
  0x83   : > { %609 = vst [vmem:[%s4836_s26 + $0x720] sm:$0xff] %v608_v36  ;;  %611 = vst [vmem:[%s4836_s26 + $0x728] sm:$0xff] %v610_v37  ;;  %v614_v39 = vld [vmem:[%s4831_s25 + $0xe58] sm:$0xff]  ;;  %v616_v40 = vld [vmem:[%s4831_s25 + $0xe60] sm:$0xff] }
  0x84   : > { %613 = vst [vmem:[%s4836_s26 + $0x730] sm:$0xff] %v612_v38  ;;  %v618_v41 = vld [vmem:[%s4831_s25 + $0xe68] sm:$0xff]  ;;  %615 = vst [vmem:[%s4836_s26 + $0x738] sm:$0xff] %v614_v39  ;;  %v620_v42 = vld [vmem:[%s4831_s25 + $0xe70] sm:$0xff] }
  0x85   : > { %617 = vst [vmem:[%s4836_s26 + $0x740] sm:$0xff] %v616_v40  ;;  %619 = vst [vmem:[%s4836_s26 + $0x748] sm:$0xff] %v618_v41  ;;  %v622_v43 = vld [vmem:[%s4831_s25 + $0xe78] sm:$0xff]  ;;  %v624_v44 = vld [vmem:[%s4831_s25 + $0xe80] sm:$0xff] }
  0x86   : > { %621 = vst [vmem:[%s4836_s26 + $0x750] sm:$0xff] %v620_v42  ;;  %623 = vst [vmem:[%s4836_s26 + $0x758] sm:$0xff] %v622_v43  ;;  %v626_v45 = vld [vmem:[%s4831_s25 + $0xe88] sm:$0xff]  ;;  %v628_v46 = vld [vmem:[%s4831_s25 + $0xe90] sm:$0xff] }
  0x87   : > { %625 = vst [vmem:[%s4836_s26 + $0x760] sm:$0xff] %v624_v44  ;;  %v630_v47 = vld [vmem:[%s4831_s25 + $0xe98] sm:$0xff]  ;;  %627 = vst [vmem:[%s4836_s26 + $0x768] sm:$0xff] %v626_v45  ;;  %v632_v48 = vld [vmem:[%s4831_s25 + $0xea0] sm:$0xff] }
  0x88   : > { %629 = vst [vmem:[%s4836_s26 + $0x770] sm:$0xff] %v628_v46  ;;  %631 = vst [vmem:[%s4836_s26 + $0x778] sm:$0xff] %v630_v47  ;;  %v634_v49 = vld [vmem:[%s4831_s25 + $0xea8] sm:$0xff]  ;;  %v636_v50 = vld [vmem:[%s4831_s25 + $0xeb0] sm:$0xff] }
  0x89   : > { %633 = vst [vmem:[%s4836_s26 + $0x780] sm:$0xff] %v632_v48  ;;  %635 = vst [vmem:[%s4836_s26 + $0x788] sm:$0xff] %v634_v49  ;;  %v638_v51 = vld [vmem:[%s4831_s25 + $0xeb8] sm:$0xff]  ;;  %v640_v52 = vld [vmem:[%s4831_s25 + $0xec0] sm:$0xff] }
  0x8a   : > { %637 = vst [vmem:[%s4836_s26 + $0x790] sm:$0xff] %v636_v50  ;;  %v642_v53 = vld [vmem:[%s4831_s25 + $0xec8] sm:$0xff]  ;;  %639 = vst [vmem:[%s4836_s26 + $0x798] sm:$0xff] %v638_v51  ;;  %v644_v54 = vld [vmem:[%s4831_s25 + $0xed0] sm:$0xff] }
  0x8b   : > { %641 = vst [vmem:[%s4836_s26 + $0x7a0] sm:$0xff] %v640_v52  ;;  %643 = vst [vmem:[%s4836_s26 + $0x7a8] sm:$0xff] %v642_v53  ;;  %v646_v55 = vld [vmem:[%s4831_s25 + $0xf70] sm:$0xff]  ;;  %v648_v56 = vld [vmem:[%s4831_s25 + $0xf78] sm:$0xff] }
  0x8c   : > { %645 = vst [vmem:[%s4836_s26 + $0x7b0] sm:$0xff] %v644_v54  ;;  %647 = vst [vmem:[%s4836_s26 + $0x7b8] sm:$0xff] %v646_v55  ;;  %v650_v57 = vld [vmem:[%s4831_s25 + $0xf80] sm:$0xff]  ;;  %v652_v58 = vld [vmem:[%s4831_s25 + $0xf88] sm:$0xff] }
  0x8d   : > { %649 = vst [vmem:[%s4836_s26 + $0x7c0] sm:$0xff] %v648_v56  ;;  %v654_v59 = vld [vmem:[%s4831_s25 + $0xf90] sm:$0xff]  ;;  %651 = vst [vmem:[%s4836_s26 + $0x7c8] sm:$0xff] %v650_v57  ;;  %v656_v60 = vld [vmem:[%s4831_s25 + $0xf98] sm:$0xff] }
  0x8e   : > { %653 = vst [vmem:[%s4836_s26 + $0x7d0] sm:$0xff] %v652_v58  ;;  %655 = vst [vmem:[%s4836_s26 + $0x7d8] sm:$0xff] %v654_v59  ;;  %v658_v61 = vld [vmem:[%s4831_s25 + $0xfa0] sm:$0xff]  ;;  %v660_v62 = vld [vmem:[%s4831_s25 + $0xfa8] sm:$0xff] }
  0x8f   : > { %657 = vst [vmem:[%s4836_s26 + $0x7e0] sm:$0xff] %v656_v60  ;;  %659 = vst [vmem:[%s4836_s26 + $0x7e8] sm:$0xff] %v658_v61  ;;  %v662_v63 = vld [vmem:[%s4831_s25 + $0xfb0] sm:$0xff]  ;;  %v664_v0 = vld [vmem:[%s4831_s25 + $0xfb8] sm:$0xff] }
  0x90   : > { %661 = vst [vmem:[%s4836_s26 + $0x7f0] sm:$0xff] %v660_v62  ;;  %v666_v1 = vld [vmem:[%s4831_s25 + $0xfc0] sm:$0xff]  ;;  %663 = vst [vmem:[%s4836_s26 + $0x7f8] sm:$0xff] %v662_v63  ;;  %v668_v2 = vld [vmem:[%s4831_s25 + $0xfc8] sm:$0xff] }
  0x91   : > { %665 = vst [vmem:[%s4836_s26 + $0x800] sm:$0xff] %v664_v0  ;;  %667 = vst [vmem:[%s4836_s26 + $0x808] sm:$0xff] %v666_v1  ;;  %v670_v3 = vld [vmem:[%s4831_s25 + $0xfd0] sm:$0xff]  ;;  %v672_v4 = vld [vmem:[%s4831_s25 + $0xfd8] sm:$0xff] }
  0x92   : > { %669 = vst [vmem:[%s4836_s26 + $0x810] sm:$0xff] %v668_v2  ;;  %671 = vst [vmem:[%s4836_s26 + $0x818] sm:$0xff] %v670_v3  ;;  %v674_v5 = vld [vmem:[%s4831_s25 + $0xfe0] sm:$0xff]  ;;  %v676_v6 = vld [vmem:[%s4831_s25 + $0xfe8] sm:$0xff] }
  0x93   : > { %673 = vst [vmem:[%s4836_s26 + $0x820] sm:$0xff] %v672_v4  ;;  %v678_v7 = vld [vmem:[%s4831_s25 + $0xff0] sm:$0xff]  ;;  %675 = vst [vmem:[%s4836_s26 + $0x828] sm:$0xff] %v674_v5  ;;  %v680_v8 = vld [vmem:[%s4831_s25 + $0xff8] sm:$0xff] }
  0x94   : > { %677 = vst [vmem:[%s4836_s26 + $0x830] sm:$0xff] %v676_v6  ;;  %679 = vst [vmem:[%s4836_s26 + $0x838] sm:$0xff] %v678_v7  ;;  %v682_v9 = vld [vmem:[%s4831_s25 + $0x1000] sm:$0xff]  ;;  %v686_v11 = vld [vmem:[%s4831_s25 + $0x10a8] sm:$0xff] }
  0x95   : > { %v684_v10 = vld [vmem:[%s4831_s25 + $0x10a0] sm:$0xff]  ;;  %681 = vst [vmem:[%s4836_s26 + $0x840] sm:$0xff] %v680_v8  ;;  %683 = vst [vmem:[%s4836_s26 + $0x848] sm:$0xff] %v682_v9  ;;  %v688_v12 = vld [vmem:[%s4831_s25 + $0x10b0] sm:$0xff] }
  0x96   : > { %685 = vst [vmem:[%s4836_s26 + $0x850] sm:$0xff] %v684_v10  ;;  %v690_v13 = vld [vmem:[%s4831_s25 + $0x10b8] sm:$0xff]  ;;  %687 = vst [vmem:[%s4836_s26 + $0x858] sm:$0xff] %v686_v11  ;;  %v692_v14 = vld [vmem:[%s4831_s25 + $0x10c0] sm:$0xff] }
  0x97   : > { %689 = vst [vmem:[%s4836_s26 + $0x860] sm:$0xff] %v688_v12  ;;  %691 = vst [vmem:[%s4836_s26 + $0x868] sm:$0xff] %v690_v13  ;;  %v694_v15 = vld [vmem:[%s4831_s25 + $0x10c8] sm:$0xff]  ;;  %v696_v16 = vld [vmem:[%s4831_s25 + $0x10d0] sm:$0xff] }
  0x98   : > { %693 = vst [vmem:[%s4836_s26 + $0x870] sm:$0xff] %v692_v14  ;;  %695 = vst [vmem:[%s4836_s26 + $0x878] sm:$0xff] %v694_v15  ;;  %v698_v17 = vld [vmem:[%s4831_s25 + $0x10d8] sm:$0xff]  ;;  %v700_v18 = vld [vmem:[%s4831_s25 + $0x10e0] sm:$0xff] }
  0x99   : > { %697 = vst [vmem:[%s4836_s26 + $0x880] sm:$0xff] %v696_v16  ;;  %v702_v19 = vld [vmem:[%s4831_s25 + $0x10e8] sm:$0xff]  ;;  %699 = vst [vmem:[%s4836_s26 + $0x888] sm:$0xff] %v698_v17  ;;  %v704_v20 = vld [vmem:[%s4831_s25 + $0x10f0] sm:$0xff] }
  0x9a   : > { %701 = vst [vmem:[%s4836_s26 + $0x890] sm:$0xff] %v700_v18  ;;  %703 = vst [vmem:[%s4836_s26 + $0x898] sm:$0xff] %v702_v19  ;;  %v706_v21 = vld [vmem:[%s4831_s25 + $0x10f8] sm:$0xff]  ;;  %v708_v22 = vld [vmem:[%s4831_s25 + $0x1100] sm:$0xff] }
  0x9b   : > { %705 = vst [vmem:[%s4836_s26 + $0x8a0] sm:$0xff] %v704_v20  ;;  %707 = vst [vmem:[%s4836_s26 + $0x8a8] sm:$0xff] %v706_v21  ;;  %v710_v23 = vld [vmem:[%s4831_s25 + $0x1108] sm:$0xff]  ;;  %v712_v24 = vld [vmem:[%s4831_s25 + $0x1110] sm:$0xff] }
  0x9c   : > { %709 = vst [vmem:[%s4836_s26 + $0x8b0] sm:$0xff] %v708_v22  ;;  %v714_v25 = vld [vmem:[%s4831_s25 + $0x1118] sm:$0xff]  ;;  %711 = vst [vmem:[%s4836_s26 + $0x8b8] sm:$0xff] %v710_v23  ;;  %v716_v26 = vld [vmem:[%s4831_s25 + $0x1120] sm:$0xff] }
  0x9d   : > { %713 = vst [vmem:[%s4836_s26 + $0x8c0] sm:$0xff] %v712_v24  ;;  %715 = vst [vmem:[%s4836_s26 + $0x8c8] sm:$0xff] %v714_v25  ;;  %v718_v27 = vld [vmem:[%s4831_s25 + $0x1128] sm:$0xff]  ;;  %v720_v28 = vld [vmem:[%s4831_s25 + $0x1130] sm:$0xff] }
  0x9e   : > { %717 = vst [vmem:[%s4836_s26 + $0x8d0] sm:$0xff] %v716_v26  ;;  %719 = vst [vmem:[%s4836_s26 + $0x8d8] sm:$0xff] %v718_v27  ;;  %v722_v29 = vld [vmem:[%s4831_s25 + $0x11d0] sm:$0xff]  ;;  %v724_v30 = vld [vmem:[%s4831_s25 + $0x11d8] sm:$0xff] }
  0x9f   : > { %721 = vst [vmem:[%s4836_s26 + $0x8e0] sm:$0xff] %v720_v28  ;;  %v726_v31 = vld [vmem:[%s4831_s25 + $0x11e0] sm:$0xff]  ;;  %723 = vst [vmem:[%s4836_s26 + $0x8e8] sm:$0xff] %v722_v29  ;;  %v728_v32 = vld [vmem:[%s4831_s25 + $0x11e8] sm:$0xff] }
  0xa0   : > { %725 = vst [vmem:[%s4836_s26 + $0x8f0] sm:$0xff] %v724_v30  ;;  %727 = vst [vmem:[%s4836_s26 + $0x8f8] sm:$0xff] %v726_v31  ;;  %v730_v33 = vld [vmem:[%s4831_s25 + $0x11f0] sm:$0xff]  ;;  %v732_v34 = vld [vmem:[%s4831_s25 + $0x11f8] sm:$0xff] }
  0xa1   : > { %729 = vst [vmem:[%s4836_s26 + $0x900] sm:$0xff] %v728_v32  ;;  %731 = vst [vmem:[%s4836_s26 + $0x908] sm:$0xff] %v730_v33  ;;  %v734_v35 = vld [vmem:[%s4831_s25 + $0x1200] sm:$0xff]  ;;  %v736_v36 = vld [vmem:[%s4831_s25 + $0x1208] sm:$0xff] }
  0xa2   : > { %733 = vst [vmem:[%s4836_s26 + $0x910] sm:$0xff] %v732_v34  ;;  %v738_v37 = vld [vmem:[%s4831_s25 + $0x1210] sm:$0xff]  ;;  %735 = vst [vmem:[%s4836_s26 + $0x918] sm:$0xff] %v734_v35  ;;  %v740_v38 = vld [vmem:[%s4831_s25 + $0x1218] sm:$0xff] }
  0xa3   : > { %737 = vst [vmem:[%s4836_s26 + $0x920] sm:$0xff] %v736_v36  ;;  %739 = vst [vmem:[%s4836_s26 + $0x928] sm:$0xff] %v738_v37  ;;  %v742_v39 = vld [vmem:[%s4831_s25 + $0x1220] sm:$0xff]  ;;  %v744_v40 = vld [vmem:[%s4831_s25 + $0x1228] sm:$0xff] }
  0xa4   : > { %741 = vst [vmem:[%s4836_s26 + $0x930] sm:$0xff] %v740_v38  ;;  %743 = vst [vmem:[%s4836_s26 + $0x938] sm:$0xff] %v742_v39  ;;  %v746_v41 = vld [vmem:[%s4831_s25 + $0x1230] sm:$0xff]  ;;  %v748_v42 = vld [vmem:[%s4831_s25 + $0x1238] sm:$0xff] }
  0xa5   : > { %745 = vst [vmem:[%s4836_s26 + $0x940] sm:$0xff] %v744_v40  ;;  %v750_v43 = vld [vmem:[%s4831_s25 + $0x1240] sm:$0xff]  ;;  %747 = vst [vmem:[%s4836_s26 + $0x948] sm:$0xff] %v746_v41  ;;  %v752_v44 = vld [vmem:[%s4831_s25 + $0x1248] sm:$0xff] }
  0xa6   : > { %749 = vst [vmem:[%s4836_s26 + $0x950] sm:$0xff] %v748_v42  ;;  %751 = vst [vmem:[%s4836_s26 + $0x958] sm:$0xff] %v750_v43  ;;  %v754_v45 = vld [vmem:[%s4831_s25 + $0x1250] sm:$0xff]  ;;  %v756_v46 = vld [vmem:[%s4831_s25 + $0x1258] sm:$0xff] }
  0xa7   : > { %753 = vst [vmem:[%s4836_s26 + $0x960] sm:$0xff] %v752_v44  ;;  %755 = vst [vmem:[%s4836_s26 + $0x968] sm:$0xff] %v754_v45  ;;  %v758_v47 = vld [vmem:[%s4831_s25 + $0x1260] sm:$0xff] }
  0xa8   : > { %757 = vst [vmem:[%s4836_s26 + $0x970] sm:$0xff] %v756_v46  ;;  %759 = vst [vmem:[%s4836_s26 + $0x978] sm:$0xff] %v758_v47 }
  0xa9 PF: > { %p3956_p5 = scmp.ge.s32.totalorder %s4773_s14, 1  ;;  %p772_p6 = scmp.lt.s32.totalorder %s4773_s14, 3 }
  0xab   : > { %p773_p7 = pnand %p3956_p5, %p772_p6 }
  0xac   : > { %s779_s27 = sand.u32 (!%p773_p7), 1, %s4765_s12   ;;  %s807_s7 = smul.u32 (!%p773_p7), 38, %s3951_s15 }
  0xad   : > { %776 = sbr.rel (%p773_p7) target bundleno = 702 (0x2be), region = 51 }
  0xae   : > { %s4267_s28 = smul.u32 (!%p773_p7), 2432, %s779_s27  ;;  %p808_p8 = scmp.lt.s32.totalorder (!%p773_p7), %s807_s7, 75 }
  0xb0   : > { %s5448_s29 = scalar_lea.vmem (!%p773_p7), [#allocation2], %s4267_s28 }
  0xb2   : > { %v4775_v48 = vmov 0   ;;  %v4294_v49 = vld [vmem:[%s5448_s29 + $0x854] ss:$152 sps:$4 sm:$0xff]   ;;  %v4298_v51 = vld [vmem:[%s5448_s29 + $0x850] ss:$152 sps:$4 sm:$0xff]   ;;  %s5954_s7 = smov (!%p808_p8, %s807_s7), 75 }
  0xb3   : > { %2876 = vmatprep.mubr.bf16.mxu0 %v4775_v48  ;;  %2917 = vmatprep.mubr.bf16.mxu1 %v4775_v48  ;;  %v4296_v50 = vld [vmem:[%s5448_s29 + $0x85c] ss:$152 sps:$4 sm:$0xff]   ;;  %v4299_v52 = vld [vmem:[%s5448_s29 + $0x858] ss:$152 sps:$4 sm:$0xff]   ;;  %v4302_v54 = vld [vmem:[%s5448_s29 + $0x72c] ss:$152 sps:$4 sm:$0xff]   ;;  %s5716_s10 = scalar_lea.vmem %s5948_s2, %s5954_s7 }
  0xb4   : > { %2844 = vmatprep.subr.bf16.mxu0 %v4294_v49  ;;  %2885 = vmatprep.subr.bf16.mxu1 %v4296_v50  ;;  %v4300_v53 = vld [vmem:[%s5448_s29 + $0x724] ss:$152 sps:$4 sm:$0xff]   ;;  %v4304_v55 = vld [vmem:[%s5448_s29 + $0x720] ss:$152 sps:$4 sm:$0xff]   ;;  %v4306_v57 = vld [vmem:[%s5448_s29 + $0x5f4] ss:$152 sps:$4 sm:$0xff]  }
  0xb5   : > { %2845 = vmatpush1.bf16.msra.mxu0 %v4298_v51  ;;  %2886 = vmatpush1.bf16.msra.mxu1 %v4299_v52  ;;  %v4305_v56 = vld [vmem:[%s5448_s29 + $0x728] ss:$152 sps:$4 sm:$0xff]   ;;  %v4308_v58 = vld [vmem:[%s5448_s29 + $0x5fc] ss:$152 sps:$4 sm:$0xff]   ;;  %v4311_v60 = vld [vmem:[%s5448_s29 + $0x5f8] ss:$152 sps:$4 sm:$0xff]  }
  0xb6   : > { %2846 = vmatprep.subr.bf16.mxu0 %v4300_v53  ;;  %2887 = vmatprep.subr.bf16.mxu1 %v4302_v54  ;;  %v4310_v59 = vld [vmem:[%s5448_s29 + $0x5f0] ss:$152 sps:$4 sm:$0xff]   ;;  %v4312_v61 = vld [vmem:[%s5448_s29 + $0x4c4] ss:$152 sps:$4 sm:$0xff]   ;;  %v4316_v63 = vld [vmem:[%s5448_s29 + $0x4c0] ss:$152 sps:$4 sm:$0xff]  }
  0xb7   : > { %v4314_v62 = vld [vmem:[%s5448_s29 + $0x4cc] ss:$152 sps:$4 sm:$0xff]   ;;  %v4317_v0 = vld [vmem:[%s5448_s29 + $0x4c8] ss:$152 sps:$4 sm:$0xff]   ;;  %v4320_v2 = vld [vmem:[%s5448_s29 + $0x39c] ss:$152 sps:$4 sm:$0xff]  }
  0xb8   : > { %v4318_v1 = vld [vmem:[%s5448_s29 + $0x394] ss:$152 sps:$4 sm:$0xff]   ;;  %v4322_v3 = vld [vmem:[%s5448_s29 + $0x390] ss:$152 sps:$4 sm:$0xff]   ;;  %v4324_v5 = vld [vmem:[%s5448_s29 + $0x264] ss:$152 sps:$4 sm:$0xff]  }
  0xb9   : > { %2847 = vmatpush1.bf16.msra.mxu0 %v4304_v55  ;;  %2888 = vmatpush1.bf16.msra.mxu1 %v4305_v56  ;;  %v4323_v4 = vld [vmem:[%s5448_s29 + $0x398] ss:$152 sps:$4 sm:$0xff]   ;;  %v4326_v6 = vld [vmem:[%s5448_s29 + $0x26c] ss:$152 sps:$4 sm:$0xff]   ;;  %v4329_v8 = vld [vmem:[%s5448_s29 + $0x268] ss:$152 sps:$4 sm:$0xff]  }
  0xba   : > { %2848 = vmatprep.subr.bf16.mxu0 %v4306_v57  ;;  %2889 = vmatprep.subr.bf16.mxu1 %v4308_v58  ;;  %v4328_v7 = vld [vmem:[%s5448_s29 + $0x260] ss:$152 sps:$4 sm:$0xff]   ;;  %v4330_v9 = vld [vmem:[%s5448_s29 + $0x134] ss:$152 sps:$4 sm:$0xff]   ;;  %v4334_v11 = vld [vmem:[%s5448_s29 + $0x130] ss:$152 sps:$4 sm:$0xff]  }
  0xbb   : > { %v4332_v10 = vld [vmem:[%s5448_s29 + $0x13c] ss:$152 sps:$4 sm:$0xff]   ;;  %v4335_v12 = vld [vmem:[%s5448_s29 + $0x138] ss:$152 sps:$4 sm:$0xff]   ;;  %v4338_v14 = vld [vmem:[%s5448_s29 + $0xc] ss:$152 sps:$4 sm:$0xff]  }
  0xbc   : > { %v4336_v13 = vld [vmem:[%s5448_s29 + $0x4] ss:$152 sps:$4 sm:$0xff]   ;;  %v4340_v15 = vld [vmem:[%s5448_s29] ss:$152 sps:$4 sm:$0xff]   ;;  %v4350_v22 = vld [vmem:[%s5448_s29 + $0x734] ss:$152 sps:$4 sm:$0xff]  }
  0xbd   : > { %2849 = vmatpush1.bf16.msra.mxu0 %v4310_v59  ;;  %2890 = vmatpush1.bf16.msra.mxu1 %v4311_v60  ;;  %v4341_v16 = vld [vmem:[%s5448_s29 + $0x8] ss:$152 sps:$4 sm:$0xff]   ;;  %v4344_v17 = vld [vmem:[%s5448_s29 + $0x864] ss:$152 sps:$4 sm:$0xff]   ;;  %v4351_v25 = vld [vmem:[%s5448_s29 + $0x738] ss:$152 sps:$4 sm:$0xff]  }
  0xbe   : > { %2850 = vmatprep.subr.bf16.mxu0 %v4312_v61  ;;  %2891 = vmatprep.subr.bf16.mxu1 %v4314_v62  ;;  %v4347_v18 = vld [vmem:[%s5448_s29 + $0x86c] ss:$152 sps:$4 sm:$0xff]   ;;  %v5487_v19 = vld [vmem:[%s5946_s0] sm:$0x1]  ;;  %v4353_v23 = vld [vmem:[%s5448_s29 + $0x73c] ss:$152 sps:$4 sm:$0xff]  }
  0xbf   : > { %v4342_v20 = vld [vmem:[%s5448_s29 + $0x860] ss:$152 sps:$4 sm:$0xff]   ;;  %v4348_v24 = vld [vmem:[%s5448_s29 + $0x730] ss:$152 sps:$4 sm:$0xff]   ;;  %v4356_v26 = vld [vmem:[%s5448_s29 + $0x604] ss:$152 sps:$4 sm:$0xff]  }
  0xc0   : > { %v4345_v21 = vld [vmem:[%s5448_s29 + $0x868] ss:$152 sps:$4 sm:$0xff]   ;;  %v4359_v27 = vld [vmem:[%s5448_s29 + $0x60c] ss:$152 sps:$4 sm:$0xff]   ;;  %v4365_v31 = vld [vmem:[%s5448_s29 + $0x4dc] ss:$152 sps:$4 sm:$0xff]  }
  0xc1   : > { %2851 = vmatpush1.bf16.msra.mxu0 %v4316_v63  ;;  %2892 = vmatpush1.bf16.msra.mxu1 %v4317_v0  ;;  %v4354_v28 = vld [vmem:[%s5448_s29 + $0x600] ss:$152 sps:$4 sm:$0xff]   ;;  %v4362_v30 = vld [vmem:[%s5448_s29 + $0x4d4] ss:$152 sps:$4 sm:$0xff]   ;;  %v4360_v32 = vld [vmem:[%s5448_s29 + $0x4d0] ss:$152 sps:$4 sm:$0xff]  }
  0xc2   : > { %2852 = vmatprep.subr.bf16.mxu0 %v4318_v1  ;;  %2893 = vmatprep.subr.bf16.mxu1 %v4320_v2  ;;  %v4357_v29 = vld [vmem:[%s5448_s29 + $0x608] ss:$152 sps:$4 sm:$0xff]   ;;  %v4363_v33 = vld [vmem:[%s5448_s29 + $0x4d8] ss:$152 sps:$4 sm:$0xff]   ;;  %v4368_v34 = vld [vmem:[%s5448_s29 + $0x3a4] ss:$152 sps:$4 sm:$0xff]  }
  0xc3   : > { %v4371_v35 = vld [vmem:[%s5448_s29 + $0x3ac] ss:$152 sps:$4 sm:$0xff]   ;;  %v4366_v36 = vld [vmem:[%s5448_s29 + $0x3a0] ss:$152 sps:$4 sm:$0xff]   ;;  %v4377_v39 = vld [vmem:[%s5448_s29 + $0x27c] ss:$152 sps:$4 sm:$0xff]  }
  0xc4   : > { %v4369_v37 = vld [vmem:[%s5448_s29 + $0x3a8] ss:$152 sps:$4 sm:$0xff]   ;;  %v4374_v38 = vld [vmem:[%s5448_s29 + $0x274] ss:$152 sps:$4 sm:$0xff]   ;;  %v4375_v41 = vld [vmem:[%s5448_s29 + $0x278] ss:$152 sps:$4 sm:$0xff]  }
  0xc5   : > { %2853 = vmatpush1.bf16.msra.mxu0 %v4322_v3  ;;  %2894 = vmatpush1.bf16.msra.mxu1 %v4323_v4  ;;  %v4372_v40 = vld [vmem:[%s5448_s29 + $0x270] ss:$152 sps:$4 sm:$0xff]   ;;  %v4380_v42 = vld [vmem:[%s5448_s29 + $0x144] ss:$152 sps:$4 sm:$0xff]   ;;  %v4378_v44 = vld [vmem:[%s5448_s29 + $0x140] ss:$152 sps:$4 sm:$0xff]  }
  0xc6   : > { %2854 = vmatprep.subr.bf16.mxu0 %v4324_v5  ;;  %2895 = vmatprep.subr.bf16.mxu1 %v4326_v6  ;;  %v4383_v43 = vld [vmem:[%s5448_s29 + $0x14c] ss:$152 sps:$4 sm:$0xff]   ;;  %v4381_v45 = vld [vmem:[%s5448_s29 + $0x148] ss:$152 sps:$4 sm:$0xff]   ;;  %v4389_v47 = vld [vmem:[%s5448_s29 + $0x1c] ss:$152 sps:$4 sm:$0xff]  }
  0xc7   : > { %v4386_v46 = vld [vmem:[%s5448_s29 + $0x14] ss:$152 sps:$4 sm:$0xff]   ;;  %v4384_v49 = vld [vmem:[%s5448_s29 + $0x10] ss:$152 sps:$4 sm:$0xff]   ;;  %v4398_v55 = vld [vmem:[%s5448_s29 + $0x744] ss:$152 sps:$4 sm:$0xff]  }
  0xc8   : > { %v4387_v50 = vld [vmem:[%s5448_s29 + $0x18] ss:$152 sps:$4 sm:$0xff]   ;;  %v4392_v51 = vld [vmem:[%s5448_s29 + $0x874] ss:$152 sps:$4 sm:$0xff]   ;;  %v4399_v58 = vld [vmem:[%s5448_s29 + $0x748] ss:$152 sps:$4 sm:$0xff]  }
  0xc9   : > { %2855 = vmatpush1.bf16.msra.mxu0 %v4328_v7  ;;  %2896 = vmatpush1.bf16.msra.mxu1 %v4329_v8  ;;  %v4395_v52 = vld [vmem:[%s5448_s29 + $0x87c] ss:$152 sps:$4 sm:$0xff]   ;;  %v4390_v53 = vld [vmem:[%s5448_s29 + $0x870] ss:$152 sps:$4 sm:$0xff]   ;;  %v4401_v56 = vld [vmem:[%s5448_s29 + $0x74c] ss:$152 sps:$4 sm:$0xff]  }
  0xca   : > { %2856 = vmatprep.subr.bf16.mxu0 %v4330_v9  ;;  %2897 = vmatprep.subr.bf16.mxu1 %v4332_v10  ;;  %v4393_v54 = vld [vmem:[%s5448_s29 + $0x878] ss:$152 sps:$4 sm:$0xff]   ;;  %v4404_v59 = vld [vmem:[%s5448_s29 + $0x614] ss:$152 sps:$4 sm:$0xff]   ;;  %v4410_v63 = vld [vmem:[%s5448_s29 + $0x4e4] ss:$152 sps:$4 sm:$0xff]  }
  0xcb   : > { %v4396_v57 = vld [vmem:[%s5448_s29 + $0x740] ss:$152 sps:$4 sm:$0xff]   ;;  %v4407_v60 = vld [vmem:[%s5448_s29 + $0x61c] ss:$152 sps:$4 sm:$0xff]   ;;  %v4402_v61 = vld [vmem:[%s5448_s29 + $0x610] ss:$152 sps:$4 sm:$0xff]  }
  0xcc   : > { %v4405_v62 = vld [vmem:[%s5448_s29 + $0x618] ss:$152 sps:$4 sm:$0xff]   ;;  %v4413_v0 = vld [vmem:[%s5448_s29 + $0x4ec] ss:$152 sps:$4 sm:$0xff]   ;;  %v4411_v2 = vld [vmem:[%s5448_s29 + $0x4e8] ss:$152 sps:$4 sm:$0xff]  }
  0xcd   : > { %2857 = vmatpush1.bf16.msra.mxu0 %v4334_v11  ;;  %2898 = vmatpush1.bf16.msra.mxu1 %v4335_v12  ;;  %v4408_v1 = vld [vmem:[%s5448_s29 + $0x4e0] ss:$152 sps:$4 sm:$0xff]   ;;  %v4416_v3 = vld [vmem:[%s5448_s29 + $0x3b4] ss:$152 sps:$4 sm:$0xff]   ;;  %v4414_v5 = vld [vmem:[%s5448_s29 + $0x3b0] ss:$152 sps:$4 sm:$0xff]  }
  0xce   : > { %2858 = vmatprep.subr.bf16.mxu0 %v4336_v13  ;;  %2899 = vmatprep.subr.bf16.mxu1 %v4338_v14  ;;  %v4419_v4 = vld [vmem:[%s5448_s29 + $0x3bc] ss:$152 sps:$4 sm:$0xff]   ;;  %v4417_v6 = vld [vmem:[%s5448_s29 + $0x3b8] ss:$152 sps:$4 sm:$0xff]   ;;  %v4425_v8 = vld [vmem:[%s5448_s29 + $0x28c] ss:$152 sps:$4 sm:$0xff]  }
  0xcf   : > { %v4422_v7 = vld [vmem:[%s5448_s29 + $0x284] ss:$152 sps:$4 sm:$0xff]   ;;  %v4420_v9 = vld [vmem:[%s5448_s29 + $0x280] ss:$152 sps:$4 sm:$0xff]   ;;  %v4428_v11 = vld [vmem:[%s5448_s29 + $0x154] ss:$152 sps:$4 sm:$0xff]  }
  0xd0   : > { %v4423_v10 = vld [vmem:[%s5448_s29 + $0x288] ss:$152 sps:$4 sm:$0xff]   ;;  %v4431_v12 = vld [vmem:[%s5448_s29 + $0x15c] ss:$152 sps:$4 sm:$0xff]   ;;  %v4429_v14 = vld [vmem:[%s5448_s29 + $0x158] ss:$152 sps:$4 sm:$0xff]  }
  0xd1   : > { %2859 = vmatpush1.bf16.msra.mxu0 %v4340_v15  ;;  %2900 = vmatpush1.bf16.msra.mxu1 %v4341_v16  ;;  %v4426_v13 = vld [vmem:[%s5448_s29 + $0x150] ss:$152 sps:$4 sm:$0xff]   ;;  %v4434_v15 = vld [vmem:[%s5448_s29 + $0x24] ss:$152 sps:$4 sm:$0xff]   ;;  %s3957_s11 = sshll.u32 %s5954_s7, 1 }
  0xd2   : > { %2926 = vmatprep.subr.bf16.mxu0 %v4344_v17  ;;  %2967 = vmatprep.subr.bf16.mxu1 %v4347_v18  ;;  %v4437_v16 = vld [vmem:[%s5448_s29 + $0x2c] ss:$152 sps:$4 sm:$0xff]   ;;  %v4432_v17 = vld [vmem:[%s5448_s29 + $0x20] ss:$152 sps:$4 sm:$0xff]   ;;  %s5772_s15 = scalar_lea.vmem %s5949_s3, %s3957_s11 }
  0xd3   : > { %v4435_v18 = vld [vmem:[%s5448_s29 + $0x28] ss:$152 sps:$4 sm:$0xff]  }
  0xd4   : > { %2877 = vmatmul.mubr.bf16.vlgmr.msra.gmra.mxu0 %v5487_v19  ;;  %2918 = vmatmul.mubr.bf16.vlgmr.msra.gmra.mxu1 %v5487_v19 }
  0xd5   : > { %2927 = vmatpush1.bf16.msra.mxu0 %v4342_v20  ;;  %2968 = vmatpush1.bf16.msra.mxu1 %v4345_v21  ;;  %v4440_v20 = vld [vmem:[%s5448_s29 + $0x884] ss:$152 sps:$4 sm:$0xff]  }
  0xd6   : > { %2928 = vmatprep.subr.bf16.mxu0 %v4350_v22  ;;  %2969 = vmatprep.subr.bf16.mxu1 %v4353_v23  ;;  %v4443_v21 = vld [vmem:[%s5448_s29 + $0x88c] ss:$152 sps:$4 sm:$0xff]   ;;  %v4438_v22 = vld [vmem:[%s5448_s29 + $0x880] ss:$152 sps:$4 sm:$0xff]  }
  0xd7   : > { %2958 = vmatprep.mubr.bf16.mxu0 %v4775_v48  ;;  %2999 = vmatprep.mubr.bf16.mxu1 %v4775_v48  ;;  %v4441_v23 = vld [vmem:[%s5448_s29 + $0x888] ss:$152 sps:$4 sm:$0xff]  }
  0xd9   : > { %2929 = vmatpush1.bf16.msra.mxu0 %v4348_v24  ;;  %2970 = vmatpush1.bf16.msra.mxu1 %v4351_v25  ;;  %v4446_v24 = vld [vmem:[%s5448_s29 + $0x754] ss:$152 sps:$4 sm:$0xff]  }
  0xda   : > { %2930 = vmatprep.subr.bf16.mxu0 %v4356_v26  ;;  %2971 = vmatprep.subr.bf16.mxu1 %v4359_v27  ;;  %v4449_v25 = vld [vmem:[%s5448_s29 + $0x75c] ss:$152 sps:$4 sm:$0xff]   ;;  %v4444_v26 = vld [vmem:[%s5448_s29 + $0x750] ss:$152 sps:$4 sm:$0xff]  }
  0xdb   : > { %v4447_v27 = vld [vmem:[%s5448_s29 + $0x758] ss:$152 sps:$4 sm:$0xff]  }
  0xdd   : > { %2931 = vmatpush1.bf16.msra.mxu0 %v4354_v28  ;;  %2972 = vmatpush1.bf16.msra.mxu1 %v4357_v29  ;;  %v4452_v28 = vld [vmem:[%s5448_s29 + $0x624] ss:$152 sps:$4 sm:$0xff]  }
  0xde   : > { %2932 = vmatprep.subr.bf16.mxu0 %v4362_v30  ;;  %2973 = vmatprep.subr.bf16.mxu1 %v4365_v31  ;;  %v4455_v29 = vld [vmem:[%s5448_s29 + $0x62c] ss:$152 sps:$4 sm:$0xff]   ;;  %v4450_v30 = vld [vmem:[%s5448_s29 + $0x620] ss:$152 sps:$4 sm:$0xff]  }
  0xdf   : > { %v4453_v31 = vld [vmem:[%s5448_s29 + $0x628] ss:$152 sps:$4 sm:$0xff]  }
  0xe1   : > { %2933 = vmatpush1.bf16.msra.mxu0 %v4360_v32  ;;  %2974 = vmatpush1.bf16.msra.mxu1 %v4363_v33  ;;  %v4458_v32 = vld [vmem:[%s5448_s29 + $0x4f4] ss:$152 sps:$4 sm:$0xff]  }
  0xe2   : > { %2934 = vmatprep.subr.bf16.mxu0 %v4368_v34  ;;  %2975 = vmatprep.subr.bf16.mxu1 %v4371_v35  ;;  %v4461_v33 = vld [vmem:[%s5448_s29 + $0x4fc] ss:$152 sps:$4 sm:$0xff]   ;;  %v4456_v34 = vld [vmem:[%s5448_s29 + $0x4f0] ss:$152 sps:$4 sm:$0xff]  }
  0xe3   : > { %v4459_v35 = vld [vmem:[%s5448_s29 + $0x4f8] ss:$152 sps:$4 sm:$0xff]  }
  0xe5   : > { %2935 = vmatpush1.bf16.msra.mxu0 %v4366_v36  ;;  %2976 = vmatpush1.bf16.msra.mxu1 %v4369_v37  ;;  %v4464_v36 = vld [vmem:[%s5448_s29 + $0x3c4] ss:$152 sps:$4 sm:$0xff]  }
  0xe6   : > { %2936 = vmatprep.subr.bf16.mxu0 %v4374_v38  ;;  %2977 = vmatprep.subr.bf16.mxu1 %v4377_v39  ;;  %v4467_v37 = vld [vmem:[%s5448_s29 + $0x3cc] ss:$152 sps:$4 sm:$0xff]   ;;  %v4462_v38 = vld [vmem:[%s5448_s29 + $0x3c0] ss:$152 sps:$4 sm:$0xff]  }
  0xe7   : > { %v4465_v39 = vld [vmem:[%s5448_s29 + $0x3c8] ss:$152 sps:$4 sm:$0xff]  }
  0xe9   : > { %2937 = vmatpush1.bf16.msra.mxu0 %v4372_v40  ;;  %2978 = vmatpush1.bf16.msra.mxu1 %v4375_v41  ;;  %v4470_v40 = vld [vmem:[%s5448_s29 + $0x294] ss:$152 sps:$4 sm:$0xff]  }
  0xea   : > { %2938 = vmatprep.subr.bf16.mxu0 %v4380_v42  ;;  %2979 = vmatprep.subr.bf16.mxu1 %v4383_v43  ;;  %v4473_v41 = vld [vmem:[%s5448_s29 + $0x29c] ss:$152 sps:$4 sm:$0xff]   ;;  %v4468_v42 = vld [vmem:[%s5448_s29 + $0x290] ss:$152 sps:$4 sm:$0xff]  }
  0xeb   : > { %v4471_v43 = vld [vmem:[%s5448_s29 + $0x298] ss:$152 sps:$4 sm:$0xff]  }
  0xed   : > { %2939 = vmatpush1.bf16.msra.mxu0 %v4378_v44  ;;  %2980 = vmatpush1.bf16.msra.mxu1 %v4381_v45  ;;  %v4476_v44 = vld [vmem:[%s5448_s29 + $0x164] ss:$152 sps:$4 sm:$0xff]  }
  0xee   : > { %2940 = vmatprep.subr.bf16.mxu0 %v4386_v46  ;;  %2981 = vmatprep.subr.bf16.mxu1 %v4389_v47  ;;  %v4479_v45 = vld [vmem:[%s5448_s29 + $0x16c] ss:$152 sps:$4 sm:$0xff]   ;;  %v4474_v46 = vld [vmem:[%s5448_s29 + $0x160] ss:$152 sps:$4 sm:$0xff]  }
  0xef   : > { %v4477_v47 = vld [vmem:[%s5448_s29 + $0x168] ss:$152 sps:$4 sm:$0xff]  }
  0xf1   : > { %2941 = vmatpush1.bf16.msra.mxu0 %v4384_v49  ;;  %2982 = vmatpush1.bf16.msra.mxu1 %v4387_v50  ;;  %v4482_v49 = vld [vmem:[%s5448_s29 + $0x34] ss:$152 sps:$4 sm:$0xff]  }
  0xf2   : > { %3008 = vmatprep.subr.bf16.mxu0 %v4392_v51  ;;  %3049 = vmatprep.subr.bf16.mxu1 %v4395_v52  ;;  %v4485_v50 = vld [vmem:[%s5448_s29 + $0x3c] ss:$152 sps:$4 sm:$0xff]   ;;  %v4480_v51 = vld [vmem:[%s5448_s29 + $0x30] ss:$152 sps:$4 sm:$0xff]  }
  0xf3   : > { %v4483_v52 = vld [vmem:[%s5448_s29 + $0x38] ss:$152 sps:$4 sm:$0xff]  }
  0xf4   : > { %2959 = vmatmul.mubr.bf16.vlgmr.msra.gmra.mxu0 %v5487_v19  ;;  %3000 = vmatmul.mubr.bf16.vlgmr.msra.gmra.mxu1 %v5487_v19 }
  0xf5   : > { %3009 = vmatpush1.bf16.msra.mxu0 %v4390_v53  ;;  %3050 = vmatpush1.bf16.msra.mxu1 %v4393_v54  ;;  %v4488_v53 = vld [vmem:[%s5448_s29 + $0x894] ss:$152 sps:$4 sm:$0xff]  }
  0xf6   : > { %3010 = vmatprep.subr.bf16.mxu0 %v4398_v55  ;;  %3051 = vmatprep.subr.bf16.mxu1 %v4401_v56  ;;  %v4491_v54 = vld [vmem:[%s5448_s29 + $0x89c] ss:$152 sps:$4 sm:$0xff]   ;;  %v4486_v55 = vld [vmem:[%s5448_s29 + $0x890] ss:$152 sps:$4 sm:$0xff]  }
  0xf7   : > { %3040 = vmatprep.mubr.bf16.mxu0 %v4775_v48  ;;  %3081 = vmatprep.mubr.bf16.mxu1 %v4775_v48  ;;  %v4489_v56 = vld [vmem:[%s5448_s29 + $0x898] ss:$152 sps:$4 sm:$0xff]  }
  0xf9   : > { %3011 = vmatpush1.bf16.msra.mxu0 %v4396_v57  ;;  %3052 = vmatpush1.bf16.msra.mxu1 %v4399_v58  ;;  %v4494_v57 = vld [vmem:[%s5448_s29 + $0x764] ss:$152 sps:$4 sm:$0xff]  }
  0xfa   : > { %3012 = vmatprep.subr.bf16.mxu0 %v4404_v59  ;;  %3053 = vmatprep.subr.bf16.mxu1 %v4407_v60  ;;  %v4497_v58 = vld [vmem:[%s5448_s29 + $0x76c] ss:$152 sps:$4 sm:$0xff]   ;;  %v4492_v59 = vld [vmem:[%s5448_s29 + $0x760] ss:$152 sps:$4 sm:$0xff]  }
  0xfb   : > { %v4495_v60 = vld [vmem:[%s5448_s29 + $0x768] ss:$152 sps:$4 sm:$0xff]  }
  0xfd   : > { %3013 = vmatpush1.bf16.msra.mxu0 %v4402_v61  ;;  %3054 = vmatpush1.bf16.msra.mxu1 %v4405_v62  ;;  %v4500_v61 = vld [vmem:[%s5448_s29 + $0x634] ss:$152 sps:$4 sm:$0xff]  }
  0xfe   : > { %3014 = vmatprep.subr.bf16.mxu0 %v4410_v63  ;;  %3055 = vmatprep.subr.bf16.mxu1 %v4413_v0  ;;  %v4503_v62 = vld [vmem:[%s5448_s29 + $0x63c] ss:$152 sps:$4 sm:$0xff]   ;;  %v4498_v63 = vld [vmem:[%s5448_s29 + $0x630] ss:$152 sps:$4 sm:$0xff]  }
  0xff   : > { %v4501_v0 = vld [vmem:[%s5448_s29 + $0x638] ss:$152 sps:$4 sm:$0xff]  }
 0x101   : > { %3015 = vmatpush1.bf16.msra.mxu0 %v4408_v1  ;;  %3056 = vmatpush1.bf16.msra.mxu1 %v4411_v2  ;;  %v4506_v1 = vld [vmem:[%s5448_s29 + $0x504] ss:$152 sps:$4 sm:$0xff]  }
 0x102   : > { %3016 = vmatprep.subr.bf16.mxu0 %v4416_v3  ;;  %3057 = vmatprep.subr.bf16.mxu1 %v4419_v4  ;;  %v4509_v2 = vld [vmem:[%s5448_s29 + $0x50c] ss:$152 sps:$4 sm:$0xff]   ;;  %v4504_v3 = vld [vmem:[%s5448_s29 + $0x500] ss:$152 sps:$4 sm:$0xff]  }
 0x103   : > { %v4507_v4 = vld [vmem:[%s5448_s29 + $0x508] ss:$152 sps:$4 sm:$0xff]  }
 0x105   : > { %3017 = vmatpush1.bf16.msra.mxu0 %v4414_v5  ;;  %3058 = vmatpush1.bf16.msra.mxu1 %v4417_v6  ;;  %v4512_v5 = vld [vmem:[%s5448_s29 + $0x3d4] ss:$152 sps:$4 sm:$0xff]  }
 0x106   : > { %3018 = vmatprep.subr.bf16.mxu0 %v4422_v7  ;;  %3059 = vmatprep.subr.bf16.mxu1 %v4425_v8  ;;  %v4515_v6 = vld [vmem:[%s5448_s29 + $0x3dc] ss:$152 sps:$4 sm:$0xff]   ;;  %v4510_v7 = vld [vmem:[%s5448_s29 + $0x3d0] ss:$152 sps:$4 sm:$0xff]  }
 0x107   : > { %v4513_v8 = vld [vmem:[%s5448_s29 + $0x3d8] ss:$152 sps:$4 sm:$0xff]  }
 0x109   : > { %3019 = vmatpush1.bf16.msra.mxu0 %v4420_v9  ;;  %3060 = vmatpush1.bf16.msra.mxu1 %v4423_v10  ;;  %v4518_v9 = vld [vmem:[%s5448_s29 + $0x2a4] ss:$152 sps:$4 sm:$0xff]  }
 0x10a   : > { %3020 = vmatprep.subr.bf16.mxu0 %v4428_v11  ;;  %3061 = vmatprep.subr.bf16.mxu1 %v4431_v12  ;;  %v4521_v10 = vld [vmem:[%s5448_s29 + $0x2ac] ss:$152 sps:$4 sm:$0xff]   ;;  %v4516_v11 = vld [vmem:[%s5448_s29 + $0x2a0] ss:$152 sps:$4 sm:$0xff]  }
 0x10b   : > { %v4519_v12 = vld [vmem:[%s5448_s29 + $0x2a8] ss:$152 sps:$4 sm:$0xff]  }
 0x10d   : > { %3021 = vmatpush1.bf16.msra.mxu0 %v4426_v13  ;;  %3062 = vmatpush1.bf16.msra.mxu1 %v4429_v14  ;;  %v4524_v13 = vld [vmem:[%s5448_s29 + $0x174] ss:$152 sps:$4 sm:$0xff]  }
 0x10e   : > { %3022 = vmatprep.subr.bf16.mxu0 %v4434_v15  ;;  %3063 = vmatprep.subr.bf16.mxu1 %v4437_v16  ;;  %v4527_v14 = vld [vmem:[%s5448_s29 + $0x17c] ss:$152 sps:$4 sm:$0xff]   ;;  %v4522_v15 = vld [vmem:[%s5448_s29 + $0x170] ss:$152 sps:$4 sm:$0xff]  }
 0x10f   : > { %v4525_v16 = vld [vmem:[%s5448_s29 + $0x178] ss:$152 sps:$4 sm:$0xff]  }
 0x111   : > { %3023 = vmatpush1.bf16.msra.mxu0 %v4432_v17  ;;  %3064 = vmatpush1.bf16.msra.mxu1 %v4435_v18  ;;  %v4530_v17 = vld [vmem:[%s5448_s29 + $0x44] ss:$152 sps:$4 sm:$0xff]  }
 0x112   : > { %3090 = vmatprep.subr.bf16.mxu0 %v4440_v20  ;;  %3131 = vmatprep.subr.bf16.mxu1 %v4443_v21  ;;  %v4533_v18 = vld [vmem:[%s5448_s29 + $0x4c] ss:$152 sps:$4 sm:$0xff]   ;;  %v4528_v20 = vld [vmem:[%s5448_s29 + $0x40] ss:$152 sps:$4 sm:$0xff]  }
 0x113   : > { %v4531_v21 = vld [vmem:[%s5448_s29 + $0x48] ss:$152 sps:$4 sm:$0xff]  }
 0x114   : > { %3041 = vmatmul.mubr.bf16.vlgmr.msra.gmra.mxu0 %v5487_v19  ;;  %3082 = vmatmul.mubr.bf16.vlgmr.msra.gmra.mxu1 %v5487_v19 }
 0x115   : > { %3091 = vmatpush1.bf16.msra.mxu0 %v4438_v22  ;;  %3132 = vmatpush1.bf16.msra.mxu1 %v4441_v23  ;;  %v4536_v22 = vld [vmem:[%s5448_s29 + $0x8a4] ss:$152 sps:$4 sm:$0xff]  }
 0x116   : > { %3092 = vmatprep.subr.bf16.mxu0 %v4446_v24  ;;  %3133 = vmatprep.subr.bf16.mxu1 %v4449_v25  ;;  %v4539_v23 = vld [vmem:[%s5448_s29 + $0x8ac] ss:$152 sps:$4 sm:$0xff]   ;;  %v4534_v24 = vld [vmem:[%s5448_s29 + $0x8a0] ss:$152 sps:$4 sm:$0xff]  }
 0x117   : > { %3122 = vmatprep.mubr.bf16.mxu0 %v4775_v48  ;;  %3163 = vmatprep.mubr.bf16.mxu1 %v4775_v48  ;;  %v4537_v25 = vld [vmem:[%s5448_s29 + $0x8a8] ss:$152 sps:$4 sm:$0xff]  }
 0x119   : > { %3093 = vmatpush1.bf16.msra.mxu0 %v4444_v26  ;;  %3134 = vmatpush1.bf16.msra.mxu1 %v4447_v27  ;;  %v4542_v26 = vld [vmem:[%s5448_s29 + $0x774] ss:$152 sps:$4 sm:$0xff]  }
 0x11a   : > { %3094 = vmatprep.subr.bf16.mxu0 %v4452_v28  ;;  %3135 = vmatprep.subr.bf16.mxu1 %v4455_v29  ;;  %v4545_v27 = vld [vmem:[%s5448_s29 + $0x77c] ss:$152 sps:$4 sm:$0xff]   ;;  %v4540_v28 = vld [vmem:[%s5448_s29 + $0x770] ss:$152 sps:$4 sm:$0xff]  }
 0x11b   : > { %v4543_v29 = vld [vmem:[%s5448_s29 + $0x778] ss:$152 sps:$4 sm:$0xff]  }
 0x11d   : > { %3095 = vmatpush1.bf16.msra.mxu0 %v4450_v30  ;;  %3136 = vmatpush1.bf16.msra.mxu1 %v4453_v31  ;;  %v4548_v30 = vld [vmem:[%s5448_s29 + $0x644] ss:$152 sps:$4 sm:$0xff]  }
 0x11e   : > { %3096 = vmatprep.subr.bf16.mxu0 %v4458_v32  ;;  %3137 = vmatprep.subr.bf16.mxu1 %v4461_v33  ;;  %v4551_v31 = vld [vmem:[%s5448_s29 + $0x64c] ss:$152 sps:$4 sm:$0xff]   ;;  %v4546_v32 = vld [vmem:[%s5448_s29 + $0x640] ss:$152 sps:$4 sm:$0xff]  }
 0x11f   : > { %v4554_v33 = vld [vmem:[%s5448_s29 + $0x514] ss:$152 sps:$4 sm:$0xff]  }
 0x121   : > { %3097 = vmatpush1.bf16.msra.mxu0 %v4456_v34  ;;  %3138 = vmatpush1.bf16.msra.mxu1 %v4459_v35  ;;  %v4557_v34 = vld [vmem:[%s5448_s29 + $0x51c] ss:$152 sps:$4 sm:$0xff]   ;;  %v4552_v35 = vld [vmem:[%s5448_s29 + $0x510] ss:$152 sps:$4 sm:$0xff]  }
 0x122   : > { %3098 = vmatprep.subr.bf16.mxu0 %v4464_v36  ;;  %3139 = vmatprep.subr.bf16.mxu1 %v4467_v37  ;;  %v4555_v36 = vld [vmem:[%s5448_s29 + $0x518] ss:$152 sps:$4 sm:$0xff]   ;;  %v4560_v37 = vld [vmem:[%s5448_s29 + $0x3e4] ss:$152 sps:$4 sm:$0xff]  }
 0x125   : > { %3099 = vmatpush1.bf16.msra.mxu0 %v4462_v38  ;;  %3140 = vmatpush1.bf16.msra.mxu1 %v4465_v39  ;;  %v4563_v38 = vld [vmem:[%s5448_s29 + $0x3ec] ss:$152 sps:$4 sm:$0xff]   ;;  %v4558_v39 = vld [vmem:[%s5448_s29 + $0x3e0] ss:$152 sps:$4 sm:$0xff]  }
 0x126   : > { %3100 = vmatprep.subr.bf16.mxu0 %v4470_v40  ;;  %3141 = vmatprep.subr.bf16.mxu1 %v4473_v41  ;;  %v4561_v40 = vld [vmem:[%s5448_s29 + $0x3e8] ss:$152 sps:$4 sm:$0xff]   ;;  %v4566_v41 = vld [vmem:[%s5448_s29 + $0x2b4] ss:$152 sps:$4 sm:$0xff]  }
 0x129   : > { %3101 = vmatpush1.bf16.msra.mxu0 %v4468_v42  ;;  %3142 = vmatpush1.bf16.msra.mxu1 %v4471_v43  ;;  %v4569_v42 = vld [vmem:[%s5448_s29 + $0x2bc] ss:$152 sps:$4 sm:$0xff]   ;;  %v4564_v43 = vld [vmem:[%s5448_s29 + $0x2b0] ss:$152 sps:$4 sm:$0xff]  }
 0x12a   : > { %3102 = vmatprep.subr.bf16.mxu0 %v4476_v44  ;;  %3143 = vmatprep.subr.bf16.mxu1 %v4479_v45  ;;  %v4567_v44 = vld [vmem:[%s5448_s29 + $0x2b8] ss:$152 sps:$4 sm:$0xff]   ;;  %v4572_v45 = vld [vmem:[%s5448_s29 + $0x184] ss:$152 sps:$4 sm:$0xff]  }
 0x12d   : > { %3103 = vmatpush1.bf16.msra.mxu0 %v4474_v46  ;;  %3144 = vmatpush1.bf16.msra.mxu1 %v4477_v47  ;;  %v4575_v46 = vld [vmem:[%s5448_s29 + $0x18c] ss:$152 sps:$4 sm:$0xff]   ;;  %v4570_v47 = vld [vmem:[%s5448_s29 + $0x180] ss:$152 sps:$4 sm:$0xff]  }
 0x12e   : > { %3104 = vmatprep.subr.bf16.mxu0 %v4482_v49  ;;  %3145 = vmatprep.subr.bf16.mxu1 %v4485_v50  ;;  %v4573_v49 = vld [vmem:[%s5448_s29 + $0x188] ss:$152 sps:$4 sm:$0xff]   ;;  %v4578_v50 = vld [vmem:[%s5448_s29 + $0x54] ss:$152 sps:$4 sm:$0xff]  }
 0x131   : > { %3105 = vmatpush1.bf16.msra.mxu0 %v4480_v51  ;;  %3146 = vmatpush1.bf16.msra.mxu1 %v4483_v52  ;;  %v4581_v51 = vld [vmem:[%s5448_s29 + $0x5c] ss:$152 sps:$4 sm:$0xff]   ;;  %v4576_v52 = vld [vmem:[%s5448_s29 + $0x50] ss:$152 sps:$4 sm:$0xff]  }
 0x132   : > { %3172 = vmatprep.subr.bf16.mxu0 %v4488_v53  ;;  %3213 = vmatprep.subr.bf16.mxu1 %v4491_v54  ;;  %v4579_v53 = vld [vmem:[%s5448_s29 + $0x58] ss:$152 sps:$4 sm:$0xff]   ;;  %v4584_v54 = vld [vmem:[%s5448_s29 + $0x8b4] ss:$152 sps:$4 sm:$0xff]  }
 0x134   : > { %3123 = vmatmul.mubr.bf16.vlgmr.msra.gmra.mxu0 %v5487_v19  ;;  %3164 = vmatmul.mubr.bf16.vlgmr.msra.gmra.mxu1 %v5487_v19 }
 0x135   : > { %3173 = vmatpush1.bf16.msra.mxu0 %v4486_v55  ;;  %3214 = vmatpush1.bf16.msra.mxu1 %v4489_v56  ;;  %v4587_v55 = vld [vmem:[%s5448_s29 + $0x8bc] ss:$152 sps:$4 sm:$0xff]   ;;  %v4582_v56 = vld [vmem:[%s5448_s29 + $0x8b0] ss:$152 sps:$4 sm:$0xff]  }
 0x136   : > { %3174 = vmatprep.subr.bf16.mxu0 %v4494_v57  ;;  %3215 = vmatprep.subr.bf16.mxu1 %v4497_v58  ;;  %v4585_v57 = vld [vmem:[%s5448_s29 + $0x8b8] ss:$152 sps:$4 sm:$0xff]   ;;  %v4590_v58 = vld [vmem:[%s5448_s29 + $0x784] ss:$152 sps:$4 sm:$0xff]  }
 0x137   : > { %3204 = vmatprep.mubr.bf16.mxu0 %v4775_v48  ;;  %3245 = vmatprep.mubr.bf16.mxu1 %v4775_v48 }
 0x139   : > { %3175 = vmatpush1.bf16.msra.mxu0 %v4492_v59  ;;  %3216 = vmatpush1.bf16.msra.mxu1 %v4495_v60  ;;  %v4593_v59 = vld [vmem:[%s5448_s29 + $0x78c] ss:$152 sps:$4 sm:$0xff]   ;;  %v5676_v60 = vld [vmem:[%s5946_s0] sm:$0x1] }
 0x13a   : > { %3176 = vmatprep.subr.bf16.mxu0 %v4500_v61  ;;  %3217 = vmatprep.subr.bf16.mxu1 %v4503_v62  ;;  %v4588_v61 = vld [vmem:[%s5448_s29 + $0x780] ss:$152 sps:$4 sm:$0xff]  }
 0x13b   : > { %v4591_v62 = vld [vmem:[%s5448_s29 + $0x788] ss:$152 sps:$4 sm:$0xff]  }
 0x13d   : > { %3177 = vmatpush1.bf16.msra.mxu0 %v4498_v63  ;;  %3218 = vmatpush1.bf16.msra.mxu1 %v4501_v0  ;;  %v4596_v63 = vld [vmem:[%s5448_s29 + $0x654] ss:$152 sps:$4 sm:$0xff]  }
 0x13e   : > { %3178 = vmatprep.subr.bf16.mxu0 %v4506_v1  ;;  %3219 = vmatprep.subr.bf16.mxu1 %v4509_v2  ;;  %v4599_v0 = vld [vmem:[%s5448_s29 + $0x65c] ss:$152 sps:$4 sm:$0xff]   ;;  %v4594_v1 = vld [vmem:[%s5448_s29 + $0x650] ss:$152 sps:$4 sm:$0xff]  }
 0x13f   : > { %v4597_v2 = vld [vmem:[%s5448_s29 + $0x658] ss:$152 sps:$4 sm:$0xff]  }
 0x141   : > { %3179 = vmatpush1.bf16.msra.mxu0 %v4504_v3  ;;  %3220 = vmatpush1.bf16.msra.mxu1 %v4507_v4  ;;  %v4602_v3 = vld [vmem:[%s5448_s29 + $0x524] ss:$152 sps:$4 sm:$0xff]  }
 0x142   : > { %3180 = vmatprep.subr.bf16.mxu0 %v4512_v5  ;;  %3221 = vmatprep.subr.bf16.mxu1 %v4515_v6  ;;  %v4605_v4 = vld [vmem:[%s5448_s29 + $0x52c] ss:$152 sps:$4 sm:$0xff]   ;;  %v4600_v5 = vld [vmem:[%s5448_s29 + $0x520] ss:$152 sps:$4 sm:$0xff]  }
 0x143   : > { %v4603_v6 = vld [vmem:[%s5448_s29 + $0x528] ss:$152 sps:$4 sm:$0xff]  }
 0x145   : > { %3181 = vmatpush1.bf16.msra.mxu0 %v4510_v7  ;;  %3222 = vmatpush1.bf16.msra.mxu1 %v4513_v8  ;;  %v4608_v7 = vld [vmem:[%s5448_s29 + $0x3f4] ss:$152 sps:$4 sm:$0xff]  }
 0x146   : > { %3182 = vmatprep.subr.bf16.mxu0 %v4518_v9  ;;  %3223 = vmatprep.subr.bf16.mxu1 %v4521_v10  ;;  %v4611_v8 = vld [vmem:[%s5448_s29 + $0x3fc] ss:$152 sps:$4 sm:$0xff]   ;;  %v4606_v9 = vld [vmem:[%s5448_s29 + $0x3f0] ss:$152 sps:$4 sm:$0xff]  }
 0x147   : > { %v4609_v10 = vld [vmem:[%s5448_s29 + $0x3f8] ss:$152 sps:$4 sm:$0xff]  }
 0x149   : > { %3183 = vmatpush1.bf16.msra.mxu0 %v4516_v11  ;;  %3224 = vmatpush1.bf16.msra.mxu1 %v4519_v12  ;;  %v4614_v11 = vld [vmem:[%s5448_s29 + $0x2c4] ss:$152 sps:$4 sm:$0xff]  }
 0x14a   : > { %3184 = vmatprep.subr.bf16.mxu0 %v4524_v13  ;;  %3225 = vmatprep.subr.bf16.mxu1 %v4527_v14  ;;  %v4617_v12 = vld [vmem:[%s5448_s29 + $0x2cc] ss:$152 sps:$4 sm:$0xff]   ;;  %v1134_v13 = vlaneseq  ;;  %v4612_v14 = vld [vmem:[%s5448_s29 + $0x2c0] ss:$152 sps:$4 sm:$0xff]  }
 0x14d   : > { %3185 = vmatpush1.bf16.msra.mxu0 %v4522_v15  ;;  %3226 = vmatpush1.bf16.msra.mxu1 %v4525_v16  ;;  %v4615_v15 = vld [vmem:[%s5448_s29 + $0x2c8] ss:$152 sps:$4 sm:$0xff]   ;;  %v4620_v16 = vld [vmem:[%s5448_s29 + $0x194] ss:$152 sps:$4 sm:$0xff]  }
 0x14e   : > { %3186 = vmatprep.subr.bf16.mxu0 %v4530_v17  ;;  %3227 = vmatprep.subr.bf16.mxu1 %v4533_v18  ;;  %v4623_v17 = vld [vmem:[%s5448_s29 + $0x19c] ss:$152 sps:$4 sm:$0xff]   ;;  %v5706_v18 = vshrl.u32 %v1134_v13, 7  ;;  %v4659_v13 = vld [vmem:[%s5448_s29 + $0x40c] ss:$152 sps:$4 sm:$0xff]  }
 0x151   : > { %3187 = vmatpush1.bf16.msra.mxu0 %v4528_v20  ;;  %3228 = vmatpush1.bf16.msra.mxu1 %v4531_v21  ;;  %v4618_v20 = vld [vmem:[%s5448_s29 + $0x190] ss:$152 sps:$4 sm:$0xff]  }
 0x152   : > { %3254 = vmatprep.subr.bf16.mxu0 %v4536_v22  ;;  %3295 = vmatprep.subr.bf16.mxu1 %v4539_v23  ;;  %v4621_v21 = vld [vmem:[%s5448_s29 + $0x198] ss:$152 sps:$4 sm:$0xff]   ;;  %v4626_v22 = vld [vmem:[%s5448_s29 + $0x64] ss:$152 sps:$4 sm:$0xff]  }
 0x153   : > { %v4629_v23 = vld [vmem:[%s5448_s29 + $0x6c] ss:$152 sps:$4 sm:$0xff]  }
 0x154   : > { %3205 = vmatmul.mubr.bf16.vlgmr.msra.gmra.mxu0 %v5487_v19  ;;  %3246 = vmatmul.mubr.bf16.vlgmr.msra.gmra.mxu1 %v5487_v19  ;;  %v4549_v19 = vld [vmem:[%s5448_s29 + $0x648] ss:$152 sps:$4 sm:$0xff]  }
 0x155   : > { %3255 = vmatpush1.bf16.msra.mxu0 %v4534_v24  ;;  %3296 = vmatpush1.bf16.msra.mxu1 %v4537_v25  ;;  %v5719_v24 = vsub.s32 0, %v5706_v18  ;;  %v5722_v25 = vsub.s32 2, %v5706_v18 }
 0x156   : > { %3256 = vmatprep.subr.bf16.mxu0 %v4542_v26  ;;  %3297 = vmatprep.subr.bf16.mxu1 %v4545_v27  ;;  %v4624_v26 = vld [vmem:[%s5448_s29 + $0x60] ss:$152 sps:$4 sm:$0xff]  }
 0x157   : > { %3286 = vmatprep.mubr.bf16.mxu0 %v4775_v48  ;;  %3327 = vmatprep.mubr.bf16.mxu1 %v4775_v48  ;;  %v4627_v27 = vld [vmem:[%s5448_s29 + $0x68] ss:$152 sps:$4 sm:$0xff]  }
 0x159   : > { %3257 = vmatpush1.bf16.msra.mxu0 %v4540_v28  ;;  %3298 = vmatpush1.bf16.msra.mxu1 %v4543_v29  ;;  %v5727_v28 = vld [vmem:[%s5716_s10] sm:$0xff] }
 0x15a   : > { %3258 = vmatprep.subr.bf16.mxu0 %v4548_v30  ;;  %3299 = vmatprep.subr.bf16.mxu1 %v4551_v31  ;;  %v4632_v29 = vld [vmem:[%s5448_s29 + $0x8c4] ss:$152 sps:$4 sm:$0xff]   ;;  %v5732_v31 = vsub.s32 1, %v5706_v18 }
 0x15b   : > { %v4635_v30 = vld [vmem:[%s5448_s29 + $0x8cc] ss:$152 sps:$4 sm:$0xff]  }
 0x15d   : > { %3259 = vmatpush1.bf16.msra.mxu0 %v4546_v32  ;;  %3300 = vmatpush1.bf16.msra.mxu1 %v4549_v19  ;;  %v5735_v32 = vsub.s32 3, %v5706_v18  ;;  %v1137_v19 = vrot.slane %v5727_v28, %v5719_v24 }
 0x15e   : > { %3260 = vmatprep.subr.bf16.mxu0 %v4554_v33  ;;  %3301 = vmatprep.subr.bf16.mxu1 %v4557_v34  ;;  %v1145_v33 = vrot.slane %v5727_v28, %v5722_v25  ;;  %v4630_v34 = vld [vmem:[%s5448_s29 + $0x8c0] ss:$152 sps:$4 sm:$0xff]  }
 0x161   : > { %3261 = vmatpush1.bf16.msra.mxu0 %v4552_v35  ;;  %3302 = vmatpush1.bf16.msra.mxu1 %v4555_v36  ;;  %v4633_v35 = vld [vmem:[%s5448_s29 + $0x8c8] ss:$152 sps:$4 sm:$0xff]   ;;  %v4776_v36 = vmov 1983009808  }
 0x162   : > { %3262 = vmatprep.subr.bf16.mxu0 %v4560_v37  ;;  %3303 = vmatprep.subr.bf16.mxu1 %v4563_v38  ;;  %v3702_v37 = vunpack.c.l.s4 %v4776_v36  ;;  %v4638_v38 = vld [vmem:[%s5448_s29 + $0x794] ss:$152 sps:$4 sm:$0xff]   ;;  %v5795_v36 = vsub.s32 6, %v5706_v18 }
 0x165   : > { %3263 = vmatpush1.bf16.msra.mxu0 %v4558_v39  ;;  %3304 = vmatpush1.bf16.msra.mxu1 %v4561_v40  ;;  %v4641_v39 = vld [vmem:[%s5448_s29 + $0x79c] ss:$152 sps:$4 sm:$0xff]   ;;  %v1141_v40 = vrot.slane %v5727_v28, %v5732_v31 }
 0x166   : > { %3264 = vmatprep.subr.bf16.mxu0 %v4566_v41  ;;  %3305 = vmatprep.subr.bf16.mxu1 %v4569_v42  ;;  %v1149_v41 = vrot.slane %v5727_v28, %v5735_v32 }
 0x169   : > { %3265 = vmatpush1.bf16.msra.mxu0 %v4564_v43  ;;  %3306 = vmatpush1.bf16.msra.mxu1 %v4567_v44 }
 0x16a   : > { %3266 = vmatprep.subr.bf16.mxu0 %v4572_v45  ;;  %3307 = vmatprep.subr.bf16.mxu1 %v4575_v46  ;;  %v3703_v46 = vunpack.c.0.s8 %v3702_v37  ;;  %v4680_v37 = vld [vmem:[%s5448_s29 + $0x8d4] ss:$152 sps:$4 sm:$0xff]  }
 0x16d   : > { %3267 = vmatpush1.bf16.msra.mxu0 %v4570_v47  ;;  %3308 = vmatpush1.bf16.msra.mxu1 %v4573_v49  ;;  %v4636_v47 = vld [vmem:[%s5448_s29 + $0x790] ss:$152 sps:$4 sm:$0xff]  }
 0x16e   : > { %3268 = vmatprep.subr.bf16.mxu0 %v4578_v50  ;;  %3309 = vmatprep.subr.bf16.mxu1 %v4581_v51  ;;  %v4639_v49 = vld [vmem:[%s5448_s29 + $0x798] ss:$152 sps:$4 sm:$0xff]  }
 0x171   : > { %3269 = vmatpush1.bf16.msra.mxu0 %v4576_v52  ;;  %3310 = vmatpush1.bf16.msra.mxu1 %v4579_v53  ;;  %v4644_v52 = vld [vmem:[%s5448_s29 + $0x664] ss:$152 sps:$4 sm:$0xff]  }
 0x172   : > { %3336 = vmatprep.subr.bf16.mxu0 %v4584_v54  ;;  %3377 = vmatprep.subr.bf16.mxu1 %v4587_v55  ;;  %v4647_v53 = vld [vmem:[%s5448_s29 + $0x66c] ss:$152 sps:$4 sm:$0xff]  }
 0x174   : > { %3287 = vmatmul.mubr.bf16.vlgmr.msra.gmra.mxu0 %v5676_v60  ;;  %3328 = vmatmul.mubr.bf16.vlgmr.msra.gmra.mxu1 %v5676_v60 }
 0x175   : > { %3337 = vmatpush1.bf16.msra.mxu0 %v4582_v56  ;;  %3378 = vmatpush1.bf16.msra.mxu1 %v4585_v57 }
 0x176   : > { %3338 = vmatprep.subr.bf16.mxu0 %v4590_v58  ;;  %3379 = vmatprep.subr.bf16.mxu1 %v4593_v59 }
 0x177   : > { %3368 = vmatprep.mubr.bf16.mxu0 %v4775_v48  ;;  %3409 = vmatprep.mubr.bf16.mxu1 %v4775_v48 }
 0x179   : > { %3339 = vmatpush1.bf16.msra.mxu0 %v4588_v61  ;;  %3380 = vmatpush1.bf16.msra.mxu1 %v4591_v62  ;;  %v5758_v62 = vsub.s32 %v3703_v46, %v5706_v18  ;;  %v4689_v46 = vld [vmem:[%s5448_s29 + $0x7ac] ss:$152 sps:$4 sm:$0xff]  }
 0x17a   : > { %3340 = vmatprep.subr.bf16.mxu0 %v4596_v63  ;;  %3381 = vmatprep.subr.bf16.mxu1 %v4599_v0  ;;  %v4642_v0 = vld [vmem:[%s5448_s29 + $0x660] ss:$152 sps:$4 sm:$0xff]  }
 0x17d   : > { %3341 = vmatpush1.bf16.msra.mxu0 %v4594_v1  ;;  %3382 = vmatpush1.bf16.msra.mxu1 %v4597_v2  ;;  %v4645_v1 = vld [vmem:[%s5448_s29 + $0x668] ss:$152 sps:$4 sm:$0xff]  }
 0x17e   : > { %3342 = vmatprep.subr.bf16.mxu0 %v4602_v3  ;;  %3383 = vmatprep.subr.bf16.mxu1 %v4605_v4  ;;  %v4650_v3 = vld [vmem:[%s5448_s29 + $0x534] ss:$152 sps:$4 sm:$0xff]  }
 0x17f   : > { %v4653_v4 = vld [vmem:[%s5448_s29 + $0x53c] ss:$152 sps:$4 sm:$0xff]  }
 0x181   : > { %3343 = vmatpush1.bf16.msra.mxu0 %v4600_v5  ;;  %3384 = vmatpush1.bf16.msra.mxu1 %v4603_v6 }
 0x182   : > { %3344 = vmatprep.subr.bf16.mxu0 %v4608_v7  ;;  %3385 = vmatprep.subr.bf16.mxu1 %v4611_v8 }
 0x185   : > { %3345 = vmatpush1.bf16.msra.mxu0 %v4606_v9  ;;  %3386 = vmatpush1.bf16.msra.mxu1 %v4609_v10  ;;  %v4648_v10 = vld [vmem:[%s5448_s29 + $0x530] ss:$152 sps:$4 sm:$0xff]  }
 0x186   : > { %3346 = vmatprep.subr.bf16.mxu0 %v4614_v11  ;;  %3387 = vmatprep.subr.bf16.mxu1 %v4617_v12  ;;  %v4651_v11 = vld [vmem:[%s5448_s29 + $0x538] ss:$152 sps:$4 sm:$0xff]   ;;  %v4656_v12 = vld [vmem:[%s5448_s29 + $0x404] ss:$152 sps:$4 sm:$0xff]  }
 0x189   : > { %3347 = vmatpush1.bf16.msra.mxu0 %v4612_v14  ;;  %3388 = vmatpush1.bf16.msra.mxu1 %v4615_v15  ;;  %v4654_v15 = vld [vmem:[%s5448_s29 + $0x400] ss:$152 sps:$4 sm:$0xff]  }
 0x18a   : > { %3348 = vmatprep.subr.bf16.mxu0 %v4620_v16  ;;  %3389 = vmatprep.subr.bf16.mxu1 %v4623_v17  ;;  %v4657_v16 = vld [vmem:[%s5448_s29 + $0x408] ss:$152 sps:$4 sm:$0xff]   ;;  %v4662_v17 = vld [vmem:[%s5448_s29 + $0x2d4] ss:$152 sps:$4 sm:$0xff]  }
 0x18d   : > { %3349 = vmatpush1.bf16.msra.mxu0 %v4618_v20  ;;  %3390 = vmatpush1.bf16.msra.mxu1 %v4621_v21  ;;  %v4665_v20 = vld [vmem:[%s5448_s29 + $0x2dc] ss:$152 sps:$4 sm:$0xff]   ;;  %v4660_v21 = vld [vmem:[%s5448_s29 + $0x2d0] ss:$152 sps:$4 sm:$0xff]  }
 0x18e   : > { %3350 = vmatprep.subr.bf16.mxu0 %v4626_v22  ;;  %3391 = vmatprep.subr.bf16.mxu1 %v4629_v23  ;;  %v4663_v22 = vld [vmem:[%s5448_s29 + $0x2d8] ss:$152 sps:$4 sm:$0xff]   ;;  %v4668_v23 = vld [vmem:[%s5448_s29 + $0x1a4] ss:$152 sps:$4 sm:$0xff]  }
 0x191   : > { %3351 = vmatpush1.bf16.msra.mxu0 %v4624_v26  ;;  %3392 = vmatpush1.bf16.msra.mxu1 %v4627_v27  ;;  %v4671_v26 = vld [vmem:[%s5448_s29 + $0x1ac] ss:$152 sps:$4 sm:$0xff]   ;;  %v4666_v27 = vld [vmem:[%s5448_s29 + $0x1a0] ss:$152 sps:$4 sm:$0xff]  }
 0x192   : > { %3418 = vmatprep.subr.bf16.mxu0 %v4632_v29  ;;  %3459 = vmatprep.subr.bf16.mxu1 %v4635_v30  ;;  %v4669_v29 = vld [vmem:[%s5448_s29 + $0x1a8] ss:$152 sps:$4 sm:$0xff]   ;;  %v4674_v30 = vld [vmem:[%s5448_s29 + $0x74] ss:$152 sps:$4 sm:$0xff]  }
 0x194   : > { %v2878_v42 = vpop.f32.mrf.mxu0  ;;  %v2919_v43 = vpop.f32.mrf.mxu1  ;;  %3369 = vmatmul.mubr.bf16.vlgmr.msra.gmra.mxu0 %v5676_v60  ;;  %3410 = vmatmul.mubr.bf16.vlgmr.msra.gmra.mxu1 %v5676_v60 }
 0x195   : > { %v2879_v44 = vadd.f32 %v2878_v42, %v1137_v19  ;;  %v2920_v45 = vadd.f32 %v2919_v43, %v1145_v33  ;;  %3419 = vmatpush1.bf16.msra.mxu0 %v4630_v34  ;;  %3460 = vmatpush1.bf16.msra.mxu1 %v4633_v35  ;;  %v4677_v19 = vld [vmem:[%s5448_s29 + $0x7c] ss:$152 sps:$4 sm:$0xff]   ;;  %v4672_v33 = vld [vmem:[%s5448_s29 + $0x70] ss:$152 sps:$4 sm:$0xff]   ;;  %v5792_v35 = vsub.s32 4, %v5706_v18  ;;  %v1161_v42 = vrot.slane %v5727_v28, %v5795_v36 }
 0x196   : > { %v2880_v50 = vpop.f32.mrf.mxu0  ;;  %v2921_v51 = vpop.f32.mrf.mxu1  ;;  %3420 = vmatprep.subr.bf16.mxu0 %v4638_v38  ;;  %3461 = vmatprep.subr.bf16.mxu1 %v4641_v39  ;;  %v4675_v34 = vld [vmem:[%s5448_s29 + $0x78] ss:$152 sps:$4 sm:$0xff]   ;;  %v4683_v38 = vld [vmem:[%s5448_s29 + $0x8dc] ss:$152 sps:$4 sm:$0xff]   ;;  %v5800_v39 = vsub.s32 5, %v5706_v18 }
 0x197   : > { %v3623_v54 = vmax.f32 %v2879_v44, 0.0  ;;  %v3625_v55 = vmax.f32 %v2920_v45, 0.0  ;;  %v2881_v56 = vadd.f32 %v2880_v50, %v1141_v40  ;;  %v2922_v57 = vadd.f32 %v2921_v51, %v1149_v41  ;;  %3450 = vmatprep.mubr.bf16.mxu0 %v4775_v48  ;;  %3491 = vmatprep.mubr.bf16.mxu1 %v4775_v48  ;;  %v4678_v43 = vld [vmem:[%s5448_s29 + $0x8d0] ss:$152 sps:$4 sm:$0xff]   ;;  %v4686_v45 = vld [vmem:[%s5448_s29 + $0x7a4] ss:$152 sps:$4 sm:$0xff]  }
 0x198   : > { %v2882_v58 = vpop.f32.mrf.mxu0  ;;  %v2923_v59 = vpop.f32.mrf.mxu1  ;;  %v5803_v40 = vsub.s32 7, %v5706_v18  ;;  %v1153_v41 = vrot.slane %v5727_v28, %v5792_v35  ;;  %v4681_v44 = vld [vmem:[%s5448_s29 + $0x8d8] ss:$152 sps:$4 sm:$0xff]   ;;  %v1157_v18 = vrot.slane %v5727_v28, %v5800_v39 }
 0x199   : > { %v3624_v61 = vmax.f32 %v2881_v56, 0.0  ;;  %v3626_v63 = vmax.f32 %v2922_v57, 0.0  ;;  %3421 = vmatpush1.bf16.msra.mxu0 %v4636_v47  ;;  %3462 = vmatpush1.bf16.msra.mxu1 %v4639_v49  ;;  %v4695_v57 = vld [vmem:[%s5448_s29 + $0x67c] ss:$152 sps:$4 sm:$0xff]  }
 0x19a   : > { %v2883_v2 = vpop.f32.mrf.mxu0  ;;  %3422 = vmatprep.subr.bf16.mxu0 %v4644_v52  ;;  %3463 = vmatprep.subr.bf16.mxu1 %v4647_v53  ;;  %v2924_v5 = vpop.f32.mrf.mxu1  ;;  %v1165_v47 = vrot.slane %v5727_v28, %v5803_v40  ;;  %v4684_v53 = vld [vmem:[%s5448_s29 + $0x7a0] ss:$152 sps:$4 sm:$0xff]   ;;  %v4692_v28 = vld [vmem:[%s5448_s29 + $0x674] ss:$152 sps:$4 sm:$0xff]  }
 0x19b   : > { %v3699_v6 = vcombine.low %v3623_v54, %v3624_v61  ;;  %v3700_v7 = vcombine.low %v3625_v55, %v3626_v63  ;;  %v4687_v54 = vld [vmem:[%s5448_s29 + $0x7a8] ss:$152 sps:$4 sm:$0xff]   ;;  %v4693_v5 = vld [vmem:[%s5448_s29 + $0x678] ss:$152 sps:$4 sm:$0xff]  }
 0x19d   : > { %v3707_v8 = vrot.slane %v3699_v6, %v5758_v62  ;;  %v3714_v9 = vrot.slane %v3700_v7, %v5758_v62  ;;  %3423 = vmatpush1.bf16.msra.mxu0 %v4642_v0  ;;  %3464 = vmatpush1.bf16.msra.mxu1 %v4645_v1  ;;  %v4698_v7 = vld [vmem:[%s5448_s29 + $0x544] ss:$152 sps:$4 sm:$0xff]  }
 0x19e   : > { %3424 = vmatprep.subr.bf16.mxu0 %v4650_v3  ;;  %3465 = vmatprep.subr.bf16.mxu1 %v4653_v4  ;;  %v4690_v4 = vld [vmem:[%s5448_s29 + $0x670] ss:$152 sps:$4 sm:$0xff]  }
 0x19f   : > { %v3715_v14 = vcombine.low %v3707_v8, %v3714_v9  ;;  %v4701_v8 = vld [vmem:[%s5448_s29 + $0x54c] ss:$152 sps:$4 sm:$0xff]  }
 0x1a1   : > { %3870 = vst [vmem:[%s5772_s15] sm:$0xff] %v3715_v14  ;;  %3425 = vmatpush1.bf16.msra.mxu0 %v4648_v10  ;;  %3466 = vmatpush1.bf16.msra.mxu1 %v4651_v11  ;;  %v4696_v14 = vld [vmem:[%s5448_s29 + $0x540] ss:$152 sps:$4 sm:$0xff]  }
 0x1a2   : > { %3426 = vmatprep.subr.bf16.mxu0 %v4656_v12  ;;  %3467 = vmatprep.subr.bf16.mxu1 %v4659_v13 }
 0x1a5   : > { %3427 = vmatpush1.bf16.msra.mxu0 %v4654_v15  ;;  %3468 = vmatpush1.bf16.msra.mxu1 %v4657_v16  ;;  %v4699_v15 = vld [vmem:[%s5448_s29 + $0x548] ss:$152 sps:$4 sm:$0xff]   ;;  %v4704_v16 = vld [vmem:[%s5448_s29 + $0x414] ss:$152 sps:$4 sm:$0xff]  }
 0x1a6   : > { %3428 = vmatprep.subr.bf16.mxu0 %v4662_v17  ;;  %3469 = vmatprep.subr.bf16.mxu1 %v4665_v20  ;;  %v4707_v17 = vld [vmem:[%s5448_s29 + $0x41c] ss:$152 sps:$4 sm:$0xff]  }
 0x1a9   : > { %3429 = vmatpush1.bf16.msra.mxu0 %v4660_v21  ;;  %3470 = vmatpush1.bf16.msra.mxu1 %v4663_v22  ;;  %v4702_v21 = vld [vmem:[%s5448_s29 + $0x410] ss:$152 sps:$4 sm:$0xff]  }
 0x1aa   : > { %3430 = vmatprep.subr.bf16.mxu0 %v4668_v23  ;;  %3471 = vmatprep.subr.bf16.mxu1 %v4671_v26  ;;  %v4705_v22 = vld [vmem:[%s5448_s29 + $0x418] ss:$152 sps:$4 sm:$0xff]   ;;  %v4710_v23 = vld [vmem:[%s5448_s29 + $0x2e4] ss:$152 sps:$4 sm:$0xff]  }
 0x1ab   : > { %v4713_v26 = vld [vmem:[%s5448_s29 + $0x2ec] ss:$152 sps:$4 sm:$0xff]  }
 0x1ad   : > { %3431 = vmatpush1.bf16.msra.mxu0 %v4666_v27  ;;  %3472 = vmatpush1.bf16.msra.mxu1 %v4669_v29  ;;  %v4708_v27 = vld [vmem:[%s5448_s29 + $0x2e0] ss:$152 sps:$4 sm:$0xff]  }
 0x1ae   : > { %3432 = vmatprep.subr.bf16.mxu0 %v4674_v30  ;;  %3473 = vmatprep.subr.bf16.mxu1 %v4677_v19  ;;  %v4711_v29 = vld [vmem:[%s5448_s29 + $0x2e8] ss:$152 sps:$4 sm:$0xff]   ;;  %v4716_v30 = vld [vmem:[%s5448_s29 + $0x1b4] ss:$152 sps:$4 sm:$0xff]  }
 0x1af   : > { %v4719_v19 = vld [vmem:[%s5448_s29 + $0x1bc] ss:$152 sps:$4 sm:$0xff]  }
 0x1b1   : > { %3433 = vmatpush1.bf16.msra.mxu0 %v4672_v33  ;;  %3474 = vmatpush1.bf16.msra.mxu1 %v4675_v34  ;;  %v4714_v33 = vld [vmem:[%s5448_s29 + $0x1b0] ss:$152 sps:$4 sm:$0xff]  }
 0x1b2   : > { %3500 = vmatprep.subr.bf16.mxu0 %v4680_v37  ;;  %3541 = vmatprep.subr.bf16.mxu1 %v4683_v38  ;;  %v4717_v34 = vld [vmem:[%s5448_s29 + $0x1b8] ss:$152 sps:$4 sm:$0xff]   ;;  %v4722_v37 = vld [vmem:[%s5448_s29 + $0x84] ss:$152 sps:$4 sm:$0xff]  }
 0x1b3   : > { %v4725_v38 = vld [vmem:[%s5448_s29 + $0x8c] ss:$152 sps:$4 sm:$0xff]  }
 0x1b4   : > { %v2960_v49 = vpop.f32.mrf.mxu0  ;;  %v3001_v50 = vpop.f32.mrf.mxu1  ;;  %3451 = vmatmul.mubr.bf16.vlgmr.msra.gmra.mxu0 %v5676_v60  ;;  %3492 = vmatmul.mubr.bf16.vlgmr.msra.gmra.mxu1 %v5676_v60 }
 0x1b5   : > { %v2961_v51 = vadd.f32 %v2960_v49, %v1153_v41  ;;  %v3002_v52 = vadd.f32 %v3001_v50, %v1161_v42  ;;  %3501 = vmatpush1.bf16.msra.mxu0 %v4678_v43  ;;  %3542 = vmatpush1.bf16.msra.mxu1 %v4681_v44  ;;  %v4720_v41 = vld [vmem:[%s5448_s29 + $0x80] ss:$152 sps:$4 sm:$0xff]   ;;  %v5851_v43 = vld [vmem:[%s5716_s10 + $0x8] sm:$0xff]  ;;  %v4728_v44 = vld [vmem:[%s5448_s29 + $0x8e4] ss:$152 sps:$4 sm:$0xff]  }
 0x1b6   : > { %v2962_v55 = vpop.f32.mrf.mxu0  ;;  %v3003_v56 = vpop.f32.mrf.mxu1  ;;  %3502 = vmatprep.subr.bf16.mxu0 %v4686_v45  ;;  %3543 = vmatprep.subr.bf16.mxu1 %v4689_v46  ;;  %v4723_v42 = vld [vmem:[%s5448_s29 + $0x88] ss:$152 sps:$4 sm:$0xff]   ;;  %v1169_v45 = vrot.slane %v5851_v43, %v5719_v24  ;;  %v1177_v46 = vrot.slane %v5851_v43, %v5722_v25  ;;  %v1173_v49 = vrot.slane %v5851_v43, %v5732_v31 }
 0x1b7   : > { %v3627_v58 = vmax.f32 %v2961_v51, 0.0  ;;  %v3629_v59 = vmax.f32 %v3002_v52, 0.0  ;;  %v2963_v61 = vadd.f32 %v2962_v55, %v1157_v18  ;;  %v3004_v63 = vadd.f32 %v3003_v56, %v1165_v47  ;;  %3532 = vmatprep.mubr.bf16.mxu0 %v4775_v48  ;;  %3573 = vmatprep.mubr.bf16.mxu1 %v4775_v48  ;;  %v4726_v18 = vld [vmem:[%s5448_s29 + $0x8e0] ss:$152 sps:$4 sm:$0xff]   ;;  %v4731_v47 = vld [vmem:[%s5448_s29 + $0x7b4] ss:$152 sps:$4 sm:$0xff]  }
 0x1b8   : > { %v2964_v0 = vpop.f32.mrf.mxu0  ;;  %v3005_v1 = vpop.f32.mrf.mxu1  ;;  %v1181_v50 = vrot.slane %v5851_v43, %v5735_v32  ;;  %v4729_v55 = vld [vmem:[%s5448_s29 + $0x7b0] ss:$152 sps:$4 sm:$0xff]  }
 0x1b9   : > { %v3628_v2 = vmax.f32 %v2963_v61, 0.0  ;;  %v3630_v3 = vmax.f32 %v3004_v63, 0.0  ;;  %3503 = vmatpush1.bf16.msra.mxu0 %v4684_v53  ;;  %3544 = vmatpush1.bf16.msra.mxu1 %v4687_v54 }
 0x1ba   : > { %v2965_v6 = vpop.f32.mrf.mxu0  ;;  %3504 = vmatprep.subr.bf16.mxu0 %v4692_v28  ;;  %3545 = vmatprep.subr.bf16.mxu1 %v4695_v57  ;;  %v3006_v9 = vpop.f32.mrf.mxu1  ;;  %v4734_v57 = vld [vmem:[%s5448_s29 + $0x684] ss:$152 sps:$4 sm:$0xff]  }
 0x1bb   : > { %v3716_v10 = vcombine.low %v3627_v58, %v3628_v2  ;;  %v3717_v11 = vcombine.low %v3629_v59, %v3630_v3 }
 0x1bd   : > { %v3724_v12 = vrot.slane %v3716_v10, %v5758_v62  ;;  %v3731_v13 = vrot.slane %v3717_v11, %v5758_v62  ;;  %3505 = vmatpush1.bf16.msra.mxu0 %v4690_v4  ;;  %3546 = vmatpush1.bf16.msra.mxu1 %v4693_v5  ;;  %v4732_v4 = vld [vmem:[%s5448_s29 + $0x680] ss:$152 sps:$4 sm:$0xff]   ;;  %v4737_v5 = vld [vmem:[%s5448_s29 + $0x554] ss:$152 sps:$4 sm:$0xff]   ;;  %v4735_v11 = vld [vmem:[%s5448_s29 + $0x550] ss:$152 sps:$4 sm:$0xff]  }
 0x1be   : > { %3506 = vmatprep.subr.bf16.mxu0 %v4698_v7  ;;  %3547 = vmatprep.subr.bf16.mxu1 %v4701_v8 }
 0x1bf   : > { %v3732_v20 = vcombine.low %v3724_v12, %v3731_v13  ;;  %v4740_v12 = vld [vmem:[%s5448_s29 + $0x424] ss:$152 sps:$4 sm:$0xff]  }
 0x1c1   : > { %3871 = vst [vmem:[%s5772_s15 + $0x8] sm:$0xff] %v3732_v20  ;;  %3507 = vmatpush1.bf16.msra.mxu0 %v4696_v14  ;;  %3548 = vmatpush1.bf16.msra.mxu1 %v4699_v15  ;;  %v4738_v14 = vld [vmem:[%s5448_s29 + $0x420] ss:$152 sps:$4 sm:$0xff]   ;;  %v4743_v15 = vld [vmem:[%s5448_s29 + $0x2f4] ss:$152 sps:$4 sm:$0xff]  }
 0x1c2   : > { %3508 = vmatprep.subr.bf16.mxu0 %v4704_v16  ;;  %3549 = vmatprep.subr.bf16.mxu1 %v4707_v17  ;;  %v4741_v16 = vld [vmem:[%s5448_s29 + $0x2f0] ss:$152 sps:$4 sm:$0xff]   ;;  %v4746_v17 = vld [vmem:[%s5448_s29 + $0x1c4] ss:$152 sps:$4 sm:$0xff]   ;;  %v4744_v20 = vld [vmem:[%s5448_s29 + $0x1c0] ss:$152 sps:$4 sm:$0xff]  }
 0x1c5   : > { %3509 = vmatpush1.bf16.msra.mxu0 %v4702_v21  ;;  %3550 = vmatpush1.bf16.msra.mxu1 %v4705_v22  ;;  %v4749_v21 = vld [vmem:[%s5448_s29 + $0x94] ss:$152 sps:$4 sm:$0xff]   ;;  %v4747_v22 = vld [vmem:[%s5448_s29 + $0x90] ss:$152 sps:$4 sm:$0xff]  }
 0x1c6   : > { %3510 = vmatprep.subr.bf16.mxu0 %v4710_v23  ;;  %3551 = vmatprep.subr.bf16.mxu1 %v4713_v26  ;;  %v1185_v23 = vrot.slane %v5851_v43, %v5792_v35  ;;  %v1193_v26 = vrot.slane %v5851_v43, %v5795_v36 }
 0x1c9   : > { %3511 = vmatpush1.bf16.msra.mxu0 %v4708_v27  ;;  %3552 = vmatpush1.bf16.msra.mxu1 %v4711_v29  ;;  %v1189_v27 = vrot.slane %v5851_v43, %v5800_v39  ;;  %v1197_v29 = vrot.slane %v5851_v43, %v5803_v40 }
 0x1ca   : > { %3512 = vmatprep.subr.bf16.mxu0 %v4716_v30  ;;  %3553 = vmatprep.subr.bf16.mxu1 %v4719_v19 }
 0x1cd   : > { %3513 = vmatpush1.bf16.msra.mxu0 %v4714_v33  ;;  %3554 = vmatpush1.bf16.msra.mxu1 %v4717_v34 }
 0x1ce   : > { %3514 = vmatprep.subr.bf16.mxu0 %v4722_v37  ;;  %3555 = vmatprep.subr.bf16.mxu1 %v4725_v38 }
 0x1d1   : > { %3515 = vmatpush1.bf16.msra.mxu0 %v4720_v41  ;;  %3556 = vmatpush1.bf16.msra.mxu1 %v4723_v42 }
 0x1d2   : > { %3582 = vmatprep.subr.bf16.mxu0 %v4728_v44 }
 0x1d4   : > { %v3042_v51 = vpop.f32.mrf.mxu0  ;;  %v3083_v52 = vpop.f32.mrf.mxu1  ;;  %3533 = vmatmul.mubr.bf16.vlgmr.msra.gmra.mxu0 %v5676_v60  ;;  %3574 = vmatmul.mubr.bf16.vlgmr.msra.gmra.mxu1 %v5676_v60 }
 0x1d5   : > { %v3043_v53 = vadd.f32 %v3042_v51, %v1169_v45  ;;  %v3084_v54 = vadd.f32 %v3083_v52, %v1177_v46  ;;  %3583 = vmatpush1.bf16.msra.mxu0 %v4726_v18  ;;  %3614 = vmatprep.mubr.bf16.mxu0 %v4775_v48 }
 0x1d6   : > { %v3044_v56 = vpop.f32.mrf.mxu0  ;;  %v3085_v28 = vpop.f32.mrf.mxu1  ;;  %3584 = vmatprep.subr.bf16.mxu0 %v4731_v47 }
 0x1d7   : > { %v3631_v58 = vmax.f32 %v3043_v53, 0.0  ;;  %v3633_v59 = vmax.f32 %v3084_v54, 0.0  ;;  %v3045_v61 = vadd.f32 %v3044_v56, %v1173_v49  ;;  %v3086_v63 = vadd.f32 %v3085_v28, %v1181_v50 }
 0x1d8   : > { %v3046_v0 = vpop.f32.mrf.mxu0  ;;  %v3087_v1 = vpop.f32.mrf.mxu1 }
 0x1d9   : > { %v3632_v2 = vmax.f32 %v3045_v61, 0.0  ;;  %v3634_v3 = vmax.f32 %v3086_v63, 0.0  ;;  %3585 = vmatpush1.bf16.msra.mxu0 %v4729_v55  ;;  %v1126_v55 = vld [vmem:[%s5716_s10 + $0x10] sm:$0xff] }
 0x1da   : > { %v3047_v48 = vpop.f32.mrf.mxu0  ;;  %3586 = vmatprep.subr.bf16.mxu0 %v4734_v57  ;;  %v3088_v6 = vpop.f32.mrf.mxu1  ;;  %v1201_v56 = vrot.slane %v1126_v55, %v5719_v24  ;;  %v1209_v28 = vrot.slane %v1126_v55, %v5722_v25  ;;  %v1205_v57 = vrot.slane %v1126_v55, %v5732_v31 }
 0x1db   : > { %v3733_v7 = vcombine.low %v3631_v58, %v3632_v2  ;;  %v3734_v8 = vcombine.low %v3633_v59, %v3634_v3  ;;  %v1213_v58 = vrot.slane %v1126_v55, %v5735_v32 }
 0x1dd   : > { %v3741_v9 = vrot.slane %v3733_v7, %v5758_v62  ;;  %v3748_v10 = vrot.slane %v3734_v8, %v5758_v62  ;;  %3587 = vmatpush1.bf16.msra.mxu0 %v4732_v4 }
 0x1de   : > { %3588 = vmatprep.subr.bf16.mxu0 %v4737_v5 }
 0x1df   : > { %v3749_v13 = vcombine.low %v3741_v9, %v3748_v10 }
 0x1e1   : > { %3872 = vst [vmem:[%s5772_s15 + $0x10] sm:$0xff] %v3749_v13  ;;  %3589 = vmatpush1.bf16.msra.mxu0 %v4735_v11 }
 0x1e2   : > { %3590 = vmatprep.subr.bf16.mxu0 %v4740_v12 }
 0x1e5   : > { %3591 = vmatpush1.bf16.msra.mxu0 %v4738_v14 }
 0x1e6   : > { %3592 = vmatprep.subr.bf16.mxu0 %v4743_v15 }
 0x1e9   : > { %3593 = vmatpush1.bf16.msra.mxu0 %v4741_v16 }
 0x1ea   : > { %3594 = vmatprep.subr.bf16.mxu0 %v4746_v17  ;;  %v1217_v17 = vrot.slane %v1126_v55, %v5792_v35 }
 0x1ed   : > { %3595 = vmatpush1.bf16.msra.mxu0 %v4744_v20  ;;  %v1225_v20 = vrot.slane %v1126_v55, %v5795_v36 }
 0x1ee   : > { %3596 = vmatprep.subr.bf16.mxu0 %v4749_v21  ;;  %v1221_v21 = vrot.slane %v1126_v55, %v5800_v39 }
 0x1f1   : > { %3597 = vmatpush1.bf16.msra.mxu0 %v4747_v22  ;;  %v1229_v22 = vrot.slane %v1126_v55, %v5803_v40 }
 0x1f4   : > { %v3124_v30 = vpop.f32.mrf.mxu0  ;;  %v3165_v19 = vpop.f32.mrf.mxu1  ;;  %3615 = vmatmul.mubr.bf16.vlgmr.msra.gmra.mxu0 %v5676_v60 }
 0x1f5   : > { %v3125_v33 = vadd.f32 %v3124_v30, %v1185_v23  ;;  %v3166_v34 = vadd.f32 %v3165_v19, %v1193_v26 }
 0x1f6   : > { %v3126_v37 = vpop.f32.mrf.mxu0  ;;  %v3167_v38 = vpop.f32.mrf.mxu1 }
 0x1f7   : > { %v3635_v41 = vmax.f32 %v3125_v33, 0.0  ;;  %v3637_v42 = vmax.f32 %v3166_v34, 0.0  ;;  %v3127_v44 = vadd.f32 %v3126_v37, %v1189_v27  ;;  %v3168_v45 = vadd.f32 %v3167_v38, %v1197_v29 }
 0x1f8   : > { %v3128_v46 = vpop.f32.mrf.mxu0  ;;  %v3169_v18 = vpop.f32.mrf.mxu1 }
 0x1f9   : > { %v3636_v47 = vmax.f32 %v3127_v44, 0.0  ;;  %v3638_v49 = vmax.f32 %v3168_v45, 0.0 }
 0x1fa   : > { %v3129_v50 = vpop.f32.mrf.mxu0  ;;  %v3170_v43 = vpop.f32.mrf.mxu1 }
 0x1fb   : > { %v3750_v51 = vcombine.low %v3635_v41, %v3636_v47  ;;  %v3751_v52 = vcombine.low %v3637_v42, %v3638_v49 }
 0x1fd   : > { %v3758_v60 = vrot.slane %v3750_v51, %v5758_v62  ;;  %v3765_v53 = vrot.slane %v3751_v52, %v5758_v62  ;;  %v1127_v52 = vld [vmem:[%s5716_s10 + $0x18] sm:$0xff] }
 0x1fe   : > { %v1245_v55 = vrot.slane %v1127_v52, %v5735_v32 }
 0x1ff   : > { %v3766_v54 = vcombine.low %v3758_v60, %v3765_v53  ;;  %v1233_v60 = vrot.slane %v1127_v52, %v5719_v24  ;;  %v1241_v53 = vrot.slane %v1127_v52, %v5722_v25 }
 0x201   : > { %3873 = vst [vmem:[%s5772_s15 + $0x18] sm:$0xff] %v3766_v54  ;;  %v1237_v54 = vrot.slane %v1127_v52, %v5732_v31 }
 0x214   : > { %v3206_v59 = vpop.f32.mrf.mxu0  ;;  %v3247_v61 = vpop.f32.mrf.mxu1 }
 0x215   : > { %v3207_v63 = vadd.f32 %v3206_v59, %v1201_v56  ;;  %v3248_v0 = vadd.f32 %v3247_v61, %v1209_v28 }
 0x216   : > { %v3208_v1 = vpop.f32.mrf.mxu0  ;;  %v3249_v2 = vpop.f32.mrf.mxu1 }
 0x217   : > { %v3639_v3 = vmax.f32 %v3207_v63, 0.0  ;;  %v3641_v4 = vmax.f32 %v3248_v0, 0.0  ;;  %v3209_v48 = vadd.f32 %v3208_v1, %v1205_v57  ;;  %v3250_v5 = vadd.f32 %v3249_v2, %v1213_v58 }
 0x218   : > { %v3210_v6 = vpop.f32.mrf.mxu0  ;;  %v3251_v7 = vpop.f32.mrf.mxu1 }
 0x219   : > { %v3640_v8 = vmax.f32 %v3209_v48, 0.0  ;;  %v3642_v9 = vmax.f32 %v3250_v5, 0.0 }
 0x21a   : > { %v3211_v10 = vpop.f32.mrf.mxu0  ;;  %v3252_v11 = vpop.f32.mrf.mxu1 }
 0x21b   : > { %v3767_v12 = vcombine.low %v3639_v3, %v3640_v8  ;;  %v3768_v13 = vcombine.low %v3641_v4, %v3642_v9 }
 0x21d   : > { %v3775_v14 = vrot.slane %v3767_v12, %v5758_v62  ;;  %v3782_v15 = vrot.slane %v3768_v13, %v5758_v62  ;;  %v1249_v13 = vrot.slane %v1127_v52, %v5792_v35 }
 0x21f   : > { %v3783_v16 = vcombine.low %v3775_v14, %v3782_v15  ;;  %v1257_v14 = vrot.slane %v1127_v52, %v5795_v36  ;;  %v1253_v15 = vrot.slane %v1127_v52, %v5800_v39 }
 0x221   : > { %3874 = vst [vmem:[%s5772_s15 + $0x20] sm:$0xff] %v3783_v16  ;;  %v1261_v16 = vrot.slane %v1127_v52, %v5803_v40 }
 0x234   : > { %v3288_v23 = vpop.f32.mrf.mxu0  ;;  %v3329_v26 = vpop.f32.mrf.mxu1 }
 0x235   : > { %v3289_v27 = vadd.f32 %v3288_v23, %v1217_v17  ;;  %v3330_v29 = vadd.f32 %v3329_v26, %v1225_v20 }
 0x236   : > { %v3290_v30 = vpop.f32.mrf.mxu0  ;;  %v3331_v19 = vpop.f32.mrf.mxu1 }
 0x237   : > { %v3643_v33 = vmax.f32 %v3289_v27, 0.0  ;;  %v3645_v34 = vmax.f32 %v3330_v29, 0.0  ;;  %v3291_v37 = vadd.f32 %v3290_v30, %v1221_v21  ;;  %v3332_v38 = vadd.f32 %v3331_v19, %v1229_v22 }
 0x238   : > { %v3292_v41 = vpop.f32.mrf.mxu0  ;;  %v3333_v42 = vpop.f32.mrf.mxu1 }
 0x239   : > { %v3644_v44 = vmax.f32 %v3291_v37, 0.0  ;;  %v3646_v45 = vmax.f32 %v3332_v38, 0.0 }
 0x23a   : > { %v3293_v46 = vpop.f32.mrf.mxu0  ;;  %v3334_v18 = vpop.f32.mrf.mxu1 }
 0x23b   : > { %v3784_v47 = vcombine.low %v3643_v33, %v3644_v44  ;;  %v3785_v49 = vcombine.low %v3645_v34, %v3646_v45  ;;  %v1128_v18 = vld [vmem:[%s5716_s10 + $0x20] sm:$0x3f] }
 0x23d   : > { %v3792_v50 = vrot.slane %v3784_v47, %v5758_v62  ;;  %v3799_v43 = vrot.slane %v3785_v49, %v5758_v62  ;;  %v1265_v47 = vrot.slane %v1128_v18, %v5719_v24  ;;  %v1273_v49 = vrot.slane %v1128_v18, %v5722_v25 }
 0x23f   : > { %v3800_v51 = vcombine.low %v3792_v50, %v3799_v43  ;;  %v1269_v50 = vrot.slane %v1128_v18, %v5732_v31  ;;  %v1277_v43 = vrot.slane %v1128_v18, %v5735_v32 }
 0x241   : > { %3875 = vst [vmem:[%s5772_s15 + $0x28] sm:$0xff] %v3800_v51 }
 0x254   : > { %v3370_v56 = vpop.f32.mrf.mxu0  ;;  %v3411_v28 = vpop.f32.mrf.mxu1 }
 0x255   : > { %v3371_v57 = vadd.f32 %v3370_v56, %v1233_v60  ;;  %v3412_v58 = vadd.f32 %v3411_v28, %v1241_v53 }
 0x256   : > { %v3372_v59 = vpop.f32.mrf.mxu0  ;;  %v3413_v61 = vpop.f32.mrf.mxu1 }
 0x257   : > { %v3647_v63 = vmax.f32 %v3371_v57, 0.0  ;;  %v3649_v0 = vmax.f32 %v3412_v58, 0.0  ;;  %v3373_v1 = vadd.f32 %v3372_v59, %v1237_v54  ;;  %v3414_v2 = vadd.f32 %v3413_v61, %v1245_v55 }
 0x258   : > { %v3374_v3 = vpop.f32.mrf.mxu0  ;;  %v3415_v4 = vpop.f32.mrf.mxu1 }
 0x259   : > { %v3648_v48 = vmax.f32 %v3373_v1, 0.0  ;;  %v3650_v5 = vmax.f32 %v3414_v2, 0.0  ;;  %v1281_v4 = vrot.slane %v1128_v18, %v5792_v35 }
 0x25a   : > { %v3375_v6 = vpop.f32.mrf.mxu0  ;;  %v3416_v7 = vpop.f32.mrf.mxu1 }
 0x25b   : > { %v3801_v8 = vcombine.low %v3647_v63, %v3648_v48  ;;  %v3802_v9 = vcombine.low %v3649_v0, %v3650_v5  ;;  %v1285_v48 = vrot.slane %v1128_v18, %v5800_v39 }
 0x25d   : > { %v3809_v10 = vrot.slane %v3801_v8, %v5758_v62  ;;  %v3816_v11 = vrot.slane %v3802_v9, %v5758_v62 }
 0x25f   : > { %v3817_v12 = vcombine.low %v3809_v10, %v3816_v11 }
 0x261   : > { %3876 = vst [vmem:[%s5772_s15 + $0x30] sm:$0xff] %v3817_v12 }
 0x274   : > { %v3452_v17 = vpop.f32.mrf.mxu0  ;;  %v3493_v20 = vpop.f32.mrf.mxu1 }
 0x275   : > { %v3453_v21 = vadd.f32 %v3452_v17, %v1249_v13  ;;  %v3494_v22 = vadd.f32 %v3493_v20, %v1257_v14 }
 0x276   : > { %v3454_v23 = vpop.f32.mrf.mxu0  ;;  %v3495_v26 = vpop.f32.mrf.mxu1 }
 0x277   : > { %v3651_v27 = vmax.f32 %v3453_v21, 0.0  ;;  %v3653_v29 = vmax.f32 %v3494_v22, 0.0  ;;  %v3455_v30 = vadd.f32 %v3454_v23, %v1253_v15  ;;  %v3496_v19 = vadd.f32 %v3495_v26, %v1261_v16 }
 0x278   : > { %v3456_v33 = vpop.f32.mrf.mxu0  ;;  %v3497_v34 = vpop.f32.mrf.mxu1 }
 0x279   : > { %v3652_v37 = vmax.f32 %v3455_v30, 0.0  ;;  %v3654_v36 = vmax.f32 %v3496_v19, 0.0 }
 0x27a   : > { %v3457_v38 = vpop.f32.mrf.mxu0  ;;  %v3498_v41 = vpop.f32.mrf.mxu1 }
 0x27b   : > { %v3818_v42 = vcombine.low %v3651_v27, %v3652_v37  ;;  %v3819_v40 = vcombine.low %v3653_v29, %v3654_v36 }
 0x27d   : > { %v3826_v44 = vrot.slane %v3818_v42, %v5758_v62  ;;  %v3833_v45 = vrot.slane %v3819_v40, %v5758_v62 }
 0x27f   : > { %v3834_v46 = vcombine.low %v3826_v44, %v3833_v45 }
 0x281   : > { %3877 = vst [vmem:[%s5772_s15 + $0x38] sm:$0xff] %v3834_v46 }
 0x294   : > { %v3534_v51 = vpop.f32.mrf.mxu0  ;;  %v3575_v52 = vpop.f32.mrf.mxu1 }
 0x295   : > { %v3535_v60 = vadd.f32 %v3534_v51, %v1265_v47  ;;  %v3576_v53 = vadd.f32 %v3575_v52, %v1273_v49 }
 0x296   : > { %v3536_v54 = vpop.f32.mrf.mxu0  ;;  %v3577_v55 = vpop.f32.mrf.mxu1 }
 0x297   : > { %v3655_v56 = vmax.f32 %v3535_v60, 0.0  ;;  %v3657_v28 = vmax.f32 %v3576_v53, 0.0  ;;  %v3537_v57 = vadd.f32 %v3536_v54, %v1269_v50  ;;  %v3578_v58 = vadd.f32 %v3577_v55, %v1277_v43 }
 0x298   : > { %v3538_v59 = vpop.f32.mrf.mxu0  ;;  %v3579_v61 = vpop.f32.mrf.mxu1 }
 0x299   : > { %v3656_v24 = vmax.f32 %v3537_v57, 0.0  ;;  %v3658_v63 = vmax.f32 %v3578_v58, 0.0 }
 0x29a   : > { %v3539_v25 = vpop.f32.mrf.mxu0  ;;  %v3580_v0 = vpop.f32.mrf.mxu1 }
 0x29b   : > { %v3835_v31 = vcombine.low %v3655_v56, %v3656_v24  ;;  %v3836_v1 = vcombine.low %v3657_v28, %v3658_v63 }
 0x29d   : > { %v3843_v32 = vrot.slane %v3835_v31, %v5758_v62  ;;  %v3850_v2 = vrot.slane %v3836_v1, %v5758_v62 }
 0x29f   : > { %v3851_v3 = vcombine.low %v3843_v32, %v3850_v2 }
 0x2a1   : > { %3878 = vst [vmem:[%s5772_s15 + $0x40] sm:$0xff] %v3851_v3 }
 0x2b4   : > { %v3616_v5 = vpop.f32.mrf.mxu0 }
 0x2b5   : > { %v3617_v6 = vadd.f32 %v3616_v5, %v1281_v4 }
 0x2b6   : > { %v3618_v7 = vpop.f32.mrf.mxu0 }
 0x2b7   : > { %v3619_v8 = vadd.f32 %v3618_v7, %v1285_v48  ;;  %v3659_v10 = vmax.f32 %v3617_v6, 0.0 }
 0x2b8   : > { %v3620_v9 = vpop.f32.mrf.mxu0 }
 0x2b9   : > { %v3660_v11 = vmax.f32 %v3619_v8, 0.0 }
 0x2ba   : > { %v3621_v12 = vpop.f32.mrf.mxu0 }
 0x2bb   : > { %v3852_v13 = vcombine.low %v3659_v10, %v3660_v11 }
 0x2bd   : > { %4262 = vst.sshfl [vmem:[%s5772_s15 + $0x48] sm:$0x33 pattern:$0x76325410] %v3852_v13 }
 0x2be PF: > { %p10_p9 = scmp.ge.s32.totalorder %s4814_s16, 4   ;;  %s5950_s12 = smov %s4769_s13 }
 0x2bf   : > { %s5951_s13 = smov %s4823_s19  ;;  %s5952_s14 = smov %s4814_s16 }
 0x2c0   :  { %12 = sbr.rel (!%p10_p9) target bundleno = 2 (0x2), region = 93 }

// kernel: conv_vae_forward.10
= control target key start
LH: loop header
LB: loop body
LE: loop exit
PB: predicated region body
PF: predicated region fallthrough
CT: control target
= control target key end

     0   :  { %s796_s12 = smov 0   ;;  %s925_s0 = inlined_call_operand.vmem [shape: bf16[1152,256], index: 0, kind: input, shape index: {}]   ;;  %s926_s1 = inlined_call_operand.vmem [shape: bf16[256,128], index: 1, kind: input, shape index: {}]   ;;  %s927_s2 = inlined_call_operand.vmem [shape: f32[1,128], index: 2, kind: input, shape index: {}]   ;;  %s928_s3 = inlined_call_operand.vmem [shape: f32[1152,128], index: 3, kind: output, shape index: {}]  }
   0x1 LB: > { %s594_s13 = sadd.s32 4294967295, %s774_s12   ;;  %p598_p0 = scmp.ge.s32.totalorder %s774_s12, 1  ;;  %s774_s12 = sphi %s796_s12, %s13_s12  }
   0x2   : > { %p139_p1 = scmp.lt.s32.totalorder %s774_s12, 10 }
   0x4   : > { %p140_p2 = pnand %p598_p0, %p139_p1 }
   0x5   : > { %s599_s16 = sshll.u32 (!%p140_p2), %s594_s13, 4 }
   0x6   : > { %143 = sbr.rel (%p140_p2) target bundleno = 274 (0x112), region = 32  ;;  %p165_p3 = scmp.lt.s32.totalorder (!%p140_p2), %s599_s16, 143 }
   0xb   : > { %v728_v0 = vld [vmem:[%s926_s1 + $0x78] sm:$0xff]   ;;  %v730_v2 = vld [vmem:[%s926_s1 + $0x70] sm:$0xff]   ;;  %v732_v4 = vld [vmem:[%s926_s1 + $0x68] sm:$0xff]   ;;  %s930_s16 = smov (!%p165_p3, %s599_s16), 143 }
   0xc   : > { %v729_v1 = vld [vmem:[%s926_s1 + $0x38] sm:$0xff]   ;;  %640 = vmatprep.subr.bf16.mxu0 %v728_v0  ;;  %704 = vmatprep.subr.bf16.mxu1 %v728_v0  ;;  %v731_v3 = vld [vmem:[%s926_s1 + $0x30] sm:$0xff]   ;;  %v733_v5 = vld [vmem:[%s926_s1 + $0x28] sm:$0xff]   ;;  %s639_s4 = sshll.u32 %s930_s16, 3 }
   0xd   : > { %641 = vmatpush3.bf16.msra.mxu0 %v729_v1  ;;  %712 = vmatpush3.bf16.msra.mxu1 %v729_v1  ;;  %v734_v6 = vld [vmem:[%s926_s1 + $0x60] sm:$0xff]   ;;  %v736_v8 = vld [vmem:[%s926_s1 + $0x58] sm:$0xff]   ;;  %s839_s9 = scalar_lea.vmem %s925_s0, %s639_s4  ;;  %v738_v10 = vld [vmem:[%s926_s1 + $0x50] sm:$0xff]   ;;  %s890_s30 = scalar_lea.vmem %s928_s3, %s639_s4 }
   0xe   : > { %642 = vmatprep.subr.bf16.mxu0 %v730_v2  ;;  %705 = vmatprep.subr.bf16.mxu1 %v730_v2  ;;  %v735_v7 = vld [vmem:[%s926_s1 + $0x20] sm:$0xff]   ;;  %v737_v9 = vld [vmem:[%s926_s1 + $0x18] sm:$0xff]   ;;  %v739_v13 = vld [vmem:[%s926_s1 + $0x10] sm:$0xff]  }
   0xf   : > { %v746_v11 = vld [vmem:[%s839_s9 + $0x4] ss:$8 sps:$4 sm:$0xff]   ;;  %v744_v18 = vld [vmem:[%s839_s9] ss:$8 sps:$4 sm:$0xff]   ;;  %v750_v20 = vld [vmem:[%s839_s9 + $0x14] ss:$8 sps:$4 sm:$0xff]  }
  0x10   : > { %v749_v12 = vld [vmem:[%s839_s9 + $0x44] ss:$8 sps:$4 sm:$0xff]   ;;  %441 = vmatprep.mubr.bf16.mxu0 %v746_v11  ;;  %v747_v19 = vld [vmem:[%s839_s9 + $0x40] ss:$8 sps:$4 sm:$0xff]   ;;  %v752_v21 = vld [vmem:[%s839_s9 + $0x54] ss:$8 sps:$4 sm:$0xff]  }
  0x11   : > { %643 = vmatpush3.bf16.msra.mxu0 %v731_v3  ;;  %713 = vmatpush3.bf16.msra.mxu1 %v731_v3  ;;  %v740_v14 = vld [vmem:[%s926_s1 + $0x48] sm:$0xff]   ;;  %v742_v16 = vld [vmem:[%s926_s1 + $0x40] sm:$0xff]   ;;  %v754_v22 = vld [vmem:[%s839_s9 + $0x10] ss:$8 sps:$4 sm:$0xff]  }
  0x12   : > { %644 = vmatprep.subr.bf16.mxu0 %v732_v4  ;;  %706 = vmatprep.subr.bf16.mxu1 %v732_v4  ;;  %v741_v15 = vld [vmem:[%s926_s1 + $0x8] sm:$0xff]   ;;  %v743_v17 = vld [vmem:[%s926_s1] sm:$0xff]   ;;  %v755_v23 = vld [vmem:[%s839_s9 + $0x50] ss:$8 sps:$4 sm:$0xff]  }
  0x13   : > { %473 = vmatprep.mubr.bf16.mxu1 %v749_v12  ;;  %v756_v24 = vld [vmem:[%s839_s9 + $0x24] ss:$8 sps:$4 sm:$0xff]   ;;  %v760_v26 = vld [vmem:[%s839_s9 + $0x20] ss:$8 sps:$4 sm:$0xff]   ;;  %v762_v28 = vld [vmem:[%s839_s9 + $0x34] ss:$8 sps:$4 sm:$0xff]  }
  0x14   : > { %v758_v25 = vld [vmem:[%s839_s9 + $0x64] ss:$8 sps:$4 sm:$0xff]   ;;  %v761_v27 = vld [vmem:[%s839_s9 + $0x60] ss:$8 sps:$4 sm:$0xff]   ;;  %v764_v29 = vld [vmem:[%s839_s9 + $0x74] ss:$8 sps:$4 sm:$0xff]  }
  0x15   : > { %645 = vmatpush3.bf16.msra.mxu0 %v733_v5  ;;  %714 = vmatpush3.bf16.msra.mxu1 %v733_v5  ;;  %v766_v30 = vld [vmem:[%s839_s9 + $0x30] ss:$8 sps:$4 sm:$0xff]   ;;  %v881_v34 = vld [vmem:[%s927_s2] ss:$0 sm:$0xff] }
  0x16   : > { %646 = vmatprep.subr.bf16.mxu0 %v734_v6  ;;  %707 = vmatprep.subr.bf16.mxu1 %v734_v6  ;;  %v767_v31 = vld [vmem:[%s839_s9 + $0x70] ss:$8 sps:$4 sm:$0xff]  }
  0x19   : > { %647 = vmatpush3.bf16.msra.mxu0 %v735_v7  ;;  %715 = vmatpush3.bf16.msra.mxu1 %v735_v7 }
  0x1a   : > { %648 = vmatprep.subr.bf16.mxu0 %v736_v8  ;;  %708 = vmatprep.subr.bf16.mxu1 %v736_v8 }
  0x1d   : > { %649 = vmatpush3.bf16.msra.mxu0 %v737_v9  ;;  %716 = vmatpush3.bf16.msra.mxu1 %v737_v9 }
  0x1e   : > { %650 = vmatprep.subr.bf16.mxu0 %v738_v10  ;;  %709 = vmatprep.subr.bf16.mxu1 %v738_v10 }
  0x21   : > { %651 = vmatpush3.bf16.msra.mxu0 %v739_v13  ;;  %717 = vmatpush3.bf16.msra.mxu1 %v739_v13 }
  0x22   : > { %652 = vmatprep.subr.bf16.mxu0 %v740_v14  ;;  %710 = vmatprep.subr.bf16.mxu1 %v740_v14 }
  0x25   : > { %653 = vmatpush3.bf16.msra.mxu0 %v741_v15  ;;  %718 = vmatpush3.bf16.msra.mxu1 %v741_v15 }
  0x26   : > { %654 = vmatprep.subr.bf16.mxu0 %v742_v16  ;;  %711 = vmatprep.subr.bf16.mxu1 %v742_v16 }
  0x29   : > { %655 = vmatpush3.bf16.msra.mxu0 %v743_v17  ;;  %719 = vmatpush3.bf16.msra.mxu1 %v743_v17 }
  0x2c   : > { %442 = vmatmul.mubr.bf16.vlgmr.msra.gmra.mxu0 %v744_v18  ;;  %474 = vmatmul.mubr.bf16.vlgmr.msra.gmra.mxu1 %v747_v19 }
  0x2d   : > { %449 = vmatprep.mubr.bf16.mxu0 %v750_v20  ;;  %481 = vmatprep.mubr.bf16.mxu1 %v752_v21 }
  0x34   : > { %450 = vmatmul.mubr.bf16.gmra.mxu0 %v754_v22  ;;  %482 = vmatmul.mubr.bf16.gmra.mxu1 %v755_v23 }
  0x35   : > { %457 = vmatprep.mubr.bf16.mxu0 %v756_v24  ;;  %489 = vmatprep.mubr.bf16.mxu1 %v758_v25 }
  0x3c   : > { %458 = vmatmul.mubr.bf16.gmra.mxu0 %v760_v26  ;;  %490 = vmatmul.mubr.bf16.gmra.mxu1 %v761_v27 }
  0x3d   : > { %465 = vmatprep.mubr.bf16.mxu0 %v762_v28  ;;  %497 = vmatprep.mubr.bf16.mxu1 %v764_v29 }
  0x44   : > { %466 = vmatmul.mubr.bf16.gmra.mxu0 %v766_v30  ;;  %498 = vmatmul.mubr.bf16.gmra.mxu1 %v767_v31 }
  0xec   : > { %v656_v32 = vpop.f32.mrf.mxu0  ;;  %v680_v33 = vpop.f32.mrf.mxu1 }
  0xee   : > { %v657_v35 = vpop.f32.mrf.mxu0  ;;  %v681_v36 = vpop.f32.mrf.mxu1 }
  0xef   : > { %v658_v37 = vadd.f32 %v657_v35, %v656_v32  ;;  %v682_v38 = vadd.f32 %v681_v36, %v680_v33 }
  0xf0   : > { %v659_v39 = vpop.f32.mrf.mxu0  ;;  %v683_v40 = vpop.f32.mrf.mxu1 }
  0xf1   : > { %v444_v41 = vadd.f32 %v658_v37, %v881_v34  ;;  %v476_v42 = vadd.f32 %v682_v38, %v881_v34 }
  0xf2   : > { %v660_v43 = vpop.f32.mrf.mxu0  ;;  %v684_v44 = vpop.f32.mrf.mxu1 }
  0xf3   : > { %v506_v45 = vmax.f32 %v444_v41, 0.0  ;;  %v514_v46 = vmax.f32 %v476_v42, 0.0  ;;  %v661_v47 = vadd.f32 %v660_v43, %v659_v39  ;;  %v685_v48 = vadd.f32 %v684_v44, %v683_v40 }
  0xf4   : > { %v662_v49 = vpop.f32.mrf.mxu0  ;;  %v686_v50 = vpop.f32.mrf.mxu1 }
  0xf5   : > { %522 = vst [vmem:[%s890_s30] sm:$0xff] %v506_v45  ;;  %530 = vst [vmem:[%s890_s30 + $0x40] sm:$0xff] %v514_v46  ;;  %v447_v51 = vadd.f32 %v661_v47, %v881_v34  ;;  %v479_v52 = vadd.f32 %v685_v48, %v881_v34 }
  0xf6   : > { %v663_v53 = vpop.f32.mrf.mxu0  ;;  %v687_v54 = vpop.f32.mrf.mxu1 }
  0xf7   : > { %v507_v55 = vmax.f32 %v447_v51, 0.0  ;;  %v515_v56 = vmax.f32 %v479_v52, 0.0  ;;  %v664_v57 = vadd.f32 %v663_v53, %v662_v49  ;;  %v688_v58 = vadd.f32 %v687_v54, %v686_v50 }
  0xf8   : > { %v665_v59 = vpop.f32.mrf.mxu0  ;;  %v689_v60 = vpop.f32.mrf.mxu1 }
  0xf9   : > { %523 = vst [vmem:[%s890_s30 + $0x8] sm:$0xff] %v507_v55  ;;  %531 = vst [vmem:[%s890_s30 + $0x48] sm:$0xff] %v515_v56  ;;  %v452_v61 = vadd.f32 %v664_v57, %v881_v34  ;;  %v484_v62 = vadd.f32 %v688_v58, %v881_v34 }
  0xfa   : > { %v666_v63 = vpop.f32.mrf.mxu0  ;;  %v690_v0 = vpop.f32.mrf.mxu1 }
  0xfb   : > { %v508_v1 = vmax.f32 %v452_v61, 0.0  ;;  %v516_v2 = vmax.f32 %v484_v62, 0.0  ;;  %v667_v3 = vadd.f32 %v666_v63, %v665_v59  ;;  %v691_v4 = vadd.f32 %v690_v0, %v689_v60 }
  0xfc   : > { %v668_v5 = vpop.f32.mrf.mxu0  ;;  %v692_v6 = vpop.f32.mrf.mxu1 }
  0xfd   : > { %524 = vst [vmem:[%s890_s30 + $0x10] sm:$0xff] %v508_v1  ;;  %532 = vst [vmem:[%s890_s30 + $0x50] sm:$0xff] %v516_v2  ;;  %v455_v7 = vadd.f32 %v667_v3, %v881_v34  ;;  %v487_v8 = vadd.f32 %v691_v4, %v881_v34 }
  0xfe   : > { %v669_v9 = vpop.f32.mrf.mxu0  ;;  %v693_v10 = vpop.f32.mrf.mxu1 }
  0xff   : > { %v509_v11 = vmax.f32 %v455_v7, 0.0  ;;  %v517_v12 = vmax.f32 %v487_v8, 0.0  ;;  %v670_v13 = vadd.f32 %v669_v9, %v668_v5  ;;  %v694_v14 = vadd.f32 %v693_v10, %v692_v6 }
 0x100   : > { %v671_v15 = vpop.f32.mrf.mxu0  ;;  %v695_v16 = vpop.f32.mrf.mxu1 }
 0x101   : > { %525 = vst [vmem:[%s890_s30 + $0x18] sm:$0xff] %v509_v11  ;;  %533 = vst [vmem:[%s890_s30 + $0x58] sm:$0xff] %v517_v12  ;;  %v460_v17 = vadd.f32 %v670_v13, %v881_v34  ;;  %v492_v18 = vadd.f32 %v694_v14, %v881_v34 }
 0x102   : > { %v672_v19 = vpop.f32.mrf.mxu0  ;;  %v696_v20 = vpop.f32.mrf.mxu1 }
 0x103   : > { %v510_v21 = vmax.f32 %v460_v17, 0.0  ;;  %v518_v22 = vmax.f32 %v492_v18, 0.0  ;;  %v673_v23 = vadd.f32 %v672_v19, %v671_v15  ;;  %v697_v24 = vadd.f32 %v696_v20, %v695_v16 }
 0x104   : > { %v674_v25 = vpop.f32.mrf.mxu0  ;;  %v698_v26 = vpop.f32.mrf.mxu1 }
 0x105   : > { %526 = vst [vmem:[%s890_s30 + $0x20] sm:$0xff] %v510_v21  ;;  %534 = vst [vmem:[%s890_s30 + $0x60] sm:$0xff] %v518_v22  ;;  %v463_v27 = vadd.f32 %v673_v23, %v881_v34  ;;  %v495_v28 = vadd.f32 %v697_v24, %v881_v34 }
 0x106   : > { %v675_v29 = vpop.f32.mrf.mxu0  ;;  %v699_v30 = vpop.f32.mrf.mxu1 }
 0x107   : > { %v511_v31 = vmax.f32 %v463_v27, 0.0  ;;  %v519_v32 = vmax.f32 %v495_v28, 0.0  ;;  %v676_v33 = vadd.f32 %v675_v29, %v674_v25  ;;  %v700_v35 = vadd.f32 %v699_v30, %v698_v26 }
 0x108   : > { %v677_v36 = vpop.f32.mrf.mxu0  ;;  %v701_v37 = vpop.f32.mrf.mxu1 }
 0x109   : > { %527 = vst [vmem:[%s890_s30 + $0x28] sm:$0xff] %v511_v31  ;;  %535 = vst [vmem:[%s890_s30 + $0x68] sm:$0xff] %v519_v32  ;;  %v468_v38 = vadd.f32 %v676_v33, %v881_v34  ;;  %v500_v39 = vadd.f32 %v700_v35, %v881_v34 }
 0x10a   : > { %v678_v40 = vpop.f32.mrf.mxu0  ;;  %v702_v41 = vpop.f32.mrf.mxu1 }
 0x10b   : > { %v512_v42 = vmax.f32 %v468_v38, 0.0  ;;  %v520_v43 = vmax.f32 %v500_v39, 0.0  ;;  %v679_v44 = vadd.f32 %v678_v40, %v677_v36  ;;  %v703_v45 = vadd.f32 %v702_v41, %v701_v37 }
 0x10d   : > { %528 = vst [vmem:[%s890_s30 + $0x30] sm:$0xff] %v512_v42  ;;  %536 = vst [vmem:[%s890_s30 + $0x70] sm:$0xff] %v520_v43  ;;  %v471_v46 = vadd.f32 %v679_v44, %v881_v34  ;;  %v503_v47 = vadd.f32 %v703_v45, %v881_v34 }
 0x10f   : > { %v513_v48 = vmax.f32 %v471_v46, 0.0  ;;  %v521_v49 = vmax.f32 %v503_v47, 0.0 }
 0x111   : > { %529 = vst [vmem:[%s890_s30 + $0x38] sm:$0xff] %v513_v48  ;;  %537 = vst [vmem:[%s890_s30 + $0x78] sm:$0xff] %v521_v49 }
 0x112 PF: > { %s13_s12 = sadd.s32 1, %s774_s12  }
 0x113   : > { %p10_p4 = scmp.ge.s32.totalorder %s13_s12, 11  }
 0x115   :  { %12 = sbr.rel (!%p10_p4) target bundleno = 1 (0x1), region = 62 }

// kernel: conv_vae_forward.8
= control target key start
LH: loop header
LB: loop body
LE: loop exit
PB: predicated region body
PF: predicated region fallthrough
CT: control target
= control target key end

     0   :  { %12 = vsyncpa [#allocation3], 0  ;;  %v1250_v36 = vlaneseq  ;;  %v12589_v37 = vmov 1966171168   ;;  %s16603_s0 = inlined_call_operand.vmem [shape: bf16[2,9728], index: 0, kind: input, shape index: {}]   ;;  %s16604_s1 = inlined_call_operand.vmem [shape: bf16[9728,256], index: 1, kind: input, shape index: {}]   ;;  %s16605_s2 = inlined_call_operand.vmem [shape: f32[1,256], index: 2, kind: input, shape index: {}]   ;;  %s16606_s3 = inlined_call_operand.vmem [shape: f32[2,128], index: 3, kind: input, shape index: {}]   ;;  %s16607_s4 = inlined_call_operand.hbm [shape: f32[2,128], index: 4, kind: output, shape index: {0}]   ;;  %s16608_s5 = inlined_call_operand.hbm [shape: f32[2,128], index: 5, kind: output, shape index: {1}]   ;;  %s16609_s6 = inlined_call_operand.vmem [shape: f32[2,128], index: 6, kind: output, shape index: {2}]  }
   0x1   :  { %v10710_v0 = vld [vmem:[%s16604_s1 + $0x74] ss:$8 sps:$4 sm:$0xff]   ;;  %v10714_v2 = vld [vmem:[%s16604_s1 + $0x70] ss:$8 sps:$4 sm:$0xff]   ;;  %v10716_v4 = vld [vmem:[%s16604_s1 + $0x64] ss:$8 sps:$4 sm:$0xff]   ;;  %v1272_v38 = vunpack.c.l.s4 %v12589_v37 }
   0x2   :  { %v10712_v1 = vld [vmem:[%s16604_s1 + $0x174] ss:$8 sps:$4 sm:$0xff]   ;;  %7891 = vmatprep.subr.bf16.mxu0 %v10710_v0  ;;  %v10715_v3 = vld [vmem:[%s16604_s1 + $0x170] ss:$8 sps:$4 sm:$0xff]   ;;  %v10718_v5 = vld [vmem:[%s16604_s1 + $0x164] ss:$8 sps:$4 sm:$0xff]  }
   0x3   :  { %7932 = vmatprep.subr.bf16.mxu1 %v10712_v1  ;;  %7892 = vmatpush1.bf16.msra.mxu0 %v10714_v2  ;;  %v10720_v6 = vld [vmem:[%s16604_s1 + $0x60] ss:$8 sps:$4 sm:$0xff]   ;;  %v10722_v8 = vld [vmem:[%s16604_s1 + $0x54] ss:$8 sps:$4 sm:$0xff]   ;;  %v10726_v10 = vld [vmem:[%s16604_s1 + $0x50] ss:$8 sps:$4 sm:$0xff]   ;;  %v1273_v43 = vunpack.c.0.s8 %v1272_v38 }
   0x4   :  { %7933 = vmatpush1.bf16.msra.mxu1 %v10715_v3  ;;  %7893 = vmatprep.subr.bf16.mxu0 %v10716_v4  ;;  %v10721_v7 = vld [vmem:[%s16604_s1 + $0x160] ss:$8 sps:$4 sm:$0xff]   ;;  %v10724_v9 = vld [vmem:[%s16604_s1 + $0x154] ss:$8 sps:$4 sm:$0xff]   ;;  %v10727_v11 = vld [vmem:[%s16604_s1 + $0x150] ss:$8 sps:$4 sm:$0xff]  }
   0x5   :  { %7934 = vmatprep.subr.bf16.mxu1 %v10718_v5  ;;  %v10728_v12 = vld [vmem:[%s16604_s1 + $0x44] ss:$8 sps:$4 sm:$0xff]   ;;  %v10732_v14 = vld [vmem:[%s16604_s1 + $0x40] ss:$8 sps:$4 sm:$0xff]   ;;  %v10734_v16 = vld [vmem:[%s16604_s1 + $0x34] ss:$8 sps:$4 sm:$0xff]  }
   0x6   :  { %v10730_v13 = vld [vmem:[%s16604_s1 + $0x144] ss:$8 sps:$4 sm:$0xff]   ;;  %v10733_v15 = vld [vmem:[%s16604_s1 + $0x140] ss:$8 sps:$4 sm:$0xff]   ;;  %v10736_v17 = vld [vmem:[%s16604_s1 + $0x134] ss:$8 sps:$4 sm:$0xff]  }
   0x7   :  { %7894 = vmatpush1.bf16.msra.mxu0 %v10720_v6  ;;  %v10738_v18 = vld [vmem:[%s16604_s1 + $0x30] ss:$8 sps:$4 sm:$0xff]   ;;  %v10740_v20 = vld [vmem:[%s16604_s1 + $0x24] ss:$8 sps:$4 sm:$0xff]   ;;  %v10744_v22 = vld [vmem:[%s16604_s1 + $0x20] ss:$8 sps:$4 sm:$0xff]  }
   0x8   :  { %7935 = vmatpush1.bf16.msra.mxu1 %v10721_v7  ;;  %7895 = vmatprep.subr.bf16.mxu0 %v10722_v8  ;;  %v10739_v19 = vld [vmem:[%s16604_s1 + $0x130] ss:$8 sps:$4 sm:$0xff]   ;;  %v10742_v21 = vld [vmem:[%s16604_s1 + $0x124] ss:$8 sps:$4 sm:$0xff]   ;;  %v10745_v23 = vld [vmem:[%s16604_s1 + $0x120] ss:$8 sps:$4 sm:$0xff]  }
   0x9   :  { %7936 = vmatprep.subr.bf16.mxu1 %v10724_v9  ;;  %v10746_v24 = vld [vmem:[%s16604_s1 + $0x14] ss:$8 sps:$4 sm:$0xff]   ;;  %v10750_v26 = vld [vmem:[%s16604_s1 + $0x10] ss:$8 sps:$4 sm:$0xff]   ;;  %v10752_v28 = vld [vmem:[%s16604_s1 + $0x4] ss:$8 sps:$4 sm:$0xff]  }
   0xa   :  { %v10748_v25 = vld [vmem:[%s16604_s1 + $0x114] ss:$8 sps:$4 sm:$0xff]   ;;  %v10751_v27 = vld [vmem:[%s16604_s1 + $0x110] ss:$8 sps:$4 sm:$0xff]   ;;  %v10754_v29 = vld [vmem:[%s16604_s1 + $0x104] ss:$8 sps:$4 sm:$0xff]  }
   0xb   :  { %7896 = vmatpush1.bf16.msra.mxu0 %v10726_v10  ;;  %v10756_v30 = vld [vmem:[%s16604_s1] ss:$8 sps:$4 sm:$0xff]   ;;  %v10758_v32 = vld [vmem:[%s16604_s1 + $0xf4] ss:$8 sps:$4 sm:$0xff]   ;;  %v10762_v34 = vld [vmem:[%s16604_s1 + $0xf0] ss:$8 sps:$4 sm:$0xff]  }
   0xc   :  { %7937 = vmatpush1.bf16.msra.mxu1 %v10727_v11  ;;  %7897 = vmatprep.subr.bf16.mxu0 %v10728_v12  ;;  %v10757_v31 = vld [vmem:[%s16604_s1 + $0x100] ss:$8 sps:$4 sm:$0xff]   ;;  %v10760_v33 = vld [vmem:[%s16604_s1 + $0x1f4] ss:$8 sps:$4 sm:$0xff]   ;;  %v10763_v35 = vld [vmem:[%s16604_s1 + $0x1f0] ss:$8 sps:$4 sm:$0xff]  }
   0xd   :  { %7938 = vmatprep.subr.bf16.mxu1 %v10730_v13  ;;  %v10764_v39 = vld [vmem:[%s16604_s1 + $0xe4] ss:$8 sps:$4 sm:$0xff]   ;;  %v10768_v41 = vld [vmem:[%s16604_s1 + $0xe0] ss:$8 sps:$4 sm:$0xff]   ;;  %v12744_v42 = vshrl.u32 %v1250_v36, 7 }
   0xe   :  { %v10766_v40 = vld [vmem:[%s16604_s1 + $0x1e4] ss:$8 sps:$4 sm:$0xff]   ;;  %v10769_v44 = vld [vmem:[%s16604_s1 + $0x1e0] ss:$8 sps:$4 sm:$0xff]   ;;  %v10770_v45 = vld [vmem:[%s16604_s1 + $0xd4] ss:$8 sps:$4 sm:$0xff]  }
   0xf   :  { %7898 = vmatpush1.bf16.msra.mxu0 %v10732_v14  ;;  %v10772_v46 = vld [vmem:[%s16604_s1 + $0x1d4] ss:$8 sps:$4 sm:$0xff]   ;;  %v10774_v47 = vld [vmem:[%s16604_s1 + $0xd0] ss:$8 sps:$4 sm:$0xff]   ;;  %v12762_v49 = vsub.s32 %v1273_v43, %v12744_v42  ;;  %v10776_v50 = vld [vmem:[%s16604_s1 + $0xc4] ss:$8 sps:$4 sm:$0xff]  }
  0x10   :  { %7939 = vmatpush1.bf16.msra.mxu1 %v10733_v15  ;;  %7899 = vmatprep.subr.bf16.mxu0 %v10734_v16  ;;  %v10775_v48 = vld [vmem:[%s16604_s1 + $0x1d0] ss:$8 sps:$4 sm:$0xff]   ;;  %v10778_v51 = vld [vmem:[%s16604_s1 + $0x1c4] ss:$8 sps:$4 sm:$0xff]   ;;  %v10780_v53 = vld [vmem:[%s16604_s1 + $0xc0] ss:$8 sps:$4 sm:$0xff]  }
  0x11   :  { %7940 = vmatprep.subr.bf16.mxu1 %v10736_v17  ;;  %v22_v52 = vld [vmem:[%s16603_s0] sm:$0xff]  ;;  %v10782_v56 = vld [vmem:[%s16604_s1 + $0xb4] ss:$8 sps:$4 sm:$0xff]   ;;  %v10786_v59 = vld [vmem:[%s16604_s1 + $0xb0] ss:$8 sps:$4 sm:$0xff]  }
  0x12   :  { %v1277_v54 = vrot.slane %v22_v52, %v12762_v49  ;;  %v10781_v55 = vld [vmem:[%s16604_s1 + $0x1c0] ss:$8 sps:$4 sm:$0xff]   ;;  %v10784_v57 = vld [vmem:[%s16604_s1 + $0x1b4] ss:$8 sps:$4 sm:$0xff]   ;;  %v10787_v61 = vld [vmem:[%s16604_s1 + $0x1b0] ss:$8 sps:$4 sm:$0xff]   ;;  %v1270_v1 = vcombine.high %v22_v52, %v22_v52 }
  0x13   :  { %7900 = vmatpush1.bf16.msra.mxu0 %v10738_v18  ;;  %v10788_v62 = vld [vmem:[%s16604_s1 + $0xa4] ss:$8 sps:$4 sm:$0xff]   ;;  %v10792_v2 = vld [vmem:[%s16604_s1 + $0xa0] ss:$8 sps:$4 sm:$0xff]   ;;  %v10794_v4 = vld [vmem:[%s16604_s1 + $0x94] ss:$8 sps:$4 sm:$0xff]  }
  0x14   :  { %7941 = vmatpush1.bf16.msra.mxu1 %v10739_v19  ;;  %7901 = vmatprep.subr.bf16.mxu0 %v10740_v20  ;;  %v1285_v58 = vcombine.high %v1277_v54, %v1277_v54  ;;  %v10790_v63 = vld [vmem:[%s16604_s1 + $0x1a4] ss:$8 sps:$4 sm:$0xff]   ;;  %v10793_v3 = vld [vmem:[%s16604_s1 + $0x1a0] ss:$8 sps:$4 sm:$0xff]   ;;  %v10796_v5 = vld [vmem:[%s16604_s1 + $0x194] ss:$8 sps:$4 sm:$0xff]   ;;  %v12812_v6 = vrot.slane %v1270_v1, %v12762_v49  ;;  %v1293_v13 = vrot.slane %v1277_v54, %v12762_v49 }
  0x15   :  { %7942 = vmatprep.subr.bf16.mxu1 %v10742_v21  ;;  %v10798_v7 = vld [vmem:[%s16604_s1 + $0x90] ss:$8 sps:$4 sm:$0xff]   ;;  %v10800_v9 = vld [vmem:[%s16604_s1 + $0x84] ss:$8 sps:$4 sm:$0xff]   ;;  %v10804_v12 = vld [vmem:[%s16604_s1 + $0x80] ss:$8 sps:$4 sm:$0xff]  }
  0x16   :  { %v1307_v60 = vrot.slane %v1285_v58, %v12762_v49  ;;  %v10799_v8 = vld [vmem:[%s16604_s1 + $0x190] ss:$8 sps:$4 sm:$0xff]   ;;  %v10802_v10 = vld [vmem:[%s16604_s1 + $0x184] ss:$8 sps:$4 sm:$0xff]   ;;  %v1286_v11 = vcombine.high %v12812_v6, %v12812_v6  ;;  %v10805_v14 = vld [vmem:[%s16604_s1 + $0x180] ss:$8 sps:$4 sm:$0xff]   ;;  %v1315_v18 = vcombine.high %v1293_v13, %v1293_v13 }
  0x17   :  { %7902 = vmatpush1.bf16.msra.mxu0 %v10744_v22  ;;  %v10809_v15 = vld [vmem:[%s16604_s1 + $0x274] ss:$8 sps:$4 sm:$0xff]   ;;  %v10807_v19 = vld [vmem:[%s16604_s1 + $0x270] ss:$8 sps:$4 sm:$0xff]   ;;  %v10815_v21 = vld [vmem:[%s16604_s1 + $0x264] ss:$8 sps:$4 sm:$0xff]  }
  0x18   :  { %7943 = vmatpush1.bf16.msra.mxu1 %v10745_v23  ;;  %7903 = vmatprep.subr.bf16.mxu0 %v10746_v24  ;;  %v1317_v0 = vcombine.high %v1307_v60, %v1307_v60  ;;  %v10812_v16 = vld [vmem:[%s16604_s1 + $0x374] ss:$8 sps:$4 sm:$0xff]   ;;  %v1314_v17 = vrot.slane %v1286_v11, %v12762_v49  ;;  %v10810_v20 = vld [vmem:[%s16604_s1 + $0x370] ss:$8 sps:$4 sm:$0xff]   ;;  %v10818_v22 = vld [vmem:[%s16604_s1 + $0x364] ss:$8 sps:$4 sm:$0xff]  }
  0x19   :  { %7944 = vmatprep.subr.bf16.mxu1 %v10748_v25  ;;  %7923 = vmatprep.mubr.bf16.mxu0 %v1307_v60  ;;  %v10813_v24 = vld [vmem:[%s16604_s1 + $0x260] ss:$8 sps:$4 sm:$0xff]   ;;  %v10831_v36 = vld [vmem:[%s16604_s1 + $0x230] ss:$8 sps:$4 sm:$0xff]   ;;  %v10839_v38 = vld [vmem:[%s16604_s1 + $0x224] ss:$8 sps:$4 sm:$0xff]  }
  0x1a   :  { %7964 = vmatprep.mubr.bf16.mxu1 %v1317_v0  ;;  %v1318_v23 = vcombine.high %v1314_v17, %v1314_v17  ;;  %v10816_v25 = vld [vmem:[%s16604_s1 + $0x360] ss:$8 sps:$4 sm:$0xff]   ;;  %v10834_v37 = vld [vmem:[%s16604_s1 + $0x330] ss:$8 sps:$4 sm:$0xff]   ;;  %v10845_v43 = vld [vmem:[%s16604_s1 + $0x214] ss:$8 sps:$4 sm:$0xff]  }
  0x1b   :  { %7904 = vmatpush1.bf16.msra.mxu0 %v10750_v26  ;;  %v10821_v26 = vld [vmem:[%s16604_s1 + $0x254] ss:$8 sps:$4 sm:$0xff]   ;;  %v10855_v54 = vld [vmem:[%s16604_s1 + $0x2f0] ss:$8 sps:$4 sm:$0xff]   ;;  %v10861_v58 = vld [vmem:[%s16604_s1 + $0x2e0] ss:$8 sps:$4 sm:$0xff]  }
  0x1c   :  { %7945 = vmatpush1.bf16.msra.mxu1 %v10751_v27  ;;  %7905 = vmatprep.subr.bf16.mxu0 %v10752_v28  ;;  %v10824_v27 = vld [vmem:[%s16604_s1 + $0x354] ss:$8 sps:$4 sm:$0xff]   ;;  %v10819_v28 = vld [vmem:[%s16604_s1 + $0x250] ss:$8 sps:$4 sm:$0xff]   ;;  %v10875_v0 = vld [vmem:[%s16604_s1 + $0x2c4] ss:$8 sps:$4 sm:$0xff]  }
  0x1d   :  { %7946 = vmatprep.subr.bf16.mxu1 %v10754_v29  ;;  %v10822_v29 = vld [vmem:[%s16604_s1 + $0x350] ss:$8 sps:$4 sm:$0xff]   ;;  %v10857_v52 = vld [vmem:[%s16604_s1 + $0x2f4] ss:$8 sps:$4 sm:$0xff]   ;;  %v10878_v1 = vld [vmem:[%s16604_s1 + $0x3c4] ss:$8 sps:$4 sm:$0xff]  }
  0x1e   :  { %v10869_v60 = vld [vmem:[%s16604_s1 + $0x2d4] ss:$8 sps:$4 sm:$0xff]   ;;  %v10885_v11 = vld [vmem:[%s16604_s1 + $0x2a0] ss:$8 sps:$4 sm:$0xff]  }
  0x1f   :  { %7906 = vmatpush1.bf16.msra.mxu0 %v10756_v30  ;;  %v10827_v30 = vld [vmem:[%s16604_s1 + $0x244] ss:$8 sps:$4 sm:$0xff]  }
  0x20   :  { %7947 = vmatpush1.bf16.msra.mxu1 %v10757_v31  ;;  %7907 = vmatprep.subr.bf16.mxu0 %v10758_v32  ;;  %v10830_v31 = vld [vmem:[%s16604_s1 + $0x344] ss:$8 sps:$4 sm:$0xff]   ;;  %v10825_v32 = vld [vmem:[%s16604_s1 + $0x240] ss:$8 sps:$4 sm:$0xff]  }
  0x21   :  { %7948 = vmatprep.subr.bf16.mxu1 %v10760_v33  ;;  %v10828_v33 = vld [vmem:[%s16604_s1 + $0x340] ss:$8 sps:$4 sm:$0xff]  }
  0x23   :  { %7908 = vmatpush2.bf16.msra.mxu0 %v10762_v34  ;;  %v10833_v34 = vld [vmem:[%s16604_s1 + $0x234] ss:$8 sps:$4 sm:$0xff]  }
  0x24   :  { %7949 = vmatpush2.bf16.msra.mxu1 %v10763_v35  ;;  %7909 = vmatprep.subr.bf16.mxu0 %v10764_v39  ;;  %v10836_v35 = vld [vmem:[%s16604_s1 + $0x334] ss:$8 sps:$4 sm:$0xff]   ;;  %v10842_v39 = vld [vmem:[%s16604_s1 + $0x324] ss:$8 sps:$4 sm:$0xff]  }
  0x25   :  { %7950 = vmatprep.subr.bf16.mxu1 %v10766_v40  ;;  %v10837_v40 = vld [vmem:[%s16604_s1 + $0x220] ss:$8 sps:$4 sm:$0xff]  }
  0x27   :  { %7910 = vmatpush2.bf16.msra.mxu0 %v10768_v41  ;;  %v10840_v41 = vld [vmem:[%s16604_s1 + $0x320] ss:$8 sps:$4 sm:$0xff]  }
  0x28   :  { %7951 = vmatpush2.bf16.msra.mxu1 %v10769_v44  ;;  %7911 = vmatprep.subr.bf16.mxu0 %v10770_v45  ;;  %v10848_v44 = vld [vmem:[%s16604_s1 + $0x314] ss:$8 sps:$4 sm:$0xff]   ;;  %v10843_v45 = vld [vmem:[%s16604_s1 + $0x210] ss:$8 sps:$4 sm:$0xff]  }
  0x29   :  { %7952 = vmatprep.subr.bf16.mxu1 %v10772_v46  ;;  %v10846_v46 = vld [vmem:[%s16604_s1 + $0x310] ss:$8 sps:$4 sm:$0xff]  }
  0x2b   :  { %7912 = vmatpush2.bf16.msra.mxu0 %v10774_v47  ;;  %v10851_v47 = vld [vmem:[%s16604_s1 + $0x204] ss:$8 sps:$4 sm:$0xff]  }
  0x2c   :  { %7953 = vmatpush2.bf16.msra.mxu1 %v10775_v48  ;;  %7913 = vmatprep.subr.bf16.mxu0 %v10776_v50  ;;  %v10854_v48 = vld [vmem:[%s16604_s1 + $0x304] ss:$8 sps:$4 sm:$0xff]   ;;  %v10849_v50 = vld [vmem:[%s16604_s1 + $0x200] ss:$8 sps:$4 sm:$0xff]  }
  0x2d   :  { %7954 = vmatprep.subr.bf16.mxu1 %v10778_v51  ;;  %v10852_v51 = vld [vmem:[%s16604_s1 + $0x300] ss:$8 sps:$4 sm:$0xff]  }
  0x2f   :  { %7914 = vmatpush2.bf16.msra.mxu0 %v10780_v53  ;;  %v10860_v53 = vld [vmem:[%s16604_s1 + $0x3f4] ss:$8 sps:$4 sm:$0xff]  }
  0x30   :  { %7955 = vmatpush2.bf16.msra.mxu1 %v10781_v55  ;;  %7915 = vmatprep.subr.bf16.mxu0 %v10782_v56  ;;  %v10858_v55 = vld [vmem:[%s16604_s1 + $0x3f0] ss:$8 sps:$4 sm:$0xff]   ;;  %v10863_v56 = vld [vmem:[%s16604_s1 + $0x2e4] ss:$8 sps:$4 sm:$0xff]  }
  0x31   :  { %7956 = vmatprep.subr.bf16.mxu1 %v10784_v57  ;;  %v10866_v57 = vld [vmem:[%s16604_s1 + $0x3e4] ss:$8 sps:$4 sm:$0xff]  }
  0x33   :  { %7916 = vmatpush2.bf16.msra.mxu0 %v10786_v59  ;;  %v10864_v59 = vld [vmem:[%s16604_s1 + $0x3e0] ss:$8 sps:$4 sm:$0xff]  }
  0x34   :  { %7957 = vmatpush2.bf16.msra.mxu1 %v10787_v61  ;;  %7917 = vmatprep.subr.bf16.mxu0 %v10788_v62  ;;  %v10872_v61 = vld [vmem:[%s16604_s1 + $0x3d4] ss:$8 sps:$4 sm:$0xff]   ;;  %v10867_v62 = vld [vmem:[%s16604_s1 + $0x2d0] ss:$8 sps:$4 sm:$0xff]  }
  0x35   :  { %7958 = vmatprep.subr.bf16.mxu1 %v10790_v63  ;;  %v10870_v63 = vld [vmem:[%s16604_s1 + $0x3d0] ss:$8 sps:$4 sm:$0xff]  }
  0x37   :  { %7918 = vmatpush2.bf16.msra.mxu0 %v10792_v2  ;;  %v10873_v2 = vld [vmem:[%s16604_s1 + $0x2c0] ss:$8 sps:$4 sm:$0xff]  }
  0x38   :  { %7959 = vmatpush2.bf16.msra.mxu1 %v10793_v3  ;;  %7919 = vmatprep.subr.bf16.mxu0 %v10794_v4  ;;  %v10876_v3 = vld [vmem:[%s16604_s1 + $0x3c0] ss:$8 sps:$4 sm:$0xff]   ;;  %v10881_v4 = vld [vmem:[%s16604_s1 + $0x2b4] ss:$8 sps:$4 sm:$0xff]  }
  0x39   :  { %7960 = vmatprep.subr.bf16.mxu1 %v10796_v5  ;;  %v10884_v5 = vld [vmem:[%s16604_s1 + $0x3b4] ss:$8 sps:$4 sm:$0xff]  }
  0x3b   :  { %7920 = vmatpush2.bf16.msra.mxu0 %v10798_v7  ;;  %v10879_v7 = vld [vmem:[%s16604_s1 + $0x2b0] ss:$8 sps:$4 sm:$0xff]  }
  0x3c   :  { %7961 = vmatpush2.bf16.msra.mxu1 %v10799_v8  ;;  %7921 = vmatprep.subr.bf16.mxu0 %v10800_v9  ;;  %v10882_v8 = vld [vmem:[%s16604_s1 + $0x3b0] ss:$8 sps:$4 sm:$0xff]   ;;  %v10887_v9 = vld [vmem:[%s16604_s1 + $0x2a4] ss:$8 sps:$4 sm:$0xff]  }
  0x3d   :  { %7962 = vmatprep.subr.bf16.mxu1 %v10802_v10  ;;  %v10890_v10 = vld [vmem:[%s16604_s1 + $0x3a4] ss:$8 sps:$4 sm:$0xff]  }
  0x3f   :  { %7922 = vmatpush2.bf16.msra.mxu0 %v10804_v12  ;;  %v10888_v12 = vld [vmem:[%s16604_s1 + $0x3a0] ss:$8 sps:$4 sm:$0xff]  }
  0x40   :  { %7963 = vmatpush2.bf16.msra.mxu1 %v10805_v14  ;;  %7973 = vmatprep.subr.bf16.mxu0 %v10809_v15  ;;  %v10896_v14 = vld [vmem:[%s16604_s1 + $0x394] ss:$8 sps:$4 sm:$0xff]   ;;  %v10891_v15 = vld [vmem:[%s16604_s1 + $0x290] ss:$8 sps:$4 sm:$0xff]  }
  0x41   :  { %8014 = vmatprep.subr.bf16.mxu1 %v10812_v16  ;;  %v10894_v16 = vld [vmem:[%s16604_s1 + $0x390] ss:$8 sps:$4 sm:$0xff]  }
  0x42   :  { %7924 = vmatmul.mubr.bf16.vlgmr.msra.gmra.mxu0 %v1293_v13  ;;  %v10893_v13 = vld [vmem:[%s16604_s1 + $0x294] ss:$8 sps:$4 sm:$0xff]  }
  0x43   :  { %7965 = vmatmul.mubr.bf16.vlgmr.msra.gmra.mxu1 %v1315_v18  ;;  %7974 = vmatpush1.bf16.msra.mxu0 %v10807_v19  ;;  %v10902_v18 = vld [vmem:[%s16604_s1 + $0x384] ss:$8 sps:$4 sm:$0xff]   ;;  %v10897_v19 = vld [vmem:[%s16604_s1 + $0x280] ss:$8 sps:$4 sm:$0xff]  }
  0x44   :  { %8015 = vmatpush1.bf16.msra.mxu1 %v10810_v20  ;;  %7975 = vmatprep.subr.bf16.mxu0 %v10815_v21  ;;  %v1300_v20 = vrot.slane %v12812_v6, %v12762_v49  ;;  %v10900_v21 = vld [vmem:[%s16604_s1 + $0x380] ss:$8 sps:$4 sm:$0xff]   ;;  %v10903_v6 = vld [vmem:[%s16604_s1 + $0x470] ss:$8 sps:$4 sm:$0xff]  }
  0x45   :  { %8016 = vmatprep.subr.bf16.mxu1 %v10818_v22  ;;  %8005 = vmatprep.mubr.bf16.mxu0 %v1314_v17  ;;  %v10899_v17 = vld [vmem:[%s16604_s1 + $0x284] ss:$8 sps:$4 sm:$0xff]   ;;  %v10905_v22 = vld [vmem:[%s16604_s1 + $0x474] ss:$8 sps:$4 sm:$0xff]  }
  0x46   :  { %8046 = vmatprep.mubr.bf16.mxu1 %v1318_v23  ;;  %v10908_v23 = vld [vmem:[%s16604_s1 + $0x574] ss:$8 sps:$4 sm:$0xff]  }
  0x47   :  { %7976 = vmatpush1.bf16.msra.mxu0 %v10813_v24  ;;  %v1316_v24 = vcombine.high %v1300_v20, %v1300_v20 }
  0x48   :  { %8017 = vmatpush1.bf16.msra.mxu1 %v10816_v25  ;;  %7977 = vmatprep.subr.bf16.mxu0 %v10821_v26  ;;  %v10906_v25 = vld [vmem:[%s16604_s1 + $0x570] ss:$8 sps:$4 sm:$0xff]   ;;  %v13045_v26 = vld [vmem:[%s16603_s0 + $0x8] sm:$0xff] }
  0x49   :  { %8018 = vmatprep.subr.bf16.mxu1 %v10824_v27  ;;  %v10911_v27 = vld [vmem:[%s16604_s1 + $0x464] ss:$8 sps:$4 sm:$0xff]  }
  0x4b   :  { %7978 = vmatpush1.bf16.msra.mxu0 %v10819_v28  ;;  %v10914_v28 = vld [vmem:[%s16604_s1 + $0x564] ss:$8 sps:$4 sm:$0xff]  }
  0x4c   :  { %8019 = vmatpush1.bf16.msra.mxu1 %v10822_v29  ;;  %7979 = vmatprep.subr.bf16.mxu0 %v10827_v30  ;;  %v13055_v29 = vrot.slane %v13045_v26, %v12762_v49 }
  0x4d   :  { %8020 = vmatprep.subr.bf16.mxu1 %v10830_v31  ;;  %v10909_v31 = vld [vmem:[%s16604_s1 + $0x460] ss:$8 sps:$4 sm:$0xff]  }
  0x4e   :  { %v1334_v30 = vcombine.high %v13055_v29, %v13055_v29 }
  0x4f   :  { %7980 = vmatpush1.bf16.msra.mxu0 %v10825_v32  ;;  %v10912_v32 = vld [vmem:[%s16604_s1 + $0x560] ss:$8 sps:$4 sm:$0xff]  }
  0x50   :  { %8021 = vmatpush1.bf16.msra.mxu1 %v10828_v33  ;;  %7981 = vmatprep.subr.bf16.mxu0 %v10833_v34  ;;  %v10917_v33 = vld [vmem:[%s16604_s1 + $0x454] ss:$8 sps:$4 sm:$0xff]  }
  0x51   :  { %8022 = vmatprep.subr.bf16.mxu1 %v10836_v35  ;;  %v10920_v34 = vld [vmem:[%s16604_s1 + $0x554] ss:$8 sps:$4 sm:$0xff]   ;;  %v1356_v35 = vrot.slane %v1334_v30, %v12762_v49 }
  0x53   :  { %7982 = vmatpush1.bf16.msra.mxu0 %v10831_v36  ;;  %v1366_v36 = vcombine.high %v1356_v35, %v1356_v35 }
  0x54   :  { %8023 = vmatpush1.bf16.msra.mxu1 %v10834_v37  ;;  %7983 = vmatprep.subr.bf16.mxu0 %v10839_v38  ;;  %v10915_v37 = vld [vmem:[%s16604_s1 + $0x450] ss:$8 sps:$4 sm:$0xff]  }
  0x55   :  { %8024 = vmatprep.subr.bf16.mxu1 %v10842_v39  ;;  %v10918_v38 = vld [vmem:[%s16604_s1 + $0x550] ss:$8 sps:$4 sm:$0xff]   ;;  %v10923_v39 = vld [vmem:[%s16604_s1 + $0x444] ss:$8 sps:$4 sm:$0xff]  }
  0x57   :  { %7984 = vmatpush1.bf16.msra.mxu0 %v10837_v40  ;;  %v10926_v40 = vld [vmem:[%s16604_s1 + $0x544] ss:$8 sps:$4 sm:$0xff]  }
  0x58   :  { %8025 = vmatpush1.bf16.msra.mxu1 %v10840_v41  ;;  %7985 = vmatprep.subr.bf16.mxu0 %v10845_v43  ;;  %v10921_v41 = vld [vmem:[%s16604_s1 + $0x440] ss:$8 sps:$4 sm:$0xff]  }
  0x59   :  { %8026 = vmatprep.subr.bf16.mxu1 %v10848_v44  ;;  %v10924_v43 = vld [vmem:[%s16604_s1 + $0x540] ss:$8 sps:$4 sm:$0xff]   ;;  %v10929_v44 = vld [vmem:[%s16604_s1 + $0x434] ss:$8 sps:$4 sm:$0xff]  }
  0x5b   :  { %7986 = vmatpush1.bf16.msra.mxu0 %v10843_v45  ;;  %v10932_v45 = vld [vmem:[%s16604_s1 + $0x534] ss:$8 sps:$4 sm:$0xff]  }
  0x5c   :  { %8027 = vmatpush1.bf16.msra.mxu1 %v10846_v46  ;;  %7987 = vmatprep.subr.bf16.mxu0 %v10851_v47  ;;  %v10927_v46 = vld [vmem:[%s16604_s1 + $0x430] ss:$8 sps:$4 sm:$0xff]  }
  0x5d   :  { %8028 = vmatprep.subr.bf16.mxu1 %v10854_v48  ;;  %v10930_v47 = vld [vmem:[%s16604_s1 + $0x530] ss:$8 sps:$4 sm:$0xff]   ;;  %v10935_v48 = vld [vmem:[%s16604_s1 + $0x424] ss:$8 sps:$4 sm:$0xff]  }
  0x5f   :  { %7988 = vmatpush1.bf16.msra.mxu0 %v10849_v50  ;;  %v10938_v50 = vld [vmem:[%s16604_s1 + $0x524] ss:$8 sps:$4 sm:$0xff]  }
  0x60   :  { %8029 = vmatpush1.bf16.msra.mxu1 %v10852_v51  ;;  %7989 = vmatprep.subr.bf16.mxu0 %v10857_v52  ;;  %v10933_v51 = vld [vmem:[%s16604_s1 + $0x420] ss:$8 sps:$4 sm:$0xff]  }
  0x61   :  { %8030 = vmatprep.subr.bf16.mxu1 %v10860_v53  ;;  %v10936_v52 = vld [vmem:[%s16604_s1 + $0x520] ss:$8 sps:$4 sm:$0xff]   ;;  %v10941_v53 = vld [vmem:[%s16604_s1 + $0x414] ss:$8 sps:$4 sm:$0xff]  }
  0x63   :  { %7990 = vmatpush2.bf16.msra.mxu0 %v10855_v54  ;;  %v10944_v54 = vld [vmem:[%s16604_s1 + $0x514] ss:$8 sps:$4 sm:$0xff]  }
  0x64   :  { %8031 = vmatpush2.bf16.msra.mxu1 %v10858_v55  ;;  %7991 = vmatprep.subr.bf16.mxu0 %v10863_v56  ;;  %v10939_v55 = vld [vmem:[%s16604_s1 + $0x410] ss:$8 sps:$4 sm:$0xff]  }
  0x65   :  { %8032 = vmatprep.subr.bf16.mxu1 %v10866_v57  ;;  %v10942_v56 = vld [vmem:[%s16604_s1 + $0x510] ss:$8 sps:$4 sm:$0xff]   ;;  %v10947_v57 = vld [vmem:[%s16604_s1 + $0x404] ss:$8 sps:$4 sm:$0xff]  }
  0x67   :  { %7992 = vmatpush2.bf16.msra.mxu0 %v10861_v58  ;;  %v10950_v58 = vld [vmem:[%s16604_s1 + $0x504] ss:$8 sps:$4 sm:$0xff]  }
  0x68   :  { %8033 = vmatpush2.bf16.msra.mxu1 %v10864_v59  ;;  %7993 = vmatprep.subr.bf16.mxu0 %v10869_v60  ;;  %v10945_v59 = vld [vmem:[%s16604_s1 + $0x400] ss:$8 sps:$4 sm:$0xff]  }
  0x69   :  { %8034 = vmatprep.subr.bf16.mxu1 %v10872_v61  ;;  %v10948_v60 = vld [vmem:[%s16604_s1 + $0x500] ss:$8 sps:$4 sm:$0xff]   ;;  %v10953_v61 = vld [vmem:[%s16604_s1 + $0x4f4] ss:$8 sps:$4 sm:$0xff]  }
  0x6b   :  { %7994 = vmatpush2.bf16.msra.mxu0 %v10867_v62  ;;  %v10956_v62 = vld [vmem:[%s16604_s1 + $0x5f4] ss:$8 sps:$4 sm:$0xff]  }
  0x6c   :  { %8035 = vmatpush2.bf16.msra.mxu1 %v10870_v63  ;;  %7995 = vmatprep.subr.bf16.mxu0 %v10875_v0  ;;  %v10951_v63 = vld [vmem:[%s16604_s1 + $0x4f0] ss:$8 sps:$4 sm:$0xff]  }
  0x6d   :  { %8036 = vmatprep.subr.bf16.mxu1 %v10878_v1  ;;  %v10954_v0 = vld [vmem:[%s16604_s1 + $0x5f0] ss:$8 sps:$4 sm:$0xff]   ;;  %v10959_v1 = vld [vmem:[%s16604_s1 + $0x4e4] ss:$8 sps:$4 sm:$0xff]  }
  0x6f   :  { %7996 = vmatpush2.bf16.msra.mxu0 %v10873_v2  ;;  %v10962_v2 = vld [vmem:[%s16604_s1 + $0x5e4] ss:$8 sps:$4 sm:$0xff]  }
  0x70   :  { %8037 = vmatpush2.bf16.msra.mxu1 %v10876_v3  ;;  %7997 = vmatprep.subr.bf16.mxu0 %v10881_v4  ;;  %v10957_v3 = vld [vmem:[%s16604_s1 + $0x4e0] ss:$8 sps:$4 sm:$0xff]  }
  0x71   :  { %8038 = vmatprep.subr.bf16.mxu1 %v10884_v5  ;;  %v10960_v4 = vld [vmem:[%s16604_s1 + $0x5e0] ss:$8 sps:$4 sm:$0xff]   ;;  %v10965_v5 = vld [vmem:[%s16604_s1 + $0x4d4] ss:$8 sps:$4 sm:$0xff]  }
  0x73   :  { %7998 = vmatpush2.bf16.msra.mxu0 %v10879_v7  ;;  %v10968_v7 = vld [vmem:[%s16604_s1 + $0x5d4] ss:$8 sps:$4 sm:$0xff]  }
  0x74   :  { %8039 = vmatpush2.bf16.msra.mxu1 %v10882_v8  ;;  %7999 = vmatprep.subr.bf16.mxu0 %v10887_v9  ;;  %v10963_v8 = vld [vmem:[%s16604_s1 + $0x4d0] ss:$8 sps:$4 sm:$0xff]  }
  0x75   :  { %8040 = vmatprep.subr.bf16.mxu1 %v10890_v10  ;;  %v10966_v9 = vld [vmem:[%s16604_s1 + $0x5d0] ss:$8 sps:$4 sm:$0xff]   ;;  %v10971_v10 = vld [vmem:[%s16604_s1 + $0x4c4] ss:$8 sps:$4 sm:$0xff]  }
  0x77   :  { %8000 = vmatpush2.bf16.msra.mxu0 %v10885_v11  ;;  %v10974_v11 = vld [vmem:[%s16604_s1 + $0x5c4] ss:$8 sps:$4 sm:$0xff]  }
  0x78   :  { %8041 = vmatpush2.bf16.msra.mxu1 %v10888_v12  ;;  %8001 = vmatprep.subr.bf16.mxu0 %v10893_v13  ;;  %v10969_v12 = vld [vmem:[%s16604_s1 + $0x4c0] ss:$8 sps:$4 sm:$0xff]  }
  0x79   :  { %8042 = vmatprep.subr.bf16.mxu1 %v10896_v14  ;;  %v10972_v13 = vld [vmem:[%s16604_s1 + $0x5c0] ss:$8 sps:$4 sm:$0xff]   ;;  %v10977_v14 = vld [vmem:[%s16604_s1 + $0x4b4] ss:$8 sps:$4 sm:$0xff]  }
  0x7b   :  { %8002 = vmatpush2.bf16.msra.mxu0 %v10891_v15  ;;  %v10980_v15 = vld [vmem:[%s16604_s1 + $0x5b4] ss:$8 sps:$4 sm:$0xff]  }
  0x7c   :  { %8043 = vmatpush2.bf16.msra.mxu1 %v10894_v16  ;;  %8003 = vmatprep.subr.bf16.mxu0 %v10899_v17  ;;  %v10975_v16 = vld [vmem:[%s16604_s1 + $0x4b0] ss:$8 sps:$4 sm:$0xff]  }
  0x7d   :  { %8044 = vmatprep.subr.bf16.mxu1 %v10902_v18  ;;  %v10978_v17 = vld [vmem:[%s16604_s1 + $0x5b0] ss:$8 sps:$4 sm:$0xff]   ;;  %v10983_v18 = vld [vmem:[%s16604_s1 + $0x4a4] ss:$8 sps:$4 sm:$0xff]  }
  0x7f   :  { %8004 = vmatpush2.bf16.msra.mxu0 %v10897_v19  ;;  %v10986_v19 = vld [vmem:[%s16604_s1 + $0x5a4] ss:$8 sps:$4 sm:$0xff]  }
  0x80   :  { %8045 = vmatpush2.bf16.msra.mxu1 %v10900_v21  ;;  %8055 = vmatprep.subr.bf16.mxu0 %v10905_v22  ;;  %v10981_v21 = vld [vmem:[%s16604_s1 + $0x4a0] ss:$8 sps:$4 sm:$0xff]  }
  0x81   :  { %8096 = vmatprep.subr.bf16.mxu1 %v10908_v23  ;;  %v10984_v22 = vld [vmem:[%s16604_s1 + $0x5a0] ss:$8 sps:$4 sm:$0xff]   ;;  %v10989_v23 = vld [vmem:[%s16604_s1 + $0x494] ss:$8 sps:$4 sm:$0xff]  }
  0x82   :  { %8006 = vmatmul.mubr.bf16.vlgmr.msra.gmra.mxu0 %v1300_v20  ;;  %v1319_v20 = vcombine.high %v13045_v26, %v13045_v26  ;;  %v10990_v26 = vld [vmem:[%s16604_s1 + $0x590] ss:$8 sps:$4 sm:$0xff]  }
  0x83   :  { %8047 = vmatmul.mubr.bf16.vlgmr.msra.gmra.mxu1 %v1316_v24  ;;  %8056 = vmatpush1.bf16.msra.mxu0 %v10903_v6  ;;  %v10992_v24 = vld [vmem:[%s16604_s1 + $0x594] ss:$8 sps:$4 sm:$0xff]  }
  0x84   :  { %8097 = vmatpush1.bf16.msra.mxu1 %v10906_v25  ;;  %8057 = vmatprep.subr.bf16.mxu0 %v10911_v27  ;;  %v13219_v6 = vrot.slane %v1319_v20, %v12762_v49  ;;  %v10987_v25 = vld [vmem:[%s16604_s1 + $0x490] ss:$8 sps:$4 sm:$0xff]   ;;  %v10995_v27 = vld [vmem:[%s16604_s1 + $0x484] ss:$8 sps:$4 sm:$0xff]  }
  0x85   :  { %8098 = vmatprep.subr.bf16.mxu1 %v10914_v28  ;;  %8087 = vmatprep.mubr.bf16.mxu0 %v1356_v35  ;;  %v10998_v28 = vld [vmem:[%s16604_s1 + $0x584] ss:$8 sps:$4 sm:$0xff]   ;;  %v11004_v35 = vld [vmem:[%s16604_s1 + $0x774] ss:$8 sps:$4 sm:$0xff]  }
  0x86   :  { %8128 = vmatprep.mubr.bf16.mxu1 %v1366_v36  ;;  %v1335_v30 = vcombine.high %v13219_v6, %v13219_v6  ;;  %v11070_v20 = vld [vmem:[%s16604_s1 + $0x7c4] ss:$8 sps:$4 sm:$0xff]  }
  0x87   :  { %8058 = vmatpush1.bf16.msra.mxu0 %v10909_v31  ;;  %v10993_v31 = vld [vmem:[%s16604_s1 + $0x480] ss:$8 sps:$4 sm:$0xff]  }
  0x88   :  { %8099 = vmatpush1.bf16.msra.mxu1 %v10912_v32  ;;  %8059 = vmatprep.subr.bf16.mxu0 %v10917_v33  ;;  %v1342_v32 = vrot.slane %v13055_v29, %v12762_v49  ;;  %v10996_v33 = vld [vmem:[%s16604_s1 + $0x580] ss:$8 sps:$4 sm:$0xff]   ;;  %v1363_v36 = vrot.slane %v1335_v30, %v12762_v49  ;;  %v10999_v29 = vld [vmem:[%s16604_s1 + $0x670] ss:$8 sps:$4 sm:$0xff]  }
  0x89   :  { %8100 = vmatprep.subr.bf16.mxu1 %v10920_v34  ;;  %v11001_v34 = vld [vmem:[%s16604_s1 + $0x674] ss:$8 sps:$4 sm:$0xff]   ;;  %v11077_v30 = vld [vmem:[%s16604_s1 + $0x6a0] ss:$8 sps:$4 sm:$0xff]  }
  0x8b   :  { %8060 = vmatpush1.bf16.msra.mxu0 %v10915_v37  ;;  %v1364_v37 = vcombine.high %v1342_v32, %v1342_v32 }
  0x8c   :  { %8101 = vmatpush1.bf16.msra.mxu1 %v10918_v38  ;;  %8061 = vmatprep.subr.bf16.mxu0 %v10923_v39  ;;  %v11002_v38 = vld [vmem:[%s16604_s1 + $0x770] ss:$8 sps:$4 sm:$0xff]   ;;  %v11007_v39 = vld [vmem:[%s16604_s1 + $0x664] ss:$8 sps:$4 sm:$0xff]  }
  0x8d   :  { %8102 = vmatprep.subr.bf16.mxu1 %v10926_v40  ;;  %v11010_v40 = vld [vmem:[%s16604_s1 + $0x764] ss:$8 sps:$4 sm:$0xff]  }
  0x8f   :  { %8062 = vmatpush1.bf16.msra.mxu0 %v10921_v41  ;;  %v1367_v41 = vcombine.high %v1363_v36, %v1363_v36 }
  0x90   :  { %8103 = vmatpush1.bf16.msra.mxu1 %v10924_v43  ;;  %8063 = vmatprep.subr.bf16.mxu0 %v10929_v44  ;;  %v11005_v43 = vld [vmem:[%s16604_s1 + $0x660] ss:$8 sps:$4 sm:$0xff]  }
  0x91   :  { %8104 = vmatprep.subr.bf16.mxu1 %v10932_v45  ;;  %v11008_v44 = vld [vmem:[%s16604_s1 + $0x760] ss:$8 sps:$4 sm:$0xff]   ;;  %v11013_v45 = vld [vmem:[%s16604_s1 + $0x654] ss:$8 sps:$4 sm:$0xff]  }
  0x93   :  { %8064 = vmatpush1.bf16.msra.mxu0 %v10927_v46  ;;  %v11016_v46 = vld [vmem:[%s16604_s1 + $0x754] ss:$8 sps:$4 sm:$0xff]  }
  0x94   :  { %8105 = vmatpush1.bf16.msra.mxu1 %v10930_v47  ;;  %8065 = vmatprep.subr.bf16.mxu0 %v10935_v48  ;;  %v11011_v47 = vld [vmem:[%s16604_s1 + $0x650] ss:$8 sps:$4 sm:$0xff]  }
  0x95   :  { %8106 = vmatprep.subr.bf16.mxu1 %v10938_v50  ;;  %v11014_v48 = vld [vmem:[%s16604_s1 + $0x750] ss:$8 sps:$4 sm:$0xff]   ;;  %v11019_v50 = vld [vmem:[%s16604_s1 + $0x644] ss:$8 sps:$4 sm:$0xff]  }
  0x97   :  { %8066 = vmatpush1.bf16.msra.mxu0 %v10933_v51  ;;  %v11022_v51 = vld [vmem:[%s16604_s1 + $0x744] ss:$8 sps:$4 sm:$0xff]  }
  0x98   :  { %8107 = vmatpush1.bf16.msra.mxu1 %v10936_v52  ;;  %8067 = vmatprep.subr.bf16.mxu0 %v10941_v53  ;;  %v11017_v52 = vld [vmem:[%s16604_s1 + $0x640] ss:$8 sps:$4 sm:$0xff]  }
  0x99   :  { %8108 = vmatprep.subr.bf16.mxu1 %v10944_v54  ;;  %v11020_v53 = vld [vmem:[%s16604_s1 + $0x740] ss:$8 sps:$4 sm:$0xff]   ;;  %v11025_v54 = vld [vmem:[%s16604_s1 + $0x634] ss:$8 sps:$4 sm:$0xff]  }
  0x9b   :  { %8068 = vmatpush1.bf16.msra.mxu0 %v10939_v55  ;;  %v11028_v55 = vld [vmem:[%s16604_s1 + $0x734] ss:$8 sps:$4 sm:$0xff]  }
  0x9c   :  { %8109 = vmatpush1.bf16.msra.mxu1 %v10942_v56  ;;  %8069 = vmatprep.subr.bf16.mxu0 %v10947_v57  ;;  %v11023_v56 = vld [vmem:[%s16604_s1 + $0x630] ss:$8 sps:$4 sm:$0xff]  }
  0x9d   :  { %8110 = vmatprep.subr.bf16.mxu1 %v10950_v58  ;;  %v11026_v57 = vld [vmem:[%s16604_s1 + $0x730] ss:$8 sps:$4 sm:$0xff]   ;;  %v11031_v58 = vld [vmem:[%s16604_s1 + $0x624] ss:$8 sps:$4 sm:$0xff]  }
  0x9f   :  { %8070 = vmatpush1.bf16.msra.mxu0 %v10945_v59  ;;  %v11034_v59 = vld [vmem:[%s16604_s1 + $0x724] ss:$8 sps:$4 sm:$0xff]  }
  0xa0   :  { %8111 = vmatpush1.bf16.msra.mxu1 %v10948_v60  ;;  %8071 = vmatprep.subr.bf16.mxu0 %v10953_v61  ;;  %v11029_v60 = vld [vmem:[%s16604_s1 + $0x620] ss:$8 sps:$4 sm:$0xff]  }
  0xa1   :  { %8112 = vmatprep.subr.bf16.mxu1 %v10956_v62  ;;  %v11032_v61 = vld [vmem:[%s16604_s1 + $0x720] ss:$8 sps:$4 sm:$0xff]   ;;  %v11037_v62 = vld [vmem:[%s16604_s1 + $0x614] ss:$8 sps:$4 sm:$0xff]  }
  0xa3   :  { %8072 = vmatpush2.bf16.msra.mxu0 %v10951_v63  ;;  %v11040_v63 = vld [vmem:[%s16604_s1 + $0x714] ss:$8 sps:$4 sm:$0xff]  }
  0xa4   :  { %8113 = vmatpush2.bf16.msra.mxu1 %v10954_v0  ;;  %8073 = vmatprep.subr.bf16.mxu0 %v10959_v1  ;;  %v11035_v0 = vld [vmem:[%s16604_s1 + $0x610] ss:$8 sps:$4 sm:$0xff]  }
  0xa5   :  { %8114 = vmatprep.subr.bf16.mxu1 %v10962_v2  ;;  %v11038_v1 = vld [vmem:[%s16604_s1 + $0x710] ss:$8 sps:$4 sm:$0xff]   ;;  %v11043_v2 = vld [vmem:[%s16604_s1 + $0x604] ss:$8 sps:$4 sm:$0xff]  }
  0xa7   :  { %8074 = vmatpush2.bf16.msra.mxu0 %v10957_v3  ;;  %v11046_v3 = vld [vmem:[%s16604_s1 + $0x704] ss:$8 sps:$4 sm:$0xff]  }
  0xa8   :  { %8115 = vmatpush2.bf16.msra.mxu1 %v10960_v4  ;;  %8075 = vmatprep.subr.bf16.mxu0 %v10965_v5  ;;  %v11041_v4 = vld [vmem:[%s16604_s1 + $0x600] ss:$8 sps:$4 sm:$0xff]  }
  0xa9   :  { %8116 = vmatprep.subr.bf16.mxu1 %v10968_v7  ;;  %v11044_v5 = vld [vmem:[%s16604_s1 + $0x700] ss:$8 sps:$4 sm:$0xff]   ;;  %v11049_v7 = vld [vmem:[%s16604_s1 + $0x6f4] ss:$8 sps:$4 sm:$0xff]  }
  0xab   :  { %8076 = vmatpush2.bf16.msra.mxu0 %v10963_v8  ;;  %v11052_v8 = vld [vmem:[%s16604_s1 + $0x7f4] ss:$8 sps:$4 sm:$0xff]  }
  0xac   :  { %8117 = vmatpush2.bf16.msra.mxu1 %v10966_v9  ;;  %8077 = vmatprep.subr.bf16.mxu0 %v10971_v10  ;;  %v11047_v9 = vld [vmem:[%s16604_s1 + $0x6f0] ss:$8 sps:$4 sm:$0xff]  }
  0xad   :  { %8118 = vmatprep.subr.bf16.mxu1 %v10974_v11  ;;  %v11050_v10 = vld [vmem:[%s16604_s1 + $0x7f0] ss:$8 sps:$4 sm:$0xff]   ;;  %v11055_v11 = vld [vmem:[%s16604_s1 + $0x6e4] ss:$8 sps:$4 sm:$0xff]  }
  0xaf   :  { %8078 = vmatpush2.bf16.msra.mxu0 %v10969_v12  ;;  %v11058_v12 = vld [vmem:[%s16604_s1 + $0x7e4] ss:$8 sps:$4 sm:$0xff]  }
  0xb0   :  { %8119 = vmatpush2.bf16.msra.mxu1 %v10972_v13  ;;  %8079 = vmatprep.subr.bf16.mxu0 %v10977_v14  ;;  %v11053_v13 = vld [vmem:[%s16604_s1 + $0x6e0] ss:$8 sps:$4 sm:$0xff]  }
  0xb1   :  { %8120 = vmatprep.subr.bf16.mxu1 %v10980_v15  ;;  %v11056_v14 = vld [vmem:[%s16604_s1 + $0x7e0] ss:$8 sps:$4 sm:$0xff]   ;;  %v11061_v15 = vld [vmem:[%s16604_s1 + $0x6d4] ss:$8 sps:$4 sm:$0xff]  }
  0xb3   :  { %8080 = vmatpush2.bf16.msra.mxu0 %v10975_v16  ;;  %v11064_v16 = vld [vmem:[%s16604_s1 + $0x7d4] ss:$8 sps:$4 sm:$0xff]  }
  0xb4   :  { %8121 = vmatpush2.bf16.msra.mxu1 %v10978_v17  ;;  %8081 = vmatprep.subr.bf16.mxu0 %v10983_v18  ;;  %v11059_v17 = vld [vmem:[%s16604_s1 + $0x6d0] ss:$8 sps:$4 sm:$0xff]  }
  0xb5   :  { %8122 = vmatprep.subr.bf16.mxu1 %v10986_v19  ;;  %v11062_v18 = vld [vmem:[%s16604_s1 + $0x7d0] ss:$8 sps:$4 sm:$0xff]   ;;  %v11067_v19 = vld [vmem:[%s16604_s1 + $0x6c4] ss:$8 sps:$4 sm:$0xff]  }
  0xb7   :  { %8082 = vmatpush2.bf16.msra.mxu0 %v10981_v21  ;;  %v11065_v21 = vld [vmem:[%s16604_s1 + $0x6c0] ss:$8 sps:$4 sm:$0xff]  }
  0xb8   :  { %8123 = vmatpush2.bf16.msra.mxu1 %v10984_v22  ;;  %8083 = vmatprep.subr.bf16.mxu0 %v10989_v23  ;;  %v11068_v22 = vld [vmem:[%s16604_s1 + $0x7c0] ss:$8 sps:$4 sm:$0xff]   ;;  %v11073_v23 = vld [vmem:[%s16604_s1 + $0x6b4] ss:$8 sps:$4 sm:$0xff]  }
  0xb9   :  { %8124 = vmatprep.subr.bf16.mxu1 %v10992_v24  ;;  %v11076_v24 = vld [vmem:[%s16604_s1 + $0x7b4] ss:$8 sps:$4 sm:$0xff]  }
  0xbb   :  { %8084 = vmatpush2.bf16.msra.mxu0 %v10987_v25  ;;  %v11071_v25 = vld [vmem:[%s16604_s1 + $0x6b0] ss:$8 sps:$4 sm:$0xff]  }
  0xbc   :  { %8125 = vmatpush2.bf16.msra.mxu1 %v10990_v26  ;;  %8085 = vmatprep.subr.bf16.mxu0 %v10995_v27  ;;  %v11074_v26 = vld [vmem:[%s16604_s1 + $0x7b0] ss:$8 sps:$4 sm:$0xff]   ;;  %v11079_v27 = vld [vmem:[%s16604_s1 + $0x6a4] ss:$8 sps:$4 sm:$0xff]  }
  0xbd   :  { %8126 = vmatprep.subr.bf16.mxu1 %v10998_v28  ;;  %v11082_v28 = vld [vmem:[%s16604_s1 + $0x7a4] ss:$8 sps:$4 sm:$0xff]  }
  0xbf   :  { %8086 = vmatpush2.bf16.msra.mxu0 %v10993_v31  ;;  %v11080_v31 = vld [vmem:[%s16604_s1 + $0x7a0] ss:$8 sps:$4 sm:$0xff]  }
  0xc0   :  { %8127 = vmatpush2.bf16.msra.mxu1 %v10996_v33  ;;  %8137 = vmatprep.subr.bf16.mxu0 %v11001_v34  ;;  %v11085_v33 = vld [vmem:[%s16604_s1 + $0x694] ss:$8 sps:$4 sm:$0xff]  }
  0xc1   :  { %8178 = vmatprep.subr.bf16.mxu1 %v11004_v35  ;;  %v11088_v34 = vld [vmem:[%s16604_s1 + $0x794] ss:$8 sps:$4 sm:$0xff]  }
  0xc2   :  { %8088 = vmatmul.mubr.bf16.vlgmr.msra.gmra.mxu0 %v1342_v32  ;;  %v13415_v32 = vld [vmem:[%s16603_s0 + $0x10] sm:$0xff] }
  0xc3   :  { %8129 = vmatmul.mubr.bf16.vlgmr.msra.gmra.mxu1 %v1364_v37  ;;  %8138 = vmatpush1.bf16.msra.mxu0 %v10999_v29  ;;  %v13425_v35 = vrot.slane %v13415_v32, %v12762_v49  ;;  %v11086_v37 = vld [vmem:[%s16604_s1 + $0x790] ss:$8 sps:$4 sm:$0xff]   ;;  %v11091_v29 = vld [vmem:[%s16604_s1 + $0x684] ss:$8 sps:$4 sm:$0xff]  }
  0xc4   :  { %8179 = vmatpush1.bf16.msra.mxu1 %v11002_v38  ;;  %8139 = vmatprep.subr.bf16.mxu0 %v11007_v39  ;;  %v11094_v38 = vld [vmem:[%s16604_s1 + $0x784] ss:$8 sps:$4 sm:$0xff]   ;;  %v11089_v39 = vld [vmem:[%s16604_s1 + $0x680] ss:$8 sps:$4 sm:$0xff]  }
  0xc5   :  { %8180 = vmatprep.subr.bf16.mxu1 %v11010_v40  ;;  %8169 = vmatprep.mubr.bf16.mxu0 %v1363_v36  ;;  %v11083_v36 = vld [vmem:[%s16604_s1 + $0x690] ss:$8 sps:$4 sm:$0xff]   ;;  %v1383_v40 = vcombine.high %v13425_v35, %v13425_v35 }
  0xc6   :  { %8210 = vmatprep.mubr.bf16.mxu1 %v1367_v41  ;;  %v11092_v41 = vld [vmem:[%s16604_s1 + $0x780] ss:$8 sps:$4 sm:$0xff]  }
  0xc7   :  { %8140 = vmatpush1.bf16.msra.mxu0 %v11005_v43  ;;  %v1248_v43 = vld [vmem:[%s16605_s2] sm:$0x3] }
  0xc8   :  { %8181 = vmatpush1.bf16.msra.mxu1 %v11008_v44  ;;  %8141 = vmatprep.subr.bf16.mxu0 %v11013_v45  ;;  %v1349_v44 = vrot.slane %v13219_v6, %v12762_v49  ;;  %v1252_v45 = vsub.s32 0, %v12744_v42  ;;  %v11096_v6 = vld [vmem:[%s16604_s1 + $0x870] ss:$8 sps:$4 sm:$0xff]  }
  0xc9   :  { %8182 = vmatprep.subr.bf16.mxu1 %v11016_v46  ;;  %v11098_v46 = vld [vmem:[%s16604_s1 + $0x874] ss:$8 sps:$4 sm:$0xff]  }
  0xcb   :  { %8142 = vmatpush1.bf16.msra.mxu0 %v11011_v47  ;;  %v11101_v47 = vld [vmem:[%s16604_s1 + $0x974] ss:$8 sps:$4 sm:$0xff]  }
  0xcc   :  { %8183 = vmatpush1.bf16.msra.mxu1 %v11014_v48  ;;  %8143 = vmatprep.subr.bf16.mxu0 %v11019_v50  ;;  %v1256_v48 = vsub.s32 1, %v12744_v42  ;;  %v1405_v50 = vrot.slane %v1383_v40, %v12762_v49  ;;  %v11107_v42 = vld [vmem:[%s16604_s1 + $0x964] ss:$8 sps:$4 sm:$0xff]   ;;  %v11150_v40 = vld [vmem:[%s16604_s1 + $0x8e0] ss:$8 sps:$4 sm:$0xff]  }
  0xcd   :  { %8184 = vmatprep.subr.bf16.mxu1 %v11022_v51  ;;  %v1365_v51 = vcombine.high %v1349_v44, %v1349_v44 }
  0xcf   :  { %8144 = vmatpush1.bf16.msra.mxu0 %v11017_v52  ;;  %v11099_v52 = vld [vmem:[%s16604_s1 + $0x970] ss:$8 sps:$4 sm:$0xff]  }
  0xd0   :  { %8185 = vmatpush1.bf16.msra.mxu1 %v11020_v53  ;;  %8145 = vmatprep.subr.bf16.mxu0 %v11025_v54  ;;  %v1253_v53 = vrot.slane %v1248_v43, %v1252_v45  ;;  %v11104_v54 = vld [vmem:[%s16604_s1 + $0x864] ss:$8 sps:$4 sm:$0xff]   ;;  %v11156_v45 = vld [vmem:[%s16604_s1 + $0x8d0] ss:$8 sps:$4 sm:$0xff]  }
  0xd1   :  { %8186 = vmatprep.subr.bf16.mxu1 %v11028_v55  ;;  %v1257_v55 = vrot.slane %v1248_v43, %v1256_v48  ;;  %v11158_v43 = vld [vmem:[%s16604_s1 + $0x8d4] ss:$8 sps:$4 sm:$0xff]   ;;  %v11167_v48 = vld [vmem:[%s16604_s1 + $0x9c4] ss:$8 sps:$4 sm:$0xff]  }
  0xd3   :  { %8146 = vmatpush1.bf16.msra.mxu0 %v11023_v56  ;;  %v1415_v56 = vcombine.high %v1405_v50, %v1405_v50 }
  0xd4   :  { %8187 = vmatpush1.bf16.msra.mxu1 %v11026_v57  ;;  %8147 = vmatprep.subr.bf16.mxu0 %v11031_v58 }
  0xd5   :  { %8188 = vmatprep.subr.bf16.mxu1 %v11034_v59  ;;  %v11102_v59 = vld [vmem:[%s16604_s1 + $0x860] ss:$8 sps:$4 sm:$0xff]  }
  0xd7   :  { %8148 = vmatpush1.bf16.msra.mxu0 %v11029_v60  ;;  %v11105_v60 = vld [vmem:[%s16604_s1 + $0x960] ss:$8 sps:$4 sm:$0xff]  }
  0xd8   :  { %8189 = vmatpush1.bf16.msra.mxu1 %v11032_v61  ;;  %8149 = vmatprep.subr.bf16.mxu0 %v11037_v62 }
  0xd9   :  { %8190 = vmatprep.subr.bf16.mxu1 %v11040_v63 }
  0xdb   :  { %8150 = vmatpush1.bf16.msra.mxu0 %v11035_v0  ;;  %v11110_v0 = vld [vmem:[%s16604_s1 + $0x854] ss:$8 sps:$4 sm:$0xff]  }
  0xdc   :  { %8191 = vmatpush1.bf16.msra.mxu1 %v11038_v1  ;;  %8151 = vmatprep.subr.bf16.mxu0 %v11043_v2  ;;  %v11113_v1 = vld [vmem:[%s16604_s1 + $0x954] ss:$8 sps:$4 sm:$0xff]  }
  0xdd   :  { %8192 = vmatprep.subr.bf16.mxu1 %v11046_v3 }
  0xdf   :  { %8152 = vmatpush1.bf16.msra.mxu0 %v11041_v4  ;;  %v11108_v4 = vld [vmem:[%s16604_s1 + $0x850] ss:$8 sps:$4 sm:$0xff]  }
  0xe0   :  { %8193 = vmatpush1.bf16.msra.mxu1 %v11044_v5  ;;  %8153 = vmatprep.subr.bf16.mxu0 %v11049_v7  ;;  %v11111_v5 = vld [vmem:[%s16604_s1 + $0x950] ss:$8 sps:$4 sm:$0xff]  }
  0xe1   :  { %8194 = vmatprep.subr.bf16.mxu1 %v11052_v8 }
  0xe3   :  { %8154 = vmatpush2.bf16.msra.mxu0 %v11047_v9 }
  0xe4   :  { %8195 = vmatpush2.bf16.msra.mxu1 %v11050_v10  ;;  %8155 = vmatprep.subr.bf16.mxu0 %v11055_v11 }
  0xe5   :  { %8196 = vmatprep.subr.bf16.mxu1 %v11058_v12  ;;  %v11116_v12 = vld [vmem:[%s16604_s1 + $0x844] ss:$8 sps:$4 sm:$0xff]  }
  0xe7   :  { %8156 = vmatpush2.bf16.msra.mxu0 %v11053_v13  ;;  %v11119_v13 = vld [vmem:[%s16604_s1 + $0x944] ss:$8 sps:$4 sm:$0xff]  }
  0xe8   :  { %8197 = vmatpush2.bf16.msra.mxu1 %v11056_v14  ;;  %8157 = vmatprep.subr.bf16.mxu0 %v11061_v15  ;;  %v11114_v14 = vld [vmem:[%s16604_s1 + $0x840] ss:$8 sps:$4 sm:$0xff]  }
  0xe9   :  { %8198 = vmatprep.subr.bf16.mxu1 %v11064_v16  ;;  %v11117_v15 = vld [vmem:[%s16604_s1 + $0x940] ss:$8 sps:$4 sm:$0xff]   ;;  %v11122_v16 = vld [vmem:[%s16604_s1 + $0x834] ss:$8 sps:$4 sm:$0xff]  }
  0xeb   :  { %8158 = vmatpush2.bf16.msra.mxu0 %v11059_v17  ;;  %v11125_v17 = vld [vmem:[%s16604_s1 + $0x934] ss:$8 sps:$4 sm:$0xff]  }
  0xec   :  { %8199 = vmatpush2.bf16.msra.mxu1 %v11062_v18  ;;  %8159 = vmatprep.subr.bf16.mxu0 %v11067_v19  ;;  %v11120_v18 = vld [vmem:[%s16604_s1 + $0x830] ss:$8 sps:$4 sm:$0xff]  }
  0xed   :  { %8200 = vmatprep.subr.bf16.mxu1 %v11070_v20  ;;  %v11123_v19 = vld [vmem:[%s16604_s1 + $0x930] ss:$8 sps:$4 sm:$0xff]   ;;  %v11128_v20 = vld [vmem:[%s16604_s1 + $0x824] ss:$8 sps:$4 sm:$0xff]  }
  0xef   :  { %8160 = vmatpush2.bf16.msra.mxu0 %v11065_v21  ;;  %v11131_v21 = vld [vmem:[%s16604_s1 + $0x924] ss:$8 sps:$4 sm:$0xff]  }
  0xf0   :  { %8201 = vmatpush2.bf16.msra.mxu1 %v11068_v22  ;;  %8161 = vmatprep.subr.bf16.mxu0 %v11073_v23  ;;  %v11126_v22 = vld [vmem:[%s16604_s1 + $0x820] ss:$8 sps:$4 sm:$0xff]  }
  0xf1   :  { %8202 = vmatprep.subr.bf16.mxu1 %v11076_v24  ;;  %v11129_v23 = vld [vmem:[%s16604_s1 + $0x920] ss:$8 sps:$4 sm:$0xff]   ;;  %v11134_v24 = vld [vmem:[%s16604_s1 + $0x814] ss:$8 sps:$4 sm:$0xff]  }
  0xf3   :  { %8162 = vmatpush2.bf16.msra.mxu0 %v11071_v25  ;;  %v11137_v25 = vld [vmem:[%s16604_s1 + $0x914] ss:$8 sps:$4 sm:$0xff]  }
  0xf4   :  { %8203 = vmatpush2.bf16.msra.mxu1 %v11074_v26  ;;  %8163 = vmatprep.subr.bf16.mxu0 %v11079_v27  ;;  %v11132_v26 = vld [vmem:[%s16604_s1 + $0x810] ss:$8 sps:$4 sm:$0xff]  }
  0xf5   :  { %8204 = vmatprep.subr.bf16.mxu1 %v11082_v28  ;;  %v11135_v27 = vld [vmem:[%s16604_s1 + $0x910] ss:$8 sps:$4 sm:$0xff]   ;;  %v11140_v28 = vld [vmem:[%s16604_s1 + $0x804] ss:$8 sps:$4 sm:$0xff]  }
  0xf7   :  { %8164 = vmatpush2.bf16.msra.mxu0 %v11077_v30  ;;  %v11143_v30 = vld [vmem:[%s16604_s1 + $0x904] ss:$8 sps:$4 sm:$0xff]  }
  0xf8   :  { %8205 = vmatpush2.bf16.msra.mxu1 %v11080_v31  ;;  %8165 = vmatprep.subr.bf16.mxu0 %v11085_v33  ;;  %v11138_v31 = vld [vmem:[%s16604_s1 + $0x800] ss:$8 sps:$4 sm:$0xff]  }
  0xf9   :  { %8206 = vmatprep.subr.bf16.mxu1 %v11088_v34  ;;  %v11141_v33 = vld [vmem:[%s16604_s1 + $0x900] ss:$8 sps:$4 sm:$0xff]   ;;  %v11146_v34 = vld [vmem:[%s16604_s1 + $0x8f4] ss:$8 sps:$4 sm:$0xff]  }
  0xfb   :  { %8166 = vmatpush2.bf16.msra.mxu0 %v11083_v36  ;;  %v11149_v36 = vld [vmem:[%s16604_s1 + $0x9f4] ss:$8 sps:$4 sm:$0xff]  }
  0xfc   :  { %8207 = vmatpush2.bf16.msra.mxu1 %v11086_v37  ;;  %8167 = vmatprep.subr.bf16.mxu0 %v11091_v29  ;;  %v11144_v37 = vld [vmem:[%s16604_s1 + $0x8f0] ss:$8 sps:$4 sm:$0xff]  }
  0xfd   :  { %8208 = vmatprep.subr.bf16.mxu1 %v11094_v38  ;;  %v11147_v29 = vld [vmem:[%s16604_s1 + $0x9f0] ss:$8 sps:$4 sm:$0xff]   ;;  %v11152_v38 = vld [vmem:[%s16604_s1 + $0x8e4] ss:$8 sps:$4 sm:$0xff]  }
  0xff   :  { %8168 = vmatpush2.bf16.msra.mxu0 %v11089_v39  ;;  %v11155_v39 = vld [vmem:[%s16604_s1 + $0x9e4] ss:$8 sps:$4 sm:$0xff]  }
 0x100   :  { %8209 = vmatpush2.bf16.msra.mxu1 %v11092_v41  ;;  %8219 = vmatprep.subr.bf16.mxu0 %v11098_v46  ;;  %v11153_v41 = vld [vmem:[%s16604_s1 + $0x9e0] ss:$8 sps:$4 sm:$0xff]   ;;  %v11159_v46 = vld [vmem:[%s16604_s1 + $0x9d0] ss:$8 sps:$4 sm:$0xff]  }
 0x101   :  { %8260 = vmatprep.subr.bf16.mxu1 %v11101_v47  ;;  %v11164_v47 = vld [vmem:[%s16604_s1 + $0x8c4] ss:$8 sps:$4 sm:$0xff]  }
 0x102   :  { %v7925_v57 = vpop.f32.mrf.mxu0  ;;  %8170 = vmatmul.mubr.bf16.vlgmr.msra.gmra.mxu0 %v1349_v44  ;;  %v11161_v44 = vld [vmem:[%s16604_s1 + $0x9d4] ss:$8 sps:$4 sm:$0xff]  }
 0x103   :  { %v7966_v58 = vpop.f32.mrf.mxu1  ;;  %8211 = vmatmul.mubr.bf16.vlgmr.msra.gmra.mxu1 %v1365_v51  ;;  %v7926_v61 = vadd.f32 %v7925_v57, %v1253_v53  ;;  %8220 = vmatpush1.bf16.msra.mxu0 %v11096_v6  ;;  %v11165_v51 = vld [vmem:[%s16604_s1 + $0x9c0] ss:$8 sps:$4 sm:$0xff]   ;;  %v11170_v6 = vld [vmem:[%s16604_s1 + $0x8b4] ss:$8 sps:$4 sm:$0xff]   ;;  %v11168_v53 = vld [vmem:[%s16604_s1 + $0x8b0] ss:$8 sps:$4 sm:$0xff]  }
 0x104   :  { %8261 = vmatpush1.bf16.msra.mxu1 %v11099_v52  ;;  %v7927_v62 = vpop.f32.mrf.mxu0  ;;  %8221 = vmatprep.subr.bf16.mxu0 %v11104_v54  ;;  %v11173_v52 = vld [vmem:[%s16604_s1 + $0x9b4] ss:$8 sps:$4 sm:$0xff]   ;;  %v11171_v54 = vld [vmem:[%s16604_s1 + $0x9b0] ss:$8 sps:$4 sm:$0xff]   ;;  %v11174_v57 = vld [vmem:[%s16604_s1 + $0x8a0] ss:$8 sps:$4 sm:$0xff]  }
 0x105   :  { %v7968_v63 = vpop.f32.mrf.mxu1  ;;  %8262 = vmatprep.subr.bf16.mxu1 %v11107_v42  ;;  %v13485_v2 = vadd.f32 %v7966_v58, %v7926_v61  ;;  %v7928_v3 = vadd.f32 %v7927_v62, %v1257_v55  ;;  %8251 = vmatprep.mubr.bf16.mxu0 %v1405_v50  ;;  %v11162_v50 = vld [vmem:[%s16604_s1 + $0x8c0] ss:$8 sps:$4 sm:$0xff]   ;;  %v11176_v42 = vld [vmem:[%s16604_s1 + $0x8a4] ss:$8 sps:$4 sm:$0xff]   ;;  %v11180_v61 = vld [vmem:[%s16604_s1 + $0x890] ss:$8 sps:$4 sm:$0xff]  }
 0x106   :  { %8292 = vmatprep.mubr.bf16.mxu1 %v1415_v56  ;;  %v7929_v7 = vpop.f32.mrf.mxu0  ;;  %v11179_v55 = vld [vmem:[%s16604_s1 + $0x9a4] ss:$8 sps:$4 sm:$0xff]   ;;  %v1368_v56 = vcombine.high %v13415_v32, %v13415_v32  ;;  %v11177_v58 = vld [vmem:[%s16604_s1 + $0x9a0] ss:$8 sps:$4 sm:$0xff]   ;;  %v11185_v32 = vld [vmem:[%s16604_s1 + $0x994] ss:$8 sps:$4 sm:$0xff]  }
 0x107   :  { %v7970_v8 = vpop.f32.mrf.mxu1  ;;  %v13493_v9 = vadd.f32 %v7968_v63, %v7928_v3  ;;  %8222 = vmatpush1.bf16.msra.mxu0 %v11102_v59  ;;  %v11182_v59 = vld [vmem:[%s16604_s1 + $0x894] ss:$8 sps:$4 sm:$0xff]   ;;  %v11183_v62 = vld [vmem:[%s16604_s1 + $0x990] ss:$8 sps:$4 sm:$0xff]   ;;  %v11188_v63 = vld [vmem:[%s16604_s1 + $0x884] ss:$8 sps:$4 sm:$0xff]   ;;  %v1391_v3 = vrot.slane %v13425_v35, %v12762_v49 }
 0x108   :  { %8263 = vmatpush1.bf16.msra.mxu1 %v11105_v60  ;;  %v7930_v10 = vpop.f32.mrf.mxu0  ;;  %8223 = vmatprep.subr.bf16.mxu0 %v11110_v0  ;;  %v13636_v60 = vrot.slane %v1368_v56, %v12762_v49  ;;  %v11191_v0 = vld [vmem:[%s16604_s1 + $0x984] ss:$8 sps:$4 sm:$0xff]   ;;  %v11194_v7 = vld [vmem:[%s16604_s1 + $0xa74] ss:$8 sps:$4 sm:$0xff]   ;;  %v11192_v8 = vld [vmem:[%s16604_s1 + $0xa70] ss:$8 sps:$4 sm:$0xff]  }
 0x109   :  { %v7971_v11 = vpop.f32.mrf.mxu1  ;;  %8264 = vmatprep.subr.bf16.mxu1 %v11113_v1  ;;  %v11197_v35 = vld [vmem:[%s16604_s1 + $0xb74] ss:$8 sps:$4 sm:$0xff]   ;;  %v11195_v10 = vld [vmem:[%s16604_s1 + $0xb70] ss:$8 sps:$4 sm:$0xff]  }
 0x10a   :  { %v1384_v1 = vcombine.high %v13636_v60, %v13636_v60  ;;  %v11240_v56 = vld [vmem:[%s16604_s1 + $0xaf0] ss:$8 sps:$4 sm:$0xff]  }
 0x10b   :  { %8224 = vmatpush1.bf16.msra.mxu0 %v11108_v4  ;;  %v11186_v4 = vld [vmem:[%s16604_s1 + $0x880] ss:$8 sps:$4 sm:$0xff]  }
 0x10c   :  { %8265 = vmatpush1.bf16.msra.mxu1 %v11111_v5  ;;  %8225 = vmatprep.subr.bf16.mxu0 %v11116_v12  ;;  %v11189_v5 = vld [vmem:[%s16604_s1 + $0x980] ss:$8 sps:$4 sm:$0xff]   ;;  %v1412_v11 = vrot.slane %v1384_v1, %v12762_v49  ;;  %v1413_v12 = vcombine.high %v1391_v3, %v1391_v3  ;;  %v11255_v1 = vld [vmem:[%s16604_s1 + $0xbd0] ss:$8 sps:$4 sm:$0xff]  }
 0x10d   :  { %8266 = vmatprep.subr.bf16.mxu1 %v11119_v13  ;;  %v11200_v13 = vld [vmem:[%s16604_s1 + $0xa64] ss:$8 sps:$4 sm:$0xff]  }
 0x10f   :  { %8226 = vmatpush1.bf16.msra.mxu0 %v11114_v14  ;;  %v11203_v14 = vld [vmem:[%s16604_s1 + $0xb64] ss:$8 sps:$4 sm:$0xff]  }
 0x110   :  { %8267 = vmatpush1.bf16.msra.mxu1 %v11117_v15  ;;  %8227 = vmatprep.subr.bf16.mxu0 %v11122_v16  ;;  %v11198_v15 = vld [vmem:[%s16604_s1 + $0xa60] ss:$8 sps:$4 sm:$0xff]  }
 0x111   :  { %8268 = vmatprep.subr.bf16.mxu1 %v11125_v17  ;;  %v11201_v16 = vld [vmem:[%s16604_s1 + $0xb60] ss:$8 sps:$4 sm:$0xff]   ;;  %v1416_v17 = vcombine.high %v1412_v11, %v1412_v11 }
 0x113   :  { %8228 = vmatpush1.bf16.msra.mxu0 %v11120_v18 }
 0x114   :  { %8269 = vmatpush1.bf16.msra.mxu1 %v11123_v19  ;;  %8229 = vmatprep.subr.bf16.mxu0 %v11128_v20 }
 0x115   :  { %8270 = vmatprep.subr.bf16.mxu1 %v11131_v21 }
 0x117   :  { %8230 = vmatpush1.bf16.msra.mxu0 %v11126_v22 }
 0x118   :  { %8271 = vmatpush1.bf16.msra.mxu1 %v11129_v23  ;;  %8231 = vmatprep.subr.bf16.mxu0 %v11134_v24  ;;  %v11206_v23 = vld [vmem:[%s16604_s1 + $0xa54] ss:$8 sps:$4 sm:$0xff]  }
 0x119   :  { %8272 = vmatprep.subr.bf16.mxu1 %v11137_v25  ;;  %v11209_v24 = vld [vmem:[%s16604_s1 + $0xb54] ss:$8 sps:$4 sm:$0xff]  }
 0x11b   :  { %8232 = vmatpush1.bf16.msra.mxu0 %v11132_v26 }
 0x11c   :  { %8273 = vmatpush1.bf16.msra.mxu1 %v11135_v27  ;;  %8233 = vmatprep.subr.bf16.mxu0 %v11140_v28  ;;  %v11207_v27 = vld [vmem:[%s16604_s1 + $0xb50] ss:$8 sps:$4 sm:$0xff]  }
 0x11d   :  { %8274 = vmatprep.subr.bf16.mxu1 %v11143_v30 }
 0x11f   :  { %8234 = vmatpush1.bf16.msra.mxu0 %v11138_v31 }
 0x120   :  { %8275 = vmatpush1.bf16.msra.mxu1 %v11141_v33  ;;  %8235 = vmatprep.subr.bf16.mxu0 %v11146_v34 }
 0x121   :  { %8276 = vmatprep.subr.bf16.mxu1 %v11149_v36  ;;  %v11215_v36 = vld [vmem:[%s16604_s1 + $0xb44] ss:$8 sps:$4 sm:$0xff]  }
 0x123   :  { %8236 = vmatpush2.bf16.msra.mxu0 %v11144_v37  ;;  %v11210_v37 = vld [vmem:[%s16604_s1 + $0xa40] ss:$8 sps:$4 sm:$0xff]  }
 0x124   :  { %8277 = vmatpush2.bf16.msra.mxu1 %v11147_v29  ;;  %8237 = vmatprep.subr.bf16.mxu0 %v11152_v38  ;;  %v11213_v29 = vld [vmem:[%s16604_s1 + $0xb40] ss:$8 sps:$4 sm:$0xff]   ;;  %v11218_v38 = vld [vmem:[%s16604_s1 + $0xa34] ss:$8 sps:$4 sm:$0xff]  }
 0x125   :  { %8278 = vmatprep.subr.bf16.mxu1 %v11155_v39  ;;  %v11221_v39 = vld [vmem:[%s16604_s1 + $0xb34] ss:$8 sps:$4 sm:$0xff]  }
 0x127   :  { %8238 = vmatpush2.bf16.msra.mxu0 %v11150_v40  ;;  %v11216_v40 = vld [vmem:[%s16604_s1 + $0xa30] ss:$8 sps:$4 sm:$0xff]  }
 0x128   :  { %8279 = vmatpush2.bf16.msra.mxu1 %v11153_v41  ;;  %8239 = vmatprep.subr.bf16.mxu0 %v11158_v43  ;;  %v11219_v41 = vld [vmem:[%s16604_s1 + $0xb30] ss:$8 sps:$4 sm:$0xff]   ;;  %v11224_v43 = vld [vmem:[%s16604_s1 + $0xa24] ss:$8 sps:$4 sm:$0xff]  }
 0x129   :  { %8280 = vmatprep.subr.bf16.mxu1 %v11161_v44  ;;  %v11227_v44 = vld [vmem:[%s16604_s1 + $0xb24] ss:$8 sps:$4 sm:$0xff]  }
 0x12b   :  { %8240 = vmatpush2.bf16.msra.mxu0 %v11156_v45  ;;  %v11222_v45 = vld [vmem:[%s16604_s1 + $0xa20] ss:$8 sps:$4 sm:$0xff]  }
 0x12c   :  { %8281 = vmatpush2.bf16.msra.mxu1 %v11159_v46  ;;  %8241 = vmatprep.subr.bf16.mxu0 %v11164_v47  ;;  %v11225_v46 = vld [vmem:[%s16604_s1 + $0xb20] ss:$8 sps:$4 sm:$0xff]   ;;  %v11230_v47 = vld [vmem:[%s16604_s1 + $0xa14] ss:$8 sps:$4 sm:$0xff]  }
 0x12d   :  { %8282 = vmatprep.subr.bf16.mxu1 %v11167_v48  ;;  %v11233_v48 = vld [vmem:[%s16604_s1 + $0xb14] ss:$8 sps:$4 sm:$0xff]  }
 0x12f   :  { %8242 = vmatpush2.bf16.msra.mxu0 %v11162_v50  ;;  %v11228_v50 = vld [vmem:[%s16604_s1 + $0xa10] ss:$8 sps:$4 sm:$0xff]  }
 0x130   :  { %8283 = vmatpush2.bf16.msra.mxu1 %v11165_v51  ;;  %8243 = vmatprep.subr.bf16.mxu0 %v11170_v6  ;;  %v11231_v51 = vld [vmem:[%s16604_s1 + $0xb10] ss:$8 sps:$4 sm:$0xff]   ;;  %v11236_v6 = vld [vmem:[%s16604_s1 + $0xa04] ss:$8 sps:$4 sm:$0xff]  }
 0x131   :  { %8284 = vmatprep.subr.bf16.mxu1 %v11173_v52  ;;  %v11239_v52 = vld [vmem:[%s16604_s1 + $0xb04] ss:$8 sps:$4 sm:$0xff]  }
 0x133   :  { %8244 = vmatpush2.bf16.msra.mxu0 %v11168_v53  ;;  %v11234_v53 = vld [vmem:[%s16604_s1 + $0xa00] ss:$8 sps:$4 sm:$0xff]  }
 0x134   :  { %8285 = vmatpush2.bf16.msra.mxu1 %v11171_v54  ;;  %8245 = vmatprep.subr.bf16.mxu0 %v11176_v42  ;;  %v11237_v54 = vld [vmem:[%s16604_s1 + $0xb00] ss:$8 sps:$4 sm:$0xff]   ;;  %v11242_v42 = vld [vmem:[%s16604_s1 + $0xaf4] ss:$8 sps:$4 sm:$0xff]  }
 0x135   :  { %8286 = vmatprep.subr.bf16.mxu1 %v11179_v55  ;;  %v11245_v55 = vld [vmem:[%s16604_s1 + $0xbf4] ss:$8 sps:$4 sm:$0xff]  }
 0x137   :  { %8246 = vmatpush2.bf16.msra.mxu0 %v11174_v57  ;;  %v11243_v57 = vld [vmem:[%s16604_s1 + $0xbf0] ss:$8 sps:$4 sm:$0xff]  }
 0x138   :  { %8287 = vmatpush2.bf16.msra.mxu1 %v11177_v58  ;;  %8247 = vmatprep.subr.bf16.mxu0 %v11182_v59  ;;  %v11248_v58 = vld [vmem:[%s16604_s1 + $0xae4] ss:$8 sps:$4 sm:$0xff]  }
 0x139   :  { %8288 = vmatprep.subr.bf16.mxu1 %v11185_v32  ;;  %v11251_v59 = vld [vmem:[%s16604_s1 + $0xbe4] ss:$8 sps:$4 sm:$0xff]   ;;  %v11246_v32 = vld [vmem:[%s16604_s1 + $0xae0] ss:$8 sps:$4 sm:$0xff]  }
 0x13b   :  { %8248 = vmatpush2.bf16.msra.mxu0 %v11180_v61  ;;  %v11249_v61 = vld [vmem:[%s16604_s1 + $0xbe0] ss:$8 sps:$4 sm:$0xff]  }
 0x13c   :  { %8289 = vmatpush2.bf16.msra.mxu1 %v11183_v62  ;;  %8249 = vmatprep.subr.bf16.mxu0 %v11188_v63  ;;  %v11254_v62 = vld [vmem:[%s16604_s1 + $0xad4] ss:$8 sps:$4 sm:$0xff]  }
 0x13d   :  { %8290 = vmatprep.subr.bf16.mxu1 %v11191_v0  ;;  %v11257_v63 = vld [vmem:[%s16604_s1 + $0xbd4] ss:$8 sps:$4 sm:$0xff]   ;;  %v11252_v0 = vld [vmem:[%s16604_s1 + $0xad0] ss:$8 sps:$4 sm:$0xff]  }
 0x13f   :  { %8250 = vmatpush2.bf16.msra.mxu0 %v11186_v4  ;;  %v11263_v4 = vld [vmem:[%s16604_s1 + $0xbc4] ss:$8 sps:$4 sm:$0xff]  }
 0x140   :  { %8291 = vmatpush2.bf16.msra.mxu1 %v11189_v5  ;;  %8301 = vmatprep.subr.bf16.mxu0 %v11194_v7  ;;  %v11258_v5 = vld [vmem:[%s16604_s1 + $0xac0] ss:$8 sps:$4 sm:$0xff]  }
 0x141   :  { %8342 = vmatprep.subr.bf16.mxu1 %v11197_v35  ;;  %v11261_v7 = vld [vmem:[%s16604_s1 + $0xbc0] ss:$8 sps:$4 sm:$0xff]   ;;  %v11266_v35 = vld [vmem:[%s16604_s1 + $0xab4] ss:$8 sps:$4 sm:$0xff]  }
 0x142   :  { %v8007_v18 = vpop.f32.mrf.mxu0  ;;  %8252 = vmatmul.mubr.bf16.vlgmr.msra.gmra.mxu0 %v1391_v3  ;;  %v11260_v3 = vld [vmem:[%s16604_s1 + $0xac4] ss:$8 sps:$4 sm:$0xff]  }
 0x143   :  { %v8048_v19 = vpop.f32.mrf.mxu1  ;;  %8293 = vmatmul.mubr.bf16.vlgmr.msra.gmra.mxu1 %v1413_v12  ;;  %v8008_v20 = vadd.f32 %v8007_v18, %v13485_v2  ;;  %8302 = vmatpush1.bf16.msra.mxu0 %v11192_v8  ;;  %v11204_v2 = vld [vmem:[%s16604_s1 + $0xa50] ss:$8 sps:$4 sm:$0xff]   ;;  %v11269_v8 = vld [vmem:[%s16604_s1 + $0xbb4] ss:$8 sps:$4 sm:$0xff]   ;;  %v11272_v12 = vld [vmem:[%s16604_s1 + $0xaa4] ss:$8 sps:$4 sm:$0xff]  }
 0x144   :  { %8343 = vmatpush1.bf16.msra.mxu1 %v11195_v10  ;;  %v8009_v21 = vpop.f32.mrf.mxu0  ;;  %8303 = vmatprep.subr.bf16.mxu0 %v11200_v13  ;;  %v11264_v10 = vld [vmem:[%s16604_s1 + $0xab0] ss:$8 sps:$4 sm:$0xff]   ;;  %v11275_v13 = vld [vmem:[%s16604_s1 + $0xba4] ss:$8 sps:$4 sm:$0xff]   ;;  %v11281_v18 = vld [vmem:[%s16604_s1 + $0xb94] ss:$8 sps:$4 sm:$0xff]  }
 0x145   :  { %v8050_v22 = vpop.f32.mrf.mxu1  ;;  %8344 = vmatprep.subr.bf16.mxu1 %v11203_v14  ;;  %v13692_v25 = vadd.f32 %v8048_v19, %v8008_v20  ;;  %v8010_v26 = vadd.f32 %v8009_v21, %v13493_v9  ;;  %8333 = vmatprep.mubr.bf16.mxu0 %v1412_v11  ;;  %v11212_v9 = vld [vmem:[%s16604_s1 + $0xa44] ss:$8 sps:$4 sm:$0xff]   ;;  %v11267_v11 = vld [vmem:[%s16604_s1 + $0xbb0] ss:$8 sps:$4 sm:$0xff]  }
 0x146   :  { %8374 = vmatprep.mubr.bf16.mxu1 %v1416_v17  ;;  %v8011_v28 = vpop.f32.mrf.mxu0  ;;  %v13832_v14 = vld [vmem:[%s16603_s0 + $0x18] sm:$0xff] }
 0x147   :  { %v8052_v30 = vpop.f32.mrf.mxu1  ;;  %v13701_v31 = vadd.f32 %v8050_v22, %v8010_v26  ;;  %8304 = vmatpush1.bf16.msra.mxu0 %v11198_v15  ;;  %v11270_v15 = vld [vmem:[%s16604_s1 + $0xaa0] ss:$8 sps:$4 sm:$0xff]   ;;  %v11278_v17 = vld [vmem:[%s16604_s1 + $0xa94] ss:$8 sps:$4 sm:$0xff]   ;;  %v13848_v19 = vrot.slane %v13832_v14, %v12762_v49  ;;  %v11276_v20 = vld [vmem:[%s16604_s1 + $0xa90] ss:$8 sps:$4 sm:$0xff]   ;;  %v1398_v26 = vrot.slane %v13636_v60, %v12762_v49 }
 0x148   :  { %8345 = vmatpush1.bf16.msra.mxu1 %v11201_v16  ;;  %v8012_v33 = vpop.f32.mrf.mxu0  ;;  %8305 = vmatprep.subr.bf16.mxu0 %v11206_v23  ;;  %v11273_v16 = vld [vmem:[%s16604_s1 + $0xba0] ss:$8 sps:$4 sm:$0xff]   ;;  %v11279_v21 = vld [vmem:[%s16604_s1 + $0xb90] ss:$8 sps:$4 sm:$0xff]   ;;  %v11284_v22 = vld [vmem:[%s16604_s1 + $0xa84] ss:$8 sps:$4 sm:$0xff]  }
 0x149   :  { %v8053_v34 = vpop.f32.mrf.mxu1  ;;  %8346 = vmatprep.subr.bf16.mxu1 %v11209_v24  ;;  %v11287_v23 = vld [vmem:[%s16604_s1 + $0xb84] ss:$8 sps:$4 sm:$0xff]   ;;  %v1432_v24 = vcombine.high %v13848_v19, %v13848_v19  ;;  %v11291_v28 = vld [vmem:[%s16604_s1 + $0xc74] ss:$8 sps:$4 sm:$0xff]   ;;  %v11289_v30 = vld [vmem:[%s16604_s1 + $0xc70] ss:$8 sps:$4 sm:$0xff]  }
 0x14a   :  { %v11294_v60 = vld [vmem:[%s16604_s1 + $0xd74] ss:$8 sps:$4 sm:$0xff]   ;;  %v11292_v33 = vld [vmem:[%s16604_s1 + $0xd70] ss:$8 sps:$4 sm:$0xff]  }
 0x14b   :  { %8306 = vmatpush1.bf16.msra.mxu0 %v11204_v2  ;;  %v11282_v2 = vld [vmem:[%s16604_s1 + $0xa80] ss:$8 sps:$4 sm:$0xff]   ;;  %v1454_v34 = vrot.slane %v1432_v24, %v12762_v49  ;;  %v11349_v24 = vld [vmem:[%s16604_s1 + $0xcd0] ss:$8 sps:$4 sm:$0xff]  }
 0x14c   :  { %8347 = vmatpush1.bf16.msra.mxu1 %v11207_v27  ;;  %8307 = vmatprep.subr.bf16.mxu0 %v11212_v9  ;;  %v11285_v27 = vld [vmem:[%s16604_s1 + $0xb80] ss:$8 sps:$4 sm:$0xff]   ;;  %v1414_v9 = vcombine.high %v1398_v26, %v1398_v26 }
 0x14d   :  { %8348 = vmatprep.subr.bf16.mxu1 %v11215_v36  ;;  %v11297_v36 = vld [vmem:[%s16604_s1 + $0xc64] ss:$8 sps:$4 sm:$0xff]  }
 0x14f   :  { %8308 = vmatpush1.bf16.msra.mxu0 %v11210_v37  ;;  %v11300_v37 = vld [vmem:[%s16604_s1 + $0xd64] ss:$8 sps:$4 sm:$0xff]  }
 0x150   :  { %8349 = vmatpush1.bf16.msra.mxu1 %v11213_v29  ;;  %8309 = vmatprep.subr.bf16.mxu0 %v11218_v38  ;;  %v11295_v29 = vld [vmem:[%s16604_s1 + $0xc60] ss:$8 sps:$4 sm:$0xff]  }
 0x151   :  { %8350 = vmatprep.subr.bf16.mxu1 %v11221_v39  ;;  %v11298_v38 = vld [vmem:[%s16604_s1 + $0xd60] ss:$8 sps:$4 sm:$0xff]   ;;  %v1464_v39 = vcombine.high %v1454_v34, %v1454_v34 }
 0x153   :  { %8310 = vmatpush1.bf16.msra.mxu0 %v11216_v40 }
 0x154   :  { %8351 = vmatpush1.bf16.msra.mxu1 %v11219_v41  ;;  %8311 = vmatprep.subr.bf16.mxu0 %v11224_v43 }
 0x155   :  { %8352 = vmatprep.subr.bf16.mxu1 %v11227_v44 }
 0x157   :  { %8312 = vmatpush1.bf16.msra.mxu0 %v11222_v45 }
 0x158   :  { %8353 = vmatpush1.bf16.msra.mxu1 %v11225_v46  ;;  %8313 = vmatprep.subr.bf16.mxu0 %v11230_v47  ;;  %v11303_v46 = vld [vmem:[%s16604_s1 + $0xc54] ss:$8 sps:$4 sm:$0xff]  }
 0x159   :  { %8354 = vmatprep.subr.bf16.mxu1 %v11233_v48  ;;  %v11306_v47 = vld [vmem:[%s16604_s1 + $0xd54] ss:$8 sps:$4 sm:$0xff]  }
 0x15b   :  { %8314 = vmatpush1.bf16.msra.mxu0 %v11228_v50 }
 0x15c   :  { %8355 = vmatpush1.bf16.msra.mxu1 %v11231_v51  ;;  %8315 = vmatprep.subr.bf16.mxu0 %v11236_v6  ;;  %v11304_v51 = vld [vmem:[%s16604_s1 + $0xd50] ss:$8 sps:$4 sm:$0xff]  }
 0x15d   :  { %8356 = vmatprep.subr.bf16.mxu1 %v11239_v52 }
 0x15f   :  { %8316 = vmatpush1.bf16.msra.mxu0 %v11234_v53 }
 0x160   :  { %8357 = vmatpush1.bf16.msra.mxu1 %v11237_v54  ;;  %8317 = vmatprep.subr.bf16.mxu0 %v11242_v42 }
 0x161   :  { %8358 = vmatprep.subr.bf16.mxu1 %v11245_v55  ;;  %v11312_v55 = vld [vmem:[%s16604_s1 + $0xd44] ss:$8 sps:$4 sm:$0xff]  }
 0x163   :  { %8318 = vmatpush2.bf16.msra.mxu0 %v11240_v56  ;;  %v11307_v56 = vld [vmem:[%s16604_s1 + $0xc40] ss:$8 sps:$4 sm:$0xff]  }
 0x164   :  { %8359 = vmatpush2.bf16.msra.mxu1 %v11243_v57  ;;  %8319 = vmatprep.subr.bf16.mxu0 %v11248_v58  ;;  %v11310_v57 = vld [vmem:[%s16604_s1 + $0xd40] ss:$8 sps:$4 sm:$0xff]   ;;  %v11315_v58 = vld [vmem:[%s16604_s1 + $0xc34] ss:$8 sps:$4 sm:$0xff]  }
 0x165   :  { %8360 = vmatprep.subr.bf16.mxu1 %v11251_v59  ;;  %v11318_v59 = vld [vmem:[%s16604_s1 + $0xd34] ss:$8 sps:$4 sm:$0xff]  }
 0x167   :  { %8320 = vmatpush2.bf16.msra.mxu0 %v11246_v32  ;;  %v11313_v32 = vld [vmem:[%s16604_s1 + $0xc30] ss:$8 sps:$4 sm:$0xff]  }
 0x168   :  { %8361 = vmatpush2.bf16.msra.mxu1 %v11249_v61  ;;  %8321 = vmatprep.subr.bf16.mxu0 %v11254_v62  ;;  %v11316_v61 = vld [vmem:[%s16604_s1 + $0xd30] ss:$8 sps:$4 sm:$0xff]   ;;  %v11321_v62 = vld [vmem:[%s16604_s1 + $0xc24] ss:$8 sps:$4 sm:$0xff]  }
 0x169   :  { %8362 = vmatprep.subr.bf16.mxu1 %v11257_v63  ;;  %v11324_v63 = vld [vmem:[%s16604_s1 + $0xd24] ss:$8 sps:$4 sm:$0xff]  }
 0x16b   :  { %8322 = vmatpush2.bf16.msra.mxu0 %v11252_v0  ;;  %v11319_v0 = vld [vmem:[%s16604_s1 + $0xc20] ss:$8 sps:$4 sm:$0xff]  }
 0x16c   :  { %8363 = vmatpush2.bf16.msra.mxu1 %v11255_v1  ;;  %8323 = vmatprep.subr.bf16.mxu0 %v11260_v3  ;;  %v11322_v1 = vld [vmem:[%s16604_s1 + $0xd20] ss:$8 sps:$4 sm:$0xff]   ;;  %v11327_v3 = vld [vmem:[%s16604_s1 + $0xc14] ss:$8 sps:$4 sm:$0xff]  }
 0x16d   :  { %8364 = vmatprep.subr.bf16.mxu1 %v11263_v4  ;;  %v11330_v4 = vld [vmem:[%s16604_s1 + $0xd14] ss:$8 sps:$4 sm:$0xff]  }
 0x16f   :  { %8324 = vmatpush2.bf16.msra.mxu0 %v11258_v5  ;;  %v11325_v5 = vld [vmem:[%s16604_s1 + $0xc10] ss:$8 sps:$4 sm:$0xff]  }
 0x170   :  { %8365 = vmatpush2.bf16.msra.mxu1 %v11261_v7  ;;  %8325 = vmatprep.subr.bf16.mxu0 %v11266_v35  ;;  %v11328_v7 = vld [vmem:[%s16604_s1 + $0xd10] ss:$8 sps:$4 sm:$0xff]   ;;  %v11333_v35 = vld [vmem:[%s16604_s1 + $0xc04] ss:$8 sps:$4 sm:$0xff]  }
 0x171   :  { %8366 = vmatprep.subr.bf16.mxu1 %v11269_v8  ;;  %v11336_v8 = vld [vmem:[%s16604_s1 + $0xd04] ss:$8 sps:$4 sm:$0xff]  }
 0x173   :  { %8326 = vmatpush2.bf16.msra.mxu0 %v11264_v10  ;;  %v11331_v10 = vld [vmem:[%s16604_s1 + $0xc00] ss:$8 sps:$4 sm:$0xff]  }
 0x174   :  { %8367 = vmatpush2.bf16.msra.mxu1 %v11267_v11  ;;  %8327 = vmatprep.subr.bf16.mxu0 %v11272_v12  ;;  %v11334_v11 = vld [vmem:[%s16604_s1 + $0xd00] ss:$8 sps:$4 sm:$0xff]   ;;  %v11339_v12 = vld [vmem:[%s16604_s1 + $0xcf4] ss:$8 sps:$4 sm:$0xff]  }
 0x175   :  { %8368 = vmatprep.subr.bf16.mxu1 %v11275_v13  ;;  %v11342_v13 = vld [vmem:[%s16604_s1 + $0xdf4] ss:$8 sps:$4 sm:$0xff]  }
 0x177   :  { %8328 = vmatpush2.bf16.msra.mxu0 %v11270_v15  ;;  %v11337_v15 = vld [vmem:[%s16604_s1 + $0xcf0] ss:$8 sps:$4 sm:$0xff]  }
 0x178   :  { %8369 = vmatpush2.bf16.msra.mxu1 %v11273_v16  ;;  %8329 = vmatprep.subr.bf16.mxu0 %v11278_v17  ;;  %v11340_v16 = vld [vmem:[%s16604_s1 + $0xdf0] ss:$8 sps:$4 sm:$0xff]   ;;  %v11345_v17 = vld [vmem:[%s16604_s1 + $0xce4] ss:$8 sps:$4 sm:$0xff]  }
 0x179   :  { %8370 = vmatprep.subr.bf16.mxu1 %v11281_v18  ;;  %v11348_v18 = vld [vmem:[%s16604_s1 + $0xde4] ss:$8 sps:$4 sm:$0xff]  }
 0x17b   :  { %8330 = vmatpush2.bf16.msra.mxu0 %v11276_v20  ;;  %v11343_v20 = vld [vmem:[%s16604_s1 + $0xce0] ss:$8 sps:$4 sm:$0xff]  }
 0x17c   :  { %8371 = vmatpush2.bf16.msra.mxu1 %v11279_v21  ;;  %8331 = vmatprep.subr.bf16.mxu0 %v11284_v22  ;;  %v11346_v21 = vld [vmem:[%s16604_s1 + $0xde0] ss:$8 sps:$4 sm:$0xff]   ;;  %v11351_v22 = vld [vmem:[%s16604_s1 + $0xcd4] ss:$8 sps:$4 sm:$0xff]  }
 0x17d   :  { %8372 = vmatprep.subr.bf16.mxu1 %v11287_v23  ;;  %v11354_v23 = vld [vmem:[%s16604_s1 + $0xdd4] ss:$8 sps:$4 sm:$0xff]  }
 0x17f   :  { %8332 = vmatpush2.bf16.msra.mxu0 %v11282_v2  ;;  %v11357_v2 = vld [vmem:[%s16604_s1 + $0xcc4] ss:$8 sps:$4 sm:$0xff]  }
 0x180   :  { %8373 = vmatpush2.bf16.msra.mxu1 %v11285_v27  ;;  %8383 = vmatprep.subr.bf16.mxu0 %v11291_v28  ;;  %v11360_v27 = vld [vmem:[%s16604_s1 + $0xdc4] ss:$8 sps:$4 sm:$0xff]   ;;  %v11355_v28 = vld [vmem:[%s16604_s1 + $0xcc0] ss:$8 sps:$4 sm:$0xff]  }
 0x181   :  { %8424 = vmatprep.subr.bf16.mxu1 %v11294_v60  ;;  %v11358_v60 = vld [vmem:[%s16604_s1 + $0xdc0] ss:$8 sps:$4 sm:$0xff]  }
 0x182   :  { %v8089_v40 = vpop.f32.mrf.mxu0  ;;  %8334 = vmatmul.mubr.bf16.vlgmr.msra.gmra.mxu0 %v1398_v26  ;;  %v11352_v26 = vld [vmem:[%s16604_s1 + $0xdd0] ss:$8 sps:$4 sm:$0xff]  }
 0x183   :  { %v8130_v41 = vpop.f32.mrf.mxu1  ;;  %8375 = vmatmul.mubr.bf16.vlgmr.msra.gmra.mxu1 %v1414_v9  ;;  %v8090_v43 = vadd.f32 %v8089_v40, %v13692_v25  ;;  %8384 = vmatpush1.bf16.msra.mxu0 %v11289_v30  ;;  %v11301_v25 = vld [vmem:[%s16604_s1 + $0xc50] ss:$8 sps:$4 sm:$0xff]   ;;  %v11363_v30 = vld [vmem:[%s16604_s1 + $0xcb4] ss:$8 sps:$4 sm:$0xff]  }
 0x184   :  { %8425 = vmatpush1.bf16.msra.mxu1 %v11292_v33  ;;  %v8091_v44 = vpop.f32.mrf.mxu0  ;;  %8385 = vmatprep.subr.bf16.mxu0 %v11297_v36  ;;  %v11366_v33 = vld [vmem:[%s16604_s1 + $0xdb4] ss:$8 sps:$4 sm:$0xff]   ;;  %v11364_v9 = vld [vmem:[%s16604_s1 + $0xdb0] ss:$8 sps:$4 sm:$0xff]   ;;  %v11369_v36 = vld [vmem:[%s16604_s1 + $0xca4] ss:$8 sps:$4 sm:$0xff]  }
 0x185   :  { %v8132_v45 = vpop.f32.mrf.mxu1  ;;  %8426 = vmatprep.subr.bf16.mxu1 %v11300_v37  ;;  %v13904_v48 = vadd.f32 %v8130_v41, %v8090_v43  ;;  %v8092_v50 = vadd.f32 %v8091_v44, %v13701_v31  ;;  %8415 = vmatprep.mubr.bf16.mxu0 %v1454_v34  ;;  %v11309_v31 = vld [vmem:[%s16604_s1 + $0xc44] ss:$8 sps:$4 sm:$0xff]   ;;  %v11361_v34 = vld [vmem:[%s16604_s1 + $0xcb0] ss:$8 sps:$4 sm:$0xff]   ;;  %v11375_v40 = vld [vmem:[%s16604_s1 + $0xc94] ss:$8 sps:$4 sm:$0xff]  }
 0x186   :  { %8456 = vmatprep.mubr.bf16.mxu1 %v1464_v39  ;;  %v8093_v6 = vpop.f32.mrf.mxu0  ;;  %v11372_v37 = vld [vmem:[%s16604_s1 + $0xda4] ss:$8 sps:$4 sm:$0xff]   ;;  %v11370_v39 = vld [vmem:[%s16604_s1 + $0xda0] ss:$8 sps:$4 sm:$0xff]   ;;  %v11373_v43 = vld [vmem:[%s16604_s1 + $0xc90] ss:$8 sps:$4 sm:$0xff]  }
 0x187   :  { %v8134_v52 = vpop.f32.mrf.mxu1  ;;  %v13913_v53 = vadd.f32 %v8132_v45, %v8092_v50  ;;  %8386 = vmatpush1.bf16.msra.mxu0 %v11295_v29  ;;  %v1417_v29 = vcombine.high %v13832_v14, %v13832_v14  ;;  %v11378_v14 = vld [vmem:[%s16604_s1 + $0xd94] ss:$8 sps:$4 sm:$0xff]   ;;  %v11376_v44 = vld [vmem:[%s16604_s1 + $0xd90] ss:$8 sps:$4 sm:$0xff]   ;;  %v11381_v45 = vld [vmem:[%s16604_s1 + $0xc84] ss:$8 sps:$4 sm:$0xff]   ;;  %v1440_v50 = vrot.slane %v13848_v19, %v12762_v49 }
 0x188   :  { %8427 = vmatpush1.bf16.msra.mxu1 %v11298_v38  ;;  %v8094_v54 = vpop.f32.mrf.mxu0  ;;  %8387 = vmatprep.subr.bf16.mxu0 %v11303_v46  ;;  %v11367_v38 = vld [vmem:[%s16604_s1 + $0xca0] ss:$8 sps:$4 sm:$0xff]   ;;  %v11384_v46 = vld [vmem:[%s16604_s1 + $0xd84] ss:$8 sps:$4 sm:$0xff]   ;;  %v11387_v6 = vld [vmem:[%s16604_s1 + $0xe74] ss:$8 sps:$4 sm:$0xff]  }
 0x189   :  { %v8135_v42 = vpop.f32.mrf.mxu1  ;;  %8428 = vmatprep.subr.bf16.mxu1 %v11306_v47  ;;  %v14056_v41 = vrot.slane %v1417_v29, %v12762_v49  ;;  %v11390_v19 = vld [vmem:[%s16604_s1 + $0xf74] ss:$8 sps:$4 sm:$0xff]   ;;  %v11385_v52 = vld [vmem:[%s16604_s1 + $0xe70] ss:$8 sps:$4 sm:$0xff]  }
 0x18a   :  { %v11388_v54 = vld [vmem:[%s16604_s1 + $0xf70] ss:$8 sps:$4 sm:$0xff]  }
 0x18b   :  { %8388 = vmatpush1.bf16.msra.mxu0 %v11301_v25  ;;  %v1433_v47 = vcombine.high %v14056_v41, %v14056_v41  ;;  %v11379_v25 = vld [vmem:[%s16604_s1 + $0xc80] ss:$8 sps:$4 sm:$0xff]   ;;  %v11433_v29 = vld [vmem:[%s16604_s1 + $0xef0] ss:$8 sps:$4 sm:$0xff]  }
 0x18c   :  { %8429 = vmatpush1.bf16.msra.mxu1 %v11304_v51  ;;  %8389 = vmatprep.subr.bf16.mxu0 %v11309_v31  ;;  %v11382_v51 = vld [vmem:[%s16604_s1 + $0xd80] ss:$8 sps:$4 sm:$0xff]   ;;  %v1462_v31 = vcombine.high %v1440_v50, %v1440_v50 }
 0x18d   :  { %8430 = vmatprep.subr.bf16.mxu1 %v11312_v55  ;;  %v1461_v42 = vrot.slane %v1433_v47, %v12762_v49  ;;  %v11393_v55 = vld [vmem:[%s16604_s1 + $0xe64] ss:$8 sps:$4 sm:$0xff]   ;;  %v11448_v47 = vld [vmem:[%s16604_s1 + $0xfd0] ss:$8 sps:$4 sm:$0xff]  }
 0x18f   :  { %8390 = vmatpush1.bf16.msra.mxu0 %v11307_v56  ;;  %v11396_v56 = vld [vmem:[%s16604_s1 + $0xf64] ss:$8 sps:$4 sm:$0xff]  }
 0x190   :  { %8431 = vmatpush1.bf16.msra.mxu1 %v11310_v57  ;;  %8391 = vmatprep.subr.bf16.mxu0 %v11315_v58  ;;  %v11391_v57 = vld [vmem:[%s16604_s1 + $0xe60] ss:$8 sps:$4 sm:$0xff]  }
 0x191   :  { %8432 = vmatprep.subr.bf16.mxu1 %v11318_v59  ;;  %v11394_v58 = vld [vmem:[%s16604_s1 + $0xf60] ss:$8 sps:$4 sm:$0xff]   ;;  %v1465_v59 = vcombine.high %v1461_v42, %v1461_v42 }
 0x193   :  { %8392 = vmatpush1.bf16.msra.mxu0 %v11313_v32 }
 0x194   :  { %8433 = vmatpush1.bf16.msra.mxu1 %v11316_v61  ;;  %8393 = vmatprep.subr.bf16.mxu0 %v11321_v62 }
 0x195   :  { %8434 = vmatprep.subr.bf16.mxu1 %v11324_v63 }
 0x197   :  { %8394 = vmatpush1.bf16.msra.mxu0 %v11319_v0 }
 0x198   :  { %8435 = vmatpush1.bf16.msra.mxu1 %v11322_v1  ;;  %8395 = vmatprep.subr.bf16.mxu0 %v11327_v3  ;;  %v11399_v1 = vld [vmem:[%s16604_s1 + $0xe54] ss:$8 sps:$4 sm:$0xff]  }
 0x199   :  { %8436 = vmatprep.subr.bf16.mxu1 %v11330_v4  ;;  %v11402_v3 = vld [vmem:[%s16604_s1 + $0xf54] ss:$8 sps:$4 sm:$0xff]  }
 0x19b   :  { %8396 = vmatpush1.bf16.msra.mxu0 %v11325_v5 }
 0x19c   :  { %8437 = vmatpush1.bf16.msra.mxu1 %v11328_v7  ;;  %8397 = vmatprep.subr.bf16.mxu0 %v11333_v35  ;;  %v11400_v7 = vld [vmem:[%s16604_s1 + $0xf50] ss:$8 sps:$4 sm:$0xff]  }
 0x19d   :  { %8438 = vmatprep.subr.bf16.mxu1 %v11336_v8 }
 0x19f   :  { %8398 = vmatpush1.bf16.msra.mxu0 %v11331_v10 }
 0x1a0   :  { %8439 = vmatpush1.bf16.msra.mxu1 %v11334_v11  ;;  %8399 = vmatprep.subr.bf16.mxu0 %v11339_v12 }
 0x1a1   :  { %8440 = vmatprep.subr.bf16.mxu1 %v11342_v13  ;;  %v11408_v13 = vld [vmem:[%s16604_s1 + $0xf44] ss:$8 sps:$4 sm:$0xff]  }
 0x1a3   :  { %8400 = vmatpush2.bf16.msra.mxu0 %v11337_v15  ;;  %v11403_v15 = vld [vmem:[%s16604_s1 + $0xe40] ss:$8 sps:$4 sm:$0xff]  }
 0x1a4   :  { %8441 = vmatpush2.bf16.msra.mxu1 %v11340_v16  ;;  %8401 = vmatprep.subr.bf16.mxu0 %v11345_v17  ;;  %v11406_v16 = vld [vmem:[%s16604_s1 + $0xf40] ss:$8 sps:$4 sm:$0xff]   ;;  %v11411_v17 = vld [vmem:[%s16604_s1 + $0xe34] ss:$8 sps:$4 sm:$0xff]  }
 0x1a5   :  { %8442 = vmatprep.subr.bf16.mxu1 %v11348_v18  ;;  %v11414_v18 = vld [vmem:[%s16604_s1 + $0xf34] ss:$8 sps:$4 sm:$0xff]  }
 0x1a7   :  { %8402 = vmatpush2.bf16.msra.mxu0 %v11343_v20  ;;  %v11409_v20 = vld [vmem:[%s16604_s1 + $0xe30] ss:$8 sps:$4 sm:$0xff]  }
 0x1a8   :  { %8443 = vmatpush2.bf16.msra.mxu1 %v11346_v21  ;;  %8403 = vmatprep.subr.bf16.mxu0 %v11351_v22  ;;  %v11412_v21 = vld [vmem:[%s16604_s1 + $0xf30] ss:$8 sps:$4 sm:$0xff]   ;;  %v11417_v22 = vld [vmem:[%s16604_s1 + $0xe24] ss:$8 sps:$4 sm:$0xff]  }
 0x1a9   :  { %8444 = vmatprep.subr.bf16.mxu1 %v11354_v23  ;;  %v11420_v23 = vld [vmem:[%s16604_s1 + $0xf24] ss:$8 sps:$4 sm:$0xff]  }
 0x1ab   :  { %8404 = vmatpush2.bf16.msra.mxu0 %v11349_v24  ;;  %v11415_v24 = vld [vmem:[%s16604_s1 + $0xe20] ss:$8 sps:$4 sm:$0xff]  }
 0x1ac   :  { %8445 = vmatpush2.bf16.msra.mxu1 %v11352_v26  ;;  %8405 = vmatprep.subr.bf16.mxu0 %v11357_v2  ;;  %v11418_v26 = vld [vmem:[%s16604_s1 + $0xf20] ss:$8 sps:$4 sm:$0xff]   ;;  %v11423_v2 = vld [vmem:[%s16604_s1 + $0xe14] ss:$8 sps:$4 sm:$0xff]  }
 0x1ad   :  { %8446 = vmatprep.subr.bf16.mxu1 %v11360_v27  ;;  %v11426_v27 = vld [vmem:[%s16604_s1 + $0xf14] ss:$8 sps:$4 sm:$0xff]  }
 0x1af   :  { %8406 = vmatpush2.bf16.msra.mxu0 %v11355_v28  ;;  %v11421_v28 = vld [vmem:[%s16604_s1 + $0xe10] ss:$8 sps:$4 sm:$0xff]  }
 0x1b0   :  { %8447 = vmatpush2.bf16.msra.mxu1 %v11358_v60  ;;  %8407 = vmatprep.subr.bf16.mxu0 %v11363_v30  ;;  %v11424_v60 = vld [vmem:[%s16604_s1 + $0xf10] ss:$8 sps:$4 sm:$0xff]   ;;  %v11429_v30 = vld [vmem:[%s16604_s1 + $0xe04] ss:$8 sps:$4 sm:$0xff]  }
 0x1b1   :  { %8448 = vmatprep.subr.bf16.mxu1 %v11366_v33  ;;  %v11432_v33 = vld [vmem:[%s16604_s1 + $0xf04] ss:$8 sps:$4 sm:$0xff]  }
 0x1b3   :  { %8408 = vmatpush2.bf16.msra.mxu0 %v11361_v34  ;;  %v11427_v34 = vld [vmem:[%s16604_s1 + $0xe00] ss:$8 sps:$4 sm:$0xff]  }
 0x1b4   :  { %8449 = vmatpush2.bf16.msra.mxu1 %v11364_v9  ;;  %8409 = vmatprep.subr.bf16.mxu0 %v11369_v36  ;;  %v11430_v9 = vld [vmem:[%s16604_s1 + $0xf00] ss:$8 sps:$4 sm:$0xff]   ;;  %v11435_v36 = vld [vmem:[%s16604_s1 + $0xef4] ss:$8 sps:$4 sm:$0xff]  }
 0x1b5   :  { %8450 = vmatprep.subr.bf16.mxu1 %v11372_v37  ;;  %v11438_v37 = vld [vmem:[%s16604_s1 + $0xff4] ss:$8 sps:$4 sm:$0xff]  }
 0x1b7   :  { %8410 = vmatpush2.bf16.msra.mxu0 %v11367_v38  ;;  %v11436_v38 = vld [vmem:[%s16604_s1 + $0xff0] ss:$8 sps:$4 sm:$0xff]  }
 0x1b8   :  { %8451 = vmatpush2.bf16.msra.mxu1 %v11370_v39  ;;  %8411 = vmatprep.subr.bf16.mxu0 %v11375_v40  ;;  %v11441_v39 = vld [vmem:[%s16604_s1 + $0xee4] ss:$8 sps:$4 sm:$0xff]  }
 0x1b9   :  { %8452 = vmatprep.subr.bf16.mxu1 %v11378_v14  ;;  %v11444_v40 = vld [vmem:[%s16604_s1 + $0xfe4] ss:$8 sps:$4 sm:$0xff]   ;;  %v11439_v14 = vld [vmem:[%s16604_s1 + $0xee0] ss:$8 sps:$4 sm:$0xff]  }
 0x1bb   :  { %8412 = vmatpush2.bf16.msra.mxu0 %v11373_v43  ;;  %v11442_v43 = vld [vmem:[%s16604_s1 + $0xfe0] ss:$8 sps:$4 sm:$0xff]  }
 0x1bc   :  { %8453 = vmatpush2.bf16.msra.mxu1 %v11376_v44  ;;  %8413 = vmatprep.subr.bf16.mxu0 %v11381_v45  ;;  %v11447_v44 = vld [vmem:[%s16604_s1 + $0xed4] ss:$8 sps:$4 sm:$0xff]  }
 0x1bd   :  { %8454 = vmatprep.subr.bf16.mxu1 %v11384_v46  ;;  %v11450_v45 = vld [vmem:[%s16604_s1 + $0xfd4] ss:$8 sps:$4 sm:$0xff]   ;;  %v11445_v46 = vld [vmem:[%s16604_s1 + $0xed0] ss:$8 sps:$4 sm:$0xff]  }
 0x1bf   :  { %8414 = vmatpush2.bf16.msra.mxu0 %v11379_v25  ;;  %v11456_v25 = vld [vmem:[%s16604_s1 + $0xfc4] ss:$8 sps:$4 sm:$0xff]  }
 0x1c0   :  { %8455 = vmatpush2.bf16.msra.mxu1 %v11382_v51  ;;  %8465 = vmatprep.subr.bf16.mxu0 %v11387_v6  ;;  %v11451_v51 = vld [vmem:[%s16604_s1 + $0xec0] ss:$8 sps:$4 sm:$0xff]  }
 0x1c1   :  { %8506 = vmatprep.subr.bf16.mxu1 %v11390_v19  ;;  %v11454_v6 = vld [vmem:[%s16604_s1 + $0xfc0] ss:$8 sps:$4 sm:$0xff]   ;;  %v11459_v19 = vld [vmem:[%s16604_s1 + $0xeb4] ss:$8 sps:$4 sm:$0xff]  }
 0x1c2   :  { %v8171_v32 = vpop.f32.mrf.mxu0  ;;  %8416 = vmatmul.mubr.bf16.vlgmr.msra.gmra.mxu0 %v1440_v50  ;;  %v11453_v50 = vld [vmem:[%s16604_s1 + $0xec4] ss:$8 sps:$4 sm:$0xff]  }
 0x1c3   :  { %v8212_v61 = vpop.f32.mrf.mxu1  ;;  %8457 = vmatmul.mubr.bf16.vlgmr.msra.gmra.mxu1 %v1462_v31  ;;  %v8172_v62 = vadd.f32 %v8171_v32, %v13904_v48  ;;  %8466 = vmatpush1.bf16.msra.mxu0 %v11385_v52  ;;  %v11397_v48 = vld [vmem:[%s16604_s1 + $0xe50] ss:$8 sps:$4 sm:$0xff]   ;;  %v11462_v52 = vld [vmem:[%s16604_s1 + $0xfb4] ss:$8 sps:$4 sm:$0xff]   ;;  %v11465_v31 = vld [vmem:[%s16604_s1 + $0xea4] ss:$8 sps:$4 sm:$0xff]  }
 0x1c4   :  { %8507 = vmatpush1.bf16.msra.mxu1 %v11388_v54  ;;  %v8173_v63 = vpop.f32.mrf.mxu0  ;;  %8467 = vmatprep.subr.bf16.mxu0 %v11393_v55  ;;  %v11457_v54 = vld [vmem:[%s16604_s1 + $0xeb0] ss:$8 sps:$4 sm:$0xff]   ;;  %v11468_v55 = vld [vmem:[%s16604_s1 + $0xfa4] ss:$8 sps:$4 sm:$0xff]   ;;  %v11474_v32 = vld [vmem:[%s16604_s1 + $0xf94] ss:$8 sps:$4 sm:$0xff]  }
 0x1c5   :  { %v8214_v0 = vpop.f32.mrf.mxu1  ;;  %8508 = vmatprep.subr.bf16.mxu1 %v11396_v56  ;;  %v14112_v4 = vadd.f32 %v8212_v61, %v8172_v62  ;;  %v8174_v5 = vadd.f32 %v8173_v63, %v13913_v53  ;;  %8497 = vmatprep.mubr.bf16.mxu0 %v1461_v42  ;;  %v11405_v53 = vld [vmem:[%s16604_s1 + $0xe44] ss:$8 sps:$4 sm:$0xff]   ;;  %v11460_v42 = vld [vmem:[%s16604_s1 + $0xfb0] ss:$8 sps:$4 sm:$0xff]  }
 0x1c6   :  { %8538 = vmatprep.mubr.bf16.mxu1 %v1465_v59  ;;  %v8175_v35 = vpop.f32.mrf.mxu0  ;;  %v14252_v56 = vld [vmem:[%s16603_s0 + $0x20] sm:$0xff]  ;;  %v11471_v59 = vld [vmem:[%s16604_s1 + $0xe94] ss:$8 sps:$4 sm:$0xff]   ;;  %v11469_v62 = vld [vmem:[%s16604_s1 + $0xe90] ss:$8 sps:$4 sm:$0xff]  }
 0x1c7   :  { %v8216_v8 = vpop.f32.mrf.mxu1  ;;  %v14121_v10 = vadd.f32 %v8214_v0, %v8174_v5  ;;  %8468 = vmatpush1.bf16.msra.mxu0 %v11391_v57  ;;  %v11463_v57 = vld [vmem:[%s16604_s1 + $0xea0] ss:$8 sps:$4 sm:$0xff]   ;;  %v14268_v61 = vrot.slane %v14252_v56, %v12762_v49  ;;  %v11472_v63 = vld [vmem:[%s16604_s1 + $0xf90] ss:$8 sps:$4 sm:$0xff]   ;;  %v11477_v0 = vld [vmem:[%s16604_s1 + $0xe84] ss:$8 sps:$4 sm:$0xff]   ;;  %v1447_v5 = vrot.slane %v14056_v41, %v12762_v49 }
 0x1c8   :  { %8509 = vmatpush1.bf16.msra.mxu1 %v11394_v58  ;;  %v8176_v11 = vpop.f32.mrf.mxu0  ;;  %8469 = vmatprep.subr.bf16.mxu0 %v11399_v1  ;;  %v11466_v58 = vld [vmem:[%s16604_s1 + $0xfa0] ss:$8 sps:$4 sm:$0xff]   ;;  %v11480_v1 = vld [vmem:[%s16604_s1 + $0xf84] ss:$8 sps:$4 sm:$0xff]   ;;  %v11484_v35 = vld [vmem:[%s16604_s1 + $0x1074] ss:$8 sps:$4 sm:$0xff]  }
 0x1c9   :  { %v8217_v12 = vpop.f32.mrf.mxu1  ;;  %8510 = vmatprep.subr.bf16.mxu1 %v11402_v3  ;;  %v1481_v3 = vcombine.high %v14268_v61, %v14268_v61  ;;  %v11487_v41 = vld [vmem:[%s16604_s1 + $0x1174] ss:$8 sps:$4 sm:$0xff]   ;;  %v11482_v8 = vld [vmem:[%s16604_s1 + $0x1070] ss:$8 sps:$4 sm:$0xff]  }
 0x1ca   :  { %v11485_v11 = vld [vmem:[%s16604_s1 + $0x1170] ss:$8 sps:$4 sm:$0xff]  }
 0x1cb   :  { %8470 = vmatpush1.bf16.msra.mxu0 %v11397_v48  ;;  %v11475_v48 = vld [vmem:[%s16604_s1 + $0xe80] ss:$8 sps:$4 sm:$0xff]   ;;  %v1503_v12 = vrot.slane %v1481_v3, %v12762_v49  ;;  %v11542_v3 = vld [vmem:[%s16604_s1 + $0x10d0] ss:$8 sps:$4 sm:$0xff]  }
 0x1cc   :  { %8511 = vmatpush1.bf16.msra.mxu1 %v11400_v7  ;;  %8471 = vmatprep.subr.bf16.mxu0 %v11405_v53  ;;  %v11478_v7 = vld [vmem:[%s16604_s1 + $0xf80] ss:$8 sps:$4 sm:$0xff]   ;;  %v1463_v53 = vcombine.high %v1447_v5, %v1447_v5 }
 0x1cd   :  { %8512 = vmatprep.subr.bf16.mxu1 %v11408_v13  ;;  %v11490_v13 = vld [vmem:[%s16604_s1 + $0x1064] ss:$8 sps:$4 sm:$0xff]  }
 0x1cf   :  { %8472 = vmatpush1.bf16.msra.mxu0 %v11403_v15  ;;  %v11493_v15 = vld [vmem:[%s16604_s1 + $0x1164] ss:$8 sps:$4 sm:$0xff]  }
 0x1d0   :  { %8513 = vmatpush1.bf16.msra.mxu1 %v11406_v16  ;;  %8473 = vmatprep.subr.bf16.mxu0 %v11411_v17  ;;  %v11488_v16 = vld [vmem:[%s16604_s1 + $0x1060] ss:$8 sps:$4 sm:$0xff]  }
 0x1d1   :  { %8514 = vmatprep.subr.bf16.mxu1 %v11414_v18  ;;  %v11491_v17 = vld [vmem:[%s16604_s1 + $0x1160] ss:$8 sps:$4 sm:$0xff]   ;;  %v1513_v18 = vcombine.high %v1503_v12, %v1503_v12 }
 0x1d3   :  { %8474 = vmatpush1.bf16.msra.mxu0 %v11409_v20 }
 0x1d4   :  { %8515 = vmatpush1.bf16.msra.mxu1 %v11412_v21  ;;  %8475 = vmatprep.subr.bf16.mxu0 %v11417_v22 }
 0x1d5   :  { %8516 = vmatprep.subr.bf16.mxu1 %v11420_v23 }
 0x1d7   :  { %8476 = vmatpush1.bf16.msra.mxu0 %v11415_v24 }
 0x1d8   :  { %8517 = vmatpush1.bf16.msra.mxu1 %v11418_v26  ;;  %8477 = vmatprep.subr.bf16.mxu0 %v11423_v2  ;;  %v11496_v26 = vld [vmem:[%s16604_s1 + $0x1054] ss:$8 sps:$4 sm:$0xff]  }
 0x1d9   :  { %8518 = vmatprep.subr.bf16.mxu1 %v11426_v27  ;;  %v11499_v2 = vld [vmem:[%s16604_s1 + $0x1154] ss:$8 sps:$4 sm:$0xff]  }
 0x1db   :  { %8478 = vmatpush1.bf16.msra.mxu0 %v11421_v28 }
 0x1dc   :  { %8519 = vmatpush1.bf16.msra.mxu1 %v11424_v60  ;;  %8479 = vmatprep.subr.bf16.mxu0 %v11429_v30  ;;  %v11497_v60 = vld [vmem:[%s16604_s1 + $0x1150] ss:$8 sps:$4 sm:$0xff]  }
 0x1dd   :  { %8520 = vmatprep.subr.bf16.mxu1 %v11432_v33 }
 0x1df   :  { %8480 = vmatpush1.bf16.msra.mxu0 %v11427_v34 }
 0x1e0   :  { %8521 = vmatpush1.bf16.msra.mxu1 %v11430_v9  ;;  %8481 = vmatprep.subr.bf16.mxu0 %v11435_v36 }
 0x1e1   :  { %8522 = vmatprep.subr.bf16.mxu1 %v11438_v37  ;;  %v11505_v37 = vld [vmem:[%s16604_s1 + $0x1144] ss:$8 sps:$4 sm:$0xff]  }
 0x1e3   :  { %8482 = vmatpush2.bf16.msra.mxu0 %v11433_v29  ;;  %v11500_v29 = vld [vmem:[%s16604_s1 + $0x1040] ss:$8 sps:$4 sm:$0xff]  }
 0x1e4   :  { %8523 = vmatpush2.bf16.msra.mxu1 %v11436_v38  ;;  %8483 = vmatprep.subr.bf16.mxu0 %v11441_v39  ;;  %v11503_v38 = vld [vmem:[%s16604_s1 + $0x1140] ss:$8 sps:$4 sm:$0xff]   ;;  %v11508_v39 = vld [vmem:[%s16604_s1 + $0x1034] ss:$8 sps:$4 sm:$0xff]  }
 0x1e5   :  { %8524 = vmatprep.subr.bf16.mxu1 %v11444_v40  ;;  %v11511_v40 = vld [vmem:[%s16604_s1 + $0x1134] ss:$8 sps:$4 sm:$0xff]  }
 0x1e7   :  { %8484 = vmatpush2.bf16.msra.mxu0 %v11439_v14  ;;  %v11506_v14 = vld [vmem:[%s16604_s1 + $0x1030] ss:$8 sps:$4 sm:$0xff]  }
 0x1e8   :  { %8525 = vmatpush2.bf16.msra.mxu1 %v11442_v43  ;;  %8485 = vmatprep.subr.bf16.mxu0 %v11447_v44  ;;  %v11509_v43 = vld [vmem:[%s16604_s1 + $0x1130] ss:$8 sps:$4 sm:$0xff]   ;;  %v11514_v44 = vld [vmem:[%s16604_s1 + $0x1024] ss:$8 sps:$4 sm:$0xff]  }
 0x1e9   :  { %8526 = vmatprep.subr.bf16.mxu1 %v11450_v45  ;;  %v11517_v45 = vld [vmem:[%s16604_s1 + $0x1124] ss:$8 sps:$4 sm:$0xff]  }
 0x1eb   :  { %8486 = vmatpush2.bf16.msra.mxu0 %v11445_v46  ;;  %v11512_v46 = vld [vmem:[%s16604_s1 + $0x1020] ss:$8 sps:$4 sm:$0xff]  }
 0x1ec   :  { %8527 = vmatpush2.bf16.msra.mxu1 %v11448_v47  ;;  %8487 = vmatprep.subr.bf16.mxu0 %v11453_v50  ;;  %v11515_v47 = vld [vmem:[%s16604_s1 + $0x1120] ss:$8 sps:$4 sm:$0xff]   ;;  %v11520_v50 = vld [vmem:[%s16604_s1 + $0x1014] ss:$8 sps:$4 sm:$0xff]  }
 0x1ed   :  { %8528 = vmatprep.subr.bf16.mxu1 %v11456_v25  ;;  %v11523_v25 = vld [vmem:[%s16604_s1 + $0x1114] ss:$8 sps:$4 sm:$0xff]  }
 0x1ef   :  { %8488 = vmatpush2.bf16.msra.mxu0 %v11451_v51  ;;  %v11518_v51 = vld [vmem:[%s16604_s1 + $0x1010] ss:$8 sps:$4 sm:$0xff]  }
 0x1f0   :  { %8529 = vmatpush2.bf16.msra.mxu1 %v11454_v6  ;;  %8489 = vmatprep.subr.bf16.mxu0 %v11459_v19  ;;  %v11521_v6 = vld [vmem:[%s16604_s1 + $0x1110] ss:$8 sps:$4 sm:$0xff]   ;;  %v11526_v19 = vld [vmem:[%s16604_s1 + $0x1004] ss:$8 sps:$4 sm:$0xff]  }
 0x1f1   :  { %8530 = vmatprep.subr.bf16.mxu1 %v11462_v52  ;;  %v11529_v52 = vld [vmem:[%s16604_s1 + $0x1104] ss:$8 sps:$4 sm:$0xff]  }
 0x1f3   :  { %8490 = vmatpush2.bf16.msra.mxu0 %v11457_v54  ;;  %v11524_v54 = vld [vmem:[%s16604_s1 + $0x1000] ss:$8 sps:$4 sm:$0xff]  }
 0x1f4   :  { %8531 = vmatpush2.bf16.msra.mxu1 %v11460_v42  ;;  %8491 = vmatprep.subr.bf16.mxu0 %v11465_v31  ;;  %v11527_v42 = vld [vmem:[%s16604_s1 + $0x1100] ss:$8 sps:$4 sm:$0xff]   ;;  %v11532_v31 = vld [vmem:[%s16604_s1 + $0x10f4] ss:$8 sps:$4 sm:$0xff]  }
 0x1f5   :  { %8532 = vmatprep.subr.bf16.mxu1 %v11468_v55  ;;  %v11535_v55 = vld [vmem:[%s16604_s1 + $0x11f4] ss:$8 sps:$4 sm:$0xff]  }
 0x1f7   :  { %8492 = vmatpush2.bf16.msra.mxu0 %v11463_v57  ;;  %v11530_v57 = vld [vmem:[%s16604_s1 + $0x10f0] ss:$8 sps:$4 sm:$0xff]  }
 0x1f8   :  { %8533 = vmatpush2.bf16.msra.mxu1 %v11466_v58  ;;  %8493 = vmatprep.subr.bf16.mxu0 %v11471_v59  ;;  %v11533_v58 = vld [vmem:[%s16604_s1 + $0x11f0] ss:$8 sps:$4 sm:$0xff]   ;;  %v11538_v59 = vld [vmem:[%s16604_s1 + $0x10e4] ss:$8 sps:$4 sm:$0xff]  }
 0x1f9   :  { %8534 = vmatprep.subr.bf16.mxu1 %v11474_v32  ;;  %v11541_v32 = vld [vmem:[%s16604_s1 + $0x11e4] ss:$8 sps:$4 sm:$0xff]  }
 0x1fb   :  { %8494 = vmatpush2.bf16.msra.mxu0 %v11469_v62  ;;  %v11536_v62 = vld [vmem:[%s16604_s1 + $0x10e0] ss:$8 sps:$4 sm:$0xff]  }
 0x1fc   :  { %8535 = vmatpush2.bf16.msra.mxu1 %v11472_v63  ;;  %8495 = vmatprep.subr.bf16.mxu0 %v11477_v0  ;;  %v11539_v63 = vld [vmem:[%s16604_s1 + $0x11e0] ss:$8 sps:$4 sm:$0xff]   ;;  %v11544_v0 = vld [vmem:[%s16604_s1 + $0x10d4] ss:$8 sps:$4 sm:$0xff]  }
 0x1fd   :  { %8536 = vmatprep.subr.bf16.mxu1 %v11480_v1  ;;  %v11547_v1 = vld [vmem:[%s16604_s1 + $0x11d4] ss:$8 sps:$4 sm:$0xff]  }
 0x1ff   :  { %8496 = vmatpush2.bf16.msra.mxu0 %v11475_v48  ;;  %v11550_v48 = vld [vmem:[%s16604_s1 + $0x10c4] ss:$8 sps:$4 sm:$0xff]  }
 0x200   :  { %8537 = vmatpush2.bf16.msra.mxu1 %v11478_v7  ;;  %8547 = vmatprep.subr.bf16.mxu0 %v11484_v35  ;;  %v11553_v7 = vld [vmem:[%s16604_s1 + $0x11c4] ss:$8 sps:$4 sm:$0xff]   ;;  %v11548_v35 = vld [vmem:[%s16604_s1 + $0x10c0] ss:$8 sps:$4 sm:$0xff]  }
 0x201   :  { %8588 = vmatprep.subr.bf16.mxu1 %v11487_v41  ;;  %v11551_v41 = vld [vmem:[%s16604_s1 + $0x11c0] ss:$8 sps:$4 sm:$0xff]  }
 0x202   :  { %v8253_v20 = vpop.f32.mrf.mxu0  ;;  %8498 = vmatmul.mubr.bf16.vlgmr.msra.gmra.mxu0 %v1447_v5  ;;  %v11545_v5 = vld [vmem:[%s16604_s1 + $0x11d0] ss:$8 sps:$4 sm:$0xff]  }
 0x203   :  { %v8294_v21 = vpop.f32.mrf.mxu1  ;;  %8539 = vmatmul.mubr.bf16.vlgmr.msra.gmra.mxu1 %v1463_v53  ;;  %v8254_v22 = vadd.f32 %v8253_v20, %v14112_v4  ;;  %8548 = vmatpush1.bf16.msra.mxu0 %v11482_v8  ;;  %v11494_v4 = vld [vmem:[%s16604_s1 + $0x1050] ss:$8 sps:$4 sm:$0xff]   ;;  %v11556_v8 = vld [vmem:[%s16604_s1 + $0x10b4] ss:$8 sps:$4 sm:$0xff]  }
 0x204   :  { %8589 = vmatpush1.bf16.msra.mxu1 %v11485_v11  ;;  %v8255_v23 = vpop.f32.mrf.mxu0  ;;  %8549 = vmatprep.subr.bf16.mxu0 %v11490_v13  ;;  %v11559_v11 = vld [vmem:[%s16604_s1 + $0x11b4] ss:$8 sps:$4 sm:$0xff]   ;;  %v11557_v53 = vld [vmem:[%s16604_s1 + $0x11b0] ss:$8 sps:$4 sm:$0xff]   ;;  %v11562_v13 = vld [vmem:[%s16604_s1 + $0x10a4] ss:$8 sps:$4 sm:$0xff]  }
 0x205   :  { %v8296_v24 = vpop.f32.mrf.mxu1  ;;  %8590 = vmatprep.subr.bf16.mxu1 %v11493_v15  ;;  %v14324_v27 = vadd.f32 %v8294_v21, %v8254_v22  ;;  %v8256_v28 = vadd.f32 %v8255_v23, %v14121_v10  ;;  %8579 = vmatprep.mubr.bf16.mxu0 %v1503_v12  ;;  %v11502_v10 = vld [vmem:[%s16604_s1 + $0x1044] ss:$8 sps:$4 sm:$0xff]   ;;  %v11554_v12 = vld [vmem:[%s16604_s1 + $0x10b0] ss:$8 sps:$4 sm:$0xff]   ;;  %v11568_v20 = vld [vmem:[%s16604_s1 + $0x1094] ss:$8 sps:$4 sm:$0xff]  }
 0x206   :  { %8620 = vmatprep.mubr.bf16.mxu1 %v1513_v18  ;;  %v8257_v30 = vpop.f32.mrf.mxu0  ;;  %v11565_v15 = vld [vmem:[%s16604_s1 + $0x11a4] ss:$8 sps:$4 sm:$0xff]   ;;  %v11563_v18 = vld [vmem:[%s16604_s1 + $0x11a0] ss:$8 sps:$4 sm:$0xff]   ;;  %v11566_v22 = vld [vmem:[%s16604_s1 + $0x1090] ss:$8 sps:$4 sm:$0xff]  }
 0x207   :  { %v8298_v33 = vpop.f32.mrf.mxu1  ;;  %v14333_v34 = vadd.f32 %v8296_v24, %v8256_v28  ;;  %8550 = vmatpush1.bf16.msra.mxu0 %v11488_v16  ;;  %v1466_v16 = vcombine.high %v14252_v56, %v14252_v56  ;;  %v11571_v56 = vld [vmem:[%s16604_s1 + $0x1194] ss:$8 sps:$4 sm:$0xff]   ;;  %v11569_v23 = vld [vmem:[%s16604_s1 + $0x1190] ss:$8 sps:$4 sm:$0xff]   ;;  %v11574_v24 = vld [vmem:[%s16604_s1 + $0x1084] ss:$8 sps:$4 sm:$0xff]   ;;  %v1489_v28 = vrot.slane %v14268_v61, %v12762_v49 }
 0x208   :  { %8591 = vmatpush1.bf16.msra.mxu1 %v11491_v17  ;;  %v8258_v9 = vpop.f32.mrf.mxu0  ;;  %8551 = vmatprep.subr.bf16.mxu0 %v11496_v26  ;;  %v11560_v17 = vld [vmem:[%s16604_s1 + $0x10a0] ss:$8 sps:$4 sm:$0xff]   ;;  %v11577_v26 = vld [vmem:[%s16604_s1 + $0x1184] ss:$8 sps:$4 sm:$0xff]   ;;  %v11580_v30 = vld [vmem:[%s16604_s1 + $0x1274] ss:$8 sps:$4 sm:$0xff]  }
 0x209   :  { %v8299_v36 = vpop.f32.mrf.mxu1  ;;  %8592 = vmatprep.subr.bf16.mxu1 %v11499_v2  ;;  %v14476_v21 = vrot.slane %v1466_v16, %v12762_v49  ;;  %v11583_v61 = vld [vmem:[%s16604_s1 + $0x1374] ss:$8 sps:$4 sm:$0xff]   ;;  %v11578_v33 = vld [vmem:[%s16604_s1 + $0x1270] ss:$8 sps:$4 sm:$0xff]  }
 0x20a   :  { %v11581_v9 = vld [vmem:[%s16604_s1 + $0x1370] ss:$8 sps:$4 sm:$0xff]  }
 0x20b   :  { %8552 = vmatpush1.bf16.msra.mxu0 %v11494_v4  ;;  %v1482_v2 = vcombine.high %v14476_v21, %v14476_v21  ;;  %v11572_v4 = vld [vmem:[%s16604_s1 + $0x1080] ss:$8 sps:$4 sm:$0xff]   ;;  %v11626_v16 = vld [vmem:[%s16604_s1 + $0x12f0] ss:$8 sps:$4 sm:$0xff]  }
 0x20c   :  { %8593 = vmatpush1.bf16.msra.mxu1 %v11497_v60  ;;  %8553 = vmatprep.subr.bf16.mxu0 %v11502_v10  ;;  %v11575_v60 = vld [vmem:[%s16604_s1 + $0x1180] ss:$8 sps:$4 sm:$0xff]   ;;  %v1511_v10 = vcombine.high %v1489_v28, %v1489_v28 }
 0x20d   :  { %8594 = vmatprep.subr.bf16.mxu1 %v11505_v37  ;;  %v1510_v36 = vrot.slane %v1482_v2, %v12762_v49  ;;  %v11586_v37 = vld [vmem:[%s16604_s1 + $0x1264] ss:$8 sps:$4 sm:$0xff]   ;;  %v11641_v2 = vld [vmem:[%s16604_s1 + $0x13d0] ss:$8 sps:$4 sm:$0xff]  }
 0x20f   :  { %8554 = vmatpush1.bf16.msra.mxu0 %v11500_v29  ;;  %v11589_v29 = vld [vmem:[%s16604_s1 + $0x1364] ss:$8 sps:$4 sm:$0xff]  }
 0x210   :  { %8595 = vmatpush1.bf16.msra.mxu1 %v11503_v38  ;;  %8555 = vmatprep.subr.bf16.mxu0 %v11508_v39  ;;  %v11584_v38 = vld [vmem:[%s16604_s1 + $0x1260] ss:$8 sps:$4 sm:$0xff]  }
 0x211   :  { %8596 = vmatprep.subr.bf16.mxu1 %v11511_v40  ;;  %v11587_v39 = vld [vmem:[%s16604_s1 + $0x1360] ss:$8 sps:$4 sm:$0xff]   ;;  %v1514_v40 = vcombine.high %v1510_v36, %v1510_v36 }
 0x213   :  { %8556 = vmatpush1.bf16.msra.mxu0 %v11506_v14 }
 0x214   :  { %8597 = vmatpush1.bf16.msra.mxu1 %v11509_v43  ;;  %8557 = vmatprep.subr.bf16.mxu0 %v11514_v44 }
 0x215   :  { %8598 = vmatprep.subr.bf16.mxu1 %v11517_v45 }
 0x217   :  { %8558 = vmatpush1.bf16.msra.mxu0 %v11512_v46 }
 0x218   :  { %8599 = vmatpush1.bf16.msra.mxu1 %v11515_v47  ;;  %8559 = vmatprep.subr.bf16.mxu0 %v11520_v50  ;;  %v11592_v47 = vld [vmem:[%s16604_s1 + $0x1254] ss:$8 sps:$4 sm:$0xff]  }
 0x219   :  { %8600 = vmatprep.subr.bf16.mxu1 %v11523_v25  ;;  %v11595_v50 = vld [vmem:[%s16604_s1 + $0x1354] ss:$8 sps:$4 sm:$0xff]  }
 0x21b   :  { %8560 = vmatpush1.bf16.msra.mxu0 %v11518_v51 }
 0x21c   :  { %8601 = vmatpush1.bf16.msra.mxu1 %v11521_v6  ;;  %8561 = vmatprep.subr.bf16.mxu0 %v11526_v19  ;;  %v11593_v6 = vld [vmem:[%s16604_s1 + $0x1350] ss:$8 sps:$4 sm:$0xff]  }
 0x21d   :  { %8602 = vmatprep.subr.bf16.mxu1 %v11529_v52 }
 0x21f   :  { %8562 = vmatpush1.bf16.msra.mxu0 %v11524_v54 }
 0x220   :  { %8603 = vmatpush1.bf16.msra.mxu1 %v11527_v42  ;;  %8563 = vmatprep.subr.bf16.mxu0 %v11532_v31 }
 0x221   :  { %8604 = vmatprep.subr.bf16.mxu1 %v11535_v55  ;;  %v11601_v55 = vld [vmem:[%s16604_s1 + $0x1344] ss:$8 sps:$4 sm:$0xff]  }
 0x223   :  { %8564 = vmatpush2.bf16.msra.mxu0 %v11530_v57  ;;  %v11596_v57 = vld [vmem:[%s16604_s1 + $0x1240] ss:$8 sps:$4 sm:$0xff]  }
 0x224   :  { %8605 = vmatpush2.bf16.msra.mxu1 %v11533_v58  ;;  %8565 = vmatprep.subr.bf16.mxu0 %v11538_v59  ;;  %v11599_v58 = vld [vmem:[%s16604_s1 + $0x1340] ss:$8 sps:$4 sm:$0xff]   ;;  %v11604_v59 = vld [vmem:[%s16604_s1 + $0x1234] ss:$8 sps:$4 sm:$0xff]  }
 0x225   :  { %8606 = vmatprep.subr.bf16.mxu1 %v11541_v32  ;;  %v11607_v32 = vld [vmem:[%s16604_s1 + $0x1334] ss:$8 sps:$4 sm:$0xff]  }
 0x227   :  { %8566 = vmatpush2.bf16.msra.mxu0 %v11536_v62  ;;  %v11602_v62 = vld [vmem:[%s16604_s1 + $0x1230] ss:$8 sps:$4 sm:$0xff]  }
 0x228   :  { %8607 = vmatpush2.bf16.msra.mxu1 %v11539_v63  ;;  %8567 = vmatprep.subr.bf16.mxu0 %v11544_v0  ;;  %v11605_v63 = vld [vmem:[%s16604_s1 + $0x1330] ss:$8 sps:$4 sm:$0xff]   ;;  %v11610_v0 = vld [vmem:[%s16604_s1 + $0x1224] ss:$8 sps:$4 sm:$0xff]  }
 0x229   :  { %8608 = vmatprep.subr.bf16.mxu1 %v11547_v1  ;;  %v11613_v1 = vld [vmem:[%s16604_s1 + $0x1324] ss:$8 sps:$4 sm:$0xff]  }
 0x22b   :  { %8568 = vmatpush2.bf16.msra.mxu0 %v11542_v3  ;;  %v11608_v3 = vld [vmem:[%s16604_s1 + $0x1220] ss:$8 sps:$4 sm:$0xff]  }
 0x22c   :  { %8609 = vmatpush2.bf16.msra.mxu1 %v11545_v5  ;;  %8569 = vmatprep.subr.bf16.mxu0 %v11550_v48  ;;  %v11611_v5 = vld [vmem:[%s16604_s1 + $0x1320] ss:$8 sps:$4 sm:$0xff]   ;;  %v11616_v48 = vld [vmem:[%s16604_s1 + $0x1214] ss:$8 sps:$4 sm:$0xff]  }
 0x22d   :  { %8610 = vmatprep.subr.bf16.mxu1 %v11553_v7  ;;  %v11619_v7 = vld [vmem:[%s16604_s1 + $0x1314] ss:$8 sps:$4 sm:$0xff]  }
 0x22f   :  { %8570 = vmatpush2.bf16.msra.mxu0 %v11548_v35  ;;  %v11614_v35 = vld [vmem:[%s16604_s1 + $0x1210] ss:$8 sps:$4 sm:$0xff]  }
 0x230   :  { %8611 = vmatpush2.bf16.msra.mxu1 %v11551_v41  ;;  %8571 = vmatprep.subr.bf16.mxu0 %v11556_v8  ;;  %v11617_v41 = vld [vmem:[%s16604_s1 + $0x1310] ss:$8 sps:$4 sm:$0xff]   ;;  %v11622_v8 = vld [vmem:[%s16604_s1 + $0x1204] ss:$8 sps:$4 sm:$0xff]  }
 0x231   :  { %8612 = vmatprep.subr.bf16.mxu1 %v11559_v11  ;;  %v11625_v11 = vld [vmem:[%s16604_s1 + $0x1304] ss:$8 sps:$4 sm:$0xff]  }
 0x233   :  { %8572 = vmatpush2.bf16.msra.mxu0 %v11554_v12  ;;  %v11620_v12 = vld [vmem:[%s16604_s1 + $0x1200] ss:$8 sps:$4 sm:$0xff]  }
 0x234   :  { %8613 = vmatpush2.bf16.msra.mxu1 %v11557_v53  ;;  %8573 = vmatprep.subr.bf16.mxu0 %v11562_v13  ;;  %v11623_v53 = vld [vmem:[%s16604_s1 + $0x1300] ss:$8 sps:$4 sm:$0xff]   ;;  %v11628_v13 = vld [vmem:[%s16604_s1 + $0x12f4] ss:$8 sps:$4 sm:$0xff]  }
 0x235   :  { %8614 = vmatprep.subr.bf16.mxu1 %v11565_v15  ;;  %v11631_v15 = vld [vmem:[%s16604_s1 + $0x13f4] ss:$8 sps:$4 sm:$0xff]  }
 0x237   :  { %8574 = vmatpush2.bf16.msra.mxu0 %v11560_v17  ;;  %v11629_v17 = vld [vmem:[%s16604_s1 + $0x13f0] ss:$8 sps:$4 sm:$0xff]  }
 0x238   :  { %8615 = vmatpush2.bf16.msra.mxu1 %v11563_v18  ;;  %8575 = vmatprep.subr.bf16.mxu0 %v11568_v20  ;;  %v11634_v18 = vld [vmem:[%s16604_s1 + $0x12e4] ss:$8 sps:$4 sm:$0xff]  }
 0x239   :  { %8616 = vmatprep.subr.bf16.mxu1 %v11571_v56  ;;  %v11637_v20 = vld [vmem:[%s16604_s1 + $0x13e4] ss:$8 sps:$4 sm:$0xff]   ;;  %v11632_v56 = vld [vmem:[%s16604_s1 + $0x12e0] ss:$8 sps:$4 sm:$0xff]  }
 0x23b   :  { %8576 = vmatpush2.bf16.msra.mxu0 %v11566_v22  ;;  %v11635_v22 = vld [vmem:[%s16604_s1 + $0x13e0] ss:$8 sps:$4 sm:$0xff]  }
 0x23c   :  { %8617 = vmatpush2.bf16.msra.mxu1 %v11569_v23  ;;  %8577 = vmatprep.subr.bf16.mxu0 %v11574_v24  ;;  %v11640_v23 = vld [vmem:[%s16604_s1 + $0x12d4] ss:$8 sps:$4 sm:$0xff]  }
 0x23d   :  { %8618 = vmatprep.subr.bf16.mxu1 %v11577_v26  ;;  %v11643_v24 = vld [vmem:[%s16604_s1 + $0x13d4] ss:$8 sps:$4 sm:$0xff]   ;;  %v11638_v26 = vld [vmem:[%s16604_s1 + $0x12d0] ss:$8 sps:$4 sm:$0xff]  }
 0x23f   :  { %8578 = vmatpush2.bf16.msra.mxu0 %v11572_v4  ;;  %v11649_v4 = vld [vmem:[%s16604_s1 + $0x13c4] ss:$8 sps:$4 sm:$0xff]  }
 0x240   :  { %8619 = vmatpush2.bf16.msra.mxu1 %v11575_v60  ;;  %8629 = vmatprep.subr.bf16.mxu0 %v11580_v30  ;;  %v11644_v60 = vld [vmem:[%s16604_s1 + $0x12c0] ss:$8 sps:$4 sm:$0xff]  }
 0x241   :  { %8670 = vmatprep.subr.bf16.mxu1 %v11583_v61  ;;  %v11647_v30 = vld [vmem:[%s16604_s1 + $0x13c0] ss:$8 sps:$4 sm:$0xff]   ;;  %v11652_v61 = vld [vmem:[%s16604_s1 + $0x12b4] ss:$8 sps:$4 sm:$0xff]  }
 0x242   :  { %v8335_v14 = vpop.f32.mrf.mxu0  ;;  %8580 = vmatmul.mubr.bf16.vlgmr.msra.gmra.mxu0 %v1489_v28  ;;  %v11646_v28 = vld [vmem:[%s16604_s1 + $0x12c4] ss:$8 sps:$4 sm:$0xff]  }
 0x243   :  { %v8376_v43 = vpop.f32.mrf.mxu1  ;;  %8621 = vmatmul.mubr.bf16.vlgmr.msra.gmra.mxu1 %v1511_v10  ;;  %v8336_v44 = vadd.f32 %v8335_v14, %v14324_v27  ;;  %8630 = vmatpush1.bf16.msra.mxu0 %v11578_v33  ;;  %v11590_v27 = vld [vmem:[%s16604_s1 + $0x1250] ss:$8 sps:$4 sm:$0xff]   ;;  %v11655_v33 = vld [vmem:[%s16604_s1 + $0x13b4] ss:$8 sps:$4 sm:$0xff]   ;;  %v11658_v10 = vld [vmem:[%s16604_s1 + $0x12a4] ss:$8 sps:$4 sm:$0xff]  }
 0x244   :  { %8671 = vmatpush1.bf16.msra.mxu1 %v11581_v9  ;;  %v8337_v45 = vpop.f32.mrf.mxu0  ;;  %8631 = vmatprep.subr.bf16.mxu0 %v11586_v37  ;;  %v11650_v9 = vld [vmem:[%s16604_s1 + $0x12b0] ss:$8 sps:$4 sm:$0xff]   ;;  %v11661_v37 = vld [vmem:[%s16604_s1 + $0x13a4] ss:$8 sps:$4 sm:$0xff]   ;;  %v11667_v14 = vld [vmem:[%s16604_s1 + $0x1394] ss:$8 sps:$4 sm:$0xff]  }
 0x245   :  { %v8378_v46 = vpop.f32.mrf.mxu1  ;;  %8672 = vmatprep.subr.bf16.mxu1 %v11589_v29  ;;  %v14532_v25 = vadd.f32 %v8376_v43, %v8336_v44  ;;  %v8338_v51 = vadd.f32 %v8337_v45, %v14333_v34  ;;  %8661 = vmatprep.mubr.bf16.mxu0 %v1510_v36  ;;  %v11598_v34 = vld [vmem:[%s16604_s1 + $0x1244] ss:$8 sps:$4 sm:$0xff]   ;;  %v11653_v36 = vld [vmem:[%s16604_s1 + $0x13b0] ss:$8 sps:$4 sm:$0xff]  }
 0x246   :  { %8702 = vmatprep.mubr.bf16.mxu1 %v1514_v40  ;;  %v8339_v19 = vpop.f32.mrf.mxu0  ;;  %v14672_v29 = vld [vmem:[%s16603_s0 + $0x28] sm:$0xff]  ;;  %v11664_v40 = vld [vmem:[%s16604_s1 + $0x1294] ss:$8 sps:$4 sm:$0xff]   ;;  %v11662_v44 = vld [vmem:[%s16604_s1 + $0x1290] ss:$8 sps:$4 sm:$0xff]  }
 0x247   :  { %v8380_v52 = vpop.f32.mrf.mxu1  ;;  %v14541_v54 = vadd.f32 %v8378_v46, %v8338_v51  ;;  %8632 = vmatpush1.bf16.msra.mxu0 %v11584_v38  ;;  %v11656_v38 = vld [vmem:[%s16604_s1 + $0x12a0] ss:$8 sps:$4 sm:$0xff]   ;;  %v14688_v43 = vrot.slane %v14672_v29, %v12762_v49  ;;  %v11665_v45 = vld [vmem:[%s16604_s1 + $0x1390] ss:$8 sps:$4 sm:$0xff]   ;;  %v11670_v46 = vld [vmem:[%s16604_s1 + $0x1284] ss:$8 sps:$4 sm:$0xff]   ;;  %v1496_v51 = vrot.slane %v14476_v21, %v12762_v49 }
 0x248   :  { %8673 = vmatpush1.bf16.msra.mxu1 %v11587_v39  ;;  %v8340_v42 = vpop.f32.mrf.mxu0  ;;  %8633 = vmatprep.subr.bf16.mxu0 %v11592_v47  ;;  %v11659_v39 = vld [vmem:[%s16604_s1 + $0x13a0] ss:$8 sps:$4 sm:$0xff]   ;;  %v11673_v47 = vld [vmem:[%s16604_s1 + $0x1384] ss:$8 sps:$4 sm:$0xff]   ;;  %v11677_v19 = vld [vmem:[%s16604_s1 + $0x1474] ss:$8 sps:$4 sm:$0xff]  }
 0x249   :  { %v8381_v31 = vpop.f32.mrf.mxu1  ;;  %8674 = vmatprep.subr.bf16.mxu1 %v11595_v50  ;;  %v1530_v50 = vcombine.high %v14688_v43, %v14688_v43  ;;  %v11680_v21 = vld [vmem:[%s16604_s1 + $0x1574] ss:$8 sps:$4 sm:$0xff]   ;;  %v11675_v52 = vld [vmem:[%s16604_s1 + $0x1470] ss:$8 sps:$4 sm:$0xff]  }
 0x24a   :  { %v11678_v42 = vld [vmem:[%s16604_s1 + $0x1570] ss:$8 sps:$4 sm:$0xff]  }
 0x24b   :  { %8634 = vmatpush1.bf16.msra.mxu0 %v11590_v27  ;;  %v11668_v27 = vld [vmem:[%s16604_s1 + $0x1280] ss:$8 sps:$4 sm:$0xff]   ;;  %v1552_v31 = vrot.slane %v1530_v50, %v12762_v49 }
 0x24c   :  { %8675 = vmatpush1.bf16.msra.mxu1 %v11593_v6  ;;  %8635 = vmatprep.subr.bf16.mxu0 %v11598_v34  ;;  %v11671_v6 = vld [vmem:[%s16604_s1 + $0x1380] ss:$8 sps:$4 sm:$0xff]   ;;  %v1512_v34 = vcombine.high %v1496_v51, %v1496_v51 }
 0x24d   :  { %8676 = vmatprep.subr.bf16.mxu1 %v11601_v55  ;;  %v11683_v55 = vld [vmem:[%s16604_s1 + $0x1464] ss:$8 sps:$4 sm:$0xff]  }
 0x24f   :  { %8636 = vmatpush1.bf16.msra.mxu0 %v11596_v57  ;;  %v11686_v57 = vld [vmem:[%s16604_s1 + $0x1564] ss:$8 sps:$4 sm:$0xff]  }
 0x250   :  { %8677 = vmatpush1.bf16.msra.mxu1 %v11599_v58  ;;  %8637 = vmatprep.subr.bf16.mxu0 %v11604_v59  ;;  %v11681_v58 = vld [vmem:[%s16604_s1 + $0x1460] ss:$8 sps:$4 sm:$0xff]  }
 0x251   :  { %8678 = vmatprep.subr.bf16.mxu1 %v11607_v32  ;;  %v11684_v59 = vld [vmem:[%s16604_s1 + $0x1560] ss:$8 sps:$4 sm:$0xff]   ;;  %v1562_v32 = vcombine.high %v1552_v31, %v1552_v31 }
 0x253   :  { %8638 = vmatpush1.bf16.msra.mxu0 %v11602_v62 }
 0x254   :  { %8679 = vmatpush1.bf16.msra.mxu1 %v11605_v63  ;;  %8639 = vmatprep.subr.bf16.mxu0 %v11610_v0 }
 0x255   :  { %8680 = vmatprep.subr.bf16.mxu1 %v11613_v1 }
 0x257   :  { %8640 = vmatpush1.bf16.msra.mxu0 %v11608_v3 }
 0x258   :  { %8681 = vmatpush1.bf16.msra.mxu1 %v11611_v5  ;;  %8641 = vmatprep.subr.bf16.mxu0 %v11616_v48  ;;  %v11689_v5 = vld [vmem:[%s16604_s1 + $0x1454] ss:$8 sps:$4 sm:$0xff]  }
 0x259   :  { %8682 = vmatprep.subr.bf16.mxu1 %v11619_v7  ;;  %v11692_v48 = vld [vmem:[%s16604_s1 + $0x1554] ss:$8 sps:$4 sm:$0xff]  }
 0x25b   :  { %8642 = vmatpush1.bf16.msra.mxu0 %v11614_v35 }
 0x25c   :  { %8683 = vmatpush1.bf16.msra.mxu1 %v11617_v41  ;;  %8643 = vmatprep.subr.bf16.mxu0 %v11622_v8  ;;  %v11690_v41 = vld [vmem:[%s16604_s1 + $0x1550] ss:$8 sps:$4 sm:$0xff]  }
 0x25d   :  { %8684 = vmatprep.subr.bf16.mxu1 %v11625_v11 }
 0x25f   :  { %8644 = vmatpush1.bf16.msra.mxu0 %v11620_v12 }
 0x260   :  { %8685 = vmatpush1.bf16.msra.mxu1 %v11623_v53  ;;  %8645 = vmatprep.subr.bf16.mxu0 %v11628_v13 }
 0x261   :  { %8686 = vmatprep.subr.bf16.mxu1 %v11631_v15  ;;  %v11698_v15 = vld [vmem:[%s16604_s1 + $0x1544] ss:$8 sps:$4 sm:$0xff]  }
 0x263   :  { %8646 = vmatpush2.bf16.msra.mxu0 %v11626_v16  ;;  %v11693_v16 = vld [vmem:[%s16604_s1 + $0x1440] ss:$8 sps:$4 sm:$0xff]  }
 0x264   :  { %8687 = vmatpush2.bf16.msra.mxu1 %v11629_v17  ;;  %8647 = vmatprep.subr.bf16.mxu0 %v11634_v18  ;;  %v11696_v17 = vld [vmem:[%s16604_s1 + $0x1540] ss:$8 sps:$4 sm:$0xff]   ;;  %v11701_v18 = vld [vmem:[%s16604_s1 + $0x1434] ss:$8 sps:$4 sm:$0xff]  }
 0x265   :  { %8688 = vmatprep.subr.bf16.mxu1 %v11637_v20  ;;  %v11704_v20 = vld [vmem:[%s16604_s1 + $0x1534] ss:$8 sps:$4 sm:$0xff]  }
 0x267   :  { %8648 = vmatpush2.bf16.msra.mxu0 %v11632_v56  ;;  %v11699_v56 = vld [vmem:[%s16604_s1 + $0x1430] ss:$8 sps:$4 sm:$0xff]  }
 0x268   :  { %8689 = vmatpush2.bf16.msra.mxu1 %v11635_v22  ;;  %8649 = vmatprep.subr.bf16.mxu0 %v11640_v23  ;;  %v11702_v22 = vld [vmem:[%s16604_s1 + $0x1530] ss:$8 sps:$4 sm:$0xff]   ;;  %v11707_v23 = vld [vmem:[%s16604_s1 + $0x1424] ss:$8 sps:$4 sm:$0xff]  }
 0x269   :  { %8690 = vmatprep.subr.bf16.mxu1 %v11643_v24  ;;  %v11710_v24 = vld [vmem:[%s16604_s1 + $0x1524] ss:$8 sps:$4 sm:$0xff]  }
 0x26b   :  { %8650 = vmatpush2.bf16.msra.mxu0 %v11638_v26  ;;  %v11705_v26 = vld [vmem:[%s16604_s1 + $0x1420] ss:$8 sps:$4 sm:$0xff]  }
 0x26c   :  { %8691 = vmatpush2.bf16.msra.mxu1 %v11641_v2  ;;  %8651 = vmatprep.subr.bf16.mxu0 %v11646_v28  ;;  %v11708_v2 = vld [vmem:[%s16604_s1 + $0x1520] ss:$8 sps:$4 sm:$0xff]   ;;  %v11713_v28 = vld [vmem:[%s16604_s1 + $0x1414] ss:$8 sps:$4 sm:$0xff]  }
 0x26d   :  { %8692 = vmatprep.subr.bf16.mxu1 %v11649_v4  ;;  %v11716_v4 = vld [vmem:[%s16604_s1 + $0x1514] ss:$8 sps:$4 sm:$0xff]  }
 0x26f   :  { %8652 = vmatpush2.bf16.msra.mxu0 %v11644_v60  ;;  %v11711_v60 = vld [vmem:[%s16604_s1 + $0x1410] ss:$8 sps:$4 sm:$0xff]  }
 0x270   :  { %8693 = vmatpush2.bf16.msra.mxu1 %v11647_v30  ;;  %8653 = vmatprep.subr.bf16.mxu0 %v11652_v61  ;;  %v11714_v30 = vld [vmem:[%s16604_s1 + $0x1510] ss:$8 sps:$4 sm:$0xff]   ;;  %v11719_v61 = vld [vmem:[%s16604_s1 + $0x1404] ss:$8 sps:$4 sm:$0xff]  }
 0x271   :  { %8694 = vmatprep.subr.bf16.mxu1 %v11655_v33  ;;  %v11722_v33 = vld [vmem:[%s16604_s1 + $0x1504] ss:$8 sps:$4 sm:$0xff]  }
 0x273   :  { %8654 = vmatpush2.bf16.msra.mxu0 %v11650_v9  ;;  %v11717_v9 = vld [vmem:[%s16604_s1 + $0x1400] ss:$8 sps:$4 sm:$0xff]  }
 0x274   :  { %8695 = vmatpush2.bf16.msra.mxu1 %v11653_v36  ;;  %8655 = vmatprep.subr.bf16.mxu0 %v11658_v10  ;;  %v11720_v36 = vld [vmem:[%s16604_s1 + $0x1500] ss:$8 sps:$4 sm:$0xff]   ;;  %v11725_v10 = vld [vmem:[%s16604_s1 + $0x14f4] ss:$8 sps:$4 sm:$0xff]  }
 0x275   :  { %8696 = vmatprep.subr.bf16.mxu1 %v11661_v37  ;;  %v11728_v37 = vld [vmem:[%s16604_s1 + $0x15f4] ss:$8 sps:$4 sm:$0xff]  }
 0x277   :  { %8656 = vmatpush2.bf16.msra.mxu0 %v11656_v38  ;;  %v11723_v38 = vld [vmem:[%s16604_s1 + $0x14f0] ss:$8 sps:$4 sm:$0xff]  }
 0x278   :  { %8697 = vmatpush2.bf16.msra.mxu1 %v11659_v39  ;;  %8657 = vmatprep.subr.bf16.mxu0 %v11664_v40  ;;  %v11726_v39 = vld [vmem:[%s16604_s1 + $0x15f0] ss:$8 sps:$4 sm:$0xff]   ;;  %v11731_v40 = vld [vmem:[%s16604_s1 + $0x14e4] ss:$8 sps:$4 sm:$0xff]  }
 0x279   :  { %8698 = vmatprep.subr.bf16.mxu1 %v11667_v14  ;;  %v11734_v14 = vld [vmem:[%s16604_s1 + $0x15e4] ss:$8 sps:$4 sm:$0xff]  }
 0x27b   :  { %8658 = vmatpush2.bf16.msra.mxu0 %v11662_v44 }
 0x27c   :  { %8699 = vmatpush2.bf16.msra.mxu1 %v11665_v45  ;;  %8659 = vmatprep.subr.bf16.mxu0 %v11670_v46 }
 0x27d   :  { %8700 = vmatprep.subr.bf16.mxu1 %v11673_v47 }
 0x27f   :  { %8660 = vmatpush2.bf16.msra.mxu0 %v11668_v27 }
 0x280   :  { %8701 = vmatpush2.bf16.msra.mxu1 %v11671_v6  ;;  %8711 = vmatprep.subr.bf16.mxu0 %v11677_v19 }
 0x281   :  { %8752 = vmatprep.subr.bf16.mxu1 %v11680_v21 }
 0x282   :  { %v8417_v62 = vpop.f32.mrf.mxu0  ;;  %8662 = vmatmul.mubr.bf16.vlgmr.msra.gmra.mxu0 %v1496_v51 }
 0x283   :  { %v8458_v63 = vpop.f32.mrf.mxu1  ;;  %8703 = vmatmul.mubr.bf16.vlgmr.msra.gmra.mxu1 %v1512_v34  ;;  %v8418_v0 = vadd.f32 %v8417_v62, %v14532_v25  ;;  %8712 = vmatpush1.bf16.msra.mxu0 %v11675_v52  ;;  %v11687_v25 = vld [vmem:[%s16604_s1 + $0x1450] ss:$8 sps:$4 sm:$0xff]  }
 0x284   :  { %8753 = vmatpush1.bf16.msra.mxu1 %v11678_v42  ;;  %v8419_v1 = vpop.f32.mrf.mxu0  ;;  %8713 = vmatprep.subr.bf16.mxu0 %v11683_v55 }
 0x285   :  { %v8460_v3 = vpop.f32.mrf.mxu1  ;;  %8754 = vmatprep.subr.bf16.mxu1 %v11686_v57  ;;  %v14744_v7 = vadd.f32 %v8458_v63, %v8418_v0  ;;  %v8420_v35 = vadd.f32 %v8419_v1, %v14541_v54  ;;  %8743 = vmatprep.mubr.bf16.mxu0 %v1552_v31  ;;  %v11695_v54 = vld [vmem:[%s16604_s1 + $0x1444] ss:$8 sps:$4 sm:$0xff]  }
 0x286   :  { %8784 = vmatprep.mubr.bf16.mxu1 %v1562_v32  ;;  %v8421_v8 = vpop.f32.mrf.mxu0 }
 0x287   :  { %v8462_v11 = vpop.f32.mrf.mxu1  ;;  %v14753_v12 = vadd.f32 %v8460_v3, %v8420_v35  ;;  %8714 = vmatpush1.bf16.msra.mxu0 %v11681_v58 }
 0x288   :  { %8755 = vmatpush1.bf16.msra.mxu1 %v11684_v59  ;;  %v8422_v53 = vpop.f32.mrf.mxu0  ;;  %8715 = vmatprep.subr.bf16.mxu0 %v11689_v5 }
 0x289   :  { %v8463_v13 = vpop.f32.mrf.mxu1  ;;  %8756 = vmatprep.subr.bf16.mxu1 %v11692_v48 }
 0x28b   :  { %8716 = vmatpush1.bf16.msra.mxu0 %v11687_v25 }
 0x28c   :  { %8757 = vmatpush1.bf16.msra.mxu1 %v11690_v41  ;;  %8717 = vmatprep.subr.bf16.mxu0 %v11695_v54 }
 0x28d   :  { %8758 = vmatprep.subr.bf16.mxu1 %v11698_v15 }
 0x28f   :  { %8718 = vmatpush1.bf16.msra.mxu0 %v11693_v16 }
 0x290   :  { %8759 = vmatpush1.bf16.msra.mxu1 %v11696_v17  ;;  %8719 = vmatprep.subr.bf16.mxu0 %v11701_v18 }
 0x291   :  { %8760 = vmatprep.subr.bf16.mxu1 %v11704_v20 }
 0x293   :  { %8720 = vmatpush1.bf16.msra.mxu0 %v11699_v56 }
 0x294   :  { %8761 = vmatpush1.bf16.msra.mxu1 %v11702_v22  ;;  %8721 = vmatprep.subr.bf16.mxu0 %v11707_v23 }
 0x295   :  { %8762 = vmatprep.subr.bf16.mxu1 %v11710_v24 }
 0x297   :  { %8722 = vmatpush1.bf16.msra.mxu0 %v11705_v26 }
 0x298   :  { %8763 = vmatpush1.bf16.msra.mxu1 %v11708_v2  ;;  %8723 = vmatprep.subr.bf16.mxu0 %v11713_v28 }
 0x299   :  { %8764 = vmatprep.subr.bf16.mxu1 %v11716_v4 }
 0x29b   :  { %8724 = vmatpush1.bf16.msra.mxu0 %v11711_v60 }
 0x29c   :  { %8765 = vmatpush1.bf16.msra.mxu1 %v11714_v30  ;;  %8725 = vmatprep.subr.bf16.mxu0 %v11719_v61 }
 0x29d   :  { %8766 = vmatprep.subr.bf16.mxu1 %v11722_v33 }
 0x29f   :  { %8726 = vmatpush1.bf16.msra.mxu0 %v11717_v9 }
 0x2a0   :  { %8767 = vmatpush1.bf16.msra.mxu1 %v11720_v36  ;;  %8727 = vmatprep.subr.bf16.mxu0 %v11725_v10 }
 0x2a1   :  { %8768 = vmatprep.subr.bf16.mxu1 %v11728_v37 }
 0x2a2   :  { %13 = vsyncpa [#allocation5], 0  ;;  %v11729_v44 = vld [vmem:[%s16604_s1 + $0x14e0] ss:$8 sps:$4 sm:$0xff]   ;;  %v11737_v46 = vld [vmem:[%s16604_s1 + $0x14d4] ss:$8 sps:$4 sm:$0xff]   ;;  %v1515_v58 = vcombine.high %v14672_v29, %v14672_v29  ;;  %v1538_v35 = vrot.slane %v14688_v43, %v12762_v49 }
 0x2a3   :  { %8728 = vmatpush2.bf16.msra.mxu0 %v11723_v38  ;;  %v11732_v45 = vld [vmem:[%s16604_s1 + $0x15e0] ss:$8 sps:$4 sm:$0xff]   ;;  %v11740_v47 = vld [vmem:[%s16604_s1 + $0x15d4] ss:$8 sps:$4 sm:$0xff]   ;;  %v11735_v50 = vld [vmem:[%s16604_s1 + $0x14d0] ss:$8 sps:$4 sm:$0xff]  }
 0x2a4   :  { %8769 = vmatpush2.bf16.msra.mxu1 %v11726_v39  ;;  %8729 = vmatprep.subr.bf16.mxu0 %v11731_v40  ;;  %v11738_v51 = vld [vmem:[%s16604_s1 + $0x15d0] ss:$8 sps:$4 sm:$0xff]   ;;  %v11743_v27 = vld [vmem:[%s16604_s1 + $0x14c4] ss:$8 sps:$4 sm:$0xff]   ;;  %v11741_v19 = vld [vmem:[%s16604_s1 + $0x14c0] ss:$8 sps:$4 sm:$0xff]   ;;  %v14896_v63 = vrot.slane %v1515_v58, %v12762_v49  ;;  %v1560_v53 = vcombine.high %v1538_v35, %v1538_v35 }
 0x2a5   :  { %8770 = vmatprep.subr.bf16.mxu1 %v11734_v14  ;;  %v11746_v6 = vld [vmem:[%s16604_s1 + $0x15c4] ss:$8 sps:$4 sm:$0xff]   ;;  %v11744_v21 = vld [vmem:[%s16604_s1 + $0x15c0] ss:$8 sps:$4 sm:$0xff]   ;;  %v11749_v52 = vld [vmem:[%s16604_s1 + $0x14b4] ss:$8 sps:$4 sm:$0xff]  }
 0x2a6   :  { %v11752_v42 = vld [vmem:[%s16604_s1 + $0x15b4] ss:$8 sps:$4 sm:$0xff]   ;;  %v11747_v31 = vld [vmem:[%s16604_s1 + $0x14b0] ss:$8 sps:$4 sm:$0xff]   ;;  %v11755_v55 = vld [vmem:[%s16604_s1 + $0x14a4] ss:$8 sps:$4 sm:$0xff]   ;;  %v1531_v48 = vcombine.high %v14896_v63, %v14896_v63 }
 0x2a7   :  { %8730 = vmatpush2.bf16.msra.mxu0 %v11729_v44  ;;  %v11750_v34 = vld [vmem:[%s16604_s1 + $0x15b0] ss:$8 sps:$4 sm:$0xff]   ;;  %v11758_v57 = vld [vmem:[%s16604_s1 + $0x15a4] ss:$8 sps:$4 sm:$0xff]   ;;  %v11753_v59 = vld [vmem:[%s16604_s1 + $0x14a0] ss:$8 sps:$4 sm:$0xff]  }
 0x2a8   :  { %8771 = vmatpush2.bf16.msra.mxu1 %v11732_v45  ;;  %8731 = vmatprep.subr.bf16.mxu0 %v11737_v46  ;;  %v11756_v32 = vld [vmem:[%s16604_s1 + $0x15a0] ss:$8 sps:$4 sm:$0xff]   ;;  %v11761_v62 = vld [vmem:[%s16604_s1 + $0x1494] ss:$8 sps:$4 sm:$0xff]   ;;  %v11759_v0 = vld [vmem:[%s16604_s1 + $0x1490] ss:$8 sps:$4 sm:$0xff]   ;;  %v1559_v11 = vrot.slane %v1531_v48, %v12762_v49 }
 0x2a9   :  { %8772 = vmatprep.subr.bf16.mxu1 %v11740_v47  ;;  %v11764_v29 = vld [vmem:[%s16604_s1 + $0x1594] ss:$8 sps:$4 sm:$0xff]   ;;  %v11762_v1 = vld [vmem:[%s16604_s1 + $0x1590] ss:$8 sps:$4 sm:$0xff]   ;;  %v11767_v3 = vld [vmem:[%s16604_s1 + $0x1484] ss:$8 sps:$4 sm:$0xff]  }
 0x2aa   :  { %v11770_v5 = vld [vmem:[%s16604_s1 + $0x1584] ss:$8 sps:$4 sm:$0xff]   ;;  %v11765_v25 = vld [vmem:[%s16604_s1 + $0x1480] ss:$8 sps:$4 sm:$0xff]   ;;  %v11773_v8 = vld [vmem:[%s16604_s1 + $0x1674] ss:$8 sps:$4 sm:$0xff]   ;;  %v1563_v17 = vcombine.high %v1559_v11, %v1559_v11 }
 0x2ab   :  { %8732 = vmatpush2.bf16.msra.mxu0 %v11735_v50  ;;  %v11768_v41 = vld [vmem:[%s16604_s1 + $0x1580] ss:$8 sps:$4 sm:$0xff]   ;;  %v11776_v43 = vld [vmem:[%s16604_s1 + $0x1774] ss:$8 sps:$4 sm:$0xff]   ;;  %v11771_v13 = vld [vmem:[%s16604_s1 + $0x1670] ss:$8 sps:$4 sm:$0xff]  }
 0x2ac   :  { %8773 = vmatpush2.bf16.msra.mxu1 %v11738_v51  ;;  %8733 = vmatprep.subr.bf16.mxu0 %v11743_v27  ;;  %v11774_v54 = vld [vmem:[%s16604_s1 + $0x1770] ss:$8 sps:$4 sm:$0xff]   ;;  %v11779_v15 = vld [vmem:[%s16604_s1 + $0x1664] ss:$8 sps:$4 sm:$0xff]   ;;  %v11777_v22 = vld [vmem:[%s16604_s1 + $0x1660] ss:$8 sps:$4 sm:$0xff]  }
 0x2ad   :  { %8774 = vmatprep.subr.bf16.mxu1 %v11746_v6  ;;  %v11782_v16 = vld [vmem:[%s16604_s1 + $0x1764] ss:$8 sps:$4 sm:$0xff]   ;;  %v11780_v23 = vld [vmem:[%s16604_s1 + $0x1760] ss:$8 sps:$4 sm:$0xff]   ;;  %v11785_v2 = vld [vmem:[%s16604_s1 + $0x1654] ss:$8 sps:$4 sm:$0xff]  }
 0x2ae   :  { %v11783_v33 = vld [vmem:[%s16604_s1 + $0x1650] ss:$8 sps:$4 sm:$0xff]   ;;  %v11794_v37 = vld [vmem:[%s16604_s1 + $0x1744] ss:$8 sps:$4 sm:$0xff]   ;;  %v11789_v38 = vld [vmem:[%s16604_s1 + $0x1640] ss:$8 sps:$4 sm:$0xff]  }
 0x2af   :  { %8734 = vmatpush2.bf16.msra.mxu0 %v11741_v19  ;;  %v11786_v9 = vld [vmem:[%s16604_s1 + $0x1750] ss:$8 sps:$4 sm:$0xff]   ;;  %v11792_v39 = vld [vmem:[%s16604_s1 + $0x1740] ss:$8 sps:$4 sm:$0xff]   ;;  %v11797_v40 = vld [vmem:[%s16604_s1 + $0x1634] ss:$8 sps:$4 sm:$0xff]  }
 0x2b0   :  { %8775 = vmatpush2.bf16.msra.mxu1 %v11744_v21  ;;  %8735 = vmatprep.subr.bf16.mxu0 %v11749_v52  ;;  %v11800_v14 = vld [vmem:[%s16604_s1 + $0x1734] ss:$8 sps:$4 sm:$0xff]   ;;  %v11795_v44 = vld [vmem:[%s16604_s1 + $0x1630] ss:$8 sps:$4 sm:$0xff]   ;;  %v11803_v46 = vld [vmem:[%s16604_s1 + $0x1624] ss:$8 sps:$4 sm:$0xff]  }
 0x2b1   :  { %8776 = vmatprep.subr.bf16.mxu1 %v11752_v42  ;;  %v11798_v45 = vld [vmem:[%s16604_s1 + $0x1730] ss:$8 sps:$4 sm:$0xff]   ;;  %v11806_v47 = vld [vmem:[%s16604_s1 + $0x1724] ss:$8 sps:$4 sm:$0xff]   ;;  %v11801_v50 = vld [vmem:[%s16604_s1 + $0x1620] ss:$8 sps:$4 sm:$0xff]  }
 0x2b2   :  { %v11804_v51 = vld [vmem:[%s16604_s1 + $0x1720] ss:$8 sps:$4 sm:$0xff]   ;;  %v11809_v27 = vld [vmem:[%s16604_s1 + $0x1614] ss:$8 sps:$4 sm:$0xff]   ;;  %v11807_v19 = vld [vmem:[%s16604_s1 + $0x1610] ss:$8 sps:$4 sm:$0xff]  }
 0x2b3   :  { %8736 = vmatpush2.bf16.msra.mxu0 %v11747_v31  ;;  %v11812_v6 = vld [vmem:[%s16604_s1 + $0x1714] ss:$8 sps:$4 sm:$0xff]   ;;  %v11810_v21 = vld [vmem:[%s16604_s1 + $0x1710] ss:$8 sps:$4 sm:$0xff]   ;;  %v11815_v52 = vld [vmem:[%s16604_s1 + $0x1604] ss:$8 sps:$4 sm:$0xff]  }
 0x2b4   :  { %8777 = vmatpush2.bf16.msra.mxu1 %v11750_v34  ;;  %8737 = vmatprep.subr.bf16.mxu0 %v11755_v55  ;;  %v11818_v42 = vld [vmem:[%s16604_s1 + $0x1704] ss:$8 sps:$4 sm:$0xff]   ;;  %v11813_v31 = vld [vmem:[%s16604_s1 + $0x1600] ss:$8 sps:$4 sm:$0xff]   ;;  %v11821_v55 = vld [vmem:[%s16604_s1 + $0x16f4] ss:$8 sps:$4 sm:$0xff]  }
 0x2b5   :  { %8778 = vmatprep.subr.bf16.mxu1 %v11758_v57  ;;  %v11816_v34 = vld [vmem:[%s16604_s1 + $0x1700] ss:$8 sps:$4 sm:$0xff]   ;;  %v11824_v57 = vld [vmem:[%s16604_s1 + $0x17f4] ss:$8 sps:$4 sm:$0xff]   ;;  %v11819_v58 = vld [vmem:[%s16604_s1 + $0x16f0] ss:$8 sps:$4 sm:$0xff]  }
 0x2b6   :  { %v11834_v48 = vld [vmem:[%s16604_s1 + $0x17d0] ss:$8 sps:$4 sm:$0xff]   ;;  %s12591_s2 = smov [#allocation4]  }
 0x2b7   :  { %8738 = vmatpush2.bf16.msra.mxu0 %v11753_v59  ;;  %v11822_v59 = vld [vmem:[%s16604_s1 + $0x17f0] ss:$8 sps:$4 sm:$0xff]   ;;  %s9474_s17 = sshll.u32 %s12591_s2, 4  ;;  %s9475_s17 = int_to_ptr.vmem [resolvable:$true] %s9474_s17 }
 0x2b8   :  { %8779 = vmatpush2.bf16.msra.mxu1 %v11756_v32  ;;  %8739 = vmatprep.subr.bf16.mxu0 %v11761_v62  ;;  %v11827_v32 = vld [vmem:[%s16604_s1 + $0x16e4] ss:$8 sps:$4 sm:$0xff]  }
 0x2b9   :  { %8780 = vmatprep.subr.bf16.mxu1 %v11764_v29  ;;  %v11830_v62 = vld [vmem:[%s16604_s1 + $0x17e4] ss:$8 sps:$4 sm:$0xff]   ;;  %v11825_v29 = vld [vmem:[%s16604_s1 + $0x16e0] ss:$8 sps:$4 sm:$0xff]  }
 0x2bb   :  { %8740 = vmatpush2.bf16.msra.mxu0 %v11759_v0  ;;  %v11828_v0 = vld [vmem:[%s16604_s1 + $0x17e0] ss:$8 sps:$4 sm:$0xff]  }
 0x2bc   :  { %8781 = vmatpush2.bf16.msra.mxu1 %v11762_v1  ;;  %8741 = vmatprep.subr.bf16.mxu0 %v11767_v3  ;;  %v11833_v1 = vld [vmem:[%s16604_s1 + $0x16d4] ss:$8 sps:$4 sm:$0xff]  }
 0x2bd   :  { %8782 = vmatprep.subr.bf16.mxu1 %v11770_v5  ;;  %v11836_v3 = vld [vmem:[%s16604_s1 + $0x17d4] ss:$8 sps:$4 sm:$0xff]   ;;  %v11831_v5 = vld [vmem:[%s16604_s1 + $0x16d0] ss:$8 sps:$4 sm:$0xff]  }
 0x2bf   :  { %8742 = vmatpush2.bf16.msra.mxu0 %v11765_v25  ;;  %v11842_v25 = vld [vmem:[%s16604_s1 + $0x17c4] ss:$8 sps:$4 sm:$0xff]  }
 0x2c0   :  { %8783 = vmatpush2.bf16.msra.mxu1 %v11768_v41  ;;  %8793 = vmatprep.subr.bf16.mxu0 %v11773_v8  ;;  %v11837_v41 = vld [vmem:[%s16604_s1 + $0x16c0] ss:$8 sps:$4 sm:$0xff]  }
 0x2c1   :  { %8834 = vmatprep.subr.bf16.mxu1 %v11776_v43  ;;  %v11840_v8 = vld [vmem:[%s16604_s1 + $0x17c0] ss:$8 sps:$4 sm:$0xff]   ;;  %v11845_v43 = vld [vmem:[%s16604_s1 + $0x16b4] ss:$8 sps:$4 sm:$0xff]  }
 0x2c2   :  { %v8499_v18 = vpop.f32.mrf.mxu0  ;;  %8744 = vmatmul.mubr.bf16.vlgmr.msra.gmra.mxu0 %v1538_v35  ;;  %v11839_v35 = vld [vmem:[%s16604_s1 + $0x16c4] ss:$8 sps:$4 sm:$0xff]  }
 0x2c3   :  { %v8540_v20 = vpop.f32.mrf.mxu1  ;;  %8785 = vmatmul.mubr.bf16.vlgmr.msra.gmra.mxu1 %v1560_v53  ;;  %v8500_v56 = vadd.f32 %v8499_v18, %v14744_v7  ;;  %8794 = vmatpush1.bf16.msra.mxu0 %v11771_v13  ;;  %v11788_v7 = vld [vmem:[%s16604_s1 + $0x1754] ss:$8 sps:$4 sm:$0xff]   ;;  %v11843_v53 = vld [vmem:[%s16604_s1 + $0x16b0] ss:$8 sps:$4 sm:$0xff]   ;;  %v11852_v18 = vld [vmem:[%s16604_s1 + $0x17a0] ss:$8 sps:$4 sm:$0xff]  }
 0x2c4   :  { %8835 = vmatpush1.bf16.msra.mxu1 %v11774_v54  ;;  %v8501_v24 = vpop.f32.mrf.mxu0  ;;  %8795 = vmatprep.subr.bf16.mxu0 %v11779_v15  ;;  %v11846_v13 = vld [vmem:[%s16604_s1 + $0x17b0] ss:$8 sps:$4 sm:$0xff]   ;;  %v11851_v54 = vld [vmem:[%s16604_s1 + $0x16a4] ss:$8 sps:$4 sm:$0xff]  }
 0x2c5   :  { %v8542_v26 = vpop.f32.mrf.mxu1  ;;  %8836 = vmatprep.subr.bf16.mxu1 %v11782_v16  ;;  %v14952_v28 = vadd.f32 %v8540_v20, %v8500_v56  ;;  %v8502_v4 = vadd.f32 %v8501_v24, %v14753_v12  ;;  %8825 = vmatprep.mubr.bf16.mxu0 %v1559_v11  ;;  %v11791_v12 = vld [vmem:[%s16604_s1 + $0x1644] ss:$8 sps:$4 sm:$0xff]   ;;  %v11848_v11 = vld [vmem:[%s16604_s1 + $0x17b4] ss:$8 sps:$4 sm:$0xff]   ;;  %v11858_v24 = vld [vmem:[%s16604_s1 + $0x1790] ss:$8 sps:$4 sm:$0xff]  }
 0x2c6   :  { %8866 = vmatprep.mubr.bf16.mxu1 %v1563_v17  ;;  %v8503_v60 = vpop.f32.mrf.mxu0  ;;  %v11854_v15 = vld [vmem:[%s16604_s1 + $0x17a4] ss:$8 sps:$4 sm:$0xff]   ;;  %v15092_v16 = vld [vmem:[%s16603_s0 + $0x30] sm:$0xff]  ;;  %v11849_v17 = vld [vmem:[%s16604_s1 + $0x16a0] ss:$8 sps:$4 sm:$0xff]  }
 0x2c7   :  { %v8544_v30 = vpop.f32.mrf.mxu1  ;;  %v14955_v61 = vadd.f32 %v8542_v26, %v8502_v4  ;;  %8796 = vmatpush1.bf16.msra.mxu0 %v11777_v22  ;;  %v11857_v20 = vld [vmem:[%s16604_s1 + $0x1694] ss:$8 sps:$4 sm:$0xff]   ;;  %v15108_v22 = vrot.slane %v15092_v16, %v12762_v49  ;;  %v11863_v26 = vld [vmem:[%s16604_s1 + $0x1684] ss:$8 sps:$4 sm:$0xff]   ;;  %v1545_v4 = vrot.slane %v14896_v63, %v12762_v49  ;;  %v11861_v60 = vld [vmem:[%s16604_s1 + $0x1680] ss:$8 sps:$4 sm:$0xff]  }
 0x2c8   :  { %8837 = vmatpush1.bf16.msra.mxu1 %v11780_v23  ;;  %v8504_v36 = vpop.f32.mrf.mxu0  ;;  %8797 = vmatprep.subr.bf16.mxu0 %v11785_v2  ;;  %v11860_v56 = vld [vmem:[%s16604_s1 + $0x1794] ss:$8 sps:$4 sm:$0xff]   ;;  %v11855_v23 = vld [vmem:[%s16604_s1 + $0x1690] ss:$8 sps:$4 sm:$0xff]   ;;  %v11866_v2 = vld [vmem:[%s16604_s1 + $0x1784] ss:$8 sps:$4 sm:$0xff]  }
 0x2c9   :  { %v8545_v10 = vpop.f32.mrf.mxu1  ;;  %8838 = vmatprep.subr.bf16.mxu1 %v11788_v7  ;;  %v1579_v7 = vcombine.high %v15108_v22, %v15108_v22  ;;  %v11864_v30 = vld [vmem:[%s16604_s1 + $0x1780] ss:$8 sps:$4 sm:$0xff]   ;;  %v11873_v63 = vld [vmem:[%s16604_s1 + $0x1974] ss:$8 sps:$4 sm:$0xff]   ;;  %v1561_v36 = vcombine.high %v1545_v4, %v1545_v4 }
 0x2ca   :  { %v11868_v10 = vld [vmem:[%s16604_s1 + $0x1870] ss:$8 sps:$4 sm:$0xff]  }
 0x2cb   :  { %8798 = vmatpush1.bf16.msra.mxu0 %v11783_v33  ;;  %v11870_v33 = vld [vmem:[%s16604_s1 + $0x1874] ss:$8 sps:$4 sm:$0xff]  }
 0x2cc   :  { %8839 = vmatpush1.bf16.msra.mxu1 %v11786_v9  ;;  %8799 = vmatprep.subr.bf16.mxu0 %v11791_v12  ;;  %v1601_v9 = vrot.slane %v1579_v7, %v12762_v49  ;;  %v11871_v12 = vld [vmem:[%s16604_s1 + $0x1970] ss:$8 sps:$4 sm:$0xff]  }
 0x2cd   :  { %8840 = vmatprep.subr.bf16.mxu1 %v11794_v37  ;;  %v11876_v37 = vld [vmem:[%s16604_s1 + $0x1864] ss:$8 sps:$4 sm:$0xff]   ;;  %v11928_v7 = vld [vmem:[%s16604_s1 + $0x18d0] ss:$8 sps:$4 sm:$0xff]  }
 0x2cf   :  { %8800 = vmatpush1.bf16.msra.mxu0 %v11789_v38  ;;  %v11879_v38 = vld [vmem:[%s16604_s1 + $0x1964] ss:$8 sps:$4 sm:$0xff]  }
 0x2d0   :  { %8841 = vmatpush1.bf16.msra.mxu1 %v11792_v39  ;;  %8801 = vmatprep.subr.bf16.mxu0 %v11797_v40  ;;  %v1611_v39 = vcombine.high %v1601_v9, %v1601_v9 }
 0x2d1   :  { %8842 = vmatprep.subr.bf16.mxu1 %v11800_v14 }
 0x2d3   :  { %8802 = vmatpush1.bf16.msra.mxu0 %v11795_v44 }
 0x2d4   :  { %8843 = vmatpush1.bf16.msra.mxu1 %v11798_v45  ;;  %8803 = vmatprep.subr.bf16.mxu0 %v11803_v46  ;;  %v11874_v45 = vld [vmem:[%s16604_s1 + $0x1860] ss:$8 sps:$4 sm:$0xff]  }
 0x2d5   :  { %8844 = vmatprep.subr.bf16.mxu1 %v11806_v47  ;;  %v11877_v46 = vld [vmem:[%s16604_s1 + $0x1960] ss:$8 sps:$4 sm:$0xff]  }
 0x2d7   :  { %8804 = vmatpush1.bf16.msra.mxu0 %v11801_v50 }
 0x2d8   :  { %8845 = vmatpush1.bf16.msra.mxu1 %v11804_v51  ;;  %8805 = vmatprep.subr.bf16.mxu0 %v11809_v27  ;;  %v11882_v51 = vld [vmem:[%s16604_s1 + $0x1854] ss:$8 sps:$4 sm:$0xff]  }
 0x2d9   :  { %8846 = vmatprep.subr.bf16.mxu1 %v11812_v6 }
 0x2db   :  { %8806 = vmatpush1.bf16.msra.mxu0 %v11807_v19 }
 0x2dc   :  { %8847 = vmatpush1.bf16.msra.mxu1 %v11810_v21  ;;  %8807 = vmatprep.subr.bf16.mxu0 %v11815_v52 }
 0x2dd   :  { %8848 = vmatprep.subr.bf16.mxu1 %v11818_v42  ;;  %v11880_v42 = vld [vmem:[%s16604_s1 + $0x1850] ss:$8 sps:$4 sm:$0xff]  }
 0x2df   :  { %8808 = vmatpush1.bf16.msra.mxu0 %v11813_v31  ;;  %v11883_v31 = vld [vmem:[%s16604_s1 + $0x1950] ss:$8 sps:$4 sm:$0xff]  }
 0x2e0   :  { %8849 = vmatpush1.bf16.msra.mxu1 %v11816_v34  ;;  %8809 = vmatprep.subr.bf16.mxu0 %v11821_v55 }
 0x2e1   :  { %8850 = vmatprep.subr.bf16.mxu1 %v11824_v57  ;;  %v11891_v57 = vld [vmem:[%s16604_s1 + $0x1944] ss:$8 sps:$4 sm:$0xff]  }
 0x2e3   :  { %8810 = vmatpush2.bf16.msra.mxu0 %v11819_v58  ;;  %v11886_v58 = vld [vmem:[%s16604_s1 + $0x1840] ss:$8 sps:$4 sm:$0xff]  }
 0x2e4   :  { %8851 = vmatpush2.bf16.msra.mxu1 %v11822_v59  ;;  %8811 = vmatprep.subr.bf16.mxu0 %v11827_v32  ;;  %v11889_v59 = vld [vmem:[%s16604_s1 + $0x1940] ss:$8 sps:$4 sm:$0xff]   ;;  %v11894_v32 = vld [vmem:[%s16604_s1 + $0x1834] ss:$8 sps:$4 sm:$0xff]  }
 0x2e5   :  { %8852 = vmatprep.subr.bf16.mxu1 %v11830_v62  ;;  %v11897_v62 = vld [vmem:[%s16604_s1 + $0x1934] ss:$8 sps:$4 sm:$0xff]  }
 0x2e7   :  { %8812 = vmatpush2.bf16.msra.mxu0 %v11825_v29  ;;  %v11892_v29 = vld [vmem:[%s16604_s1 + $0x1830] ss:$8 sps:$4 sm:$0xff]  }
 0x2e8   :  { %8853 = vmatpush2.bf16.msra.mxu1 %v11828_v0  ;;  %8813 = vmatprep.subr.bf16.mxu0 %v11833_v1  ;;  %v11895_v0 = vld [vmem:[%s16604_s1 + $0x1930] ss:$8 sps:$4 sm:$0xff]   ;;  %v11900_v1 = vld [vmem:[%s16604_s1 + $0x1824] ss:$8 sps:$4 sm:$0xff]  }
 0x2e9   :  { %8854 = vmatprep.subr.bf16.mxu1 %v11836_v3  ;;  %v11903_v3 = vld [vmem:[%s16604_s1 + $0x1924] ss:$8 sps:$4 sm:$0xff]  }
 0x2eb   :  { %8814 = vmatpush2.bf16.msra.mxu0 %v11831_v5  ;;  %v11898_v5 = vld [vmem:[%s16604_s1 + $0x1820] ss:$8 sps:$4 sm:$0xff]  }
 0x2ec   :  { %8855 = vmatpush2.bf16.msra.mxu1 %v11834_v48  ;;  %8815 = vmatprep.subr.bf16.mxu0 %v11839_v35  ;;  %v11901_v48 = vld [vmem:[%s16604_s1 + $0x1920] ss:$8 sps:$4 sm:$0xff]   ;;  %v11906_v35 = vld [vmem:[%s16604_s1 + $0x1814] ss:$8 sps:$4 sm:$0xff]  }
 0x2ed   :  { %8856 = vmatprep.subr.bf16.mxu1 %v11842_v25  ;;  %v11909_v25 = vld [vmem:[%s16604_s1 + $0x1914] ss:$8 sps:$4 sm:$0xff]  }
 0x2ef   :  { %8816 = vmatpush2.bf16.msra.mxu0 %v11837_v41  ;;  %v11904_v41 = vld [vmem:[%s16604_s1 + $0x1810] ss:$8 sps:$4 sm:$0xff]  }
 0x2f0   :  { %8857 = vmatpush2.bf16.msra.mxu1 %v11840_v8  ;;  %8817 = vmatprep.subr.bf16.mxu0 %v11845_v43  ;;  %v11907_v8 = vld [vmem:[%s16604_s1 + $0x1910] ss:$8 sps:$4 sm:$0xff]   ;;  %v11912_v43 = vld [vmem:[%s16604_s1 + $0x1804] ss:$8 sps:$4 sm:$0xff]  }
 0x2f1   :  { %8858 = vmatprep.subr.bf16.mxu1 %v11848_v11  ;;  %v11915_v11 = vld [vmem:[%s16604_s1 + $0x1904] ss:$8 sps:$4 sm:$0xff]  }
 0x2f3   :  { %8818 = vmatpush2.bf16.msra.mxu0 %v11843_v53  ;;  %v11910_v53 = vld [vmem:[%s16604_s1 + $0x1800] ss:$8 sps:$4 sm:$0xff]  }
 0x2f4   :  { %8859 = vmatpush2.bf16.msra.mxu1 %v11846_v13  ;;  %8819 = vmatprep.subr.bf16.mxu0 %v11851_v54  ;;  %v11913_v13 = vld [vmem:[%s16604_s1 + $0x1900] ss:$8 sps:$4 sm:$0xff]   ;;  %v11918_v54 = vld [vmem:[%s16604_s1 + $0x18f4] ss:$8 sps:$4 sm:$0xff]  }
 0x2f5   :  { %8860 = vmatprep.subr.bf16.mxu1 %v11854_v15  ;;  %v11921_v15 = vld [vmem:[%s16604_s1 + $0x19f4] ss:$8 sps:$4 sm:$0xff]  }
 0x2f7   :  { %8820 = vmatpush2.bf16.msra.mxu0 %v11849_v17  ;;  %v11916_v17 = vld [vmem:[%s16604_s1 + $0x18f0] ss:$8 sps:$4 sm:$0xff]  }
 0x2f8   :  { %8861 = vmatpush2.bf16.msra.mxu1 %v11852_v18  ;;  %8821 = vmatprep.subr.bf16.mxu0 %v11857_v20  ;;  %v11919_v18 = vld [vmem:[%s16604_s1 + $0x19f0] ss:$8 sps:$4 sm:$0xff]   ;;  %v11924_v20 = vld [vmem:[%s16604_s1 + $0x18e4] ss:$8 sps:$4 sm:$0xff]  }
 0x2f9   :  { %8862 = vmatprep.subr.bf16.mxu1 %v11860_v56  ;;  %v11927_v56 = vld [vmem:[%s16604_s1 + $0x19e4] ss:$8 sps:$4 sm:$0xff]  }
 0x2fb   :  { %8822 = vmatpush2.bf16.msra.mxu0 %v11855_v23  ;;  %v11922_v23 = vld [vmem:[%s16604_s1 + $0x18e0] ss:$8 sps:$4 sm:$0xff]  }
 0x2fc   :  { %8863 = vmatpush2.bf16.msra.mxu1 %v11858_v24  ;;  %8823 = vmatprep.subr.bf16.mxu0 %v11863_v26  ;;  %v11925_v24 = vld [vmem:[%s16604_s1 + $0x19e0] ss:$8 sps:$4 sm:$0xff]   ;;  %v11930_v26 = vld [vmem:[%s16604_s1 + $0x18d4] ss:$8 sps:$4 sm:$0xff]  }
 0x2fd   :  { %8864 = vmatprep.subr.bf16.mxu1 %v11866_v2  ;;  %v11933_v2 = vld [vmem:[%s16604_s1 + $0x19d4] ss:$8 sps:$4 sm:$0xff]  }
 0x2ff   :  { %8824 = vmatpush2.bf16.msra.mxu0 %v11861_v60  ;;  %v11936_v60 = vld [vmem:[%s16604_s1 + $0x18c4] ss:$8 sps:$4 sm:$0xff]  }
 0x300   :  { %8865 = vmatpush2.bf16.msra.mxu1 %v11864_v30  ;;  %8875 = vmatprep.subr.bf16.mxu0 %v11870_v33  ;;  %v11939_v30 = vld [vmem:[%s16604_s1 + $0x19c4] ss:$8 sps:$4 sm:$0xff]   ;;  %v11934_v33 = vld [vmem:[%s16604_s1 + $0x18c0] ss:$8 sps:$4 sm:$0xff]  }
 0x301   :  { %8916 = vmatprep.subr.bf16.mxu1 %v11873_v63  ;;  %v11937_v63 = vld [vmem:[%s16604_s1 + $0x19c0] ss:$8 sps:$4 sm:$0xff]  }
 0x302   :  { %v8581_v40 = vpop.f32.mrf.mxu0  ;;  %8826 = vmatmul.mubr.bf16.vlgmr.msra.gmra.mxu0 %v1545_v4  ;;  %v11931_v4 = vld [vmem:[%s16604_s1 + $0x19d0] ss:$8 sps:$4 sm:$0xff]  }
 0x303   :  { %v8622_v14 = vpop.f32.mrf.mxu1  ;;  %8867 = vmatmul.mubr.bf16.vlgmr.msra.gmra.mxu1 %v1561_v36  ;;  %v8582_v44 = vadd.f32 %v8581_v40, %v14952_v28  ;;  %8876 = vmatpush1.bf16.msra.mxu0 %v11868_v10  ;;  %v11885_v28 = vld [vmem:[%s16604_s1 + $0x1954] ss:$8 sps:$4 sm:$0xff]   ;;  %v11940_v10 = vld [vmem:[%s16604_s1 + $0x18b0] ss:$8 sps:$4 sm:$0xff]   ;;  %v11946_v40 = vld [vmem:[%s16604_s1 + $0x18a0] ss:$8 sps:$4 sm:$0xff]  }
 0x304   :  { %8917 = vmatpush1.bf16.msra.mxu1 %v11871_v12  ;;  %v8583_v47 = vpop.f32.mrf.mxu0  ;;  %8877 = vmatprep.subr.bf16.mxu0 %v11876_v37  ;;  %v11945_v36 = vld [vmem:[%s16604_s1 + $0x19b4] ss:$8 sps:$4 sm:$0xff]   ;;  %v11943_v12 = vld [vmem:[%s16604_s1 + $0x19b0] ss:$8 sps:$4 sm:$0xff]   ;;  %v11948_v37 = vld [vmem:[%s16604_s1 + $0x18a4] ss:$8 sps:$4 sm:$0xff]  }
 0x305   :  { %v8624_v50 = vpop.f32.mrf.mxu1  ;;  %8918 = vmatprep.subr.bf16.mxu1 %v11879_v38  ;;  %v15164_v27 = vadd.f32 %v8622_v14, %v8582_v44  ;;  %v8584_v6 = vadd.f32 %v8583_v47, %v14955_v61  ;;  %8907 = vmatprep.mubr.bf16.mxu0 %v1601_v9  ;;  %v11888_v61 = vld [vmem:[%s16604_s1 + $0x1844] ss:$8 sps:$4 sm:$0xff]   ;;  %v11942_v9 = vld [vmem:[%s16604_s1 + $0x18b4] ss:$8 sps:$4 sm:$0xff]   ;;  %v11949_v14 = vld [vmem:[%s16604_s1 + $0x19a0] ss:$8 sps:$4 sm:$0xff]  }
 0x306   :  { %8948 = vmatprep.mubr.bf16.mxu1 %v1611_v39  ;;  %v8585_v19 = vpop.f32.mrf.mxu0  ;;  %v11951_v38 = vld [vmem:[%s16604_s1 + $0x19a4] ss:$8 sps:$4 sm:$0xff]   ;;  %v1564_v39 = vcombine.high %v15092_v16, %v15092_v16  ;;  %v11954_v44 = vld [vmem:[%s16604_s1 + $0x1894] ss:$8 sps:$4 sm:$0xff]   ;;  %v11955_v47 = vld [vmem:[%s16604_s1 + $0x1990] ss:$8 sps:$4 sm:$0xff]  }
 0x307   :  { %v8626_v21 = vpop.f32.mrf.mxu1  ;;  %v15167_v52 = vadd.f32 %v8624_v50, %v8584_v6  ;;  %8878 = vmatpush1.bf16.msra.mxu0 %v11874_v45  ;;  %v11957_v16 = vld [vmem:[%s16604_s1 + $0x1994] ss:$8 sps:$4 sm:$0xff]   ;;  %v11960_v50 = vld [vmem:[%s16604_s1 + $0x1884] ss:$8 sps:$4 sm:$0xff]   ;;  %v1587_v6 = vrot.slane %v15108_v22, %v12762_v49  ;;  %v11958_v19 = vld [vmem:[%s16604_s1 + $0x1880] ss:$8 sps:$4 sm:$0xff]  }
 0x308   :  { %8919 = vmatpush1.bf16.msra.mxu1 %v11877_v46  ;;  %v8586_v34 = vpop.f32.mrf.mxu0  ;;  %8879 = vmatprep.subr.bf16.mxu0 %v11882_v51  ;;  %v15316_v45 = vrot.slane %v1564_v39, %v12762_v49  ;;  %v11952_v46 = vld [vmem:[%s16604_s1 + $0x1890] ss:$8 sps:$4 sm:$0xff]   ;;  %v11963_v51 = vld [vmem:[%s16604_s1 + $0x1984] ss:$8 sps:$4 sm:$0xff]   ;;  %v11961_v21 = vld [vmem:[%s16604_s1 + $0x1980] ss:$8 sps:$4 sm:$0xff]  }
 0x309   :  { %v8627_v55 = vpop.f32.mrf.mxu1  ;;  %8920 = vmatprep.subr.bf16.mxu1 %v11885_v28  ;;  %v11969_v22 = vld [vmem:[%s16604_s1 + $0x1b74] ss:$8 sps:$4 sm:$0xff]   ;;  %v1609_v34 = vcombine.high %v1587_v6, %v1587_v6  ;;  %v12012_v39 = vld [vmem:[%s16604_s1 + $0x1af0] ss:$8 sps:$4 sm:$0xff]  }
 0x30a   :  { %v1580_v28 = vcombine.high %v15316_v45, %v15316_v45  ;;  %v11964_v55 = vld [vmem:[%s16604_s1 + $0x1a70] ss:$8 sps:$4 sm:$0xff]  }
 0x30b   :  { %8880 = vmatpush1.bf16.msra.mxu0 %v11880_v42  ;;  %v11966_v42 = vld [vmem:[%s16604_s1 + $0x1a74] ss:$8 sps:$4 sm:$0xff]  }
 0x30c   :  { %8921 = vmatpush1.bf16.msra.mxu1 %v11883_v31  ;;  %8881 = vmatprep.subr.bf16.mxu0 %v11888_v61  ;;  %v1608_v31 = vrot.slane %v1580_v28, %v12762_v49  ;;  %v11967_v61 = vld [vmem:[%s16604_s1 + $0x1b70] ss:$8 sps:$4 sm:$0xff]  }
 0x30d   :  { %8922 = vmatprep.subr.bf16.mxu1 %v11891_v57  ;;  %v11972_v57 = vld [vmem:[%s16604_s1 + $0x1a64] ss:$8 sps:$4 sm:$0xff]   ;;  %v12027_v28 = vld [vmem:[%s16604_s1 + $0x1bd0] ss:$8 sps:$4 sm:$0xff]  }
 0x30f   :  { %8882 = vmatpush1.bf16.msra.mxu0 %v11886_v58  ;;  %v11975_v58 = vld [vmem:[%s16604_s1 + $0x1b64] ss:$8 sps:$4 sm:$0xff]  }
 0x310   :  { %8923 = vmatpush1.bf16.msra.mxu1 %v11889_v59  ;;  %8883 = vmatprep.subr.bf16.mxu0 %v11894_v32  ;;  %v1612_v59 = vcombine.high %v1608_v31, %v1608_v31 }
 0x311   :  { %8924 = vmatprep.subr.bf16.mxu1 %v11897_v62 }
 0x313   :  { %8884 = vmatpush1.bf16.msra.mxu0 %v11892_v29 }
 0x314   :  { %8925 = vmatpush1.bf16.msra.mxu1 %v11895_v0  ;;  %8885 = vmatprep.subr.bf16.mxu0 %v11900_v1  ;;  %v11970_v0 = vld [vmem:[%s16604_s1 + $0x1a60] ss:$8 sps:$4 sm:$0xff]  }
 0x315   :  { %8926 = vmatprep.subr.bf16.mxu1 %v11903_v3  ;;  %v11973_v1 = vld [vmem:[%s16604_s1 + $0x1b60] ss:$8 sps:$4 sm:$0xff]  }
 0x317   :  { %8886 = vmatpush1.bf16.msra.mxu0 %v11898_v5 }
 0x318   :  { %8927 = vmatpush1.bf16.msra.mxu1 %v11901_v48  ;;  %8887 = vmatprep.subr.bf16.mxu0 %v11906_v35  ;;  %v11978_v48 = vld [vmem:[%s16604_s1 + $0x1a54] ss:$8 sps:$4 sm:$0xff]  }
 0x319   :  { %8928 = vmatprep.subr.bf16.mxu1 %v11909_v25 }
 0x31b   :  { %8888 = vmatpush1.bf16.msra.mxu0 %v11904_v41 }
 0x31c   :  { %8929 = vmatpush1.bf16.msra.mxu1 %v11907_v8  ;;  %8889 = vmatprep.subr.bf16.mxu0 %v11912_v43 }
 0x31d   :  { %8930 = vmatprep.subr.bf16.mxu1 %v11915_v11  ;;  %v11976_v11 = vld [vmem:[%s16604_s1 + $0x1a50] ss:$8 sps:$4 sm:$0xff]  }
 0x31f   :  { %8890 = vmatpush1.bf16.msra.mxu0 %v11910_v53  ;;  %v11979_v53 = vld [vmem:[%s16604_s1 + $0x1b50] ss:$8 sps:$4 sm:$0xff]  }
 0x320   :  { %8931 = vmatpush1.bf16.msra.mxu1 %v11913_v13  ;;  %8891 = vmatprep.subr.bf16.mxu0 %v11918_v54 }
 0x321   :  { %8932 = vmatprep.subr.bf16.mxu1 %v11921_v15  ;;  %v11987_v15 = vld [vmem:[%s16604_s1 + $0x1b44] ss:$8 sps:$4 sm:$0xff]  }
 0x323   :  { %8892 = vmatpush2.bf16.msra.mxu0 %v11916_v17  ;;  %v11982_v17 = vld [vmem:[%s16604_s1 + $0x1a40] ss:$8 sps:$4 sm:$0xff]  }
 0x324   :  { %8933 = vmatpush2.bf16.msra.mxu1 %v11919_v18  ;;  %8893 = vmatprep.subr.bf16.mxu0 %v11924_v20  ;;  %v11985_v18 = vld [vmem:[%s16604_s1 + $0x1b40] ss:$8 sps:$4 sm:$0xff]   ;;  %v11990_v20 = vld [vmem:[%s16604_s1 + $0x1a34] ss:$8 sps:$4 sm:$0xff]  }
 0x325   :  { %8934 = vmatprep.subr.bf16.mxu1 %v11927_v56  ;;  %v11993_v56 = vld [vmem:[%s16604_s1 + $0x1b34] ss:$8 sps:$4 sm:$0xff]  }
 0x327   :  { %8894 = vmatpush2.bf16.msra.mxu0 %v11922_v23  ;;  %v11988_v23 = vld [vmem:[%s16604_s1 + $0x1a30] ss:$8 sps:$4 sm:$0xff]  }
 0x328   :  { %8935 = vmatpush2.bf16.msra.mxu1 %v11925_v24  ;;  %8895 = vmatprep.subr.bf16.mxu0 %v11930_v26  ;;  %v11991_v24 = vld [vmem:[%s16604_s1 + $0x1b30] ss:$8 sps:$4 sm:$0xff]   ;;  %v11996_v26 = vld [vmem:[%s16604_s1 + $0x1a24] ss:$8 sps:$4 sm:$0xff]  }
 0x329   :  { %8936 = vmatprep.subr.bf16.mxu1 %v11933_v2  ;;  %v11999_v2 = vld [vmem:[%s16604_s1 + $0x1b24] ss:$8 sps:$4 sm:$0xff]  }
 0x32b   :  { %8896 = vmatpush2.bf16.msra.mxu0 %v11928_v7  ;;  %v11994_v7 = vld [vmem:[%s16604_s1 + $0x1a20] ss:$8 sps:$4 sm:$0xff]  }
 0x32c   :  { %8937 = vmatpush2.bf16.msra.mxu1 %v11931_v4  ;;  %8897 = vmatprep.subr.bf16.mxu0 %v11936_v60  ;;  %v11997_v4 = vld [vmem:[%s16604_s1 + $0x1b20] ss:$8 sps:$4 sm:$0xff]   ;;  %v12002_v60 = vld [vmem:[%s16604_s1 + $0x1a14] ss:$8 sps:$4 sm:$0xff]  }
 0x32d   :  { %8938 = vmatprep.subr.bf16.mxu1 %v11939_v30  ;;  %v12005_v30 = vld [vmem:[%s16604_s1 + $0x1b14] ss:$8 sps:$4 sm:$0xff]  }
 0x32f   :  { %8898 = vmatpush2.bf16.msra.mxu0 %v11934_v33  ;;  %v12000_v33 = vld [vmem:[%s16604_s1 + $0x1a10] ss:$8 sps:$4 sm:$0xff]  }
 0x330   :  { %8939 = vmatpush2.bf16.msra.mxu1 %v11937_v63  ;;  %8899 = vmatprep.subr.bf16.mxu0 %v11942_v9  ;;  %v12003_v63 = vld [vmem:[%s16604_s1 + $0x1b10] ss:$8 sps:$4 sm:$0xff]   ;;  %v12008_v9 = vld [vmem:[%s16604_s1 + $0x1a04] ss:$8 sps:$4 sm:$0xff]  }
 0x331   :  { %8940 = vmatprep.subr.bf16.mxu1 %v11945_v36  ;;  %v12011_v36 = vld [vmem:[%s16604_s1 + $0x1b04] ss:$8 sps:$4 sm:$0xff]  }
 0x333   :  { %8900 = vmatpush2.bf16.msra.mxu0 %v11940_v10  ;;  %v12006_v10 = vld [vmem:[%s16604_s1 + $0x1a00] ss:$8 sps:$4 sm:$0xff]  }
 0x334   :  { %8941 = vmatpush2.bf16.msra.mxu1 %v11943_v12  ;;  %8901 = vmatprep.subr.bf16.mxu0 %v11948_v37  ;;  %v12009_v12 = vld [vmem:[%s16604_s1 + $0x1b00] ss:$8 sps:$4 sm:$0xff]   ;;  %v12014_v37 = vld [vmem:[%s16604_s1 + $0x1af4] ss:$8 sps:$4 sm:$0xff]  }
 0x335   :  { %8942 = vmatprep.subr.bf16.mxu1 %v11951_v38  ;;  %v12017_v38 = vld [vmem:[%s16604_s1 + $0x1bf4] ss:$8 sps:$4 sm:$0xff]  }
 0x337   :  { %8902 = vmatpush2.bf16.msra.mxu0 %v11946_v40  ;;  %v12015_v40 = vld [vmem:[%s16604_s1 + $0x1bf0] ss:$8 sps:$4 sm:$0xff]  }
 0x338   :  { %8943 = vmatpush2.bf16.msra.mxu1 %v11949_v14  ;;  %8903 = vmatprep.subr.bf16.mxu0 %v11954_v44  ;;  %v12020_v14 = vld [vmem:[%s16604_s1 + $0x1ae4] ss:$8 sps:$4 sm:$0xff]  }
 0x339   :  { %8944 = vmatprep.subr.bf16.mxu1 %v11957_v16  ;;  %v12023_v44 = vld [vmem:[%s16604_s1 + $0x1be4] ss:$8 sps:$4 sm:$0xff]   ;;  %v12018_v16 = vld [vmem:[%s16604_s1 + $0x1ae0] ss:$8 sps:$4 sm:$0xff]  }
 0x33b   :  { %8904 = vmatpush2.bf16.msra.mxu0 %v11952_v46  ;;  %v12021_v46 = vld [vmem:[%s16604_s1 + $0x1be0] ss:$8 sps:$4 sm:$0xff]  }
 0x33c   :  { %8945 = vmatpush2.bf16.msra.mxu1 %v11955_v47  ;;  %8905 = vmatprep.subr.bf16.mxu0 %v11960_v50  ;;  %v12026_v47 = vld [vmem:[%s16604_s1 + $0x1ad4] ss:$8 sps:$4 sm:$0xff]  }
 0x33d   :  { %8946 = vmatprep.subr.bf16.mxu1 %v11963_v51  ;;  %v12029_v50 = vld [vmem:[%s16604_s1 + $0x1bd4] ss:$8 sps:$4 sm:$0xff]   ;;  %v12024_v51 = vld [vmem:[%s16604_s1 + $0x1ad0] ss:$8 sps:$4 sm:$0xff]  }
 0x33f   :  { %8906 = vmatpush2.bf16.msra.mxu0 %v11958_v19  ;;  %v12035_v19 = vld [vmem:[%s16604_s1 + $0x1bc4] ss:$8 sps:$4 sm:$0xff]  }
 0x340   :  { %8947 = vmatpush2.bf16.msra.mxu1 %v11961_v21  ;;  %8957 = vmatprep.subr.bf16.mxu0 %v11966_v42  ;;  %v12030_v21 = vld [vmem:[%s16604_s1 + $0x1ac0] ss:$8 sps:$4 sm:$0xff]  }
 0x341   :  { %8998 = vmatprep.subr.bf16.mxu1 %v11969_v22  ;;  %v12033_v42 = vld [vmem:[%s16604_s1 + $0x1bc0] ss:$8 sps:$4 sm:$0xff]   ;;  %v12038_v22 = vld [vmem:[%s16604_s1 + $0x1ab4] ss:$8 sps:$4 sm:$0xff]  }
 0x342   :  { %v8663_v32 = vpop.f32.mrf.mxu0  ;;  %8908 = vmatmul.mubr.bf16.vlgmr.msra.gmra.mxu0 %v1587_v6  ;;  %v12032_v6 = vld [vmem:[%s16604_s1 + $0x1ac4] ss:$8 sps:$4 sm:$0xff]  }
 0x343   :  { %v8704_v62 = vpop.f32.mrf.mxu1  ;;  %8949 = vmatmul.mubr.bf16.vlgmr.msra.gmra.mxu1 %v1609_v34  ;;  %v8664_v29 = vadd.f32 %v8663_v32, %v15164_v27  ;;  %8958 = vmatpush1.bf16.msra.mxu0 %v11964_v55  ;;  %v11981_v27 = vld [vmem:[%s16604_s1 + $0x1b54] ss:$8 sps:$4 sm:$0xff]   ;;  %v12036_v34 = vld [vmem:[%s16604_s1 + $0x1ab0] ss:$8 sps:$4 sm:$0xff]   ;;  %v12045_v32 = vld [vmem:[%s16604_s1 + $0x1ba0] ss:$8 sps:$4 sm:$0xff]  }
 0x344   :  { %8999 = vmatpush1.bf16.msra.mxu1 %v11967_v61  ;;  %v8665_v3 = vpop.f32.mrf.mxu0  ;;  %8959 = vmatprep.subr.bf16.mxu0 %v11972_v57  ;;  %v12039_v55 = vld [vmem:[%s16604_s1 + $0x1bb0] ss:$8 sps:$4 sm:$0xff]   ;;  %v12044_v61 = vld [vmem:[%s16604_s1 + $0x1aa4] ss:$8 sps:$4 sm:$0xff]  }
 0x345   :  { %v8706_v5 = vpop.f32.mrf.mxu1  ;;  %9000 = vmatprep.subr.bf16.mxu1 %v11975_v58  ;;  %v15372_v35 = vadd.f32 %v8704_v62, %v8664_v29  ;;  %v8666_v25 = vadd.f32 %v8665_v3, %v15167_v52  ;;  %8989 = vmatprep.mubr.bf16.mxu0 %v1608_v31  ;;  %v11984_v52 = vld [vmem:[%s16604_s1 + $0x1a44] ss:$8 sps:$4 sm:$0xff]   ;;  %v12041_v31 = vld [vmem:[%s16604_s1 + $0x1bb4] ss:$8 sps:$4 sm:$0xff]   ;;  %v12051_v3 = vld [vmem:[%s16604_s1 + $0x1b90] ss:$8 sps:$4 sm:$0xff]  }
 0x346   :  { %9030 = vmatprep.mubr.bf16.mxu1 %v1612_v59  ;;  %v8667_v41 = vpop.f32.mrf.mxu0  ;;  %v12047_v57 = vld [vmem:[%s16604_s1 + $0x1ba4] ss:$8 sps:$4 sm:$0xff]   ;;  %v15512_v58 = vld [vmem:[%s16603_s0 + $0x38] sm:$0xff]  ;;  %v12042_v59 = vld [vmem:[%s16604_s1 + $0x1aa0] ss:$8 sps:$4 sm:$0xff]  }
 0x347   :  { %v8708_v8 = vpop.f32.mrf.mxu1  ;;  %v15375_v43 = vadd.f32 %v8706_v5, %v8666_v25  ;;  %8960 = vmatpush1.bf16.msra.mxu0 %v11970_v0  ;;  %v12050_v62 = vld [vmem:[%s16604_s1 + $0x1a94] ss:$8 sps:$4 sm:$0xff]   ;;  %v15528_v0 = vrot.slane %v15512_v58, %v12762_v49  ;;  %v12056_v5 = vld [vmem:[%s16604_s1 + $0x1a84] ss:$8 sps:$4 sm:$0xff]   ;;  %v1594_v25 = vrot.slane %v15316_v45, %v12762_v49  ;;  %v12054_v41 = vld [vmem:[%s16604_s1 + $0x1a80] ss:$8 sps:$4 sm:$0xff]  }
 0x348   :  { %9001 = vmatpush1.bf16.msra.mxu1 %v11973_v1  ;;  %v8668_v13 = vpop.f32.mrf.mxu0  ;;  %8961 = vmatprep.subr.bf16.mxu0 %v11978_v48  ;;  %v12053_v29 = vld [vmem:[%s16604_s1 + $0x1b94] ss:$8 sps:$4 sm:$0xff]   ;;  %v12048_v1 = vld [vmem:[%s16604_s1 + $0x1a90] ss:$8 sps:$4 sm:$0xff]   ;;  %v12059_v48 = vld [vmem:[%s16604_s1 + $0x1b84] ss:$8 sps:$4 sm:$0xff]  }
 0x349   :  { %v8709_v54 = vpop.f32.mrf.mxu1  ;;  %9002 = vmatprep.subr.bf16.mxu1 %v11981_v27  ;;  %v1628_v27 = vcombine.high %v15528_v0, %v15528_v0  ;;  %v12057_v8 = vld [vmem:[%s16604_s1 + $0x1b80] ss:$8 sps:$4 sm:$0xff]   ;;  %v12066_v45 = vld [vmem:[%s16604_s1 + $0x1d74] ss:$8 sps:$4 sm:$0xff]   ;;  %v1610_v13 = vcombine.high %v1594_v25, %v1594_v25 }
 0x34a   :  { %v12061_v54 = vld [vmem:[%s16604_s1 + $0x1c70] ss:$8 sps:$4 sm:$0xff]  }
 0x34b   :  { %8962 = vmatpush1.bf16.msra.mxu0 %v11976_v11  ;;  %v12063_v11 = vld [vmem:[%s16604_s1 + $0x1c74] ss:$8 sps:$4 sm:$0xff]  }
 0x34c   :  { %9003 = vmatpush1.bf16.msra.mxu1 %v11979_v53  ;;  %8963 = vmatprep.subr.bf16.mxu0 %v11984_v52  ;;  %v1650_v53 = vrot.slane %v1628_v27, %v12762_v49  ;;  %v12064_v52 = vld [vmem:[%s16604_s1 + $0x1d70] ss:$8 sps:$4 sm:$0xff]  }
 0x34d   :  { %9004 = vmatprep.subr.bf16.mxu1 %v11987_v15  ;;  %v12069_v15 = vld [vmem:[%s16604_s1 + $0x1c64] ss:$8 sps:$4 sm:$0xff]   ;;  %v12121_v27 = vld [vmem:[%s16604_s1 + $0x1cd0] ss:$8 sps:$4 sm:$0xff]  }
 0x34f   :  { %8964 = vmatpush1.bf16.msra.mxu0 %v11982_v17  ;;  %v12072_v17 = vld [vmem:[%s16604_s1 + $0x1d64] ss:$8 sps:$4 sm:$0xff]  }
 0x350   :  { %9005 = vmatpush1.bf16.msra.mxu1 %v11985_v18  ;;  %8965 = vmatprep.subr.bf16.mxu0 %v11990_v20  ;;  %v1660_v18 = vcombine.high %v1650_v53, %v1650_v53 }
 0x351   :  { %9006 = vmatprep.subr.bf16.mxu1 %v11993_v56 }
 0x353   :  { %8966 = vmatpush1.bf16.msra.mxu0 %v11988_v23 }
 0x354   :  { %9007 = vmatpush1.bf16.msra.mxu1 %v11991_v24  ;;  %8967 = vmatprep.subr.bf16.mxu0 %v11996_v26  ;;  %v12067_v24 = vld [vmem:[%s16604_s1 + $0x1c60] ss:$8 sps:$4 sm:$0xff]  }
 0x355   :  { %9008 = vmatprep.subr.bf16.mxu1 %v11999_v2  ;;  %v12070_v26 = vld [vmem:[%s16604_s1 + $0x1d60] ss:$8 sps:$4 sm:$0xff]  }
 0x357   :  { %8968 = vmatpush1.bf16.msra.mxu0 %v11994_v7 }
 0x358   :  { %9009 = vmatpush1.bf16.msra.mxu1 %v11997_v4  ;;  %8969 = vmatprep.subr.bf16.mxu0 %v12002_v60  ;;  %v12075_v4 = vld [vmem:[%s16604_s1 + $0x1c54] ss:$8 sps:$4 sm:$0xff]  }
 0x359   :  { %9010 = vmatprep.subr.bf16.mxu1 %v12005_v30 }
 0x35b   :  { %8970 = vmatpush1.bf16.msra.mxu0 %v12000_v33 }
 0x35c   :  { %9011 = vmatpush1.bf16.msra.mxu1 %v12003_v63  ;;  %8971 = vmatprep.subr.bf16.mxu0 %v12008_v9 }
 0x35d   :  { %9012 = vmatprep.subr.bf16.mxu1 %v12011_v36  ;;  %v12073_v36 = vld [vmem:[%s16604_s1 + $0x1c50] ss:$8 sps:$4 sm:$0xff]  }
 0x35f   :  { %8972 = vmatpush1.bf16.msra.mxu0 %v12006_v10  ;;  %v12076_v10 = vld [vmem:[%s16604_s1 + $0x1d50] ss:$8 sps:$4 sm:$0xff]  }
 0x360   :  { %9013 = vmatpush1.bf16.msra.mxu1 %v12009_v12  ;;  %8973 = vmatprep.subr.bf16.mxu0 %v12014_v37 }
 0x361   :  { %9014 = vmatprep.subr.bf16.mxu1 %v12017_v38  ;;  %v12084_v38 = vld [vmem:[%s16604_s1 + $0x1d44] ss:$8 sps:$4 sm:$0xff]  }
 0x363   :  { %8974 = vmatpush2.bf16.msra.mxu0 %v12012_v39  ;;  %v12079_v39 = vld [vmem:[%s16604_s1 + $0x1c40] ss:$8 sps:$4 sm:$0xff]  }
 0x364   :  { %9015 = vmatpush2.bf16.msra.mxu1 %v12015_v40  ;;  %8975 = vmatprep.subr.bf16.mxu0 %v12020_v14  ;;  %v12082_v40 = vld [vmem:[%s16604_s1 + $0x1d40] ss:$8 sps:$4 sm:$0xff]   ;;  %v12087_v14 = vld [vmem:[%s16604_s1 + $0x1c34] ss:$8 sps:$4 sm:$0xff]  }
 0x365   :  { %9016 = vmatprep.subr.bf16.mxu1 %v12023_v44  ;;  %v12090_v44 = vld [vmem:[%s16604_s1 + $0x1d34] ss:$8 sps:$4 sm:$0xff]  }
 0x367   :  { %8976 = vmatpush2.bf16.msra.mxu0 %v12018_v16  ;;  %v12085_v16 = vld [vmem:[%s16604_s1 + $0x1c30] ss:$8 sps:$4 sm:$0xff]  }
 0x368   :  { %9017 = vmatpush2.bf16.msra.mxu1 %v12021_v46  ;;  %8977 = vmatprep.subr.bf16.mxu0 %v12026_v47  ;;  %v12088_v46 = vld [vmem:[%s16604_s1 + $0x1d30] ss:$8 sps:$4 sm:$0xff]   ;;  %v12093_v47 = vld [vmem:[%s16604_s1 + $0x1c24] ss:$8 sps:$4 sm:$0xff]  }
 0x369   :  { %9018 = vmatprep.subr.bf16.mxu1 %v12029_v50  ;;  %v12096_v50 = vld [vmem:[%s16604_s1 + $0x1d24] ss:$8 sps:$4 sm:$0xff]  }
 0x36b   :  { %8978 = vmatpush2.bf16.msra.mxu0 %v12024_v51  ;;  %v12091_v51 = vld [vmem:[%s16604_s1 + $0x1c20] ss:$8 sps:$4 sm:$0xff]  }
 0x36c   :  { %9019 = vmatpush2.bf16.msra.mxu1 %v12027_v28  ;;  %8979 = vmatprep.subr.bf16.mxu0 %v12032_v6  ;;  %v12094_v28 = vld [vmem:[%s16604_s1 + $0x1d20] ss:$8 sps:$4 sm:$0xff]   ;;  %v12099_v6 = vld [vmem:[%s16604_s1 + $0x1c14] ss:$8 sps:$4 sm:$0xff]  }
 0x36d   :  { %9020 = vmatprep.subr.bf16.mxu1 %v12035_v19  ;;  %v12102_v19 = vld [vmem:[%s16604_s1 + $0x1d14] ss:$8 sps:$4 sm:$0xff]  }
 0x36f   :  { %8980 = vmatpush2.bf16.msra.mxu0 %v12030_v21  ;;  %v12097_v21 = vld [vmem:[%s16604_s1 + $0x1c10] ss:$8 sps:$4 sm:$0xff]  }
 0x370   :  { %9021 = vmatpush2.bf16.msra.mxu1 %v12033_v42  ;;  %8981 = vmatprep.subr.bf16.mxu0 %v12038_v22  ;;  %v12100_v42 = vld [vmem:[%s16604_s1 + $0x1d10] ss:$8 sps:$4 sm:$0xff]   ;;  %v12105_v22 = vld [vmem:[%s16604_s1 + $0x1c04] ss:$8 sps:$4 sm:$0xff]  }
 0x371   :  { %9022 = vmatprep.subr.bf16.mxu1 %v12041_v31  ;;  %v12108_v31 = vld [vmem:[%s16604_s1 + $0x1d04] ss:$8 sps:$4 sm:$0xff]  }
 0x373   :  { %8982 = vmatpush2.bf16.msra.mxu0 %v12036_v34  ;;  %v12103_v34 = vld [vmem:[%s16604_s1 + $0x1c00] ss:$8 sps:$4 sm:$0xff]  }
 0x374   :  { %9023 = vmatpush2.bf16.msra.mxu1 %v12039_v55  ;;  %8983 = vmatprep.subr.bf16.mxu0 %v12044_v61  ;;  %v12106_v55 = vld [vmem:[%s16604_s1 + $0x1d00] ss:$8 sps:$4 sm:$0xff]   ;;  %v12111_v61 = vld [vmem:[%s16604_s1 + $0x1cf4] ss:$8 sps:$4 sm:$0xff]  }
 0x375   :  { %9024 = vmatprep.subr.bf16.mxu1 %v12047_v57  ;;  %v12114_v57 = vld [vmem:[%s16604_s1 + $0x1df4] ss:$8 sps:$4 sm:$0xff]  }
 0x377   :  { %8984 = vmatpush2.bf16.msra.mxu0 %v12042_v59  ;;  %v12109_v59 = vld [vmem:[%s16604_s1 + $0x1cf0] ss:$8 sps:$4 sm:$0xff]  }
 0x378   :  { %9025 = vmatpush2.bf16.msra.mxu1 %v12045_v32  ;;  %8985 = vmatprep.subr.bf16.mxu0 %v12050_v62  ;;  %v12112_v32 = vld [vmem:[%s16604_s1 + $0x1df0] ss:$8 sps:$4 sm:$0xff]   ;;  %v12117_v62 = vld [vmem:[%s16604_s1 + $0x1ce4] ss:$8 sps:$4 sm:$0xff]  }
 0x379   :  { %9026 = vmatprep.subr.bf16.mxu1 %v12053_v29  ;;  %v12120_v29 = vld [vmem:[%s16604_s1 + $0x1de4] ss:$8 sps:$4 sm:$0xff]  }
 0x37b   :  { %8986 = vmatpush2.bf16.msra.mxu0 %v12048_v1  ;;  %v12115_v1 = vld [vmem:[%s16604_s1 + $0x1ce0] ss:$8 sps:$4 sm:$0xff]  }
 0x37c   :  { %9027 = vmatpush2.bf16.msra.mxu1 %v12051_v3  ;;  %8987 = vmatprep.subr.bf16.mxu0 %v12056_v5  ;;  %v12118_v3 = vld [vmem:[%s16604_s1 + $0x1de0] ss:$8 sps:$4 sm:$0xff]   ;;  %v12123_v5 = vld [vmem:[%s16604_s1 + $0x1cd4] ss:$8 sps:$4 sm:$0xff]  }
 0x37d   :  { %9028 = vmatprep.subr.bf16.mxu1 %v12059_v48  ;;  %v12126_v48 = vld [vmem:[%s16604_s1 + $0x1dd4] ss:$8 sps:$4 sm:$0xff]  }
 0x37f   :  { %8988 = vmatpush2.bf16.msra.mxu0 %v12054_v41  ;;  %v12129_v41 = vld [vmem:[%s16604_s1 + $0x1cc4] ss:$8 sps:$4 sm:$0xff]  }
 0x380   :  { %9029 = vmatpush2.bf16.msra.mxu1 %v12057_v8  ;;  %9039 = vmatprep.subr.bf16.mxu0 %v12063_v11  ;;  %v12132_v8 = vld [vmem:[%s16604_s1 + $0x1dc4] ss:$8 sps:$4 sm:$0xff]   ;;  %v12127_v11 = vld [vmem:[%s16604_s1 + $0x1cc0] ss:$8 sps:$4 sm:$0xff]  }
 0x381   :  { %9080 = vmatprep.subr.bf16.mxu1 %v12066_v45  ;;  %v12130_v45 = vld [vmem:[%s16604_s1 + $0x1dc0] ss:$8 sps:$4 sm:$0xff]  }
 0x382   :  { %v8745_v20 = vpop.f32.mrf.mxu0  ;;  %8990 = vmatmul.mubr.bf16.vlgmr.msra.gmra.mxu0 %v1594_v25  ;;  %v12124_v25 = vld [vmem:[%s16604_s1 + $0x1dd0] ss:$8 sps:$4 sm:$0xff]  }
 0x383   :  { %v8786_v56 = vpop.f32.mrf.mxu1  ;;  %9031 = vmatmul.mubr.bf16.vlgmr.msra.gmra.mxu1 %v1610_v13  ;;  %v8746_v23 = vadd.f32 %v8745_v20, %v15372_v35  ;;  %9040 = vmatpush1.bf16.msra.mxu0 %v12061_v54  ;;  %v12078_v35 = vld [vmem:[%s16604_s1 + $0x1d54] ss:$8 sps:$4 sm:$0xff]   ;;  %v12133_v54 = vld [vmem:[%s16604_s1 + $0x1cb0] ss:$8 sps:$4 sm:$0xff]   ;;  %v12139_v20 = vld [vmem:[%s16604_s1 + $0x1ca0] ss:$8 sps:$4 sm:$0xff]  }
 0x384   :  { %9081 = vmatpush1.bf16.msra.mxu1 %v12064_v52  ;;  %v8747_v2 = vpop.f32.mrf.mxu0  ;;  %9041 = vmatprep.subr.bf16.mxu0 %v12069_v15  ;;  %v12138_v13 = vld [vmem:[%s16604_s1 + $0x1db4] ss:$8 sps:$4 sm:$0xff]   ;;  %v12136_v52 = vld [vmem:[%s16604_s1 + $0x1db0] ss:$8 sps:$4 sm:$0xff]   ;;  %v12141_v15 = vld [vmem:[%s16604_s1 + $0x1ca4] ss:$8 sps:$4 sm:$0xff]  }
 0x385   :  { %v8788_v7 = vpop.f32.mrf.mxu1  ;;  %9082 = vmatprep.subr.bf16.mxu1 %v12072_v17  ;;  %v15584_v60 = vadd.f32 %v8786_v56, %v8746_v23  ;;  %v8748_v30 = vadd.f32 %v8747_v2, %v15375_v43  ;;  %9071 = vmatprep.mubr.bf16.mxu0 %v1650_v53  ;;  %v12081_v43 = vld [vmem:[%s16604_s1 + $0x1c44] ss:$8 sps:$4 sm:$0xff]   ;;  %v12135_v53 = vld [vmem:[%s16604_s1 + $0x1cb4] ss:$8 sps:$4 sm:$0xff]   ;;  %v12142_v56 = vld [vmem:[%s16604_s1 + $0x1da0] ss:$8 sps:$4 sm:$0xff]  }
 0x386   :  { %9112 = vmatprep.mubr.bf16.mxu1 %v1660_v18  ;;  %v8749_v33 = vpop.f32.mrf.mxu0  ;;  %v12144_v17 = vld [vmem:[%s16604_s1 + $0x1da4] ss:$8 sps:$4 sm:$0xff]   ;;  %v1613_v18 = vcombine.high %v15512_v58, %v15512_v58  ;;  %v12147_v23 = vld [vmem:[%s16604_s1 + $0x1c94] ss:$8 sps:$4 sm:$0xff]   ;;  %v12148_v2 = vld [vmem:[%s16604_s1 + $0x1d90] ss:$8 sps:$4 sm:$0xff]  }
 0x387   :  { %v8790_v63 = vpop.f32.mrf.mxu1  ;;  %v15587_v9 = vadd.f32 %v8788_v7, %v8748_v30  ;;  %9042 = vmatpush1.bf16.msra.mxu0 %v12067_v24  ;;  %v12150_v58 = vld [vmem:[%s16604_s1 + $0x1d94] ss:$8 sps:$4 sm:$0xff]   ;;  %v12153_v7 = vld [vmem:[%s16604_s1 + $0x1c84] ss:$8 sps:$4 sm:$0xff]   ;;  %v1636_v30 = vrot.slane %v15528_v0, %v12762_v49  ;;  %v12151_v33 = vld [vmem:[%s16604_s1 + $0x1c80] ss:$8 sps:$4 sm:$0xff]  }
 0x388   :  { %9083 = vmatpush1.bf16.msra.mxu1 %v12070_v26  ;;  %v8750_v12 = vpop.f32.mrf.mxu0  ;;  %9043 = vmatprep.subr.bf16.mxu0 %v12075_v4  ;;  %v15736_v24 = vrot.slane %v1613_v18, %v12762_v49  ;;  %v12145_v26 = vld [vmem:[%s16604_s1 + $0x1c90] ss:$8 sps:$4 sm:$0xff]   ;;  %v12156_v4 = vld [vmem:[%s16604_s1 + $0x1d84] ss:$8 sps:$4 sm:$0xff]   ;;  %v12154_v63 = vld [vmem:[%s16604_s1 + $0x1d80] ss:$8 sps:$4 sm:$0xff]  }
 0x389   :  { %v8791_v37 = vpop.f32.mrf.mxu1  ;;  %9084 = vmatprep.subr.bf16.mxu1 %v12078_v35  ;;  %v12162_v0 = vld [vmem:[%s16604_s1 + $0x1f74] ss:$8 sps:$4 sm:$0xff]   ;;  %v1658_v12 = vcombine.high %v1636_v30, %v1636_v30  ;;  %v12205_v18 = vld [vmem:[%s16604_s1 + $0x1ef0] ss:$8 sps:$4 sm:$0xff]  }
 0x38a   :  { %v1629_v35 = vcombine.high %v15736_v24, %v15736_v24  ;;  %v12157_v37 = vld [vmem:[%s16604_s1 + $0x1e70] ss:$8 sps:$4 sm:$0xff]  }
 0x38b   :  { %9044 = vmatpush1.bf16.msra.mxu0 %v12073_v36  ;;  %v12159_v36 = vld [vmem:[%s16604_s1 + $0x1e74] ss:$8 sps:$4 sm:$0xff]  }
 0x38c   :  { %9085 = vmatpush1.bf16.msra.mxu1 %v12076_v10  ;;  %9045 = vmatprep.subr.bf16.mxu0 %v12081_v43  ;;  %v1657_v10 = vrot.slane %v1629_v35, %v12762_v49  ;;  %v12160_v43 = vld [vmem:[%s16604_s1 + $0x1f70] ss:$8 sps:$4 sm:$0xff]  }
 0x38d   :  { %9086 = vmatprep.subr.bf16.mxu1 %v12084_v38  ;;  %v12165_v38 = vld [vmem:[%s16604_s1 + $0x1e64] ss:$8 sps:$4 sm:$0xff]   ;;  %v12220_v35 = vld [vmem:[%s16604_s1 + $0x1fd0] ss:$8 sps:$4 sm:$0xff]  }
 0x38f   :  { %9046 = vmatpush1.bf16.msra.mxu0 %v12079_v39  ;;  %v12168_v39 = vld [vmem:[%s16604_s1 + $0x1f64] ss:$8 sps:$4 sm:$0xff]  }
 0x390   :  { %9087 = vmatpush1.bf16.msra.mxu1 %v12082_v40  ;;  %9047 = vmatprep.subr.bf16.mxu0 %v12087_v14  ;;  %v1661_v40 = vcombine.high %v1657_v10, %v1657_v10 }
 0x391   :  { %9088 = vmatprep.subr.bf16.mxu1 %v12090_v44 }
 0x393   :  { %9048 = vmatpush1.bf16.msra.mxu0 %v12085_v16 }
 0x394   :  { %9089 = vmatpush1.bf16.msra.mxu1 %v12088_v46  ;;  %9049 = vmatprep.subr.bf16.mxu0 %v12093_v47  ;;  %v12163_v46 = vld [vmem:[%s16604_s1 + $0x1e60] ss:$8 sps:$4 sm:$0xff]  }
 0x395   :  { %9090 = vmatprep.subr.bf16.mxu1 %v12096_v50  ;;  %v12166_v47 = vld [vmem:[%s16604_s1 + $0x1f60] ss:$8 sps:$4 sm:$0xff]  }
 0x397   :  { %9050 = vmatpush1.bf16.msra.mxu0 %v12091_v51 }
 0x398   :  { %9091 = vmatpush1.bf16.msra.mxu1 %v12094_v28  ;;  %9051 = vmatprep.subr.bf16.mxu0 %v12099_v6  ;;  %v12171_v28 = vld [vmem:[%s16604_s1 + $0x1e54] ss:$8 sps:$4 sm:$0xff]  }
 0x399   :  { %9092 = vmatprep.subr.bf16.mxu1 %v12102_v19 }
 0x39b   :  { %9052 = vmatpush1.bf16.msra.mxu0 %v12097_v21 }
 0x39c   :  { %9093 = vmatpush1.bf16.msra.mxu1 %v12100_v42  ;;  %9053 = vmatprep.subr.bf16.mxu0 %v12105_v22 }
 0x39d   :  { %9094 = vmatprep.subr.bf16.mxu1 %v12108_v31  ;;  %v12169_v31 = vld [vmem:[%s16604_s1 + $0x1e50] ss:$8 sps:$4 sm:$0xff]  }
 0x39f   :  { %9054 = vmatpush1.bf16.msra.mxu0 %v12103_v34  ;;  %v12172_v34 = vld [vmem:[%s16604_s1 + $0x1f50] ss:$8 sps:$4 sm:$0xff]  }
 0x3a0   :  { %9095 = vmatpush1.bf16.msra.mxu1 %v12106_v55  ;;  %9055 = vmatprep.subr.bf16.mxu0 %v12111_v61 }
 0x3a1   :  { %9096 = vmatprep.subr.bf16.mxu1 %v12114_v57  ;;  %v12180_v57 = vld [vmem:[%s16604_s1 + $0x1f44] ss:$8 sps:$4 sm:$0xff]  }
 0x3a3   :  { %9056 = vmatpush2.bf16.msra.mxu0 %v12109_v59  ;;  %v12175_v59 = vld [vmem:[%s16604_s1 + $0x1e40] ss:$8 sps:$4 sm:$0xff]  }
 0x3a4   :  { %9097 = vmatpush2.bf16.msra.mxu1 %v12112_v32  ;;  %9057 = vmatprep.subr.bf16.mxu0 %v12117_v62  ;;  %v12178_v32 = vld [vmem:[%s16604_s1 + $0x1f40] ss:$8 sps:$4 sm:$0xff]   ;;  %v12183_v62 = vld [vmem:[%s16604_s1 + $0x1e34] ss:$8 sps:$4 sm:$0xff]  }
 0x3a5   :  { %9098 = vmatprep.subr.bf16.mxu1 %v12120_v29  ;;  %v12186_v29 = vld [vmem:[%s16604_s1 + $0x1f34] ss:$8 sps:$4 sm:$0xff]  }
 0x3a7   :  { %9058 = vmatpush2.bf16.msra.mxu0 %v12115_v1  ;;  %v12181_v1 = vld [vmem:[%s16604_s1 + $0x1e30] ss:$8 sps:$4 sm:$0xff]  }
 0x3a8   :  { %9099 = vmatpush2.bf16.msra.mxu1 %v12118_v3  ;;  %9059 = vmatprep.subr.bf16.mxu0 %v12123_v5  ;;  %v12184_v3 = vld [vmem:[%s16604_s1 + $0x1f30] ss:$8 sps:$4 sm:$0xff]   ;;  %v12189_v5 = vld [vmem:[%s16604_s1 + $0x1e24] ss:$8 sps:$4 sm:$0xff]  }
 0x3a9   :  { %9100 = vmatprep.subr.bf16.mxu1 %v12126_v48  ;;  %v12192_v48 = vld [vmem:[%s16604_s1 + $0x1f24] ss:$8 sps:$4 sm:$0xff]  }
 0x3ab   :  { %9060 = vmatpush2.bf16.msra.mxu0 %v12121_v27  ;;  %v12187_v27 = vld [vmem:[%s16604_s1 + $0x1e20] ss:$8 sps:$4 sm:$0xff]  }
 0x3ac   :  { %9101 = vmatpush2.bf16.msra.mxu1 %v12124_v25  ;;  %9061 = vmatprep.subr.bf16.mxu0 %v12129_v41  ;;  %v12190_v25 = vld [vmem:[%s16604_s1 + $0x1f20] ss:$8 sps:$4 sm:$0xff]   ;;  %v12195_v41 = vld [vmem:[%s16604_s1 + $0x1e14] ss:$8 sps:$4 sm:$0xff]  }
 0x3ad   :  { %9102 = vmatprep.subr.bf16.mxu1 %v12132_v8  ;;  %v12198_v8 = vld [vmem:[%s16604_s1 + $0x1f14] ss:$8 sps:$4 sm:$0xff]  }
 0x3af   :  { %9062 = vmatpush2.bf16.msra.mxu0 %v12127_v11  ;;  %v12193_v11 = vld [vmem:[%s16604_s1 + $0x1e10] ss:$8 sps:$4 sm:$0xff]  }
 0x3b0   :  { %9103 = vmatpush2.bf16.msra.mxu1 %v12130_v45  ;;  %9063 = vmatprep.subr.bf16.mxu0 %v12135_v53  ;;  %v12196_v45 = vld [vmem:[%s16604_s1 + $0x1f10] ss:$8 sps:$4 sm:$0xff]   ;;  %v12201_v53 = vld [vmem:[%s16604_s1 + $0x1e04] ss:$8 sps:$4 sm:$0xff]  }
 0x3b1   :  { %9104 = vmatprep.subr.bf16.mxu1 %v12138_v13  ;;  %v12204_v13 = vld [vmem:[%s16604_s1 + $0x1f04] ss:$8 sps:$4 sm:$0xff]  }
 0x3b3   :  { %9064 = vmatpush2.bf16.msra.mxu0 %v12133_v54  ;;  %v12199_v54 = vld [vmem:[%s16604_s1 + $0x1e00] ss:$8 sps:$4 sm:$0xff]  }
 0x3b4   :  { %9105 = vmatpush2.bf16.msra.mxu1 %v12136_v52  ;;  %9065 = vmatprep.subr.bf16.mxu0 %v12141_v15  ;;  %v12202_v52 = vld [vmem:[%s16604_s1 + $0x1f00] ss:$8 sps:$4 sm:$0xff]   ;;  %v12207_v15 = vld [vmem:[%s16604_s1 + $0x1ef4] ss:$8 sps:$4 sm:$0xff]  }
 0x3b5   :  { %9106 = vmatprep.subr.bf16.mxu1 %v12144_v17  ;;  %v12210_v17 = vld [vmem:[%s16604_s1 + $0x1ff4] ss:$8 sps:$4 sm:$0xff]  }
 0x3b7   :  { %9066 = vmatpush2.bf16.msra.mxu0 %v12139_v20  ;;  %v12208_v20 = vld [vmem:[%s16604_s1 + $0x1ff0] ss:$8 sps:$4 sm:$0xff]  }
 0x3b8   :  { %9107 = vmatpush2.bf16.msra.mxu1 %v12142_v56  ;;  %9067 = vmatprep.subr.bf16.mxu0 %v12147_v23  ;;  %v12213_v56 = vld [vmem:[%s16604_s1 + $0x1ee4] ss:$8 sps:$4 sm:$0xff]  }
 0x3b9   :  { %9108 = vmatprep.subr.bf16.mxu1 %v12150_v58  ;;  %v12216_v23 = vld [vmem:[%s16604_s1 + $0x1fe4] ss:$8 sps:$4 sm:$0xff]   ;;  %v12211_v58 = vld [vmem:[%s16604_s1 + $0x1ee0] ss:$8 sps:$4 sm:$0xff]  }
 0x3bb   :  { %9068 = vmatpush2.bf16.msra.mxu0 %v12145_v26  ;;  %v12214_v26 = vld [vmem:[%s16604_s1 + $0x1fe0] ss:$8 sps:$4 sm:$0xff]  }
 0x3bc   :  { %9109 = vmatpush2.bf16.msra.mxu1 %v12148_v2  ;;  %9069 = vmatprep.subr.bf16.mxu0 %v12153_v7  ;;  %v12219_v2 = vld [vmem:[%s16604_s1 + $0x1ed4] ss:$8 sps:$4 sm:$0xff]  }
 0x3bd   :  { %9110 = vmatprep.subr.bf16.mxu1 %v12156_v4  ;;  %v12222_v7 = vld [vmem:[%s16604_s1 + $0x1fd4] ss:$8 sps:$4 sm:$0xff]   ;;  %v12217_v4 = vld [vmem:[%s16604_s1 + $0x1ed0] ss:$8 sps:$4 sm:$0xff]  }
 0x3bf   :  { %9070 = vmatpush2.bf16.msra.mxu0 %v12151_v33  ;;  %v12228_v33 = vld [vmem:[%s16604_s1 + $0x1fc4] ss:$8 sps:$4 sm:$0xff]  }
 0x3c0   :  { %9111 = vmatpush2.bf16.msra.mxu1 %v12154_v63  ;;  %9121 = vmatprep.subr.bf16.mxu0 %v12159_v36  ;;  %v12223_v63 = vld [vmem:[%s16604_s1 + $0x1ec0] ss:$8 sps:$4 sm:$0xff]  }
 0x3c1   :  { %9162 = vmatprep.subr.bf16.mxu1 %v12162_v0  ;;  %v12226_v36 = vld [vmem:[%s16604_s1 + $0x1fc0] ss:$8 sps:$4 sm:$0xff]   ;;  %v12231_v0 = vld [vmem:[%s16604_s1 + $0x1eb4] ss:$8 sps:$4 sm:$0xff]  }
 0x3c2   :  { %v8827_v14 = vpop.f32.mrf.mxu0  ;;  %9072 = vmatmul.mubr.bf16.vlgmr.msra.gmra.mxu0 %v1636_v30  ;;  %v12225_v30 = vld [vmem:[%s16604_s1 + $0x1ec4] ss:$8 sps:$4 sm:$0xff]  }
 0x3c3   :  { %v8868_v44 = vpop.f32.mrf.mxu1  ;;  %9113 = vmatmul.mubr.bf16.vlgmr.msra.gmra.mxu1 %v1658_v12  ;;  %v8828_v16 = vadd.f32 %v8827_v14, %v15584_v60  ;;  %9122 = vmatpush1.bf16.msra.mxu0 %v12157_v37  ;;  %v12174_v60 = vld [vmem:[%s16604_s1 + $0x1f54] ss:$8 sps:$4 sm:$0xff]   ;;  %v12229_v12 = vld [vmem:[%s16604_s1 + $0x1eb0] ss:$8 sps:$4 sm:$0xff]   ;;  %v12238_v14 = vld [vmem:[%s16604_s1 + $0x1fa0] ss:$8 sps:$4 sm:$0xff]  }
 0x3c4   :  { %9163 = vmatpush1.bf16.msra.mxu1 %v12160_v43  ;;  %v8829_v50 = vpop.f32.mrf.mxu0  ;;  %9123 = vmatprep.subr.bf16.mxu0 %v12165_v38  ;;  %v12232_v37 = vld [vmem:[%s16604_s1 + $0x1fb0] ss:$8 sps:$4 sm:$0xff]   ;;  %v12237_v43 = vld [vmem:[%s16604_s1 + $0x1ea4] ss:$8 sps:$4 sm:$0xff]  }
 0x3c5   :  { %v8870_v51 = vpop.f32.mrf.mxu1  ;;  %9164 = vmatprep.subr.bf16.mxu1 %v12168_v39  ;;  %v15792_v6 = vadd.f32 %v8868_v44, %v8828_v16  ;;  %v8830_v19 = vadd.f32 %v8829_v50, %v15587_v9  ;;  %9153 = vmatprep.mubr.bf16.mxu0 %v1657_v10  ;;  %v12177_v9 = vld [vmem:[%s16604_s1 + $0x1e44] ss:$8 sps:$4 sm:$0xff]   ;;  %v12234_v10 = vld [vmem:[%s16604_s1 + $0x1fb4] ss:$8 sps:$4 sm:$0xff]   ;;  %v12244_v50 = vld [vmem:[%s16604_s1 + $0x1f90] ss:$8 sps:$4 sm:$0xff]  }
 0x3c6   :  { %9194 = vmatprep.mubr.bf16.mxu1 %v1661_v40  ;;  %v8831_v21 = vpop.f32.mrf.mxu0  ;;  %v12240_v38 = vld [vmem:[%s16604_s1 + $0x1fa4] ss:$8 sps:$4 sm:$0xff]   ;;  %v12235_v40 = vld [vmem:[%s16604_s1 + $0x1ea0] ss:$8 sps:$4 sm:$0xff]   ;;  %v12243_v44 = vld [vmem:[%s16604_s1 + $0x1e94] ss:$8 sps:$4 sm:$0xff]  }
 0x3c7   :  { %v8872_v42 = vpop.f32.mrf.mxu1  ;;  %v15795_v22 = vadd.f32 %v8870_v51, %v8830_v19  ;;  %9124 = vmatpush1.bf16.msra.mxu0 %v12163_v46  ;;  %v15932_v39 = vld [vmem:[%s16603_s0 + $0x40] sm:$0xff]  ;;  %v12246_v16 = vld [vmem:[%s16604_s1 + $0x1f94] ss:$8 sps:$4 sm:$0xff]   ;;  %v1643_v19 = vrot.slane %v15736_v24, %v12762_v49 }
 0x3c8   :  { %9165 = vmatpush1.bf16.msra.mxu1 %v12166_v47  ;;  %v8832_v55 = vpop.f32.mrf.mxu0  ;;  %9125 = vmatprep.subr.bf16.mxu0 %v12171_v28  ;;  %v15948_v46 = vrot.slane %v15932_v39, %v12762_v49  ;;  %v12241_v47 = vld [vmem:[%s16604_s1 + $0x1e90] ss:$8 sps:$4 sm:$0xff]   ;;  %v12249_v51 = vld [vmem:[%s16604_s1 + $0x1e84] ss:$8 sps:$4 sm:$0xff]   ;;  %v12247_v21 = vld [vmem:[%s16604_s1 + $0x1e80] ss:$8 sps:$4 sm:$0xff]  }
 0x3c9   :  { %v8873_v61 = vpop.f32.mrf.mxu1  ;;  %9166 = vmatprep.subr.bf16.mxu1 %v12174_v60  ;;  %v12252_v28 = vld [vmem:[%s16604_s1 + $0x1f84] ss:$8 sps:$4 sm:$0xff]   ;;  %v12250_v42 = vld [vmem:[%s16604_s1 + $0x1f80] ss:$8 sps:$4 sm:$0xff]   ;;  %v12259_v24 = vld [vmem:[%s16604_s1 + $0x2174] ss:$8 sps:$4 sm:$0xff]   ;;  %v1659_v55 = vcombine.high %v1643_v19, %v1643_v19 }
 0x3ca   :  { %v1677_v60 = vcombine.high %v15948_v46, %v15948_v46  ;;  %v12254_v61 = vld [vmem:[%s16604_s1 + $0x2070] ss:$8 sps:$4 sm:$0xff]  }
 0x3cb   :  { %9126 = vmatpush1.bf16.msra.mxu0 %v12169_v31  ;;  %v12256_v31 = vld [vmem:[%s16604_s1 + $0x2074] ss:$8 sps:$4 sm:$0xff]  }
 0x3cc   :  { %9167 = vmatpush1.bf16.msra.mxu1 %v12172_v34  ;;  %9127 = vmatprep.subr.bf16.mxu0 %v12177_v9  ;;  %v1699_v34 = vrot.slane %v1677_v60, %v12762_v49  ;;  %v12257_v9 = vld [vmem:[%s16604_s1 + $0x2170] ss:$8 sps:$4 sm:$0xff]  }
 0x3cd   :  { %9168 = vmatprep.subr.bf16.mxu1 %v12180_v57  ;;  %v12262_v57 = vld [vmem:[%s16604_s1 + $0x2064] ss:$8 sps:$4 sm:$0xff]   ;;  %v12314_v60 = vld [vmem:[%s16604_s1 + $0x20d0] ss:$8 sps:$4 sm:$0xff]  }
 0x3cf   :  { %9128 = vmatpush1.bf16.msra.mxu0 %v12175_v59  ;;  %v12265_v59 = vld [vmem:[%s16604_s1 + $0x2164] ss:$8 sps:$4 sm:$0xff]  }
 0x3d0   :  { %9169 = vmatpush1.bf16.msra.mxu1 %v12178_v32  ;;  %9129 = vmatprep.subr.bf16.mxu0 %v12183_v62  ;;  %v1709_v32 = vcombine.high %v1699_v34, %v1699_v34 }
 0x3d1   :  { %9170 = vmatprep.subr.bf16.mxu1 %v12186_v29 }
 0x3d3   :  { %9130 = vmatpush1.bf16.msra.mxu0 %v12181_v1 }
 0x3d4   :  { %9171 = vmatpush1.bf16.msra.mxu1 %v12184_v3  ;;  %9131 = vmatprep.subr.bf16.mxu0 %v12189_v5  ;;  %v12260_v3 = vld [vmem:[%s16604_s1 + $0x2060] ss:$8 sps:$4 sm:$0xff]  }
 0x3d5   :  { %9172 = vmatprep.subr.bf16.mxu1 %v12192_v48  ;;  %v12263_v5 = vld [vmem:[%s16604_s1 + $0x2160] ss:$8 sps:$4 sm:$0xff]  }
 0x3d7   :  { %9132 = vmatpush1.bf16.msra.mxu0 %v12187_v27 }
 0x3d8   :  { %9173 = vmatpush1.bf16.msra.mxu1 %v12190_v25  ;;  %9133 = vmatprep.subr.bf16.mxu0 %v12195_v41  ;;  %v12268_v25 = vld [vmem:[%s16604_s1 + $0x2054] ss:$8 sps:$4 sm:$0xff]  }
 0x3d9   :  { %9174 = vmatprep.subr.bf16.mxu1 %v12198_v8 }
 0x3db   :  { %9134 = vmatpush1.bf16.msra.mxu0 %v12193_v11 }
 0x3dc   :  { %9175 = vmatpush1.bf16.msra.mxu1 %v12196_v45  ;;  %9135 = vmatprep.subr.bf16.mxu0 %v12201_v53 }
 0x3dd   :  { %9176 = vmatprep.subr.bf16.mxu1 %v12204_v13  ;;  %v12266_v13 = vld [vmem:[%s16604_s1 + $0x2050] ss:$8 sps:$4 sm:$0xff]  }
 0x3df   :  { %9136 = vmatpush1.bf16.msra.mxu0 %v12199_v54  ;;  %v12269_v54 = vld [vmem:[%s16604_s1 + $0x2150] ss:$8 sps:$4 sm:$0xff]  }
 0x3e0   :  { %9177 = vmatpush1.bf16.msra.mxu1 %v12202_v52  ;;  %9137 = vmatprep.subr.bf16.mxu0 %v12207_v15 }
 0x3e1   :  { %9178 = vmatprep.subr.bf16.mxu1 %v12210_v17  ;;  %v12277_v17 = vld [vmem:[%s16604_s1 + $0x2144] ss:$8 sps:$4 sm:$0xff]  }
 0x3e3   :  { %9138 = vmatpush2.bf16.msra.mxu0 %v12205_v18  ;;  %v12272_v18 = vld [vmem:[%s16604_s1 + $0x2040] ss:$8 sps:$4 sm:$0xff]  }
 0x3e4   :  { %9179 = vmatpush2.bf16.msra.mxu1 %v12208_v20  ;;  %9139 = vmatprep.subr.bf16.mxu0 %v12213_v56  ;;  %v12275_v20 = vld [vmem:[%s16604_s1 + $0x2140] ss:$8 sps:$4 sm:$0xff]   ;;  %v12280_v56 = vld [vmem:[%s16604_s1 + $0x2034] ss:$8 sps:$4 sm:$0xff]  }
 0x3e5   :  { %9180 = vmatprep.subr.bf16.mxu1 %v12216_v23  ;;  %v12283_v23 = vld [vmem:[%s16604_s1 + $0x2134] ss:$8 sps:$4 sm:$0xff]  }
 0x3e7   :  { %9140 = vmatpush2.bf16.msra.mxu0 %v12211_v58  ;;  %v12278_v58 = vld [vmem:[%s16604_s1 + $0x2030] ss:$8 sps:$4 sm:$0xff]  }
 0x3e8   :  { %9181 = vmatpush2.bf16.msra.mxu1 %v12214_v26  ;;  %9141 = vmatprep.subr.bf16.mxu0 %v12219_v2  ;;  %v12281_v26 = vld [vmem:[%s16604_s1 + $0x2130] ss:$8 sps:$4 sm:$0xff]   ;;  %v12286_v2 = vld [vmem:[%s16604_s1 + $0x2024] ss:$8 sps:$4 sm:$0xff]  }
 0x3e9   :  { %9182 = vmatprep.subr.bf16.mxu1 %v12222_v7  ;;  %v12289_v7 = vld [vmem:[%s16604_s1 + $0x2124] ss:$8 sps:$4 sm:$0xff]  }
 0x3eb   :  { %9142 = vmatpush2.bf16.msra.mxu0 %v12217_v4  ;;  %v12284_v4 = vld [vmem:[%s16604_s1 + $0x2020] ss:$8 sps:$4 sm:$0xff]  }
 0x3ec   :  { %9183 = vmatpush2.bf16.msra.mxu1 %v12220_v35  ;;  %9143 = vmatprep.subr.bf16.mxu0 %v12225_v30  ;;  %v12287_v35 = vld [vmem:[%s16604_s1 + $0x2120] ss:$8 sps:$4 sm:$0xff]   ;;  %v12292_v30 = vld [vmem:[%s16604_s1 + $0x2014] ss:$8 sps:$4 sm:$0xff]  }
 0x3ed   :  { %9184 = vmatprep.subr.bf16.mxu1 %v12228_v33  ;;  %v12295_v33 = vld [vmem:[%s16604_s1 + $0x2114] ss:$8 sps:$4 sm:$0xff]  }
 0x3ef   :  { %9144 = vmatpush2.bf16.msra.mxu0 %v12223_v63  ;;  %v12290_v63 = vld [vmem:[%s16604_s1 + $0x2010] ss:$8 sps:$4 sm:$0xff]  }
 0x3f0   :  { %9185 = vmatpush2.bf16.msra.mxu1 %v12226_v36  ;;  %9145 = vmatprep.subr.bf16.mxu0 %v12231_v0  ;;  %v12293_v36 = vld [vmem:[%s16604_s1 + $0x2110] ss:$8 sps:$4 sm:$0xff]   ;;  %v12298_v0 = vld [vmem:[%s16604_s1 + $0x2004] ss:$8 sps:$4 sm:$0xff]  }
 0x3f1   :  { %9186 = vmatprep.subr.bf16.mxu1 %v12234_v10  ;;  %v12301_v10 = vld [vmem:[%s16604_s1 + $0x2104] ss:$8 sps:$4 sm:$0xff]  }
 0x3f3   :  { %9146 = vmatpush2.bf16.msra.mxu0 %v12229_v12  ;;  %v12296_v12 = vld [vmem:[%s16604_s1 + $0x2000] ss:$8 sps:$4 sm:$0xff]  }
 0x3f4   :  { %9187 = vmatpush2.bf16.msra.mxu1 %v12232_v37  ;;  %9147 = vmatprep.subr.bf16.mxu0 %v12237_v43  ;;  %v12299_v37 = vld [vmem:[%s16604_s1 + $0x2100] ss:$8 sps:$4 sm:$0xff]   ;;  %v12304_v43 = vld [vmem:[%s16604_s1 + $0x20f4] ss:$8 sps:$4 sm:$0xff]  }
 0x3f5   :  { %9188 = vmatprep.subr.bf16.mxu1 %v12240_v38  ;;  %v12307_v38 = vld [vmem:[%s16604_s1 + $0x21f4] ss:$8 sps:$4 sm:$0xff]  }
 0x3f7   :  { %9148 = vmatpush2.bf16.msra.mxu0 %v12235_v40  ;;  %v12302_v40 = vld [vmem:[%s16604_s1 + $0x20f0] ss:$8 sps:$4 sm:$0xff]  }
 0x3f8   :  { %9189 = vmatpush2.bf16.msra.mxu1 %v12238_v14  ;;  %9149 = vmatprep.subr.bf16.mxu0 %v12243_v44  ;;  %v12305_v14 = vld [vmem:[%s16604_s1 + $0x21f0] ss:$8 sps:$4 sm:$0xff]   ;;  %v12310_v44 = vld [vmem:[%s16604_s1 + $0x20e4] ss:$8 sps:$4 sm:$0xff]  }
 0x3f9   :  { %9190 = vmatprep.subr.bf16.mxu1 %v12246_v16  ;;  %v12313_v16 = vld [vmem:[%s16604_s1 + $0x21e4] ss:$8 sps:$4 sm:$0xff]  }
 0x3fb   :  { %9150 = vmatpush2.bf16.msra.mxu0 %v12241_v47  ;;  %v12308_v47 = vld [vmem:[%s16604_s1 + $0x20e0] ss:$8 sps:$4 sm:$0xff]  }
 0x3fc   :  { %9191 = vmatpush2.bf16.msra.mxu1 %v12244_v50  ;;  %9151 = vmatprep.subr.bf16.mxu0 %v12249_v51  ;;  %v12311_v50 = vld [vmem:[%s16604_s1 + $0x21e0] ss:$8 sps:$4 sm:$0xff]   ;;  %v12316_v51 = vld [vmem:[%s16604_s1 + $0x20d4] ss:$8 sps:$4 sm:$0xff]  }
 0x3fd   :  { %9192 = vmatprep.subr.bf16.mxu1 %v12252_v28  ;;  %v12319_v28 = vld [vmem:[%s16604_s1 + $0x21d4] ss:$8 sps:$4 sm:$0xff]  }
 0x3ff   :  { %9152 = vmatpush2.bf16.msra.mxu0 %v12247_v21  ;;  %v12322_v21 = vld [vmem:[%s16604_s1 + $0x20c4] ss:$8 sps:$4 sm:$0xff]  }
 0x400   :  { %9193 = vmatpush2.bf16.msra.mxu1 %v12250_v42  ;;  %9203 = vmatprep.subr.bf16.mxu0 %v12256_v31  ;;  %v12325_v42 = vld [vmem:[%s16604_s1 + $0x21c4] ss:$8 sps:$4 sm:$0xff]   ;;  %v12320_v31 = vld [vmem:[%s16604_s1 + $0x20c0] ss:$8 sps:$4 sm:$0xff]  }
 0x401   :  { %9244 = vmatprep.subr.bf16.mxu1 %v12259_v24  ;;  %v12323_v24 = vld [vmem:[%s16604_s1 + $0x21c0] ss:$8 sps:$4 sm:$0xff]  }
 0x402   :  { %v8909_v62 = vpop.f32.mrf.mxu0  ;;  %9154 = vmatmul.mubr.bf16.vlgmr.msra.gmra.mxu0 %v1643_v19  ;;  %v12317_v19 = vld [vmem:[%s16604_s1 + $0x21d0] ss:$8 sps:$4 sm:$0xff]  }
 0x403   :  { %v8950_v29 = vpop.f32.mrf.mxu1  ;;  %9195 = vmatmul.mubr.bf16.vlgmr.msra.gmra.mxu1 %v1659_v55  ;;  %v8910_v1 = vadd.f32 %v8909_v62, %v15792_v6  ;;  %9204 = vmatpush1.bf16.msra.mxu0 %v12254_v61  ;;  %v12271_v6 = vld [vmem:[%s16604_s1 + $0x2154] ss:$8 sps:$4 sm:$0xff]   ;;  %v12326_v61 = vld [vmem:[%s16604_s1 + $0x20b0] ss:$8 sps:$4 sm:$0xff]   ;;  %v12332_v62 = vld [vmem:[%s16604_s1 + $0x20a0] ss:$8 sps:$4 sm:$0xff]  }
 0x404   :  { %9245 = vmatpush1.bf16.msra.mxu1 %v12257_v9  ;;  %v8911_v48 = vpop.f32.mrf.mxu0  ;;  %9205 = vmatprep.subr.bf16.mxu0 %v12262_v57  ;;  %v12331_v55 = vld [vmem:[%s16604_s1 + $0x21b4] ss:$8 sps:$4 sm:$0xff]   ;;  %v12329_v9 = vld [vmem:[%s16604_s1 + $0x21b0] ss:$8 sps:$4 sm:$0xff]   ;;  %v12334_v57 = vld [vmem:[%s16604_s1 + $0x20a4] ss:$8 sps:$4 sm:$0xff]  }
 0x405   :  { %v8952_v27 = vpop.f32.mrf.mxu1  ;;  %9246 = vmatprep.subr.bf16.mxu1 %v12265_v59  ;;  %v16004_v41 = vadd.f32 %v8950_v29, %v8910_v1  ;;  %v8912_v8 = vadd.f32 %v8911_v48, %v15795_v22  ;;  %9235 = vmatprep.mubr.bf16.mxu0 %v1699_v34  ;;  %v12274_v22 = vld [vmem:[%s16604_s1 + $0x2044] ss:$8 sps:$4 sm:$0xff]   ;;  %v12328_v34 = vld [vmem:[%s16604_s1 + $0x20b4] ss:$8 sps:$4 sm:$0xff]   ;;  %v12335_v29 = vld [vmem:[%s16604_s1 + $0x21a0] ss:$8 sps:$4 sm:$0xff]  }
 0x406   :  { %9276 = vmatprep.mubr.bf16.mxu1 %v1709_v32  ;;  %v8913_v11 = vpop.f32.mrf.mxu0  ;;  %v12337_v59 = vld [vmem:[%s16604_s1 + $0x21a4] ss:$8 sps:$4 sm:$0xff]   ;;  %v1662_v32 = vcombine.high %v15932_v39, %v15932_v39  ;;  %v12340_v1 = vld [vmem:[%s16604_s1 + $0x2094] ss:$8 sps:$4 sm:$0xff]   ;;  %v12341_v48 = vld [vmem:[%s16604_s1 + $0x2190] ss:$8 sps:$4 sm:$0xff]  }
 0x407   :  { %v8954_v45 = vpop.f32.mrf.mxu1  ;;  %v16007_v53 = vadd.f32 %v8952_v27, %v8912_v8  ;;  %9206 = vmatpush1.bf16.msra.mxu0 %v12260_v3  ;;  %v12343_v39 = vld [vmem:[%s16604_s1 + $0x2194] ss:$8 sps:$4 sm:$0xff]   ;;  %v12346_v27 = vld [vmem:[%s16604_s1 + $0x2084] ss:$8 sps:$4 sm:$0xff]   ;;  %v1685_v8 = vrot.slane %v15948_v46, %v12762_v49  ;;  %v12344_v11 = vld [vmem:[%s16604_s1 + $0x2080] ss:$8 sps:$4 sm:$0xff]  }
 0x408   :  { %9247 = vmatpush1.bf16.msra.mxu1 %v12263_v5  ;;  %v8914_v52 = vpop.f32.mrf.mxu0  ;;  %9207 = vmatprep.subr.bf16.mxu0 %v12268_v25  ;;  %v16156_v3 = vrot.slane %v1662_v32, %v12762_v49  ;;  %v12338_v5 = vld [vmem:[%s16604_s1 + $0x2090] ss:$8 sps:$4 sm:$0xff]   ;;  %v12349_v25 = vld [vmem:[%s16604_s1 + $0x2184] ss:$8 sps:$4 sm:$0xff]   ;;  %v12347_v45 = vld [vmem:[%s16604_s1 + $0x2180] ss:$8 sps:$4 sm:$0xff]  }
 0x409   :  { %v8955_v15 = vpop.f32.mrf.mxu1  ;;  %9248 = vmatprep.subr.bf16.mxu1 %v12271_v6  ;;  %v12355_v46 = vld [vmem:[%s16604_s1 + $0x2374] ss:$8 sps:$4 sm:$0xff]   ;;  %v1707_v52 = vcombine.high %v1685_v8, %v1685_v8  ;;  %v12398_v32 = vld [vmem:[%s16604_s1 + $0x22f0] ss:$8 sps:$4 sm:$0xff]  }
 0x40a   :  { %v1678_v6 = vcombine.high %v16156_v3, %v16156_v3  ;;  %v12350_v15 = vld [vmem:[%s16604_s1 + $0x2270] ss:$8 sps:$4 sm:$0xff]  }
 0x40b   :  { %9208 = vmatpush1.bf16.msra.mxu0 %v12266_v13  ;;  %v12352_v13 = vld [vmem:[%s16604_s1 + $0x2274] ss:$8 sps:$4 sm:$0xff]  }
 0x40c   :  { %9249 = vmatpush1.bf16.msra.mxu1 %v12269_v54  ;;  %9209 = vmatprep.subr.bf16.mxu0 %v12274_v22  ;;  %v1706_v54 = vrot.slane %v1678_v6, %v12762_v49  ;;  %v12353_v22 = vld [vmem:[%s16604_s1 + $0x2370] ss:$8 sps:$4 sm:$0xff]  }
 0x40d   :  { %9250 = vmatprep.subr.bf16.mxu1 %v12277_v17  ;;  %v12358_v17 = vld [vmem:[%s16604_s1 + $0x2264] ss:$8 sps:$4 sm:$0xff]   ;;  %v12413_v6 = vld [vmem:[%s16604_s1 + $0x23d0] ss:$8 sps:$4 sm:$0xff]  }
 0x40f   :  { %9210 = vmatpush1.bf16.msra.mxu0 %v12272_v18  ;;  %v12361_v18 = vld [vmem:[%s16604_s1 + $0x2364] ss:$8 sps:$4 sm:$0xff]  }
 0x410   :  { %9251 = vmatpush1.bf16.msra.mxu1 %v12275_v20  ;;  %9211 = vmatprep.subr.bf16.mxu0 %v12280_v56  ;;  %v1710_v20 = vcombine.high %v1706_v54, %v1706_v54 }
 0x411   :  { %9252 = vmatprep.subr.bf16.mxu1 %v12283_v23 }
 0x413   :  { %9212 = vmatpush1.bf16.msra.mxu0 %v12278_v58 }
 0x414   :  { %9253 = vmatpush1.bf16.msra.mxu1 %v12281_v26  ;;  %9213 = vmatprep.subr.bf16.mxu0 %v12286_v2  ;;  %v12356_v26 = vld [vmem:[%s16604_s1 + $0x2260] ss:$8 sps:$4 sm:$0xff]  }
 0x415   :  { %9254 = vmatprep.subr.bf16.mxu1 %v12289_v7  ;;  %v12359_v2 = vld [vmem:[%s16604_s1 + $0x2360] ss:$8 sps:$4 sm:$0xff]  }
 0x417   :  { %9214 = vmatpush1.bf16.msra.mxu0 %v12284_v4 }
 0x418   :  { %9255 = vmatpush1.bf16.msra.mxu1 %v12287_v35  ;;  %9215 = vmatprep.subr.bf16.mxu0 %v12292_v30  ;;  %v12364_v35 = vld [vmem:[%s16604_s1 + $0x2254] ss:$8 sps:$4 sm:$0xff]  }
 0x419   :  { %9256 = vmatprep.subr.bf16.mxu1 %v12295_v33 }
 0x41b   :  { %9216 = vmatpush1.bf16.msra.mxu0 %v12290_v63 }
 0x41c   :  { %9257 = vmatpush1.bf16.msra.mxu1 %v12293_v36  ;;  %9217 = vmatprep.subr.bf16.mxu0 %v12298_v0 }
 0x41d   :  { %9258 = vmatprep.subr.bf16.mxu1 %v12301_v10  ;;  %v12362_v10 = vld [vmem:[%s16604_s1 + $0x2250] ss:$8 sps:$4 sm:$0xff]  }
 0x41f   :  { %9218 = vmatpush1.bf16.msra.mxu0 %v12296_v12  ;;  %v12365_v12 = vld [vmem:[%s16604_s1 + $0x2350] ss:$8 sps:$4 sm:$0xff]  }
 0x420   :  { %9259 = vmatpush1.bf16.msra.mxu1 %v12299_v37  ;;  %9219 = vmatprep.subr.bf16.mxu0 %v12304_v43 }
 0x421   :  { %9260 = vmatprep.subr.bf16.mxu1 %v12307_v38  ;;  %v12373_v38 = vld [vmem:[%s16604_s1 + $0x2344] ss:$8 sps:$4 sm:$0xff]  }
 0x423   :  { %9220 = vmatpush2.bf16.msra.mxu0 %v12302_v40  ;;  %v12368_v40 = vld [vmem:[%s16604_s1 + $0x2240] ss:$8 sps:$4 sm:$0xff]  }
 0x424   :  { %9261 = vmatpush2.bf16.msra.mxu1 %v12305_v14  ;;  %9221 = vmatprep.subr.bf16.mxu0 %v12310_v44  ;;  %v12371_v14 = vld [vmem:[%s16604_s1 + $0x2340] ss:$8 sps:$4 sm:$0xff]   ;;  %v12376_v44 = vld [vmem:[%s16604_s1 + $0x2234] ss:$8 sps:$4 sm:$0xff]  }
 0x425   :  { %9262 = vmatprep.subr.bf16.mxu1 %v12313_v16  ;;  %v12379_v16 = vld [vmem:[%s16604_s1 + $0x2334] ss:$8 sps:$4 sm:$0xff]  }
 0x427   :  { %9222 = vmatpush2.bf16.msra.mxu0 %v12308_v47  ;;  %v12374_v47 = vld [vmem:[%s16604_s1 + $0x2230] ss:$8 sps:$4 sm:$0xff]  }
 0x428   :  { %9263 = vmatpush2.bf16.msra.mxu1 %v12311_v50  ;;  %9223 = vmatprep.subr.bf16.mxu0 %v12316_v51  ;;  %v12377_v50 = vld [vmem:[%s16604_s1 + $0x2330] ss:$8 sps:$4 sm:$0xff]   ;;  %v12382_v51 = vld [vmem:[%s16604_s1 + $0x2224] ss:$8 sps:$4 sm:$0xff]  }
 0x429   :  { %9264 = vmatprep.subr.bf16.mxu1 %v12319_v28  ;;  %v12385_v28 = vld [vmem:[%s16604_s1 + $0x2324] ss:$8 sps:$4 sm:$0xff]  }
 0x42b   :  { %9224 = vmatpush2.bf16.msra.mxu0 %v12314_v60  ;;  %v12380_v60 = vld [vmem:[%s16604_s1 + $0x2220] ss:$8 sps:$4 sm:$0xff]  }
 0x42c   :  { %9265 = vmatpush2.bf16.msra.mxu1 %v12317_v19  ;;  %9225 = vmatprep.subr.bf16.mxu0 %v12322_v21  ;;  %v12383_v19 = vld [vmem:[%s16604_s1 + $0x2320] ss:$8 sps:$4 sm:$0xff]   ;;  %v12388_v21 = vld [vmem:[%s16604_s1 + $0x2214] ss:$8 sps:$4 sm:$0xff]  }
 0x42d   :  { %9266 = vmatprep.subr.bf16.mxu1 %v12325_v42  ;;  %v12391_v42 = vld [vmem:[%s16604_s1 + $0x2314] ss:$8 sps:$4 sm:$0xff]  }
 0x42f   :  { %9226 = vmatpush2.bf16.msra.mxu0 %v12320_v31  ;;  %v12386_v31 = vld [vmem:[%s16604_s1 + $0x2210] ss:$8 sps:$4 sm:$0xff]  }
 0x430   :  { %9267 = vmatpush2.bf16.msra.mxu1 %v12323_v24  ;;  %9227 = vmatprep.subr.bf16.mxu0 %v12328_v34  ;;  %v12389_v24 = vld [vmem:[%s16604_s1 + $0x2310] ss:$8 sps:$4 sm:$0xff]   ;;  %v12394_v34 = vld [vmem:[%s16604_s1 + $0x2204] ss:$8 sps:$4 sm:$0xff]  }
 0x431   :  { %9268 = vmatprep.subr.bf16.mxu1 %v12331_v55  ;;  %v12397_v55 = vld [vmem:[%s16604_s1 + $0x2304] ss:$8 sps:$4 sm:$0xff]  }
 0x433   :  { %9228 = vmatpush2.bf16.msra.mxu0 %v12326_v61  ;;  %v12392_v61 = vld [vmem:[%s16604_s1 + $0x2200] ss:$8 sps:$4 sm:$0xff]  }
 0x434   :  { %9269 = vmatpush2.bf16.msra.mxu1 %v12329_v9  ;;  %9229 = vmatprep.subr.bf16.mxu0 %v12334_v57  ;;  %v12395_v9 = vld [vmem:[%s16604_s1 + $0x2300] ss:$8 sps:$4 sm:$0xff]   ;;  %v12400_v57 = vld [vmem:[%s16604_s1 + $0x22f4] ss:$8 sps:$4 sm:$0xff]  }
 0x435   :  { %9270 = vmatprep.subr.bf16.mxu1 %v12337_v59  ;;  %v12403_v59 = vld [vmem:[%s16604_s1 + $0x23f4] ss:$8 sps:$4 sm:$0xff]  }
 0x437   :  { %9230 = vmatpush2.bf16.msra.mxu0 %v12332_v62  ;;  %v12401_v62 = vld [vmem:[%s16604_s1 + $0x23f0] ss:$8 sps:$4 sm:$0xff]  }
 0x438   :  { %9271 = vmatpush2.bf16.msra.mxu1 %v12335_v29  ;;  %9231 = vmatprep.subr.bf16.mxu0 %v12340_v1  ;;  %v12406_v29 = vld [vmem:[%s16604_s1 + $0x22e4] ss:$8 sps:$4 sm:$0xff]  }
 0x439   :  { %9272 = vmatprep.subr.bf16.mxu1 %v12343_v39  ;;  %v12409_v1 = vld [vmem:[%s16604_s1 + $0x23e4] ss:$8 sps:$4 sm:$0xff]   ;;  %v12404_v39 = vld [vmem:[%s16604_s1 + $0x22e0] ss:$8 sps:$4 sm:$0xff]  }
 0x43b   :  { %9232 = vmatpush2.bf16.msra.mxu0 %v12338_v5  ;;  %v12407_v5 = vld [vmem:[%s16604_s1 + $0x23e0] ss:$8 sps:$4 sm:$0xff]  }
 0x43c   :  { %9273 = vmatpush2.bf16.msra.mxu1 %v12341_v48  ;;  %9233 = vmatprep.subr.bf16.mxu0 %v12346_v27  ;;  %v12412_v48 = vld [vmem:[%s16604_s1 + $0x22d4] ss:$8 sps:$4 sm:$0xff]  }
 0x43d   :  { %9274 = vmatprep.subr.bf16.mxu1 %v12349_v25  ;;  %v12415_v27 = vld [vmem:[%s16604_s1 + $0x23d4] ss:$8 sps:$4 sm:$0xff]   ;;  %v12410_v25 = vld [vmem:[%s16604_s1 + $0x22d0] ss:$8 sps:$4 sm:$0xff]  }
 0x43f   :  { %9234 = vmatpush2.bf16.msra.mxu0 %v12344_v11  ;;  %v12421_v11 = vld [vmem:[%s16604_s1 + $0x23c4] ss:$8 sps:$4 sm:$0xff]  }
 0x440   :  { %9275 = vmatpush2.bf16.msra.mxu1 %v12347_v45  ;;  %9285 = vmatprep.subr.bf16.mxu0 %v12352_v13  ;;  %v12416_v45 = vld [vmem:[%s16604_s1 + $0x22c0] ss:$8 sps:$4 sm:$0xff]  }
 0x441   :  { %9326 = vmatprep.subr.bf16.mxu1 %v12355_v46  ;;  %v12419_v13 = vld [vmem:[%s16604_s1 + $0x23c0] ss:$8 sps:$4 sm:$0xff]   ;;  %v12424_v46 = vld [vmem:[%s16604_s1 + $0x22b4] ss:$8 sps:$4 sm:$0xff]  }
 0x442   :  { %v8991_v56 = vpop.f32.mrf.mxu0  ;;  %9236 = vmatmul.mubr.bf16.vlgmr.msra.gmra.mxu0 %v1685_v8  ;;  %v12418_v8 = vld [vmem:[%s16604_s1 + $0x22c4] ss:$8 sps:$4 sm:$0xff]  }
 0x443   :  { %v9032_v23 = vpop.f32.mrf.mxu1  ;;  %9277 = vmatmul.mubr.bf16.vlgmr.msra.gmra.mxu1 %v1707_v52  ;;  %v8992_v58 = vadd.f32 %v8991_v56, %v16004_v41  ;;  %9286 = vmatpush1.bf16.msra.mxu0 %v12350_v15  ;;  %v12367_v41 = vld [vmem:[%s16604_s1 + $0x2354] ss:$8 sps:$4 sm:$0xff]   ;;  %v12422_v52 = vld [vmem:[%s16604_s1 + $0x22b0] ss:$8 sps:$4 sm:$0xff]  }
 0x444   :  { %9327 = vmatpush1.bf16.msra.mxu1 %v12353_v22  ;;  %v8993_v7 = vpop.f32.mrf.mxu0  ;;  %9287 = vmatprep.subr.bf16.mxu0 %v12358_v17  ;;  %v12425_v15 = vld [vmem:[%s16604_s1 + $0x23b0] ss:$8 sps:$4 sm:$0xff]   ;;  %v12430_v22 = vld [vmem:[%s16604_s1 + $0x22a4] ss:$8 sps:$4 sm:$0xff]   ;;  %v12436_v56 = vld [vmem:[%s16604_s1 + $0x2294] ss:$8 sps:$4 sm:$0xff]  }
 0x445   :  { %v9034_v4 = vpop.f32.mrf.mxu1  ;;  %9328 = vmatprep.subr.bf16.mxu1 %v12361_v18  ;;  %v16212_v30 = vadd.f32 %v9032_v23, %v8992_v58  ;;  %v8994_v33 = vadd.f32 %v8993_v7, %v16007_v53  ;;  %9317 = vmatprep.mubr.bf16.mxu0 %v1706_v54  ;;  %v12370_v53 = vld [vmem:[%s16604_s1 + $0x2244] ss:$8 sps:$4 sm:$0xff]   ;;  %v12427_v54 = vld [vmem:[%s16604_s1 + $0x23b4] ss:$8 sps:$4 sm:$0xff]   ;;  %v12428_v18 = vld [vmem:[%s16604_s1 + $0x22a0] ss:$8 sps:$4 sm:$0xff]  }
 0x446   :  { %9358 = vmatprep.mubr.bf16.mxu1 %v1710_v20  ;;  %v8995_v63 = vpop.f32.mrf.mxu0  ;;  %v12433_v17 = vld [vmem:[%s16604_s1 + $0x23a4] ss:$8 sps:$4 sm:$0xff]   ;;  %v12431_v20 = vld [vmem:[%s16604_s1 + $0x23a0] ss:$8 sps:$4 sm:$0xff]   ;;  %v12439_v23 = vld [vmem:[%s16604_s1 + $0x2394] ss:$8 sps:$4 sm:$0xff]  }
 0x447   :  { %v9036_v36 = vpop.f32.mrf.mxu1  ;;  %v16215_v0 = vadd.f32 %v9034_v4, %v8994_v33  ;;  %9288 = vmatpush1.bf16.msra.mxu0 %v12356_v26  ;;  %v16364_v58 = vld.sshfl [vmem:[%s16603_s0 + $0x48] sm:$0x33 pattern:$0x75316420]  ;;  %v12434_v26 = vld [vmem:[%s16604_s1 + $0x2290] ss:$8 sps:$4 sm:$0xff]  }
 0x448   :  { %9329 = vmatpush1.bf16.msra.mxu1 %v12359_v2  ;;  %v8996_v37 = vpop.f32.mrf.mxu0  ;;  %9289 = vmatprep.subr.bf16.mxu0 %v12364_v35  ;;  %v12437_v2 = vld [vmem:[%s16604_s1 + $0x2390] ss:$8 sps:$4 sm:$0xff]   ;;  %v12442_v7 = vld [vmem:[%s16604_s1 + $0x2284] ss:$8 sps:$4 sm:$0xff]   ;;  %v1718_v35 = vcombine.high %v16364_v58, %v16364_v58  ;;  %v12440_v33 = vld [vmem:[%s16604_s1 + $0x2280] ss:$8 sps:$4 sm:$0xff]  }
 0x449   :  { %v9037_v43 = vpop.f32.mrf.mxu1  ;;  %9330 = vmatprep.subr.bf16.mxu1 %v12367_v41  ;;  %v12445_v4 = vld [vmem:[%s16604_s1 + $0x2384] ss:$8 sps:$4 sm:$0xff]   ;;  %v1692_v41 = vrot.slane %v16156_v3, %v12762_v49  ;;  %v12443_v63 = vld [vmem:[%s16604_s1 + $0x2380] ss:$8 sps:$4 sm:$0xff]   ;;  %v12449_v36 = vld [vmem:[%s16604_s1 + $0x2474] ss:$8 sps:$4 sm:$0xff]  }
 0x44a   :  { %v12452_v3 = vld [vmem:[%s16604_s1 + $0x2574] ss:$8 sps:$4 sm:$0xff]   ;;  %v12447_v37 = vld [vmem:[%s16604_s1 + $0x2470] ss:$8 sps:$4 sm:$0xff]  }
 0x44b   :  { %9290 = vmatpush1.bf16.msra.mxu0 %v12362_v10  ;;  %v1732_v10 = vrot.slane %v1718_v35, %v12762_v49  ;;  %v12450_v43 = vld [vmem:[%s16604_s1 + $0x2570] ss:$8 sps:$4 sm:$0xff]  }
 0x44c   :  { %9331 = vmatpush1.bf16.msra.mxu1 %v12365_v12  ;;  %9291 = vmatprep.subr.bf16.mxu0 %v12370_v53  ;;  %v1708_v12 = vcombine.high %v1692_v41, %v1692_v41  ;;  %v12455_v53 = vld [vmem:[%s16604_s1 + $0x2464] ss:$8 sps:$4 sm:$0xff]   ;;  %v12510_v35 = vld [vmem:[%s16604_s1 + $0x25d0] ss:$8 sps:$4 sm:$0xff]  }
 0x44d   :  { %9332 = vmatprep.subr.bf16.mxu1 %v12373_v38  ;;  %v12458_v38 = vld [vmem:[%s16604_s1 + $0x2564] ss:$8 sps:$4 sm:$0xff]  }
 0x44f   :  { %9292 = vmatpush1.bf16.msra.mxu0 %v12368_v40  ;;  %v1734_v40 = vcombine.high %v1732_v10, %v1732_v10 }
 0x450   :  { %9333 = vmatpush1.bf16.msra.mxu1 %v12371_v14  ;;  %9293 = vmatprep.subr.bf16.mxu0 %v12376_v44 }
 0x451   :  { %9334 = vmatprep.subr.bf16.mxu1 %v12379_v16 }
 0x453   :  { %9294 = vmatpush1.bf16.msra.mxu0 %v12374_v47  ;;  %v12453_v47 = vld [vmem:[%s16604_s1 + $0x2460] ss:$8 sps:$4 sm:$0xff]  }
 0x454   :  { %9335 = vmatpush1.bf16.msra.mxu1 %v12377_v50  ;;  %9295 = vmatprep.subr.bf16.mxu0 %v12382_v51  ;;  %v12456_v50 = vld [vmem:[%s16604_s1 + $0x2560] ss:$8 sps:$4 sm:$0xff]  }
 0x455   :  { %9336 = vmatprep.subr.bf16.mxu1 %v12385_v28 }
 0x457   :  { %9296 = vmatpush1.bf16.msra.mxu0 %v12380_v60  ;;  %v12461_v60 = vld [vmem:[%s16604_s1 + $0x2454] ss:$8 sps:$4 sm:$0xff]  }
 0x458   :  { %9337 = vmatpush1.bf16.msra.mxu1 %v12383_v19  ;;  %9297 = vmatprep.subr.bf16.mxu0 %v12388_v21 }
 0x459   :  { %9338 = vmatprep.subr.bf16.mxu1 %v12391_v42 }
 0x45b   :  { %9298 = vmatpush1.bf16.msra.mxu0 %v12386_v31 }
 0x45c   :  { %9339 = vmatpush1.bf16.msra.mxu1 %v12389_v24  ;;  %9299 = vmatprep.subr.bf16.mxu0 %v12394_v34  ;;  %v12459_v34 = vld [vmem:[%s16604_s1 + $0x2450] ss:$8 sps:$4 sm:$0xff]  }
 0x45d   :  { %9340 = vmatprep.subr.bf16.mxu1 %v12397_v55  ;;  %v12462_v55 = vld [vmem:[%s16604_s1 + $0x2550] ss:$8 sps:$4 sm:$0xff]  }
 0x45f   :  { %9300 = vmatpush1.bf16.msra.mxu0 %v12392_v61 }
 0x460   :  { %9341 = vmatpush1.bf16.msra.mxu1 %v12395_v9  ;;  %9301 = vmatprep.subr.bf16.mxu0 %v12400_v57  ;;  %v12470_v57 = vld [vmem:[%s16604_s1 + $0x2544] ss:$8 sps:$4 sm:$0xff]  }
 0x461   :  { %9342 = vmatprep.subr.bf16.mxu1 %v12403_v59  ;;  %v12465_v59 = vld [vmem:[%s16604_s1 + $0x2440] ss:$8 sps:$4 sm:$0xff]  }
 0x463   :  { %9302 = vmatpush2.bf16.msra.mxu0 %v12398_v32  ;;  %v12468_v32 = vld [vmem:[%s16604_s1 + $0x2540] ss:$8 sps:$4 sm:$0xff]  }
 0x464   :  { %9343 = vmatpush2.bf16.msra.mxu1 %v12401_v62  ;;  %9303 = vmatprep.subr.bf16.mxu0 %v12406_v29  ;;  %v12473_v62 = vld [vmem:[%s16604_s1 + $0x2434] ss:$8 sps:$4 sm:$0xff]  }
 0x465   :  { %9344 = vmatprep.subr.bf16.mxu1 %v12409_v1  ;;  %v12476_v29 = vld [vmem:[%s16604_s1 + $0x2534] ss:$8 sps:$4 sm:$0xff]   ;;  %v12471_v1 = vld [vmem:[%s16604_s1 + $0x2430] ss:$8 sps:$4 sm:$0xff]  }
 0x467   :  { %9304 = vmatpush2.bf16.msra.mxu0 %v12404_v39  ;;  %v12474_v39 = vld [vmem:[%s16604_s1 + $0x2530] ss:$8 sps:$4 sm:$0xff]  }
 0x468   :  { %9345 = vmatpush2.bf16.msra.mxu1 %v12407_v5  ;;  %9305 = vmatprep.subr.bf16.mxu0 %v12412_v48  ;;  %v12479_v5 = vld [vmem:[%s16604_s1 + $0x2424] ss:$8 sps:$4 sm:$0xff]  }
 0x469   :  { %9346 = vmatprep.subr.bf16.mxu1 %v12415_v27  ;;  %v12482_v48 = vld [vmem:[%s16604_s1 + $0x2524] ss:$8 sps:$4 sm:$0xff]   ;;  %v12477_v27 = vld [vmem:[%s16604_s1 + $0x2420] ss:$8 sps:$4 sm:$0xff]  }
 0x46b   :  { %9306 = vmatpush2.bf16.msra.mxu0 %v12410_v25  ;;  %v12480_v25 = vld [vmem:[%s16604_s1 + $0x2520] ss:$8 sps:$4 sm:$0xff]  }
 0x46c   :  { %9347 = vmatpush2.bf16.msra.mxu1 %v12413_v6  ;;  %9307 = vmatprep.subr.bf16.mxu0 %v12418_v8  ;;  %v12485_v6 = vld [vmem:[%s16604_s1 + $0x2414] ss:$8 sps:$4 sm:$0xff]  }
 0x46d   :  { %9348 = vmatprep.subr.bf16.mxu1 %v12421_v11  ;;  %v12488_v8 = vld [vmem:[%s16604_s1 + $0x2514] ss:$8 sps:$4 sm:$0xff]   ;;  %v12483_v11 = vld [vmem:[%s16604_s1 + $0x2410] ss:$8 sps:$4 sm:$0xff]  }
 0x46f   :  { %9308 = vmatpush2.bf16.msra.mxu0 %v12416_v45  ;;  %v12486_v45 = vld [vmem:[%s16604_s1 + $0x2510] ss:$8 sps:$4 sm:$0xff]  }
 0x470   :  { %9349 = vmatpush2.bf16.msra.mxu1 %v12419_v13  ;;  %9309 = vmatprep.subr.bf16.mxu0 %v12424_v46  ;;  %v12491_v13 = vld [vmem:[%s16604_s1 + $0x2404] ss:$8 sps:$4 sm:$0xff]  }
 0x471   :  { %9350 = vmatprep.subr.bf16.mxu1 %v12427_v54  ;;  %v12494_v46 = vld [vmem:[%s16604_s1 + $0x2504] ss:$8 sps:$4 sm:$0xff]   ;;  %v12489_v54 = vld [vmem:[%s16604_s1 + $0x2400] ss:$8 sps:$4 sm:$0xff]  }
 0x473   :  { %9310 = vmatpush2.bf16.msra.mxu0 %v12422_v52  ;;  %v12492_v52 = vld [vmem:[%s16604_s1 + $0x2500] ss:$8 sps:$4 sm:$0xff]  }
 0x474   :  { %9351 = vmatpush2.bf16.msra.mxu1 %v12425_v15  ;;  %9311 = vmatprep.subr.bf16.mxu0 %v12430_v22  ;;  %v12497_v15 = vld [vmem:[%s16604_s1 + $0x24f4] ss:$8 sps:$4 sm:$0xff]  }
 0x475   :  { %9352 = vmatprep.subr.bf16.mxu1 %v12433_v17  ;;  %v12500_v22 = vld [vmem:[%s16604_s1 + $0x25f4] ss:$8 sps:$4 sm:$0xff]   ;;  %v12495_v17 = vld [vmem:[%s16604_s1 + $0x24f0] ss:$8 sps:$4 sm:$0xff]  }
 0x477   :  { %9312 = vmatpush2.bf16.msra.mxu0 %v12428_v18  ;;  %v12498_v18 = vld [vmem:[%s16604_s1 + $0x25f0] ss:$8 sps:$4 sm:$0xff]  }
 0x478   :  { %9353 = vmatpush2.bf16.msra.mxu1 %v12431_v20  ;;  %9313 = vmatprep.subr.bf16.mxu0 %v12436_v56  ;;  %v12503_v20 = vld [vmem:[%s16604_s1 + $0x24e4] ss:$8 sps:$4 sm:$0xff]  }
 0x479   :  { %9354 = vmatprep.subr.bf16.mxu1 %v12439_v23  ;;  %v12506_v56 = vld [vmem:[%s16604_s1 + $0x25e4] ss:$8 sps:$4 sm:$0xff]   ;;  %v12501_v23 = vld [vmem:[%s16604_s1 + $0x24e0] ss:$8 sps:$4 sm:$0xff]  }
 0x47b   :  { %9314 = vmatpush2.bf16.msra.mxu0 %v12434_v26  ;;  %v12504_v26 = vld [vmem:[%s16604_s1 + $0x25e0] ss:$8 sps:$4 sm:$0xff]  }
 0x47c   :  { %9355 = vmatpush2.bf16.msra.mxu1 %v12437_v2  ;;  %9315 = vmatprep.subr.bf16.mxu0 %v12442_v7  ;;  %v12509_v2 = vld [vmem:[%s16604_s1 + $0x24d4] ss:$8 sps:$4 sm:$0xff]  }
 0x47d   :  { %9356 = vmatprep.subr.bf16.mxu1 %v12445_v4  ;;  %v12512_v7 = vld [vmem:[%s16604_s1 + $0x25d4] ss:$8 sps:$4 sm:$0xff]   ;;  %v12507_v4 = vld [vmem:[%s16604_s1 + $0x24d0] ss:$8 sps:$4 sm:$0xff]  }
 0x47f   :  { %9316 = vmatpush2.bf16.msra.mxu0 %v12440_v33  ;;  %v12518_v33 = vld [vmem:[%s16604_s1 + $0x25c4] ss:$8 sps:$4 sm:$0xff]  }
 0x480   :  { %9357 = vmatpush2.bf16.msra.mxu1 %v12443_v63  ;;  %9367 = vmatprep.subr.bf16.mxu0 %v12449_v36  ;;  %v12513_v63 = vld [vmem:[%s16604_s1 + $0x24c0] ss:$8 sps:$4 sm:$0xff]  }
 0x481   :  { %9408 = vmatprep.subr.bf16.mxu1 %v12452_v3  ;;  %v12516_v36 = vld [vmem:[%s16604_s1 + $0x25c0] ss:$8 sps:$4 sm:$0xff]   ;;  %v12521_v3 = vld [vmem:[%s16604_s1 + $0x24b4] ss:$8 sps:$4 sm:$0xff]  }
 0x482   :  { %v9073_v14 = vpop.f32.mrf.mxu0  ;;  %9318 = vmatmul.mubr.bf16.vlgmr.msra.gmra.mxu0 %v1692_v41  ;;  %v12515_v41 = vld [vmem:[%s16604_s1 + $0x24c4] ss:$8 sps:$4 sm:$0xff]  }
 0x483   :  { %v9114_v44 = vpop.f32.mrf.mxu1  ;;  %9359 = vmatmul.mubr.bf16.vlgmr.msra.gmra.mxu1 %v1708_v12  ;;  %v9074_v16 = vadd.f32 %v9073_v14, %v16212_v30  ;;  %9368 = vmatpush1.bf16.msra.mxu0 %v12447_v37  ;;  %v12464_v30 = vld [vmem:[%s16604_s1 + $0x2554] ss:$8 sps:$4 sm:$0xff]   ;;  %v12519_v12 = vld [vmem:[%s16604_s1 + $0x24b0] ss:$8 sps:$4 sm:$0xff]  }
 0x484   :  { %9409 = vmatpush1.bf16.msra.mxu1 %v12450_v43  ;;  %v9075_v51 = vpop.f32.mrf.mxu0  ;;  %9369 = vmatprep.subr.bf16.mxu0 %v12455_v53  ;;  %v12522_v37 = vld [vmem:[%s16604_s1 + $0x25b0] ss:$8 sps:$4 sm:$0xff]   ;;  %v12527_v43 = vld [vmem:[%s16604_s1 + $0x24a4] ss:$8 sps:$4 sm:$0xff]   ;;  %v12533_v14 = vld [vmem:[%s16604_s1 + $0x2494] ss:$8 sps:$4 sm:$0xff]  }
 0x485   :  { %v9116_v28 = vpop.f32.mrf.mxu1  ;;  %9410 = vmatprep.subr.bf16.mxu1 %v12458_v38  ;;  %v16420_v19 = vadd.f32 %v9114_v44, %v9074_v16  ;;  %v9076_v21 = vadd.f32 %v9075_v51, %v16215_v0  ;;  %9399 = vmatprep.mubr.bf16.mxu0 %v1732_v10  ;;  %v12467_v0 = vld [vmem:[%s16604_s1 + $0x2444] ss:$8 sps:$4 sm:$0xff]   ;;  %v12524_v10 = vld [vmem:[%s16604_s1 + $0x25b4] ss:$8 sps:$4 sm:$0xff]   ;;  %v12525_v38 = vld [vmem:[%s16604_s1 + $0x24a0] ss:$8 sps:$4 sm:$0xff]  }
 0x486   :  { %9440 = vmatprep.mubr.bf16.mxu1 %v1734_v40  ;;  %v9077_v42 = vpop.f32.mrf.mxu0  ;;  %v12530_v53 = vld [vmem:[%s16604_s1 + $0x25a4] ss:$8 sps:$4 sm:$0xff]   ;;  %v12528_v40 = vld [vmem:[%s16604_s1 + $0x25a0] ss:$8 sps:$4 sm:$0xff]   ;;  %v12536_v44 = vld [vmem:[%s16604_s1 + $0x2594] ss:$8 sps:$4 sm:$0xff]  }
 0x487   :  { %v9118_v31 = vpop.f32.mrf.mxu1  ;;  %v16423_v24 = vadd.f32 %v9116_v28, %v9076_v21  ;;  %9370 = vmatpush1.bf16.msra.mxu0 %v12453_v47  ;;  %v12531_v16 = vld [vmem:[%s16604_s1 + $0x2490] ss:$8 sps:$4 sm:$0xff]   ;;  %v12542_v51 = vld [vmem:[%s16604_s1 + $0x2584] ss:$8 sps:$4 sm:$0xff]   ;;  %v1725_v28 = vrot.slane %v16364_v58, %v12762_v49 }
 0x488   :  { %9411 = vmatpush1.bf16.msra.mxu1 %v12456_v50  ;;  %v9078_v61 = vpop.f32.mrf.mxu0  ;;  %9371 = vmatprep.subr.bf16.mxu0 %v12461_v60  ;;  %v12534_v47 = vld [vmem:[%s16604_s1 + $0x2590] ss:$8 sps:$4 sm:$0xff]   ;;  %v12539_v50 = vld [vmem:[%s16604_s1 + $0x2484] ss:$8 sps:$4 sm:$0xff]   ;;  %v12537_v60 = vld [vmem:[%s16604_s1 + $0x2480] ss:$8 sps:$4 sm:$0xff]  }
 0x489   :  { %v9119_v9 = vpop.f32.mrf.mxu1  ;;  %9412 = vmatprep.subr.bf16.mxu1 %v12464_v30  ;;  %v12540_v30 = vld [vmem:[%s16604_s1 + $0x2580] ss:$8 sps:$4 sm:$0xff]   ;;  %v1733_v21 = vcombine.high %v1725_v28, %v1725_v28  ;;  %s12590_s1 = smov [#allocation2]  }
 0x48a   :  { %s9464_s16 = sshll.u32 %s12590_s1, 4  ;;  %s9465_s16 = int_to_ptr.vmem [resolvable:$true] %s9464_s16 }
 0x48b   :  { %9372 = vmatpush1.bf16.msra.mxu0 %v12459_v34  ;;  %s12545_s18 = scalar_lea.vmem %s9465_s16, 32  ;;  %p12550_p1 = scmp.lt.s32.totalorder %s9465_s16, %s9465_s16 }
 0x48c   :  { %9413 = vmatpush1.bf16.msra.mxu1 %v12462_v55  ;;  %9373 = vmatprep.subr.bf16.mxu0 %v12467_v0  ;;  %p12546_p0 = scmp.ne.s32.totalorder %s9465_s16, %s12545_s18  ;;  %p12551_p2 = scmp.lt.s32.totalorder %s12545_s18, %s12545_s18 }
 0x48d   :  { %9414 = vmatprep.subr.bf16.mxu1 %v12470_v57 }
 0x48e   :  { %p12552_p3 = por %p12551_p2, %p12550_p1 }
 0x48f   :  { %9374 = vmatpush1.bf16.msra.mxu0 %v12465_v59 }
 0x490   :  { %9415 = vmatpush1.bf16.msra.mxu1 %v12468_v32  ;;  %9375 = vmatprep.subr.bf16.mxu0 %v12473_v62  ;;  %p12553_p4 = pnand %p12552_p3, %p12546_p0 }
 0x491   :  { %9416 = vmatprep.subr.bf16.mxu1 %v12476_v29 }
 0x493   :  { %9376 = vmatpush1.bf16.msra.mxu0 %v12471_v1 }
 0x494   :  { %9417 = vmatpush1.bf16.msra.mxu1 %v12474_v39  ;;  %9377 = vmatprep.subr.bf16.mxu0 %v12479_v5 }
 0x495   :  { %9418 = vmatprep.subr.bf16.mxu1 %v12482_v48 }
 0x497   :  { %9378 = vmatpush1.bf16.msra.mxu0 %v12477_v27 }
 0x498   :  { %9419 = vmatpush1.bf16.msra.mxu1 %v12480_v25  ;;  %9379 = vmatprep.subr.bf16.mxu0 %v12485_v6 }
 0x499   :  { %9420 = vmatprep.subr.bf16.mxu1 %v12488_v8 }
 0x49b   :  { %9380 = vmatpush1.bf16.msra.mxu0 %v12483_v11 }
 0x49c   :  { %9421 = vmatpush1.bf16.msra.mxu1 %v12486_v45  ;;  %9381 = vmatprep.subr.bf16.mxu0 %v12491_v13 }
 0x49d   :  { %9422 = vmatprep.subr.bf16.mxu1 %v12494_v46 }
 0x49f   :  { %9382 = vmatpush1.bf16.msra.mxu0 %v12489_v54 }
 0x4a0   :  { %9423 = vmatpush1.bf16.msra.mxu1 %v12492_v52  ;;  %9383 = vmatprep.subr.bf16.mxu0 %v12497_v15 }
 0x4a1   :  { %9424 = vmatprep.subr.bf16.mxu1 %v12500_v22 }
 0x4a3   :  { %9384 = vmatpush2.bf16.msra.mxu0 %v12495_v17 }
 0x4a4   :  { %9425 = vmatpush2.bf16.msra.mxu1 %v12498_v18  ;;  %9385 = vmatprep.subr.bf16.mxu0 %v12503_v20 }
 0x4a5   :  { %9426 = vmatprep.subr.bf16.mxu1 %v12506_v56 }
 0x4a7   :  { %9386 = vmatpush2.bf16.msra.mxu0 %v12501_v23 }
 0x4a8   :  { %9427 = vmatpush2.bf16.msra.mxu1 %v12504_v26  ;;  %9387 = vmatprep.subr.bf16.mxu0 %v12509_v2 }
 0x4a9   :  { %9428 = vmatprep.subr.bf16.mxu1 %v12512_v7 }
 0x4ab   :  { %9388 = vmatpush2.bf16.msra.mxu0 %v12507_v4 }
 0x4ac   :  { %9429 = vmatpush2.bf16.msra.mxu1 %v12510_v35  ;;  %9389 = vmatprep.subr.bf16.mxu0 %v12515_v41 }
 0x4ad   :  { %9430 = vmatprep.subr.bf16.mxu1 %v12518_v33 }
 0x4af   :  { %9390 = vmatpush2.bf16.msra.mxu0 %v12513_v63 }
 0x4b0   :  { %9431 = vmatpush2.bf16.msra.mxu1 %v12516_v36  ;;  %9391 = vmatprep.subr.bf16.mxu0 %v12521_v3 }
 0x4b1   :  { %9432 = vmatprep.subr.bf16.mxu1 %v12524_v10 }
 0x4b3   :  { %9392 = vmatpush2.bf16.msra.mxu0 %v12519_v12 }
 0x4b4   :  { %9433 = vmatpush2.bf16.msra.mxu1 %v12522_v37  ;;  %9393 = vmatprep.subr.bf16.mxu0 %v12527_v43 }
 0x4b5   :  { %9434 = vmatprep.subr.bf16.mxu1 %v12530_v53 }
 0x4b7   :  { %9394 = vmatpush2.bf16.msra.mxu0 %v12525_v38 }
 0x4b8   :  { %9435 = vmatpush2.bf16.msra.mxu1 %v12528_v40  ;;  %9395 = vmatprep.subr.bf16.mxu0 %v12533_v14 }
 0x4b9   :  { %9436 = vmatprep.subr.bf16.mxu1 %v12536_v44 }
 0x4bb   :  { %9396 = vmatpush2.bf16.msra.mxu0 %v12531_v16 }
 0x4bc   :  { %9437 = vmatpush2.bf16.msra.mxu1 %v12534_v47  ;;  %9397 = vmatprep.subr.bf16.mxu0 %v12539_v50 }
 0x4bd   :  { %9438 = vmatprep.subr.bf16.mxu1 %v12542_v51 }
 0x4bf   :  { %9398 = vmatpush2.bf16.msra.mxu0 %v12537_v60 }
 0x4c0   :  { %9439 = vmatpush2.bf16.msra.mxu1 %v12540_v30 }
 0x4c2   :  { %v9155_v42 = vpop.f32.mrf.mxu0  ;;  %9400 = vmatmul.mubr.bf16.vlgmr.msra.gmra.mxu0 %v1725_v28 }
 0x4c3   :  { %v9196_v31 = vpop.f32.mrf.mxu1  ;;  %9441 = vmatmul.mubr.bf16.vlgmr.msra.gmra.mxu1 %v1733_v21  ;;  %v9156_v49 = vadd.f32 %v9155_v42, %v16420_v19 }
 0x4c4   :  { %v9157_v58 = vpop.f32.mrf.mxu0 }
 0x4c5   :  { %v9198_v34 = vpop.f32.mrf.mxu1  ;;  %v9197_v55 = vadd.f32 %v9196_v31, %v9156_v49  ;;  %v9158_v61 = vadd.f32 %v9157_v58, %v16423_v24 }
 0x4c6   :  { %v9159_v9 = vpop.f32.mrf.mxu0 }
 0x4c7   :  { %v9200_v0 = vpop.f32.mrf.mxu1  ;;  %v9199_v57 = vadd.f32 %v9198_v34, %v9158_v61 }
 0x4c8   :  { %v9160_v59 = vpop.f32.mrf.mxu0 }
 0x4c9   :  { %v9201_v32 = vpop.f32.mrf.mxu1 }
 0x502   :  { %v9237_v62 = vpop.f32.mrf.mxu0 }
 0x503   :  { %v9278_v29 = vpop.f32.mrf.mxu1  ;;  %v9238_v1 = vadd.f32 %v9237_v62, %v9197_v55 }
 0x504   :  { %v9239_v39 = vpop.f32.mrf.mxu0 }
 0x505   :  { %v9280_v5 = vpop.f32.mrf.mxu1  ;;  %v9279_v48 = vadd.f32 %v9278_v29, %v9238_v1  ;;  %v9240_v27 = vadd.f32 %v9239_v39, %v9199_v57 }
 0x506   :  { %v9241_v25 = vpop.f32.mrf.mxu0 }
 0x507   :  { %v9282_v6 = vpop.f32.mrf.mxu1  ;;  %v9281_v19 = vadd.f32 %v9280_v5, %v9240_v27 }
 0x508   :  { %v9242_v8 = vpop.f32.mrf.mxu0 }
 0x509   :  { %v9283_v11 = vpop.f32.mrf.mxu1 }
 0x542   :  { %v9319_v45 = vpop.f32.mrf.mxu0 }
 0x543   :  { %v9360_v13 = vpop.f32.mrf.mxu1  ;;  %v9320_v17 = vadd.f32 %v9319_v45, %v9279_v48 }
 0x544   :  { %v9321_v24 = vpop.f32.mrf.mxu0 }
 0x545   :  { %v9362_v46 = vpop.f32.mrf.mxu1  ;;  %v9322_v18 = vadd.f32 %v9321_v24, %v9281_v19  ;;  %v9361_v20 = vadd.f32 %v9360_v13, %v9320_v17 }
 0x546   :  { %v9323_v54 = vpop.f32.mrf.mxu0 }
 0x547   :  { %v9364_v52 = vpop.f32.mrf.mxu1  ;;  %v9363_v26 = vadd.f32 %v9362_v46, %v9322_v18 }
 0x548   :  { %v9324_v15 = vpop.f32.mrf.mxu0 }
 0x549   :  { %v9365_v22 = vpop.f32.mrf.mxu1 }
 0x582   :  { %v9401_v56 = vpop.f32.mrf.mxu0 }
 0x583   :  { %v9442_v23 = vpop.f32.mrf.mxu1  ;;  %v9402_v2 = vadd.f32 %v9401_v56, %v9361_v20 }
 0x584   :  { %v9403_v7 = vpop.f32.mrf.mxu0 }
 0x585   :  { %v9444_v4 = vpop.f32.mrf.mxu1  ;;  %v9443_v35 = vadd.f32 %v9442_v23, %v9402_v2  ;;  %v9404_v41 = vadd.f32 %v9403_v7, %v9363_v26 }
 0x586   :  { %v9405_v33 = vpop.f32.mrf.mxu0 }
 0x587   :  { %v9446_v63 = vpop.f32.mrf.mxu1  ;;  %9449 = vst [vmem:[#allocation2] sm:$0x3] %v9443_v35  ;;  %v9445_v36 = vadd.f32 %v9444_v4, %v9404_v41 }
 0x588   :  { %v9406_v3 = vpop.f32.mrf.mxu0 }
 0x589   :  { %v9447_v10 = vpop.f32.mrf.mxu1 }
 0x58a   :  { %12556 = shalt.err (!%p12553_p4)
}
 0x58b   :  { %9467 = dma.vmem_to_hbm [thread:$0]  %s9465_s16, 32, %s16607_s4, [#allocation3]   ;;  %v9451_v12 = vmul.f32 0.5, %v9445_v36  ;;  %9450 = vst [vmem:[#allocation4] sm:$0x3] %v9445_v36 }
 0x58c   :  { %s12565_s21 = scalar_lea.vmem %s9475_s17, 32  ;;  %p12570_p6 = scmp.lt.s32.totalorder %s9475_s17, %s9475_s17 }
 0x58d   :  { %p12566_p5 = scmp.ne.s32.totalorder %s9475_s17, %s12565_s21  ;;  %p12571_p7 = scmp.lt.s32.totalorder %s12565_s21, %s12565_s21 }
 0x58f   :  { %p12572_p8 = por %p12571_p7, %p12570_p6 }
 0x591   :  { %p12573_p9 = pnand %p12572_p8, %p12566_p5 }
 0x593   :  { %12576 = shalt.err (!%p12573_p9)
}
 0x594   :  { %9477 = dma.vmem_to_hbm [thread:$0]  %s9475_s17, 32, %s16608_s5, [#allocation5]   ;;  %v9452_v37 = vmul.f32 1.442695, %v9451_v12  ;;  %v9454_v43 = vld [vmem:[%s16606_s3] sm:$0x3] }
 0x596   :  { %12543 = vpow2.f32 %v9452_v37 }
 0x5a3   :  { %v12544_v53 = vpop.eup %12543 }
 0x5a4   :  { %v9455_v38 = vmul.f32 %v12544_v53, %v9454_v43 }
 0x5a6   :  { %v9456_v40 = vadd.f32 %v9455_v38, %v9443_v35 }
 0x5a8   :  { %9457 = vst [vmem:[%s16609_s6] sm:$0x3] %v9456_v40 }
 0x5a9   :  { %12585 = dma.done.wait [#allocation3], 32  }
 0x5aa   :  { %12586 = vsyncadd [#allocation3], 4294967264 }
 0x5ab   :  { %12587 = dma.done.wait [#allocation5], 32  }
 0x5ac   :  { %12588 = vsyncadd [#allocation5], 4294967264 }
 0x5ad   :  { %9488 = vsyncpa [#allocation3], 1 }
 0x5ae   :  { %9489 = vsyncpa [#allocation5], 1 }

// kernel: conv_vae_forward.11
= control target key start
LH: loop header
LB: loop body
LE: loop exit
PB: predicated region body
PF: predicated region fallthrough
CT: control target
= control target key end

     0   :  { %s876_s12 = smov 0   ;;  %s1005_s0 = inlined_call_operand.vmem [shape: bf16[1664,256], index: 0, kind: input, shape index: {}]   ;;  %s1006_s1 = inlined_call_operand.vmem [shape: bf16[256,128], index: 1, kind: input, shape index: {}]   ;;  %s1007_s2 = inlined_call_operand.vmem [shape: f32[1,128], index: 2, kind: input, shape index: {}]   ;;  %s1008_s3 = inlined_call_operand.vmem [shape: f32[1664,128], index: 3, kind: output, shape index: {}]  }
   0x1 LB: > { %s642_s13 = sadd.s32 4294967295, %s854_s12   ;;  %p646_p0 = scmp.ge.s32.totalorder %s854_s12, 1  ;;  %s854_s12 = sphi %s876_s12, %s13_s12  }
   0x2   : > { %p139_p1 = scmp.lt.s32.totalorder %s854_s12, 14 }
   0x4   : > { %p140_p2 = pnand %p646_p0, %p139_p1 }
   0x5   : > { %s647_s16 = sshll.u32 (!%p140_p2), %s642_s13, 4 }
   0x6   : > { %143 = sbr.rel (%p140_p2) target bundleno = 293 (0x125), region = 32  ;;  %p165_p3 = scmp.lt.s32.totalorder (!%p140_p2), %s647_s16, 207 }
   0xb   : > { %v776_v0 = vld [vmem:[%s1006_s1 + $0x78] sm:$0xff]   ;;  %v778_v2 = vld [vmem:[%s1006_s1 + $0x70] sm:$0xff]   ;;  %v780_v4 = vld [vmem:[%s1006_s1 + $0x68] sm:$0xff]   ;;  %s1010_s16 = smov (!%p165_p3, %s647_s16), 207 }
   0xc   : > { %v777_v1 = vld [vmem:[%s1006_s1 + $0x38] sm:$0xff]   ;;  %688 = vmatprep.subr.bf16.mxu0 %v776_v0  ;;  %752 = vmatprep.subr.bf16.mxu1 %v776_v0  ;;  %v779_v3 = vld [vmem:[%s1006_s1 + $0x30] sm:$0xff]   ;;  %v781_v5 = vld [vmem:[%s1006_s1 + $0x28] sm:$0xff]   ;;  %s687_s4 = sshll.u32 %s1010_s16, 3 }
   0xd   : > { %689 = vmatpush3.bf16.msra.mxu0 %v777_v1  ;;  %760 = vmatpush3.bf16.msra.mxu1 %v777_v1  ;;  %v782_v6 = vld [vmem:[%s1006_s1 + $0x60] sm:$0xff]   ;;  %v784_v8 = vld [vmem:[%s1006_s1 + $0x58] sm:$0xff]   ;;  %s919_s9 = scalar_lea.vmem %s1005_s0, %s687_s4  ;;  %v786_v10 = vld [vmem:[%s1006_s1 + $0x50] sm:$0xff]   ;;  %s978_s30 = scalar_lea.vmem %s1008_s3, %s687_s4 }
   0xe   : > { %690 = vmatprep.subr.bf16.mxu0 %v778_v2  ;;  %753 = vmatprep.subr.bf16.mxu1 %v778_v2  ;;  %v783_v7 = vld [vmem:[%s1006_s1 + $0x20] sm:$0xff]   ;;  %v785_v9 = vld [vmem:[%s1006_s1 + $0x18] sm:$0xff]   ;;  %v787_v13 = vld [vmem:[%s1006_s1 + $0x10] sm:$0xff]  }
   0xf   : > { %v794_v11 = vld [vmem:[%s919_s9 + $0x4] ss:$8 sps:$4 sm:$0xff]   ;;  %v792_v18 = vld [vmem:[%s919_s9] ss:$8 sps:$4 sm:$0xff]   ;;  %v798_v20 = vld [vmem:[%s919_s9 + $0x14] ss:$8 sps:$4 sm:$0xff]  }
  0x10   : > { %v797_v12 = vld [vmem:[%s919_s9 + $0x44] ss:$8 sps:$4 sm:$0xff]   ;;  %441 = vmatprep.mubr.bf16.mxu0 %v794_v11  ;;  %v795_v19 = vld [vmem:[%s919_s9 + $0x40] ss:$8 sps:$4 sm:$0xff]   ;;  %v800_v21 = vld [vmem:[%s919_s9 + $0x54] ss:$8 sps:$4 sm:$0xff]  }
  0x11   : > { %691 = vmatpush3.bf16.msra.mxu0 %v779_v3  ;;  %761 = vmatpush3.bf16.msra.mxu1 %v779_v3  ;;  %v788_v14 = vld [vmem:[%s1006_s1 + $0x48] sm:$0xff]   ;;  %v790_v16 = vld [vmem:[%s1006_s1 + $0x40] sm:$0xff]   ;;  %v802_v22 = vld [vmem:[%s919_s9 + $0x10] ss:$8 sps:$4 sm:$0xff]  }
  0x12   : > { %692 = vmatprep.subr.bf16.mxu0 %v780_v4  ;;  %754 = vmatprep.subr.bf16.mxu1 %v780_v4  ;;  %v789_v15 = vld [vmem:[%s1006_s1 + $0x8] sm:$0xff]   ;;  %v791_v17 = vld [vmem:[%s1006_s1] sm:$0xff]   ;;  %v803_v23 = vld [vmem:[%s919_s9 + $0x50] ss:$8 sps:$4 sm:$0xff]  }
  0x13   : > { %473 = vmatprep.mubr.bf16.mxu1 %v797_v12  ;;  %v804_v24 = vld [vmem:[%s919_s9 + $0x24] ss:$8 sps:$4 sm:$0xff]   ;;  %v808_v26 = vld [vmem:[%s919_s9 + $0x20] ss:$8 sps:$4 sm:$0xff]   ;;  %v810_v28 = vld [vmem:[%s919_s9 + $0x34] ss:$8 sps:$4 sm:$0xff]  }
  0x14   : > { %v806_v25 = vld [vmem:[%s919_s9 + $0x64] ss:$8 sps:$4 sm:$0xff]   ;;  %v809_v27 = vld [vmem:[%s919_s9 + $0x60] ss:$8 sps:$4 sm:$0xff]   ;;  %v812_v29 = vld [vmem:[%s919_s9 + $0x74] ss:$8 sps:$4 sm:$0xff]  }
  0x15   : > { %693 = vmatpush3.bf16.msra.mxu0 %v781_v5  ;;  %762 = vmatpush3.bf16.msra.mxu1 %v781_v5  ;;  %v814_v30 = vld [vmem:[%s919_s9 + $0x30] ss:$8 sps:$4 sm:$0xff]   ;;  %v961_v34 = vld [vmem:[%s1007_s2] ss:$0 sm:$0xff] }
  0x16   : > { %694 = vmatprep.subr.bf16.mxu0 %v782_v6  ;;  %755 = vmatprep.subr.bf16.mxu1 %v782_v6  ;;  %v815_v31 = vld [vmem:[%s919_s9 + $0x70] ss:$8 sps:$4 sm:$0xff]  }
  0x19   : > { %695 = vmatpush3.bf16.msra.mxu0 %v783_v7  ;;  %763 = vmatpush3.bf16.msra.mxu1 %v783_v7 }
  0x1a   : > { %696 = vmatprep.subr.bf16.mxu0 %v784_v8  ;;  %756 = vmatprep.subr.bf16.mxu1 %v784_v8 }
  0x1d   : > { %697 = vmatpush3.bf16.msra.mxu0 %v785_v9  ;;  %764 = vmatpush3.bf16.msra.mxu1 %v785_v9 }
  0x1e   : > { %698 = vmatprep.subr.bf16.mxu0 %v786_v10  ;;  %757 = vmatprep.subr.bf16.mxu1 %v786_v10 }
  0x21   : > { %699 = vmatpush3.bf16.msra.mxu0 %v787_v13  ;;  %765 = vmatpush3.bf16.msra.mxu1 %v787_v13 }
  0x22   : > { %700 = vmatprep.subr.bf16.mxu0 %v788_v14  ;;  %758 = vmatprep.subr.bf16.mxu1 %v788_v14 }
  0x25   : > { %701 = vmatpush3.bf16.msra.mxu0 %v789_v15  ;;  %766 = vmatpush3.bf16.msra.mxu1 %v789_v15 }
  0x26   : > { %702 = vmatprep.subr.bf16.mxu0 %v790_v16  ;;  %759 = vmatprep.subr.bf16.mxu1 %v790_v16 }
  0x29   : > { %703 = vmatpush3.bf16.msra.mxu0 %v791_v17  ;;  %767 = vmatpush3.bf16.msra.mxu1 %v791_v17 }
  0x2c   : > { %442 = vmatmul.mubr.bf16.vlgmr.msra.gmra.mxu0 %v792_v18  ;;  %474 = vmatmul.mubr.bf16.vlgmr.msra.gmra.mxu1 %v795_v19 }
  0x2d   : > { %449 = vmatprep.mubr.bf16.mxu0 %v798_v20  ;;  %481 = vmatprep.mubr.bf16.mxu1 %v800_v21 }
  0x34   : > { %450 = vmatmul.mubr.bf16.gmra.mxu0 %v802_v22  ;;  %482 = vmatmul.mubr.bf16.gmra.mxu1 %v803_v23 }
  0x35   : > { %457 = vmatprep.mubr.bf16.mxu0 %v804_v24  ;;  %489 = vmatprep.mubr.bf16.mxu1 %v806_v25 }
  0x3c   : > { %458 = vmatmul.mubr.bf16.gmra.mxu0 %v808_v26  ;;  %490 = vmatmul.mubr.bf16.gmra.mxu1 %v809_v27 }
  0x3d   : > { %465 = vmatprep.mubr.bf16.mxu0 %v810_v28  ;;  %497 = vmatprep.mubr.bf16.mxu1 %v812_v29 }
  0x44   : > { %466 = vmatmul.mubr.bf16.gmra.mxu0 %v814_v30  ;;  %498 = vmatmul.mubr.bf16.gmra.mxu1 %v815_v31 }
  0xec   : > { %v704_v32 = vpop.f32.mrf.mxu0  ;;  %v728_v33 = vpop.f32.mrf.mxu1 }
  0xee   : > { %v705_v35 = vpop.f32.mrf.mxu0  ;;  %v729_v36 = vpop.f32.mrf.mxu1 }
  0xef   : > { %v706_v37 = vadd.f32 %v705_v35, %v704_v32  ;;  %v730_v38 = vadd.f32 %v729_v36, %v728_v33 }
  0xf0   : > { %v707_v39 = vpop.f32.mrf.mxu0  ;;  %v731_v40 = vpop.f32.mrf.mxu1 }
  0xf1   : > { %v444_v41 = vadd.f32 %v706_v37, %v961_v34  ;;  %v476_v42 = vadd.f32 %v730_v38, %v961_v34 }
  0xf2   : > { %v708_v43 = vpop.f32.mrf.mxu0  ;;  %v732_v44 = vpop.f32.mrf.mxu1 }
  0xf3   : > { %v506_v45 = vmul.f32 0.5, %v444_v41  ;;  %v514_v46 = vmul.f32 0.5, %v476_v42  ;;  %v709_v47 = vadd.f32 %v708_v43, %v707_v39  ;;  %v733_v48 = vadd.f32 %v732_v44, %v731_v40 }
  0xf4   : > { %v710_v49 = vpop.f32.mrf.mxu0  ;;  %v734_v50 = vpop.f32.mrf.mxu1 }
  0xf5   : > { %816 = vtanh.f32 %v506_v45  ;;  %v447_v51 = vadd.f32 %v709_v47, %v961_v34  ;;  %v479_v52 = vadd.f32 %v733_v48, %v961_v34 }
  0xf6   : > { %818 = vtanh.f32 %v514_v46  ;;  %v711_v53 = vpop.f32.mrf.mxu0  ;;  %v735_v54 = vpop.f32.mrf.mxu1 }
  0xf7   : > { %v507_v55 = vmul.f32 0.5, %v447_v51  ;;  %v515_v56 = vmul.f32 0.5, %v479_v52  ;;  %v712_v57 = vadd.f32 %v711_v53, %v710_v49  ;;  %v736_v58 = vadd.f32 %v735_v54, %v734_v50 }
  0xf8   : > { %v713_v59 = vpop.f32.mrf.mxu0  ;;  %v737_v60 = vpop.f32.mrf.mxu1 }
  0xf9   : > { %820 = vtanh.f32 %v507_v55  ;;  %v452_v61 = vadd.f32 %v712_v57, %v961_v34  ;;  %v484_v62 = vadd.f32 %v736_v58, %v961_v34 }
  0xfa   : > { %822 = vtanh.f32 %v515_v56  ;;  %v714_v63 = vpop.f32.mrf.mxu0  ;;  %v738_v0 = vpop.f32.mrf.mxu1 }
  0xfb   : > { %v508_v1 = vmul.f32 0.5, %v452_v61  ;;  %v516_v2 = vmul.f32 0.5, %v484_v62  ;;  %v715_v3 = vadd.f32 %v714_v63, %v713_v59  ;;  %v739_v4 = vadd.f32 %v738_v0, %v737_v60 }
  0xfc   : > { %v716_v5 = vpop.f32.mrf.mxu0  ;;  %v740_v6 = vpop.f32.mrf.mxu1 }
  0xfd   : > { %824 = vtanh.f32 %v508_v1  ;;  %v455_v7 = vadd.f32 %v715_v3, %v961_v34  ;;  %v487_v8 = vadd.f32 %v739_v4, %v961_v34 }
  0xfe   : > { %826 = vtanh.f32 %v516_v2  ;;  %v717_v9 = vpop.f32.mrf.mxu0  ;;  %v741_v10 = vpop.f32.mrf.mxu1 }
  0xff   : > { %v509_v11 = vmul.f32 0.5, %v455_v7  ;;  %v517_v12 = vmul.f32 0.5, %v487_v8  ;;  %v718_v13 = vadd.f32 %v717_v9, %v716_v5  ;;  %v742_v14 = vadd.f32 %v741_v10, %v740_v6 }
 0x100   : > { %v719_v15 = vpop.f32.mrf.mxu0  ;;  %v743_v16 = vpop.f32.mrf.mxu1 }
 0x101   : > { %828 = vtanh.f32 %v509_v11  ;;  %v460_v17 = vadd.f32 %v718_v13, %v961_v34  ;;  %v492_v18 = vadd.f32 %v742_v14, %v961_v34 }
 0x102   : > { %v817_v19 = vpop.eup %816  ;;  %830 = vtanh.f32 %v517_v12  ;;  %v720_v20 = vpop.f32.mrf.mxu0 }
 0x103   : > { %v744_v21 = vpop.f32.mrf.mxu1  ;;  %v819_v22 = vpop.eup %818  ;;  %v538_v23 = vadd.f32 1.0, %v817_v19  ;;  %v510_v24 = vmul.f32 0.5, %v460_v17  ;;  %v518_v25 = vmul.f32 0.5, %v492_v18  ;;  %v721_v26 = vadd.f32 %v720_v20, %v719_v15 }
 0x104   : > { %v546_v27 = vadd.f32 1.0, %v819_v22  ;;  %v745_v28 = vadd.f32 %v744_v21, %v743_v16  ;;  %v722_v29 = vpop.f32.mrf.mxu0 }
 0x105   : > { %v746_v30 = vpop.f32.mrf.mxu1  ;;  %v554_v31 = vmul.f32 0.5, %v538_v23  ;;  %832 = vtanh.f32 %v510_v24  ;;  %v463_v32 = vadd.f32 %v721_v26, %v961_v34 }
 0x106   : > { %v821_v33 = vpop.eup %820  ;;  %v562_v35 = vmul.f32 0.5, %v546_v27  ;;  %834 = vtanh.f32 %v518_v25  ;;  %v495_v36 = vadd.f32 %v745_v28, %v961_v34  ;;  %v723_v37 = vpop.f32.mrf.mxu0 }
 0x107   : > { %v747_v38 = vpop.f32.mrf.mxu1  ;;  %v823_v39 = vpop.eup %822  ;;  %570 = vst [vmem:[%s978_s30] sm:$0xff] %v554_v31  ;;  %v539_v40 = vadd.f32 1.0, %v821_v33  ;;  %v511_v41 = vmul.f32 0.5, %v463_v32  ;;  %v724_v42 = vadd.f32 %v723_v37, %v722_v29 }
 0x108   : > { %v748_v43 = vadd.f32 %v747_v38, %v746_v30  ;;  %578 = vst [vmem:[%s978_s30 + $0x40] sm:$0xff] %v562_v35  ;;  %v547_v44 = vadd.f32 1.0, %v823_v39  ;;  %v519_v45 = vmul.f32 0.5, %v495_v36  ;;  %v725_v46 = vpop.f32.mrf.mxu0 }
 0x109   : > { %v749_v47 = vpop.f32.mrf.mxu1  ;;  %v555_v48 = vmul.f32 0.5, %v539_v40  ;;  %836 = vtanh.f32 %v511_v41  ;;  %v468_v49 = vadd.f32 %v724_v42, %v961_v34 }
 0x10a   : > { %v500_v50 = vadd.f32 %v748_v43, %v961_v34  ;;  %v825_v51 = vpop.eup %824  ;;  %v563_v52 = vmul.f32 0.5, %v547_v44  ;;  %838 = vtanh.f32 %v519_v45  ;;  %v726_v53 = vpop.f32.mrf.mxu0 }
 0x10b   : > { %v750_v54 = vpop.f32.mrf.mxu1  ;;  %v827_v55 = vpop.eup %826  ;;  %571 = vst [vmem:[%s978_s30 + $0x8] sm:$0xff] %v555_v48  ;;  %v540_v56 = vadd.f32 1.0, %v825_v51  ;;  %v512_v57 = vmul.f32 0.5, %v468_v49  ;;  %v727_v59 = vadd.f32 %v726_v53, %v725_v46 }
 0x10c   : > { %v520_v58 = vmul.f32 0.5, %v500_v50  ;;  %579 = vst [vmem:[%s978_s30 + $0x48] sm:$0xff] %v563_v52  ;;  %v548_v60 = vadd.f32 1.0, %v827_v55  ;;  %v751_v61 = vadd.f32 %v750_v54, %v749_v47 }
 0x10d   : > { %v556_v62 = vmul.f32 0.5, %v540_v56  ;;  %840 = vtanh.f32 %v512_v57  ;;  %v471_v63 = vadd.f32 %v727_v59, %v961_v34 }
 0x10e   : > { %v829_v0 = vpop.eup %828  ;;  %v564_v1 = vmul.f32 0.5, %v548_v60  ;;  %842 = vtanh.f32 %v520_v58  ;;  %v503_v2 = vadd.f32 %v751_v61, %v961_v34 }
 0x10f   : > { %v831_v3 = vpop.eup %830  ;;  %572 = vst [vmem:[%s978_s30 + $0x10] sm:$0xff] %v556_v62  ;;  %v541_v4 = vadd.f32 1.0, %v829_v0  ;;  %v513_v5 = vmul.f32 0.5, %v471_v63 }
 0x110   : > { %580 = vst [vmem:[%s978_s30 + $0x50] sm:$0xff] %v564_v1  ;;  %v549_v6 = vadd.f32 1.0, %v831_v3  ;;  %v521_v7 = vmul.f32 0.5, %v503_v2 }
 0x111   : > { %v557_v8 = vmul.f32 0.5, %v541_v4  ;;  %844 = vtanh.f32 %v513_v5 }
 0x112   : > { %v833_v9 = vpop.eup %832  ;;  %v565_v10 = vmul.f32 0.5, %v549_v6  ;;  %846 = vtanh.f32 %v521_v7 }
 0x113   : > { %v835_v11 = vpop.eup %834  ;;  %573 = vst [vmem:[%s978_s30 + $0x18] sm:$0xff] %v557_v8  ;;  %v542_v12 = vadd.f32 1.0, %v833_v9 }
 0x114   : > { %581 = vst [vmem:[%s978_s30 + $0x58] sm:$0xff] %v565_v10  ;;  %v550_v34 = vadd.f32 1.0, %v835_v11 }
 0x115   : > { %v558_v13 = vmul.f32 0.5, %v542_v12 }
 0x116   : > { %v837_v14 = vpop.eup %836  ;;  %v566_v15 = vmul.f32 0.5, %v550_v34 }
 0x117   : > { %v839_v16 = vpop.eup %838  ;;  %574 = vst [vmem:[%s978_s30 + $0x20] sm:$0xff] %v558_v13  ;;  %v543_v17 = vadd.f32 1.0, %v837_v14 }
 0x118   : > { %582 = vst [vmem:[%s978_s30 + $0x60] sm:$0xff] %v566_v15  ;;  %v551_v18 = vadd.f32 1.0, %v839_v16 }
 0x119   : > { %v559_v19 = vmul.f32 0.5, %v543_v17 }
 0x11a   : > { %v841_v20 = vpop.eup %840  ;;  %v567_v21 = vmul.f32 0.5, %v551_v18 }
 0x11b   : > { %v843_v22 = vpop.eup %842  ;;  %575 = vst [vmem:[%s978_s30 + $0x28] sm:$0xff] %v559_v19  ;;  %v544_v23 = vadd.f32 1.0, %v841_v20 }
 0x11c   : > { %583 = vst [vmem:[%s978_s30 + $0x68] sm:$0xff] %v567_v21  ;;  %v552_v24 = vadd.f32 1.0, %v843_v22 }
 0x11d   : > { %v560_v25 = vmul.f32 0.5, %v544_v23 }
 0x11e   : > { %v845_v26 = vpop.eup %844  ;;  %v568_v27 = vmul.f32 0.5, %v552_v24 }
 0x11f   : > { %v847_v28 = vpop.eup %846  ;;  %576 = vst [vmem:[%s978_s30 + $0x30] sm:$0xff] %v560_v25  ;;  %v545_v29 = vadd.f32 1.0, %v845_v26 }
 0x120   : > { %584 = vst [vmem:[%s978_s30 + $0x70] sm:$0xff] %v568_v27  ;;  %v553_v30 = vadd.f32 1.0, %v847_v28 }
 0x121   : > { %v561_v31 = vmul.f32 0.5, %v545_v29 }
 0x122   : > { %v569_v32 = vmul.f32 0.5, %v553_v30 }
 0x123   : > { %577 = vst [vmem:[%s978_s30 + $0x38] sm:$0xff] %v561_v31 }
 0x124   : > { %585 = vst [vmem:[%s978_s30 + $0x78] sm:$0xff] %v569_v32 }
 0x125 PF: > { %s13_s12 = sadd.s32 1, %s854_s12  }
 0x126   : > { %p10_p4 = scmp.ge.s32.totalorder %s13_s12, 15  }
 0x128   :  { %12 = sbr.rel (!%p10_p4) target bundleno = 1 (0x1), region = 62 }

</bundles_post_ra>
